<compile_context>
chip_gen: v6e
topology: v6e:2x2x1
jax: 0.10.0
libtpu: 0.0.40
codegen_flags: <defaults>
</compile_context>

<pallas_src>
import math
import jax
import jax.numpy as jnp
from jax.experimental import pallas as pl
from jax.experimental.pallas import tpu as pltpu

# Use true f32 matmuls everywhere (kernel and reference) so the correctness
# check is tight; at these shapes the kernel is latency-bound, not MXU-bound.
jax.config.update("jax_default_matmul_precision", "highest")

# ---------------- config (small, consistent with the module) ----------------
B = 2              # batch
SOURCE_EMB = 16    # source_emb_dim
TARGET_EMB = 8     # target_emb_dim
NUM_BLOCKS = 2     # num_blocks
HIDDEN = 32        # hidden_dim
N_HEAD = 4         # n_head
SEQ_LEN = 8        # seq_len
HEAD_DIM = HIDDEN // N_HEAD
FF_DIM = 4 * HIDDEN
LN_EPS = 1e-5      # PyTorch LayerNorm default


# ---------------- shared helper (kernel + reference) ----------------
def _layernorm(x, gamma, beta):
    mu = jnp.mean(x, axis=-1, keepdims=True)
    var = jnp.mean((x - mu) ** 2, axis=-1, keepdims=True)
    return (x - mu) * jax.lax.rsqrt(var + LN_EPS) * gamma + beta


# ---------------- fused kernel (single invocation, whole batch) ----------------
def encoder_kernel(x_ref, w_in_ref, w_qkvp_ref, w_ff1_ref, w_ff2_ref,
                   bias_ln_ref, w_out_ref, b_out_ref, o_ref,
                   h_scr, qkv_scr, att_scr):
    x = x_ref[...]                                               # (B, S)

    # ---- project_to_input: 8 small (B,S)@(S,H) dots into the (B,T,H) scratch.
    for t in range(SEQ_LEN):
        w_t = w_in_ref[t, 0:SOURCE_EMB, :]                       # (S, H)
        b_t = w_in_ref[t, SOURCE_EMB:SOURCE_EMB + 1, :]          # (1, H)
        h_scr[:, t, :] = (jnp.dot(x, w_t, preferred_element_type=jnp.float32)
                          + b_t)
    h = h_scr[...]                                               # (B, T, H)

    scale = 1.0 / math.sqrt(HEAD_DIM)

    for blk in range(NUM_BLOCKS):                                # static unroll
        # ---- attention sublayer: fused QKV projection (all heads, whole batch)
        w_qkv = w_qkvp_ref[blk, :, :, 0:3 * HIDDEN]              # (B, H, 3H)
        b_qkv = bias_ln_ref[blk, 0:1, 0:3 * HIDDEN]              # (1, 3H)
        qkv_scr[...] = jnp.einsum('bth,bhf->btf', h, w_qkv,
                                  preferred_element_type=jnp.float32) + b_qkv

        # per-head scores/softmax/AV, batched over B; heads are static lane
        # slices of the qkv scratch (PyTorch layout: [q | k | v], heads inside)
        for hd in range(N_HEAD):
            q = qkv_scr[:, :, hd * HEAD_DIM:(hd + 1) * HEAD_DIM]
            k = qkv_scr[:, :, HIDDEN + hd * HEAD_DIM:HIDDEN + (hd + 1) * HEAD_DIM]
            v = qkv_scr[:, :, 2 * HIDDEN + hd * HEAD_DIM:2 * HIDDEN + (hd + 1) * HEAD_DIM]
            att = jnp.einsum('bqd,bkd->bqk', q, k,
                             preferred_element_type=jnp.float32) * scale
            att = att - jnp.max(att, axis=-1, keepdims=True)
            p = jnp.exp(att)
            p = p * pl.reciprocal(jnp.sum(p, axis=-1, keepdims=True),
                                  approx=True)                    # EUP recip
            att_scr[:, :, hd * HEAD_DIM:(hd + 1) * HEAD_DIM] = jnp.einsum(
                'bqk,bkd->bqd', p, v, preferred_element_type=jnp.float32)

        # single c_proj dot on the assembled multi-head output
        w_proj = w_qkvp_ref[blk, :, :, 3 * HIDDEN:4 * HIDDEN]    # (B, H, H)
        b_proj = bias_ln_ref[blk, 1:2, 0:HIDDEN]
        y = jnp.einsum('bth,bhf->btf', att_scr[...], w_proj,
                       preferred_element_type=jnp.float32) + b_proj

        # dropout is identity in eval mode
        g1 = bias_ln_ref[blk, 4:5, 0:HIDDEN]
        be1 = bias_ln_ref[blk, 5:6, 0:HIDDEN]
        h = _layernorm(h + y, g1, be1)                           # ln_1

        # ---- FFN sublayer ----
        f = jnp.einsum('bth,bhf->btf', h, w_ff1_ref[blk],
                       preferred_element_type=jnp.float32) + bias_ln_ref[blk, 2:3, 0:FF_DIM]
        f = jnp.maximum(f, 0.0)                                  # ReLU
        f = jnp.einsum('btf,bfh->bth', f, w_ff2_ref[blk],
                       preferred_element_type=jnp.float32) + bias_ln_ref[blk, 3:4, 0:HIDDEN]

        g2 = bias_ln_ref[blk, 6:7, 0:HIDDEN]
        be2 = bias_ln_ref[blk, 7:8, 0:HIDDEN]
        h = _layernorm(h + f, g2, be2)                           # ln_2

    # ---- mean pool over tokens (batched einsum with a 1/T row) + output proj ----
    ones_row = jnp.full((B, 1, SEQ_LEN), 1.0 / SEQ_LEN, dtype=jnp.float32)
    pooled = jnp.einsum('bot,bth->boh', ones_row, h,
                        preferred_element_type=jnp.float32)       # (B, 1, H)
    o_ref[...] = (jnp.einsum('boh,bhf->bof', pooled, w_out_ref[...],
                             preferred_element_type=jnp.float32)
                  + b_out_ref[...])                               # (B, 1, TARGET)


# ---------------- wrapper ----------------
@jax.jit
def transformer_encoder_aligner(x, kp):
    out = pl.pallas_call(
        encoder_kernel,
        out_shape=jax.ShapeDtypeStruct((B, 1, TARGET_EMB), jnp.float32),
        scratch_shapes=[
            pltpu.VMEM((B, SEQ_LEN, HIDDEN), jnp.float32),        # h assembly
            pltpu.VMEM((B, SEQ_LEN, 3 * HIDDEN), jnp.float32),    # fused qkv
            pltpu.VMEM((B, SEQ_LEN, HIDDEN), jnp.float32),        # per-head attn out
        ],
        cost_estimate=pl.CostEstimate(flops=850_000, transcendentals=1_500,
                                      bytes_accessed=250_000),
    )(x, kp["w_in_cat"], kp["w_qkvp"], kp["w_ff1"], kp["w_ff2"],
      kp["bias_ln"], kp["w_out"], kp["b_out"])
    return out.reshape(B, TARGET_EMB)


# ---------------- one-time weight re-layout / packing for the kernel ----------------
def prepare_params(p):
    H, T, S, NB = HIDDEN, SEQ_LEN, SOURCE_EMB, NUM_BLOCKS

    def pad128(v):                       # (NB, w) -> (NB, 128)
        return jnp.pad(v, ((0, 0), (0, 128 - v.shape[-1])))

    def tile_b(w):                       # (NB, r, c) -> (NB, B, r, c)
        return jnp.tile(w[:, None], (1, B, 1, 1))

    # project_to_input: per-token weight + bias packed together: (T, S+1, H)
    w_in_t = p["w_in"].reshape(S, T, H).transpose(1, 0, 2)        # (T, S, H)
    b_in_t = p["b_in"].reshape(T, 1, H)
    w_in_cat = jnp.concatenate([w_in_t, b_in_t], axis=1)          # (T, S+1, H)

    # [Wq | Wk | Wv | Wproj] -> lane-dense 128 columns, pre-tiled over B for
    # batched einsums inside the kernel.
    w_qkvp = tile_b(jnp.concatenate([p["w_attn"], p["w_proj"]], axis=-1))  # (NB,B,H,128)
    w_ff1 = tile_b(p["w_ff1"])                                    # (NB, B, H, 4H)
    w_ff2 = tile_b(p["w_ff2"])                                    # (NB, B, 4H, H)

    # all biases + LayerNorm params in one (NB, 8, 128) slab (one DMA):
    # rows: 0=b_attn 1=b_proj 2=b_ff1 3=b_ff2 4=g1 5=be1 6=g2 7=be2
    bias_ln = jnp.stack([pad128(p["b_attn"]), pad128(p["b_proj"]),
                         pad128(p["b_ff1"]), pad128(p["b_ff2"]),
                         pad128(p["g1"]), pad128(p["be1"]),
                         pad128(p["g2"]), pad128(p["be2"])], axis=1)

    w_out = jnp.tile(p["w_out"][None], (B, 1, 1))                 # (B, H, TARGET)
    b_out = p["b_out"].reshape(1, 1, TARGET_EMB)

    return dict(w_in_cat=w_in_cat, w_qkvp=w_qkvp, w_ff1=w_ff1, w_ff2=w_ff2,
                bias_ln=bias_ln, w_out=w_out, b_out=b_out)


# ---------------- pure-JAX reference (PyTorch-faithful, canonical params) ----------------
def reference_forward(x, p):
    h = (x @ p["w_in"] + p["b_in"]).reshape(B, SEQ_LEN, HIDDEN)
    for blk in range(NUM_BLOCKS):
        qkv = h @ p["w_attn"][blk] + p["b_attn"][blk]
        q, k, v = jnp.split(qkv, 3, axis=-1)
        q = q.reshape(B, SEQ_LEN, N_HEAD, HEAD_DIM).transpose(0, 2, 1, 3)
        k = k.reshape(B, SEQ_LEN, N_HEAD, HEAD_DIM).transpose(0, 2, 1, 3)
        v = v.reshape(B, SEQ_LEN, N_HEAD, HEAD_DIM).transpose(0, 2, 1, 3)
        att = (q @ jnp.swapaxes(k, -2, -1)) / math.sqrt(HEAD_DIM)
        att = jax.nn.softmax(att, axis=-1)
        y = (att @ v).transpose(0, 2, 1, 3).reshape(B, SEQ_LEN, HIDDEN)
        y = y @ p["w_proj"][blk] + p["b_proj"][blk]
        h = _layernorm(h + y, p["g1"][blk], p["be1"][blk])
        f = h @ p["w_ff1"][blk] + p["b_ff1"][blk]
        f = jnp.maximum(f, 0.0)
        f = f @ p["w_ff2"][blk] + p["b_ff2"][blk]
        h = _layernorm(h + f, p["g2"][blk], p["be2"][blk])
    return h.mean(axis=1) @ p["w_out"] + p["b_out"]


# ---------------- deterministic parameter init (canonical PyTorch-like layout) ----------------
def init_params(key):
    ks = jax.random.split(key, 12)

    def w(k, shape, scale=0.05):
        return scale * jax.random.normal(k, shape, dtype=jnp.float32)

    return dict(
        w_in=w(ks[0], (SOURCE_EMB, SEQ_LEN * HIDDEN)),
        b_in=w(ks[1], (SEQ_LEN * HIDDEN,), 0.02),
        w_attn=w(ks[2], (NUM_BLOCKS, HIDDEN, 3 * HIDDEN)),
        b_attn=w(ks[3], (NUM_BLOCKS, 3 * HIDDEN), 0.02),
        w_proj=w(ks[4], (NUM_BLOCKS, HIDDEN, HIDDEN)),
        b_proj=w(ks[5], (NUM_BLOCKS, HIDDEN), 0.02),
        g1=jnp.ones((NUM_BLOCKS, HIDDEN), jnp.float32),
        be1=jnp.zeros((NUM_BLOCKS, HIDDEN), jnp.float32),
        w_ff1=w(ks[6], (NUM_BLOCKS, HIDDEN, 4 * HIDDEN)),
        b_ff1=w(ks[7], (NUM_BLOCKS, 4 * HIDDEN), 0.02),
        w_ff2=w(ks[8], (NUM_BLOCKS, 4 * HIDDEN, HIDDEN)),
        b_ff2=w(ks[9], (NUM_BLOCKS, HIDDEN), 0.02),
        g2=jnp.ones((NUM_BLOCKS, HIDDEN), jnp.float32),
        be2=jnp.zeros((NUM_BLOCKS, HIDDEN), jnp.float32),
        w_out=w(ks[10], (HIDDEN, TARGET_EMB)),
        b_out=w(ks[11], (TARGET_EMB,), 0.02),
    )


if __name__ == "__main__":
    key = jax.random.PRNGKey(0)
    k_x, k_p = jax.random.split(key)
    x = jax.random.normal(k_x, (B, SOURCE_EMB), dtype=jnp.float32)
    params = init_params(k_p)
    kernel_params = prepare_params(params)    # one-time weight re-layout/packing

    out = jax.block_until_ready(transformer_encoder_aligner(x, kernel_params))
    ref = jax.block_until_ready(reference_forward(x, params))

    assert out.shape == (B, TARGET_EMB)
    max_err = float(jnp.max(jnp.abs(out - ref)))
    # tolerance 1e-3 covers the approx EUP reciprocal used in the softmax
    assert jnp.allclose(out, ref, atol=1e-3, rtol=1e-3), (
        f"mismatch: max abs err {max_err}")

    print("KERNEL_OK")
</pallas_src>

<mosaic_0001>
module attributes {stable_mosaic.version = 11 : i64} {
  func.func @encoder_kernel(%arg0: memref<2x16xf32, #tpu.memory_space<vmem>>, %arg1: memref<8x17x32xf32, #tpu.memory_space<vmem>>, %arg2: memref<2x2x32x128xf32, #tpu.memory_space<vmem>>, %arg3: memref<2x2x32x128xf32, #tpu.memory_space<vmem>>, %arg4: memref<2x2x128x32xf32, #tpu.memory_space<vmem>>, %arg5: memref<2x8x128xf32, #tpu.memory_space<vmem>>, %arg6: memref<2x32x8xf32, #tpu.memory_space<vmem>>, %arg7: memref<1x1x8xf32, #tpu.memory_space<vmem>>, %arg8: memref<2x1x8xf32, #tpu.memory_space<vmem>>, %arg9: memref<2x8x32xf32, #tpu.memory_space<vmem>>, %arg10: memref<2x8x96xf32, #tpu.memory_space<vmem>>, %arg11: memref<2x8x32xf32, #tpu.memory_space<vmem>>) attributes {dimension_semantics = [], scalar_prefetch = 0 : i64, scratch_operands = 3 : i64, tpu.core_type = #tpu.core_type<tc>} {
    %c0 = arith.constant 0 : index
    %c0_0 = arith.constant 0 : index
    %0 = vector.load %arg0[%c0, %c0_0] : memref<2x16xf32, #tpu.memory_space<vmem>>, vector<2x16xf32>
    %c0_1 = arith.constant 0 : index
    %c0_2 = arith.constant 0 : index
    %c0_3 = arith.constant 0 : index
    %1 = vector.load %arg1[%c0_1, %c0_2, %c0_3] : memref<8x17x32xf32, #tpu.memory_space<vmem>>, vector<1x16x32xf32>
    %2 = vector.shape_cast %1 : vector<1x16x32xf32> to vector<16x32xf32>
    %c0_4 = arith.constant 0 : index
    %c16 = arith.constant 16 : index
    %c0_5 = arith.constant 0 : index
    %3 = vector.load %arg1[%c0_4, %c16, %c0_5] : memref<8x17x32xf32, #tpu.memory_space<vmem>>, vector<1x1x32xf32>
    %4 = vector.shape_cast %3 : vector<1x1x32xf32> to vector<1x32xf32>
    %cst = arith.constant dense<0.000000e+00> : vector<2x32xf32>
    %5 = tpu.matmul %0, %2, %cst {dimension_numbers = #tpu.dot_dimension_numbers<[1], [0], [0], [1], [0, 0, 1, 1], [], []>, precision = #tpu.contract_precision<fp32>} : vector<2x16xf32>, vector<16x32xf32>, vector<2x32xf32> -> vector<2x32xf32>
    %6 = vector.broadcast %4 : vector<1x32xf32> to vector<2x32xf32>
    %7 = arith.addf %5, %6 : vector<2x32xf32>
    %c0_6 = arith.constant 0 : index
    %c0_7 = arith.constant 0 : index
    %c0_8 = arith.constant 0 : index
    %8 = vector.load %arg9[%c0_6, %c0_7, %c0_8] : memref<2x8x32xf32, #tpu.memory_space<vmem>>, vector<2x1x32xf32>
    %9 = vector.shape_cast %8 : vector<2x1x32xf32> to vector<2x32xf32>
    %10 = vector.shape_cast %7 : vector<2x32xf32> to vector<2x1x32xf32>
    tpu.vector_store %arg9[%c0_6, %c0_7, %c0_8], %10 {strides = array<i32>} : memref<2x8x32xf32, #tpu.memory_space<vmem>>, vector<2x1x32xf32>,
    %c1 = arith.constant 1 : index
    %c0_9 = arith.constant 0 : index
    %c0_10 = arith.constant 0 : index
    %11 = vector.load %arg1[%c1, %c0_9, %c0_10] : memref<8x17x32xf32, #tpu.memory_space<vmem>>, vector<1x16x32xf32>
    %12 = vector.shape_cast %11 : vector<1x16x32xf32> to vector<16x32xf32>
    %c1_11 = arith.constant 1 : index
    %c16_12 = arith.constant 16 : index
    %c0_13 = arith.constant 0 : index
    %13 = vector.load %arg1[%c1_11, %c16_12, %c0_13] : memref<8x17x32xf32, #tpu.memory_space<vmem>>, vector<1x1x32xf32>
    %14 = vector.shape_cast %13 : vector<1x1x32xf32> to vector<1x32xf32>
    %cst_14 = arith.constant dense<0.000000e+00> : vector<2x32xf32>
    %15 = tpu.matmul %0, %12, %cst_14 {dimension_numbers = #tpu.dot_dimension_numbers<[1], [0], [0], [1], [0, 0, 1, 1], [], []>, precision = #tpu.contract_precision<fp32>} : vector<2x16xf32>, vector<16x32xf32>, vector<2x32xf32> -> vector<2x32xf32>
    %16 = vector.broadcast %14 : vector<1x32xf32> to vector<2x32xf32>
    %17 = arith.addf %15, %16 : vector<2x32xf32>
    %c0_15 = arith.constant 0 : index
    %c1_16 = arith.constant 1 : index
    %c0_17 = arith.constant 0 : index
    %18 = vector.load %arg9[%c0_15, %c1_16, %c0_17] : memref<2x8x32xf32, #tpu.memory_space<vmem>>, vector<2x1x32xf32>
    %19 = vector.shape_cast %18 : vector<2x1x32xf32> to vector<2x32xf32>
    %20 = vector.shape_cast %17 : vector<2x32xf32> to vector<2x1x32xf32>
    tpu.vector_store %arg9[%c0_15, %c1_16, %c0_17], %20 {strides = array<i32>} : memref<2x8x32xf32, #tpu.memory_space<vmem>>, vector<2x1x32xf32>,
    %c2 = arith.constant 2 : index
    %c0_18 = arith.constant 0 : index
    %c0_19 = arith.constant 0 : index
    %21 = vector.load %arg1[%c2, %c0_18, %c0_19] : memref<8x17x32xf32, #tpu.memory_space<vmem>>, vector<1x16x32xf32>
    %22 = vector.shape_cast %21 : vector<1x16x32xf32> to vector<16x32xf32>
    %c2_20 = arith.constant 2 : index
    %c16_21 = arith.constant 16 : index
    %c0_22 = arith.constant 0 : index
    %23 = vector.load %arg1[%c2_20, %c16_21, %c0_22] : memref<8x17x32xf32, #tpu.memory_space<vmem>>, vector<1x1x32xf32>
    %24 = vector.shape_cast %23 : vector<1x1x32xf32> to vector<1x32xf32>
    %cst_23 = arith.constant dense<0.000000e+00> : vector<2x32xf32>
    %25 = tpu.matmul %0, %22, %cst_23 {dimension_numbers = #tpu.dot_dimension_numbers<[1], [0], [0], [1], [0, 0, 1, 1], [], []>, precision = #tpu.contract_precision<fp32>} : vector<2x16xf32>, vector<16x32xf32>, vector<2x32xf32> -> vector<2x32xf32>
    %26 = vector.broadcast %24 : vector<1x32xf32> to vector<2x32xf32>
    %27 = arith.addf %25, %26 : vector<2x32xf32>
    %c0_24 = arith.constant 0 : index
    %c2_25 = arith.constant 2 : index
    %c0_26 = arith.constant 0 : index
    %28 = vector.load %arg9[%c0_24, %c2_25, %c0_26] : memref<2x8x32xf32, #tpu.memory_space<vmem>>, vector<2x1x32xf32>
    %29 = vector.shape_cast %28 : vector<2x1x32xf32> to vector<2x32xf32>
    %30 = vector.shape_cast %27 : vector<2x32xf32> to vector<2x1x32xf32>
    tpu.vector_store %arg9[%c0_24, %c2_25, %c0_26], %30 {strides = array<i32>} : memref<2x8x32xf32, #tpu.memory_space<vmem>>, vector<2x1x32xf32>,
    %c3 = arith.constant 3 : index
    %c0_27 = arith.constant 0 : index
    %c0_28 = arith.constant 0 : index
    %31 = vector.load %arg1[%c3, %c0_27, %c0_28] : memref<8x17x32xf32, #tpu.memory_space<vmem>>, vector<1x16x32xf32>
    %32 = vector.shape_cast %31 : vector<1x16x32xf32> to vector<16x32xf32>
    %c3_29 = arith.constant 3 : index
    %c16_30 = arith.constant 16 : index
    %c0_31 = arith.constant 0 : index
    %33 = vector.load %arg1[%c3_29, %c16_30, %c0_31] : memref<8x17x32xf32, #tpu.memory_space<vmem>>, vector<1x1x32xf32>
    %34 = vector.shape_cast %33 : vector<1x1x32xf32> to vector<1x32xf32>
    %cst_32 = arith.constant dense<0.000000e+00> : vector<2x32xf32>
    %35 = tpu.matmul %0, %32, %cst_32 {dimension_numbers = #tpu.dot_dimension_numbers<[1], [0], [0], [1], [0, 0, 1, 1], [], []>, precision = #tpu.contract_precision<fp32>} : vector<2x16xf32>, vector<16x32xf32>, vector<2x32xf32> -> vector<2x32xf32>
    %36 = vector.broadcast %34 : vector<1x32xf32> to vector<2x32xf32>
    %37 = arith.addf %35, %36 : vector<2x32xf32>
    %c0_33 = arith.constant 0 : index
    %c3_34 = arith.constant 3 : index
    %c0_35 = arith.constant 0 : index
    %38 = vector.load %arg9[%c0_33, %c3_34, %c0_35] : memref<2x8x32xf32, #tpu.memory_space<vmem>>, vector<2x1x32xf32>
    %39 = vector.shape_cast %38 : vector<2x1x32xf32> to vector<2x32xf32>
    %40 = vector.shape_cast %37 : vector<2x32xf32> to vector<2x1x32xf32>
    tpu.vector_store %arg9[%c0_33, %c3_34, %c0_35], %40 {strides = array<i32>} : memref<2x8x32xf32, #tpu.memory_space<vmem>>, vector<2x1x32xf32>,
    %c4 = arith.constant 4 : index
    %c0_36 = arith.constant 0 : index
    %c0_37 = arith.constant 0 : index
    %41 = vector.load %arg1[%c4, %c0_36, %c0_37] : memref<8x17x32xf32, #tpu.memory_space<vmem>>, vector<1x16x32xf32>
    %42 = vector.shape_cast %41 : vector<1x16x32xf32> to vector<16x32xf32>
    %c4_38 = arith.constant 4 : index
    %c16_39 = arith.constant 16 : index
    %c0_40 = arith.constant 0 : index
    %43 = vector.load %arg1[%c4_38, %c16_39, %c0_40] : memref<8x17x32xf32, #tpu.memory_space<vmem>>, vector<1x1x32xf32>
    %44 = vector.shape_cast %43 : vector<1x1x32xf32> to vector<1x32xf32>
    %cst_41 = arith.constant dense<0.000000e+00> : vector<2x32xf32>
    %45 = tpu.matmul %0, %42, %cst_41 {dimension_numbers = #tpu.dot_dimension_numbers<[1], [0], [0], [1], [0, 0, 1, 1], [], []>, precision = #tpu.contract_precision<fp32>} : vector<2x16xf32>, vector<16x32xf32>, vector<2x32xf32> -> vector<2x32xf32>
    %46 = vector.broadcast %44 : vector<1x32xf32> to vector<2x32xf32>
    %47 = arith.addf %45, %46 : vector<2x32xf32>
    %c0_42 = arith.constant 0 : index
    %c4_43 = arith.constant 4 : index
    %c0_44 = arith.constant 0 : index
    %48 = vector.load %arg9[%c0_42, %c4_43, %c0_44] : memref<2x8x32xf32, #tpu.memory_space<vmem>>, vector<2x1x32xf32>
    %49 = vector.shape_cast %48 : vector<2x1x32xf32> to vector<2x32xf32>
    %50 = vector.shape_cast %47 : vector<2x32xf32> to vector<2x1x32xf32>
    tpu.vector_store %arg9[%c0_42, %c4_43, %c0_44], %50 {strides = array<i32>} : memref<2x8x32xf32, #tpu.memory_space<vmem>>, vector<2x1x32xf32>,
    %c5 = arith.constant 5 : index
    %c0_45 = arith.constant 0 : index
    %c0_46 = arith.constant 0 : index
    %51 = vector.load %arg1[%c5, %c0_45, %c0_46] : memref<8x17x32xf32, #tpu.memory_space<vmem>>, vector<1x16x32xf32>
    %52 = vector.shape_cast %51 : vector<1x16x32xf32> to vector<16x32xf32>
    %c5_47 = arith.constant 5 : index
    %c16_48 = arith.constant 16 : index
    %c0_49 = arith.constant 0 : index
    %53 = vector.load %arg1[%c5_47, %c16_48, %c0_49] : memref<8x17x32xf32, #tpu.memory_space<vmem>>, vector<1x1x32xf32>
    %54 = vector.shape_cast %53 : vector<1x1x32xf32> to vector<1x32xf32>
    %cst_50 = arith.constant dense<0.000000e+00> : vector<2x32xf32>
    %55 = tpu.matmul %0, %52, %cst_50 {dimension_numbers = #tpu.dot_dimension_numbers<[1], [0], [0], [1], [0, 0, 1, 1], [], []>, precision = #tpu.contract_precision<fp32>} : vector<2x16xf32>, vector<16x32xf32>, vector<2x32xf32> -> vector<2x32xf32>
    %56 = vector.broadcast %54 : vector<1x32xf32> to vector<2x32xf32>
    %57 = arith.addf %55, %56 : vector<2x32xf32>
    %c0_51 = arith.constant 0 : index
    %c5_52 = arith.constant 5 : index
    %c0_53 = arith.constant 0 : index
    %58 = vector.load %arg9[%c0_51, %c5_52, %c0_53] : memref<2x8x32xf32, #tpu.memory_space<vmem>>, vector<2x1x32xf32>
    %59 = vector.shape_cast %58 : vector<2x1x32xf32> to vector<2x32xf32>
    %60 = vector.shape_cast %57 : vector<2x32xf32> to vector<2x1x32xf32>
    tpu.vector_store %arg9[%c0_51, %c5_52, %c0_53], %60 {strides = array<i32>} : memref<2x8x32xf32, #tpu.memory_space<vmem>>, vector<2x1x32xf32>,
    %c6 = arith.constant 6 : index
    %c0_54 = arith.constant 0 : index
    %c0_55 = arith.constant 0 : index
    %61 = vector.load %arg1[%c6, %c0_54, %c0_55] : memref<8x17x32xf32, #tpu.memory_space<vmem>>, vector<1x16x32xf32>
    %62 = vector.shape_cast %61 : vector<1x16x32xf32> to vector<16x32xf32>
    %c6_56 = arith.constant 6 : index
    %c16_57 = arith.constant 16 : index
    %c0_58 = arith.constant 0 : index
    %63 = vector.load %arg1[%c6_56, %c16_57, %c0_58] : memref<8x17x32xf32, #tpu.memory_space<vmem>>, vector<1x1x32xf32>
    %64 = vector.shape_cast %63 : vector<1x1x32xf32> to vector<1x32xf32>
    %cst_59 = arith.constant dense<0.000000e+00> : vector<2x32xf32>
    %65 = tpu.matmul %0, %62, %cst_59 {dimension_numbers = #tpu.dot_dimension_numbers<[1], [0], [0], [1], [0, 0, 1, 1], [], []>, precision = #tpu.contract_precision<fp32>} : vector<2x16xf32>, vector<16x32xf32>, vector<2x32xf32> -> vector<2x32xf32>
    %66 = vector.broadcast %64 : vector<1x32xf32> to vector<2x32xf32>
    %67 = arith.addf %65, %66 : vector<2x32xf32>
    %c0_60 = arith.constant 0 : index
    %c6_61 = arith.constant 6 : index
    %c0_62 = arith.constant 0 : index
    %68 = vector.load %arg9[%c0_60, %c6_61, %c0_62] : memref<2x8x32xf32, #tpu.memory_space<vmem>>, vector<2x1x32xf32>
    %69 = vector.shape_cast %68 : vector<2x1x32xf32> to vector<2x32xf32>
    %70 = vector.shape_cast %67 : vector<2x32xf32> to vector<2x1x32xf32>
    tpu.vector_store %arg9[%c0_60, %c6_61, %c0_62], %70 {strides = array<i32>} : memref<2x8x32xf32, #tpu.memory_space<vmem>>, vector<2x1x32xf32>,
    %c7 = arith.constant 7 : index
    %c0_63 = arith.constant 0 : index
    %c0_64 = arith.constant 0 : index
    %71 = vector.load %arg1[%c7, %c0_63, %c0_64] : memref<8x17x32xf32, #tpu.memory_space<vmem>>, vector<1x16x32xf32>
    %72 = vector.shape_cast %71 : vector<1x16x32xf32> to vector<16x32xf32>
    %c7_65 = arith.constant 7 : index
    %c16_66 = arith.constant 16 : index
    %c0_67 = arith.constant 0 : index
    %73 = vector.load %arg1[%c7_65, %c16_66, %c0_67] : memref<8x17x32xf32, #tpu.memory_space<vmem>>, vector<1x1x32xf32>
    %74 = vector.shape_cast %73 : vector<1x1x32xf32> to vector<1x32xf32>
    %cst_68 = arith.constant dense<0.000000e+00> : vector<2x32xf32>
    %75 = tpu.matmul %0, %72, %cst_68 {dimension_numbers = #tpu.dot_dimension_numbers<[1], [0], [0], [1], [0, 0, 1, 1], [], []>, precision = #tpu.contract_precision<fp32>} : vector<2x16xf32>, vector<16x32xf32>, vector<2x32xf32> -> vector<2x32xf32>
    %76 = vector.broadcast %74 : vector<1x32xf32> to vector<2x32xf32>
    %77 = arith.addf %75, %76 : vector<2x32xf32>
    %c0_69 = arith.constant 0 : index
    %c7_70 = arith.constant 7 : index
    %c0_71 = arith.constant 0 : index
    %78 = vector.load %arg9[%c0_69, %c7_70, %c0_71] : memref<2x8x32xf32, #tpu.memory_space<vmem>>, vector<2x1x32xf32>
    %79 = vector.shape_cast %78 : vector<2x1x32xf32> to vector<2x32xf32>
    %80 = vector.shape_cast %77 : vector<2x32xf32> to vector<2x1x32xf32>
    tpu.vector_store %arg9[%c0_69, %c7_70, %c0_71], %80 {strides = array<i32>} : memref<2x8x32xf32, #tpu.memory_space<vmem>>, vector<2x1x32xf32>,
    %c0_72 = arith.constant 0 : index
    %c0_73 = arith.constant 0 : index
    %c0_74 = arith.constant 0 : index
    %81 = vector.load %arg9[%c0_72, %c0_73, %c0_74] : memref<2x8x32xf32, #tpu.memory_space<vmem>>, vector<2x8x32xf32>
    %c0_75 = arith.constant 0 : index
    %c0_76 = arith.constant 0 : index
    %c0_77 = arith.constant 0 : index
    %c0_78 = arith.constant 0 : index
    %82 = vector.load %arg2[%c0_75, %c0_76, %c0_77, %c0_78] : memref<2x2x32x128xf32, #tpu.memory_space<vmem>>, vector<1x2x32x96xf32>
    %83 = vector.shape_cast %82 : vector<1x2x32x96xf32> to vector<2x32x96xf32>
    %c0_79 = arith.constant 0 : index
    %c0_80 = arith.constant 0 : index
    %c0_81 = arith.constant 0 : index
    %84 = vector.load %arg5[%c0_79, %c0_80, %c0_81] : memref<2x8x128xf32, #tpu.memory_space<vmem>>, vector<1x1x96xf32>
    %85 = vector.shape_cast %84 : vector<1x1x96xf32> to vector<1x96xf32>
    "tpu.trace_start"() <{level = 10 : i32, message = "bth,bhf->btf"}> : () -> ()
    %cst_82 = arith.constant dense<0.000000e+00> : vector<2x8x96xf32>
    %86 = tpu.matmul %81, %83, %cst_82 {dimension_numbers = #tpu.dot_dimension_numbers<[2], [1], [1], [2], [0, 0, 0, 1, 1, 2], [0], [0]>, precision = #tpu.contract_precision<fp32>} : vector<2x8x32xf32>, vector<2x32x96xf32>, vector<2x8x96xf32> -> vector<2x8x96xf32>
    "tpu.trace_stop"() : () -> ()
    %87 = vector.shape_cast %85 : vector<1x96xf32> to vector<1x1x96xf32>
    %88 = vector.broadcast %87 : vector<1x1x96xf32> to vector<2x8x96xf32>
    %89 = arith.addf %86, %88 : vector<2x8x96xf32>
    %c0_83 = arith.constant 0 : index
    %c0_84 = arith.constant 0 : index
    %c0_85 = arith.constant 0 : index
    %90 = vector.load %arg10[%c0_83, %c0_84, %c0_85] : memref<2x8x96xf32, #tpu.memory_space<vmem>>, vector<2x8x96xf32>
    tpu.vector_store %arg10[%c0_83, %c0_84, %c0_85], %89 {strides = array<i32>} : memref<2x8x96xf32, #tpu.memory_space<vmem>>, vector<2x8x96xf32>,
    %c0_86 = arith.constant 0 : index
    %c0_87 = arith.constant 0 : index
    %c0_88 = arith.constant 0 : index
    %91 = vector.load %arg10[%c0_86, %c0_87, %c0_88] : memref<2x8x96xf32, #tpu.memory_space<vmem>>, vector<2x8x8xf32>
    %c0_89 = arith.constant 0 : index
    %c0_90 = arith.constant 0 : index
    %c32 = arith.constant 32 : index
    %92 = vector.load %arg10[%c0_89, %c0_90, %c32] : memref<2x8x96xf32, #tpu.memory_space<vmem>>, vector<2x8x8xf32>
    %c0_91 = arith.constant 0 : index
    %c0_92 = arith.constant 0 : index
    %c64 = arith.constant 64 : index
    %93 = vector.load %arg10[%c0_91, %c0_92, %c64] : memref<2x8x96xf32, #tpu.memory_space<vmem>>, vector<2x8x8xf32>
    "tpu.trace_start"() <{level = 10 : i32, message = "bqd,bkd->bqk"}> : () -> ()
    %cst_93 = arith.constant dense<0.000000e+00> : vector<2x8x8xf32>
    %94 = tpu.matmul %91, %92, %cst_93 {dimension_numbers = #tpu.dot_dimension_numbers<[2], [2], [1], [1], [0, 0, 0, 1, 1, 1], [0], [0]>, precision = #tpu.contract_precision<fp32>} : vector<2x8x8xf32>, vector<2x8x8xf32>, vector<2x8x8xf32> -> vector<2x8x8xf32>
    "tpu.trace_stop"() : () -> ()
    %cst_94 = arith.constant 0.353553385 : f32
    %95 = vector.broadcast %cst_94 : f32 to vector<2x8x8xf32>
    %96 = arith.mulf %94, %95 : vector<2x8x8xf32>
    %cst_95 = arith.constant dense<0xFF800000> : vector<2x8xf32>
    %97 = vector.multi_reduction <maximumf>, %96, %cst_95 [2] : vector<2x8x8xf32> to vector<2x8xf32>
    %98 = vector.shape_cast %97 : vector<2x8xf32> to vector<2x8x1xf32>
    %99 = vector.broadcast %98 : vector<2x8x1xf32> to vector<2x8x8xf32>
    %100 = arith.subf %96, %99 : vector<2x8x8xf32>
    %101 = math.exp %100 : vector<2x8x8xf32>
    %cst_96 = arith.constant dense<0.000000e+00> : vector<2x8xf32>
    %102 = vector.multi_reduction <add>, %101, %cst_96 [2] : vector<2x8x8xf32> to vector<2x8xf32>
    %103 = vector.shape_cast %102 : vector<2x8xf32> to vector<2x8x1xf32>
    %104 = tpu.reciprocal %103 {approx = true} : vector<2x8x1xf32> -> vector<2x8x1xf32>
    %105 = vector.broadcast %104 : vector<2x8x1xf32> to vector<2x8x8xf32>
    %106 = arith.mulf %101, %105 : vector<2x8x8xf32>
    "tpu.trace_start"() <{level = 10 : i32, message = "bqk,bkd->bqd"}> : () -> ()
    %cst_97 = arith.constant dense<0.000000e+00> : vector<2x8x8xf32>
    %107 = tpu.matmul %106, %93, %cst_97 {dimension_numbers = #tpu.dot_dimension_numbers<[2], [1], [1], [2], [0, 0, 0, 1, 1, 2], [0], [0]>, precision = #tpu.contract_precision<fp32>} : vector<2x8x8xf32>, vector<2x8x8xf32>, vector<2x8x8xf32> -> vector<2x8x8xf32>
    "tpu.trace_stop"() : () -> ()
    %c0_98 = arith.constant 0 : index
    %c0_99 = arith.constant 0 : index
    %c0_100 = arith.constant 0 : index
    %108 = vector.load %arg11[%c0_98, %c0_99, %c0_100] : memref<2x8x32xf32, #tpu.memory_space<vmem>>, vector<2x8x8xf32>
    tpu.vector_store %arg11[%c0_98, %c0_99, %c0_100], %107 {strides = array<i32>} : memref<2x8x32xf32, #tpu.memory_space<vmem>>, vector<2x8x8xf32>,
    %c0_101 = arith.constant 0 : index
    %c0_102 = arith.constant 0 : index
    %c8 = arith.constant 8 : index
    %109 = vector.load %arg10[%c0_101, %c0_102, %c8] : memref<2x8x96xf32, #tpu.memory_space<vmem>>, vector<2x8x8xf32>
    %c0_103 = arith.constant 0 : index
    %c0_104 = arith.constant 0 : index
    %c40 = arith.constant 40 : index
    %110 = vector.load %arg10[%c0_103, %c0_104, %c40] : memref<2x8x96xf32, #tpu.memory_space<vmem>>, vector<2x8x8xf32>
    %c0_105 = arith.constant 0 : index
    %c0_106 = arith.constant 0 : index
    %c72 = arith.constant 72 : index
    %111 = vector.load %arg10[%c0_105, %c0_106, %c72] : memref<2x8x96xf32, #tpu.memory_space<vmem>>, vector<2x8x8xf32>
    "tpu.trace_start"() <{level = 10 : i32, message = "bqd,bkd->bqk"}> : () -> ()
    %cst_107 = arith.constant dense<0.000000e+00> : vector<2x8x8xf32>
    %112 = tpu.matmul %109, %110, %cst_107 {dimension_numbers = #tpu.dot_dimension_numbers<[2], [2], [1], [1], [0, 0, 0, 1, 1, 1], [0], [0]>, precision = #tpu.contract_precision<fp32>} : vector<2x8x8xf32>, vector<2x8x8xf32>, vector<2x8x8xf32> -> vector<2x8x8xf32>
    "tpu.trace_stop"() : () -> ()
    %cst_108 = arith.constant 0.353553385 : f32
    %113 = vector.broadcast %cst_108 : f32 to vector<2x8x8xf32>
    %114 = arith.mulf %112, %113 : vector<2x8x8xf32>
    %cst_109 = arith.constant dense<0xFF800000> : vector<2x8xf32>
    %115 = vector.multi_reduction <maximumf>, %114, %cst_109 [2] : vector<2x8x8xf32> to vector<2x8xf32>
    %116 = vector.shape_cast %115 : vector<2x8xf32> to vector<2x8x1xf32>
    %117 = vector.broadcast %116 : vector<2x8x1xf32> to vector<2x8x8xf32>
    %118 = arith.subf %114, %117 : vector<2x8x8xf32>
    %119 = math.exp %118 : vector<2x8x8xf32>
    %cst_110 = arith.constant dense<0.000000e+00> : vector<2x8xf32>
    %120 = vector.multi_reduction <add>, %119, %cst_110 [2] : vector<2x8x8xf32> to vector<2x8xf32>
    %121 = vector.shape_cast %120 : vector<2x8xf32> to vector<2x8x1xf32>
    %122 = tpu.reciprocal %121 {approx = true} : vector<2x8x1xf32> -> vector<2x8x1xf32>
    %123 = vector.broadcast %122 : vector<2x8x1xf32> to vector<2x8x8xf32>
    %124 = arith.mulf %119, %123 : vector<2x8x8xf32>
    "tpu.trace_start"() <{level = 10 : i32, message = "bqk,bkd->bqd"}> : () -> ()
    %cst_111 = arith.constant dense<0.000000e+00> : vector<2x8x8xf32>
    %125 = tpu.matmul %124, %111, %cst_111 {dimension_numbers = #tpu.dot_dimension_numbers<[2], [1], [1], [2], [0, 0, 0, 1, 1, 2], [0], [0]>, precision = #tpu.contract_precision<fp32>} : vector<2x8x8xf32>, vector<2x8x8xf32>, vector<2x8x8xf32> -> vector<2x8x8xf32>
    "tpu.trace_stop"() : () -> ()
    %c0_112 = arith.constant 0 : index
    %c0_113 = arith.constant 0 : index
    %c8_114 = arith.constant 8 : index
    %126 = vector.load %arg11[%c0_112, %c0_113, %c8_114] : memref<2x8x32xf32, #tpu.memory_space<vmem>>, vector<2x8x8xf32>
    tpu.vector_store %arg11[%c0_112, %c0_113, %c8_114], %125 {strides = array<i32>} : memref<2x8x32xf32, #tpu.memory_space<vmem>>, vector<2x8x8xf32>,
    %c0_115 = arith.constant 0 : index
    %c0_116 = arith.constant 0 : index
    %c16_117 = arith.constant 16 : index
    %127 = vector.load %arg10[%c0_115, %c0_116, %c16_117] : memref<2x8x96xf32, #tpu.memory_space<vmem>>, vector<2x8x8xf32>
    %c0_118 = arith.constant 0 : index
    %c0_119 = arith.constant 0 : index
    %c48 = arith.constant 48 : index
    %128 = vector.load %arg10[%c0_118, %c0_119, %c48] : memref<2x8x96xf32, #tpu.memory_space<vmem>>, vector<2x8x8xf32>
    %c0_120 = arith.constant 0 : index
    %c0_121 = arith.constant 0 : index
    %c80 = arith.constant 80 : index
    %129 = vector.load %arg10[%c0_120, %c0_121, %c80] : memref<2x8x96xf32, #tpu.memory_space<vmem>>, vector<2x8x8xf32>
    "tpu.trace_start"() <{level = 10 : i32, message = "bqd,bkd->bqk"}> : () -> ()
    %cst_122 = arith.constant dense<0.000000e+00> : vector<2x8x8xf32>
    %130 = tpu.matmul %127, %128, %cst_122 {dimension_numbers = #tpu.dot_dimension_numbers<[2], [2], [1], [1], [0, 0, 0, 1, 1, 1], [0], [0]>, precision = #tpu.contract_precision<fp32>} : vector<2x8x8xf32>, vector<2x8x8xf32>, vector<2x8x8xf32> -> vector<2x8x8xf32>
    "tpu.trace_stop"() : () -> ()
    %cst_123 = arith.constant 0.353553385 : f32
    %131 = vector.broadcast %cst_123 : f32 to vector<2x8x8xf32>
    %132 = arith.mulf %130, %131 : vector<2x8x8xf32>
    %cst_124 = arith.constant dense<0xFF800000> : vector<2x8xf32>
    %133 = vector.multi_reduction <maximumf>, %132, %cst_124 [2] : vector<2x8x8xf32> to vector<2x8xf32>
    %134 = vector.shape_cast %133 : vector<2x8xf32> to vector<2x8x1xf32>
    %135 = vector.broadcast %134 : vector<2x8x1xf32> to vector<2x8x8xf32>
    %136 = arith.subf %132, %135 : vector<2x8x8xf32>
    %137 = math.exp %136 : vector<2x8x8xf32>
    %cst_125 = arith.constant dense<0.000000e+00> : vector<2x8xf32>
    %138 = vector.multi_reduction <add>, %137, %cst_125 [2] : vector<2x8x8xf32> to vector<2x8xf32>
    %139 = vector.shape_cast %138 : vector<2x8xf32> to vector<2x8x1xf32>
    %140 = tpu.reciprocal %139 {approx = true} : vector<2x8x1xf32> -> vector<2x8x1xf32>
    %141 = vector.broadcast %140 : vector<2x8x1xf32> to vector<2x8x8xf32>
    %142 = arith.mulf %137, %141 : vector<2x8x8xf32>
    "tpu.trace_start"() <{level = 10 : i32, message = "bqk,bkd->bqd"}> : () -> ()
    %cst_126 = arith.constant dense<0.000000e+00> : vector<2x8x8xf32>
    %143 = tpu.matmul %142, %129, %cst_126 {dimension_numbers = #tpu.dot_dimension_numbers<[2], [1], [1], [2], [0, 0, 0, 1, 1, 2], [0], [0]>, precision = #tpu.contract_precision<fp32>} : vector<2x8x8xf32>, vector<2x8x8xf32>, vector<2x8x8xf32> -> vector<2x8x8xf32>
    "tpu.trace_stop"() : () -> ()
    %c0_127 = arith.constant 0 : index
    %c0_128 = arith.constant 0 : index
    %c16_129 = arith.constant 16 : index
    %144 = vector.load %arg11[%c0_127, %c0_128, %c16_129] : memref<2x8x32xf32, #tpu.memory_space<vmem>>, vector<2x8x8xf32>
    tpu.vector_store %arg11[%c0_127, %c0_128, %c16_129], %143 {strides = array<i32>} : memref<2x8x32xf32, #tpu.memory_space<vmem>>, vector<2x8x8xf32>,
    %c0_130 = arith.constant 0 : index
    %c0_131 = arith.constant 0 : index
    %c24 = arith.constant 24 : index
    %145 = vector.load %arg10[%c0_130, %c0_131, %c24] : memref<2x8x96xf32, #tpu.memory_space<vmem>>, vector<2x8x8xf32>
    %c0_132 = arith.constant 0 : index
    %c0_133 = arith.constant 0 : index
    %c56 = arith.constant 56 : index
    %146 = vector.load %arg10[%c0_132, %c0_133, %c56] : memref<2x8x96xf32, #tpu.memory_space<vmem>>, vector<2x8x8xf32>
    %c0_134 = arith.constant 0 : index
    %c0_135 = arith.constant 0 : index
    %c88 = arith.constant 88 : index
    %147 = vector.load %arg10[%c0_134, %c0_135, %c88] : memref<2x8x96xf32, #tpu.memory_space<vmem>>, vector<2x8x8xf32>
    "tpu.trace_start"() <{level = 10 : i32, message = "bqd,bkd->bqk"}> : () -> ()
    %cst_136 = arith.constant dense<0.000000e+00> : vector<2x8x8xf32>
    %148 = tpu.matmul %145, %146, %cst_136 {dimension_numbers = #tpu.dot_dimension_numbers<[2], [2], [1], [1], [0, 0, 0, 1, 1, 1], [0], [0]>, precision = #tpu.contract_precision<fp32>} : vector<2x8x8xf32>, vector<2x8x8xf32>, vector<2x8x8xf32> -> vector<2x8x8xf32>
    "tpu.trace_stop"() : () -> ()
    %cst_137 = arith.constant 0.353553385 : f32
    %149 = vector.broadcast %cst_137 : f32 to vector<2x8x8xf32>
    %150 = arith.mulf %148, %149 : vector<2x8x8xf32>
    %cst_138 = arith.constant dense<0xFF800000> : vector<2x8xf32>
    %151 = vector.multi_reduction <maximumf>, %150, %cst_138 [2] : vector<2x8x8xf32> to vector<2x8xf32>
    %152 = vector.shape_cast %151 : vector<2x8xf32> to vector<2x8x1xf32>
    %153 = vector.broadcast %152 : vector<2x8x1xf32> to vector<2x8x8xf32>
    %154 = arith.subf %150, %153 : vector<2x8x8xf32>
    %155 = math.exp %154 : vector<2x8x8xf32>
    %cst_139 = arith.constant dense<0.000000e+00> : vector<2x8xf32>
    %156 = vector.multi_reduction <add>, %155, %cst_139 [2] : vector<2x8x8xf32> to vector<2x8xf32>
    %157 = vector.shape_cast %156 : vector<2x8xf32> to vector<2x8x1xf32>
    %158 = tpu.reciprocal %157 {approx = true} : vector<2x8x1xf32> -> vector<2x8x1xf32>
    %159 = vector.broadcast %158 : vector<2x8x1xf32> to vector<2x8x8xf32>
    %160 = arith.mulf %155, %159 : vector<2x8x8xf32>
    "tpu.trace_start"() <{level = 10 : i32, message = "bqk,bkd->bqd"}> : () -> ()
    %cst_140 = arith.constant dense<0.000000e+00> : vector<2x8x8xf32>
    %161 = tpu.matmul %160, %147, %cst_140 {dimension_numbers = #tpu.dot_dimension_numbers<[2], [1], [1], [2], [0, 0, 0, 1, 1, 2], [0], [0]>, precision = #tpu.contract_precision<fp32>} : vector<2x8x8xf32>, vector<2x8x8xf32>, vector<2x8x8xf32> -> vector<2x8x8xf32>
    "tpu.trace_stop"() : () -> ()
    %c0_141 = arith.constant 0 : index
    %c0_142 = arith.constant 0 : index
    %c24_143 = arith.constant 24 : index
    %162 = vector.load %arg11[%c0_141, %c0_142, %c24_143] : memref<2x8x32xf32, #tpu.memory_space<vmem>>, vector<2x8x8xf32>
    tpu.vector_store %arg11[%c0_141, %c0_142, %c24_143], %161 {strides = array<i32>} : memref<2x8x32xf32, #tpu.memory_space<vmem>>, vector<2x8x8xf32>,
    %c0_144 = arith.constant 0 : index
    %c0_145 = arith.constant 0 : index
    %c0_146 = arith.constant 0 : index
    %c96 = arith.constant 96 : index
    %163 = vector.load %arg2[%c0_144, %c0_145, %c0_146, %c96] : memref<2x2x32x128xf32, #tpu.memory_space<vmem>>, vector<1x2x32x32xf32>
    %164 = vector.shape_cast %163 : vector<1x2x32x32xf32> to vector<2x32x32xf32>
    %c0_147 = arith.constant 0 : index
    %c1_148 = arith.constant 1 : index
    %c0_149 = arith.constant 0 : index
    %165 = vector.load %arg5[%c0_147, %c1_148, %c0_149] : memref<2x8x128xf32, #tpu.memory_space<vmem>>, vector<1x1x32xf32>
    %166 = vector.shape_cast %165 : vector<1x1x32xf32> to vector<1x32xf32>
    %c0_150 = arith.constant 0 : index
    %c0_151 = arith.constant 0 : index
    %c0_152 = arith.constant 0 : index
    %167 = vector.load %arg11[%c0_150, %c0_151, %c0_152] : memref<2x8x32xf32, #tpu.memory_space<vmem>>, vector<2x8x32xf32>
    "tpu.trace_start"() <{level = 10 : i32, message = "bth,bhf->btf"}> : () -> ()
    %cst_153 = arith.constant dense<0.000000e+00> : vector<2x8x32xf32>
    %168 = tpu.matmul %167, %164, %cst_153 {dimension_numbers = #tpu.dot_dimension_numbers<[2], [1], [1], [2], [0, 0, 0, 1, 1, 2], [0], [0]>, precision = #tpu.contract_precision<fp32>} : vector<2x8x32xf32>, vector<2x32x32xf32>, vector<2x8x32xf32> -> vector<2x8x32xf32>
    "tpu.trace_stop"() : () -> ()
    %169 = vector.shape_cast %166 : vector<1x32xf32> to vector<1x1x32xf32>
    %170 = vector.broadcast %169 : vector<1x1x32xf32> to vector<2x8x32xf32>
    %171 = arith.addf %168, %170 : vector<2x8x32xf32>
    %c0_154 = arith.constant 0 : index
    %c4_155 = arith.constant 4 : index
    %c0_156 = arith.constant 0 : index
    %172 = vector.load %arg5[%c0_154, %c4_155, %c0_156] : memref<2x8x128xf32, #tpu.memory_space<vmem>>, vector<1x1x32xf32>
    %173 = vector.shape_cast %172 : vector<1x1x32xf32> to vector<1x32xf32>
    %c0_157 = arith.constant 0 : index
    %c5_158 = arith.constant 5 : index
    %c0_159 = arith.constant 0 : index
    %174 = vector.load %arg5[%c0_157, %c5_158, %c0_159] : memref<2x8x128xf32, #tpu.memory_space<vmem>>, vector<1x1x32xf32>
    %175 = vector.shape_cast %174 : vector<1x1x32xf32> to vector<1x32xf32>
    %176 = arith.addf %81, %171 : vector<2x8x32xf32>
    %cst_160 = arith.constant dense<0.000000e+00> : vector<2x8xf32>
    %177 = vector.multi_reduction <add>, %176, %cst_160 [2] : vector<2x8x32xf32> to vector<2x8xf32>
    %178 = vector.shape_cast %177 : vector<2x8xf32> to vector<2x8x1xf32>
    %cst_161 = arith.constant 3.200000e+01 : f32
    %179 = vector.broadcast %cst_161 : f32 to vector<2x8x1xf32>
    %180 = arith.divf %178, %179 : vector<2x8x1xf32>
    %181 = vector.broadcast %180 : vector<2x8x1xf32> to vector<2x8x32xf32>
    %182 = arith.subf %176, %181 : vector<2x8x32xf32>
    %183 = arith.mulf %182, %182 : vector<2x8x32xf32>
    %cst_162 = arith.constant dense<0.000000e+00> : vector<2x8xf32>
    %184 = vector.multi_reduction <add>, %183, %cst_162 [2] : vector<2x8x32xf32> to vector<2x8xf32>
    %185 = vector.shape_cast %184 : vector<2x8xf32> to vector<2x8x1xf32>
    %cst_163 = arith.constant 3.200000e+01 : f32
    %186 = vector.broadcast %cst_163 : f32 to vector<2x8x1xf32>
    %187 = arith.divf %185, %186 : vector<2x8x1xf32>
    %188 = vector.broadcast %180 : vector<2x8x1xf32> to vector<2x8x32xf32>
    %189 = arith.subf %176, %188 : vector<2x8x32xf32>
    %cst_164 = arith.constant 9.99999974E-6 : f32
    %190 = vector.broadcast %cst_164 : f32 to vector<2x8x1xf32>
    %191 = arith.addf %187, %190 : vector<2x8x1xf32>
    %192 = math.rsqrt %191 : vector<2x8x1xf32>
    %193 = vector.broadcast %192 : vector<2x8x1xf32> to vector<2x8x32xf32>
    %194 = arith.mulf %189, %193 : vector<2x8x32xf32>
    %195 = vector.shape_cast %173 : vector<1x32xf32> to vector<1x1x32xf32>
    %196 = vector.broadcast %195 : vector<1x1x32xf32> to vector<2x8x32xf32>
    %197 = arith.mulf %194, %196 : vector<2x8x32xf32>
    %198 = vector.shape_cast %175 : vector<1x32xf32> to vector<1x1x32xf32>
    %199 = vector.broadcast %198 : vector<1x1x32xf32> to vector<2x8x32xf32>
    %200 = arith.addf %197, %199 : vector<2x8x32xf32>
    %c0_165 = arith.constant 0 : index
    %c0_166 = arith.constant 0 : index
    %c0_167 = arith.constant 0 : index
    %c0_168 = arith.constant 0 : index
    %201 = vector.load %arg3[%c0_165, %c0_166, %c0_167, %c0_168] : memref<2x2x32x128xf32, #tpu.memory_space<vmem>>, vector<1x2x32x128xf32>
    %202 = vector.shape_cast %201 : vector<1x2x32x128xf32> to vector<2x32x128xf32>
    "tpu.trace_start"() <{level = 10 : i32, message = "bth,bhf->btf"}> : () -> ()
    %cst_169 = arith.constant dense<0.000000e+00> : vector<2x8x128xf32>
    %203 = tpu.matmul %200, %202, %cst_169 {dimension_numbers = #tpu.dot_dimension_numbers<[2], [1], [1], [2], [0, 0, 0, 1, 1, 2], [0], [0]>, precision = #tpu.contract_precision<fp32>} : vector<2x8x32xf32>, vector<2x32x128xf32>, vector<2x8x128xf32> -> vector<2x8x128xf32>
    "tpu.trace_stop"() : () -> ()
    %c0_170 = arith.constant 0 : index
    %c2_171 = arith.constant 2 : index
    %c0_172 = arith.constant 0 : index
    %204 = vector.load %arg5[%c0_170, %c2_171, %c0_172] : memref<2x8x128xf32, #tpu.memory_space<vmem>>, vector<1x1x128xf32>
    %205 = vector.shape_cast %204 : vector<1x1x128xf32> to vector<1x128xf32>
    %206 = vector.shape_cast %205 : vector<1x128xf32> to vector<1x1x128xf32>
    %207 = vector.broadcast %206 : vector<1x1x128xf32> to vector<2x8x128xf32>
    %208 = arith.addf %203, %207 : vector<2x8x128xf32>
    %cst_173 = arith.constant 0.000000e+00 : f32
    %209 = vector.broadcast %cst_173 : f32 to vector<2x8x128xf32>
    %210 = arith.maximumf %208, %209 : vector<2x8x128xf32>
    %c0_174 = arith.constant 0 : index
    %c0_175 = arith.constant 0 : index
    %c0_176 = arith.constant 0 : index
    %c0_177 = arith.constant 0 : index
    %211 = vector.load %arg4[%c0_174, %c0_175, %c0_176, %c0_177] : memref<2x2x128x32xf32, #tpu.memory_space<vmem>>, vector<1x2x128x32xf32>
    %212 = vector.shape_cast %211 : vector<1x2x128x32xf32> to vector<2x128x32xf32>
    "tpu.trace_start"() <{level = 10 : i32, message = "btf,bfh->bth"}> : () -> ()
    %cst_178 = arith.constant dense<0.000000e+00> : vector<2x8x32xf32>
    %213 = tpu.matmul %210, %212, %cst_178 {dimension_numbers = #tpu.dot_dimension_numbers<[2], [1], [1], [2], [0, 0, 0, 1, 1, 2], [0], [0]>, precision = #tpu.contract_precision<fp32>} : vector<2x8x128xf32>, vector<2x128x32xf32>, vector<2x8x32xf32> -> vector<2x8x32xf32>
    "tpu.trace_stop"() : () -> ()
    %c0_179 = arith.constant 0 : index
    %c3_180 = arith.constant 3 : index
    %c0_181 = arith.constant 0 : index
    %214 = vector.load %arg5[%c0_179, %c3_180, %c0_181] : memref<2x8x128xf32, #tpu.memory_space<vmem>>, vector<1x1x32xf32>
    %215 = vector.shape_cast %214 : vector<1x1x32xf32> to vector<1x32xf32>
    %216 = vector.shape_cast %215 : vector<1x32xf32> to vector<1x1x32xf32>
    %217 = vector.broadcast %216 : vector<1x1x32xf32> to vector<2x8x32xf32>
    %218 = arith.addf %213, %217 : vector<2x8x32xf32>
    %c0_182 = arith.constant 0 : index
    %c6_183 = arith.constant 6 : index
    %c0_184 = arith.constant 0 : index
    %219 = vector.load %arg5[%c0_182, %c6_183, %c0_184] : memref<2x8x128xf32, #tpu.memory_space<vmem>>, vector<1x1x32xf32>
    %220 = vector.shape_cast %219 : vector<1x1x32xf32> to vector<1x32xf32>
    %c0_185 = arith.constant 0 : index
    %c7_186 = arith.constant 7 : index
    %c0_187 = arith.constant 0 : index
    %221 = vector.load %arg5[%c0_185, %c7_186, %c0_187] : memref<2x8x128xf32, #tpu.memory_space<vmem>>, vector<1x1x32xf32>
    %222 = vector.shape_cast %221 : vector<1x1x32xf32> to vector<1x32xf32>
    %223 = arith.addf %200, %218 : vector<2x8x32xf32>
    %cst_188 = arith.constant dense<0.000000e+00> : vector<2x8xf32>
    %224 = vector.multi_reduction <add>, %223, %cst_188 [2] : vector<2x8x32xf32> to vector<2x8xf32>
    %225 = vector.shape_cast %224 : vector<2x8xf32> to vector<2x8x1xf32>
    %cst_189 = arith.constant 3.200000e+01 : f32
    %226 = vector.broadcast %cst_189 : f32 to vector<2x8x1xf32>
    %227 = arith.divf %225, %226 : vector<2x8x1xf32>
    %228 = vector.broadcast %227 : vector<2x8x1xf32> to vector<2x8x32xf32>
    %229 = arith.subf %223, %228 : vector<2x8x32xf32>
    %230 = arith.mulf %229, %229 : vector<2x8x32xf32>
    %cst_190 = arith.constant dense<0.000000e+00> : vector<2x8xf32>
    %231 = vector.multi_reduction <add>, %230, %cst_190 [2] : vector<2x8x32xf32> to vector<2x8xf32>
    %232 = vector.shape_cast %231 : vector<2x8xf32> to vector<2x8x1xf32>
    %cst_191 = arith.constant 3.200000e+01 : f32
    %233 = vector.broadcast %cst_191 : f32 to vector<2x8x1xf32>
    %234 = arith.divf %232, %233 : vector<2x8x1xf32>
    %235 = vector.broadcast %227 : vector<2x8x1xf32> to vector<2x8x32xf32>
    %236 = arith.subf %223, %235 : vector<2x8x32xf32>
    %cst_192 = arith.constant 9.99999974E-6 : f32
    %237 = vector.broadcast %cst_192 : f32 to vector<2x8x1xf32>
    %238 = arith.addf %234, %237 : vector<2x8x1xf32>
    %239 = math.rsqrt %238 : vector<2x8x1xf32>
    %240 = vector.broadcast %239 : vector<2x8x1xf32> to vector<2x8x32xf32>
    %241 = arith.mulf %236, %240 : vector<2x8x32xf32>
    %242 = vector.shape_cast %220 : vector<1x32xf32> to vector<1x1x32xf32>
    %243 = vector.broadcast %242 : vector<1x1x32xf32> to vector<2x8x32xf32>
    %244 = arith.mulf %241, %243 : vector<2x8x32xf32>
    %245 = vector.shape_cast %222 : vector<1x32xf32> to vector<1x1x32xf32>
    %246 = vector.broadcast %245 : vector<1x1x32xf32> to vector<2x8x32xf32>
    %247 = arith.addf %244, %246 : vector<2x8x32xf32>
    %c1_193 = arith.constant 1 : index
    %c0_194 = arith.constant 0 : index
    %c0_195 = arith.constant 0 : index
    %c0_196 = arith.constant 0 : index
    %248 = vector.load %arg2[%c1_193, %c0_194, %c0_195, %c0_196] : memref<2x2x32x128xf32, #tpu.memory_space<vmem>>, vector<1x2x32x96xf32>
    %249 = vector.shape_cast %248 : vector<1x2x32x96xf32> to vector<2x32x96xf32>
    %c1_197 = arith.constant 1 : index
    %c0_198 = arith.constant 0 : index
    %c0_199 = arith.constant 0 : index
    %250 = vector.load %arg5[%c1_197, %c0_198, %c0_199] : memref<2x8x128xf32, #tpu.memory_space<vmem>>, vector<1x1x96xf32>
    %251 = vector.shape_cast %250 : vector<1x1x96xf32> to vector<1x96xf32>
    "tpu.trace_start"() <{level = 10 : i32, message = "bth,bhf->btf"}> : () -> ()
    %cst_200 = arith.constant dense<0.000000e+00> : vector<2x8x96xf32>
    %252 = tpu.matmul %247, %249, %cst_200 {dimension_numbers = #tpu.dot_dimension_numbers<[2], [1], [1], [2], [0, 0, 0, 1, 1, 2], [0], [0]>, precision = #tpu.contract_precision<fp32>} : vector<2x8x32xf32>, vector<2x32x96xf32>, vector<2x8x96xf32> -> vector<2x8x96xf32>
    "tpu.trace_stop"() : () -> ()
    %253 = vector.shape_cast %251 : vector<1x96xf32> to vector<1x1x96xf32>
    %254 = vector.broadcast %253 : vector<1x1x96xf32> to vector<2x8x96xf32>
    %255 = arith.addf %252, %254 : vector<2x8x96xf32>
    %c0_201 = arith.constant 0 : index
    %c0_202 = arith.constant 0 : index
    %c0_203 = arith.constant 0 : index
    %256 = vector.load %arg10[%c0_201, %c0_202, %c0_203] : memref<2x8x96xf32, #tpu.memory_space<vmem>>, vector<2x8x96xf32>
    tpu.vector_store %arg10[%c0_201, %c0_202, %c0_203], %255 {strides = array<i32>} : memref<2x8x96xf32, #tpu.memory_space<vmem>>, vector<2x8x96xf32>,
    %c0_204 = arith.constant 0 : index
    %c0_205 = arith.constant 0 : index
    %c0_206 = arith.constant 0 : index
    %257 = vector.load %arg10[%c0_204, %c0_205, %c0_206] : memref<2x8x96xf32, #tpu.memory_space<vmem>>, vector<2x8x8xf32>
    %c0_207 = arith.constant 0 : index
    %c0_208 = arith.constant 0 : index
    %c32_209 = arith.constant 32 : index
    %258 = vector.load %arg10[%c0_207, %c0_208, %c32_209] : memref<2x8x96xf32, #tpu.memory_space<vmem>>, vector<2x8x8xf32>
    %c0_210 = arith.constant 0 : index
    %c0_211 = arith.constant 0 : index
    %c64_212 = arith.constant 64 : index
    %259 = vector.load %arg10[%c0_210, %c0_211, %c64_212] : memref<2x8x96xf32, #tpu.memory_space<vmem>>, vector<2x8x8xf32>
    "tpu.trace_start"() <{level = 10 : i32, message = "bqd,bkd->bqk"}> : () -> ()
    %cst_213 = arith.constant dense<0.000000e+00> : vector<2x8x8xf32>
    %260 = tpu.matmul %257, %258, %cst_213 {dimension_numbers = #tpu.dot_dimension_numbers<[2], [2], [1], [1], [0, 0, 0, 1, 1, 1], [0], [0]>, precision = #tpu.contract_precision<fp32>} : vector<2x8x8xf32>, vector<2x8x8xf32>, vector<2x8x8xf32> -> vector<2x8x8xf32>
    "tpu.trace_stop"() : () -> ()
    %cst_214 = arith.constant 0.353553385 : f32
    %261 = vector.broadcast %cst_214 : f32 to vector<2x8x8xf32>
    %262 = arith.mulf %260, %261 : vector<2x8x8xf32>
    %cst_215 = arith.constant dense<0xFF800000> : vector<2x8xf32>
    %263 = vector.multi_reduction <maximumf>, %262, %cst_215 [2] : vector<2x8x8xf32> to vector<2x8xf32>
    %264 = vector.shape_cast %263 : vector<2x8xf32> to vector<2x8x1xf32>
    %265 = vector.broadcast %264 : vector<2x8x1xf32> to vector<2x8x8xf32>
    %266 = arith.subf %262, %265 : vector<2x8x8xf32>
    %267 = math.exp %266 : vector<2x8x8xf32>
    %cst_216 = arith.constant dense<0.000000e+00> : vector<2x8xf32>
    %268 = vector.multi_reduction <add>, %267, %cst_216 [2] : vector<2x8x8xf32> to vector<2x8xf32>
    %269 = vector.shape_cast %268 : vector<2x8xf32> to vector<2x8x1xf32>
    %270 = tpu.reciprocal %269 {approx = true} : vector<2x8x1xf32> -> vector<2x8x1xf32>
    %271 = vector.broadcast %270 : vector<2x8x1xf32> to vector<2x8x8xf32>
    %272 = arith.mulf %267, %271 : vector<2x8x8xf32>
    "tpu.trace_start"() <{level = 10 : i32, message = "bqk,bkd->bqd"}> : () -> ()
    %cst_217 = arith.constant dense<0.000000e+00> : vector<2x8x8xf32>
    %273 = tpu.matmul %272, %259, %cst_217 {dimension_numbers = #tpu.dot_dimension_numbers<[2], [1], [1], [2], [0, 0, 0, 1, 1, 2], [0], [0]>, precision = #tpu.contract_precision<fp32>} : vector<2x8x8xf32>, vector<2x8x8xf32>, vector<2x8x8xf32> -> vector<2x8x8xf32>
    "tpu.trace_stop"() : () -> ()
    %c0_218 = arith.constant 0 : index
    %c0_219 = arith.constant 0 : index
    %c0_220 = arith.constant 0 : index
    %274 = vector.load %arg11[%c0_218, %c0_219, %c0_220] : memref<2x8x32xf32, #tpu.memory_space<vmem>>, vector<2x8x8xf32>
    tpu.vector_store %arg11[%c0_218, %c0_219, %c0_220], %273 {strides = array<i32>} : memref<2x8x32xf32, #tpu.memory_space<vmem>>, vector<2x8x8xf32>,
    %c0_221 = arith.constant 0 : index
    %c0_222 = arith.constant 0 : index
    %c8_223 = arith.constant 8 : index
    %275 = vector.load %arg10[%c0_221, %c0_222, %c8_223] : memref<2x8x96xf32, #tpu.memory_space<vmem>>, vector<2x8x8xf32>
    %c0_224 = arith.constant 0 : index
    %c0_225 = arith.constant 0 : index
    %c40_226 = arith.constant 40 : index
    %276 = vector.load %arg10[%c0_224, %c0_225, %c40_226] : memref<2x8x96xf32, #tpu.memory_space<vmem>>, vector<2x8x8xf32>
    %c0_227 = arith.constant 0 : index
    %c0_228 = arith.constant 0 : index
    %c72_229 = arith.constant 72 : index
    %277 = vector.load %arg10[%c0_227, %c0_228, %c72_229] : memref<2x8x96xf32, #tpu.memory_space<vmem>>, vector<2x8x8xf32>
    "tpu.trace_start"() <{level = 10 : i32, message = "bqd,bkd->bqk"}> : () -> ()
    %cst_230 = arith.constant dense<0.000000e+00> : vector<2x8x8xf32>
    %278 = tpu.matmul %275, %276, %cst_230 {dimension_numbers = #tpu.dot_dimension_numbers<[2], [2], [1], [1], [0, 0, 0, 1, 1, 1], [0], [0]>, precision = #tpu.contract_precision<fp32>} : vector<2x8x8xf32>, vector<2x8x8xf32>, vector<2x8x8xf32> -> vector<2x8x8xf32>
    "tpu.trace_stop"() : () -> ()
    %cst_231 = arith.constant 0.353553385 : f32
    %279 = vector.broadcast %cst_231 : f32 to vector<2x8x8xf32>
    %280 = arith.mulf %278, %279 : vector<2x8x8xf32>
    %cst_232 = arith.constant dense<0xFF800000> : vector<2x8xf32>
    %281 = vector.multi_reduction <maximumf>, %280, %cst_232 [2] : vector<2x8x8xf32> to vector<2x8xf32>
    %282 = vector.shape_cast %281 : vector<2x8xf32> to vector<2x8x1xf32>
    %283 = vector.broadcast %282 : vector<2x8x1xf32> to vector<2x8x8xf32>
    %284 = arith.subf %280, %283 : vector<2x8x8xf32>
    %285 = math.exp %284 : vector<2x8x8xf32>
    %cst_233 = arith.constant dense<0.000000e+00> : vector<2x8xf32>
    %286 = vector.multi_reduction <add>, %285, %cst_233 [2] : vector<2x8x8xf32> to vector<2x8xf32>
    %287 = vector.shape_cast %286 : vector<2x8xf32> to vector<2x8x1xf32>
    %288 = tpu.reciprocal %287 {approx = true} : vector<2x8x1xf32> -> vector<2x8x1xf32>
    %289 = vector.broadcast %288 : vector<2x8x1xf32> to vector<2x8x8xf32>
    %290 = arith.mulf %285, %289 : vector<2x8x8xf32>
    "tpu.trace_start"() <{level = 10 : i32, message = "bqk,bkd->bqd"}> : () -> ()
    %cst_234 = arith.constant dense<0.000000e+00> : vector<2x8x8xf32>
    %291 = tpu.matmul %290, %277, %cst_234 {dimension_numbers = #tpu.dot_dimension_numbers<[2], [1], [1], [2], [0, 0, 0, 1, 1, 2], [0], [0]>, precision = #tpu.contract_precision<fp32>} : vector<2x8x8xf32>, vector<2x8x8xf32>, vector<2x8x8xf32> -> vector<2x8x8xf32>
    "tpu.trace_stop"() : () -> ()
    %c0_235 = arith.constant 0 : index
    %c0_236 = arith.constant 0 : index
    %c8_237 = arith.constant 8 : index
    %292 = vector.load %arg11[%c0_235, %c0_236, %c8_237] : memref<2x8x32xf32, #tpu.memory_space<vmem>>, vector<2x8x8xf32>
    tpu.vector_store %arg11[%c0_235, %c0_236, %c8_237], %291 {strides = array<i32>} : memref<2x8x32xf32, #tpu.memory_space<vmem>>, vector<2x8x8xf32>,
    %c0_238 = arith.constant 0 : index
    %c0_239 = arith.constant 0 : index
    %c16_240 = arith.constant 16 : index
    %293 = vector.load %arg10[%c0_238, %c0_239, %c16_240] : memref<2x8x96xf32, #tpu.memory_space<vmem>>, vector<2x8x8xf32>
    %c0_241 = arith.constant 0 : index
    %c0_242 = arith.constant 0 : index
    %c48_243 = arith.constant 48 : index
    %294 = vector.load %arg10[%c0_241, %c0_242, %c48_243] : memref<2x8x96xf32, #tpu.memory_space<vmem>>, vector<2x8x8xf32>
    %c0_244 = arith.constant 0 : index
    %c0_245 = arith.constant 0 : index
    %c80_246 = arith.constant 80 : index
    %295 = vector.load %arg10[%c0_244, %c0_245, %c80_246] : memref<2x8x96xf32, #tpu.memory_space<vmem>>, vector<2x8x8xf32>
    "tpu.trace_start"() <{level = 10 : i32, message = "bqd,bkd->bqk"}> : () -> ()
    %cst_247 = arith.constant dense<0.000000e+00> : vector<2x8x8xf32>
    %296 = tpu.matmul %293, %294, %cst_247 {dimension_numbers = #tpu.dot_dimension_numbers<[2], [2], [1], [1], [0, 0, 0, 1, 1, 1], [0], [0]>, precision = #tpu.contract_precision<fp32>} : vector<2x8x8xf32>, vector<2x8x8xf32>, vector<2x8x8xf32> -> vector<2x8x8xf32>
    "tpu.trace_stop"() : () -> ()
    %cst_248 = arith.constant 0.353553385 : f32
    %297 = vector.broadcast %cst_248 : f32 to vector<2x8x8xf32>
    %298 = arith.mulf %296, %297 : vector<2x8x8xf32>
    %cst_249 = arith.constant dense<0xFF800000> : vector<2x8xf32>
    %299 = vector.multi_reduction <maximumf>, %298, %cst_249 [2] : vector<2x8x8xf32> to vector<2x8xf32>
    %300 = vector.shape_cast %299 : vector<2x8xf32> to vector<2x8x1xf32>
    %301 = vector.broadcast %300 : vector<2x8x1xf32> to vector<2x8x8xf32>
    %302 = arith.subf %298, %301 : vector<2x8x8xf32>
    %303 = math.exp %302 : vector<2x8x8xf32>
    %cst_250 = arith.constant dense<0.000000e+00> : vector<2x8xf32>
    %304 = vector.multi_reduction <add>, %303, %cst_250 [2] : vector<2x8x8xf32> to vector<2x8xf32>
    %305 = vector.shape_cast %304 : vector<2x8xf32> to vector<2x8x1xf32>
    %306 = tpu.reciprocal %305 {approx = true} : vector<2x8x1xf32> -> vector<2x8x1xf32>
    %307 = vector.broadcast %306 : vector<2x8x1xf32> to vector<2x8x8xf32>
    %308 = arith.mulf %303, %307 : vector<2x8x8xf32>
    "tpu.trace_start"() <{level = 10 : i32, message = "bqk,bkd->bqd"}> : () -> ()
    %cst_251 = arith.constant dense<0.000000e+00> : vector<2x8x8xf32>
    %309 = tpu.matmul %308, %295, %cst_251 {dimension_numbers = #tpu.dot_dimension_numbers<[2], [1], [1], [2], [0, 0, 0, 1, 1, 2], [0], [0]>, precision = #tpu.contract_precision<fp32>} : vector<2x8x8xf32>, vector<2x8x8xf32>, vector<2x8x8xf32> -> vector<2x8x8xf32>
    "tpu.trace_stop"() : () -> ()
    %c0_252 = arith.constant 0 : index
    %c0_253 = arith.constant 0 : index
    %c16_254 = arith.constant 16 : index
    %310 = vector.load %arg11[%c0_252, %c0_253, %c16_254] : memref<2x8x32xf32, #tpu.memory_space<vmem>>, vector<2x8x8xf32>
    tpu.vector_store %arg11[%c0_252, %c0_253, %c16_254], %309 {strides = array<i32>} : memref<2x8x32xf32, #tpu.memory_space<vmem>>, vector<2x8x8xf32>,
    %c0_255 = arith.constant 0 : index
    %c0_256 = arith.constant 0 : index
    %c24_257 = arith.constant 24 : index
    %311 = vector.load %arg10[%c0_255, %c0_256, %c24_257] : memref<2x8x96xf32, #tpu.memory_space<vmem>>, vector<2x8x8xf32>
    %c0_258 = arith.constant 0 : index
    %c0_259 = arith.constant 0 : index
    %c56_260 = arith.constant 56 : index
    %312 = vector.load %arg10[%c0_258, %c0_259, %c56_260] : memref<2x8x96xf32, #tpu.memory_space<vmem>>, vector<2x8x8xf32>
    %c0_261 = arith.constant 0 : index
    %c0_262 = arith.constant 0 : index
    %c88_263 = arith.constant 88 : index
    %313 = vector.load %arg10[%c0_261, %c0_262, %c88_263] : memref<2x8x96xf32, #tpu.memory_space<vmem>>, vector<2x8x8xf32>
    "tpu.trace_start"() <{level = 10 : i32, message = "bqd,bkd->bqk"}> : () -> ()
    %cst_264 = arith.constant dense<0.000000e+00> : vector<2x8x8xf32>
    %314 = tpu.matmul %311, %312, %cst_264 {dimension_numbers = #tpu.dot_dimension_numbers<[2], [2], [1], [1], [0, 0, 0, 1, 1, 1], [0], [0]>, precision = #tpu.contract_precision<fp32>} : vector<2x8x8xf32>, vector<2x8x8xf32>, vector<2x8x8xf32> -> vector<2x8x8xf32>
    "tpu.trace_stop"() : () -> ()
    %cst_265 = arith.constant 0.353553385 : f32
    %315 = vector.broadcast %cst_265 : f32 to vector<2x8x8xf32>
    %316 = arith.mulf %314, %315 : vector<2x8x8xf32>
    %cst_266 = arith.constant dense<0xFF800000> : vector<2x8xf32>
    %317 = vector.multi_reduction <maximumf>, %316, %cst_266 [2] : vector<2x8x8xf32> to vector<2x8xf32>
    %318 = vector.shape_cast %317 : vector<2x8xf32> to vector<2x8x1xf32>
    %319 = vector.broadcast %318 : vector<2x8x1xf32> to vector<2x8x8xf32>
    %320 = arith.subf %316, %319 : vector<2x8x8xf32>
    %321 = math.exp %320 : vector<2x8x8xf32>
    %cst_267 = arith.constant dense<0.000000e+00> : vector<2x8xf32>
    %322 = vector.multi_reduction <add>, %321, %cst_267 [2] : vector<2x8x8xf32> to vector<2x8xf32>
    %323 = vector.shape_cast %322 : vector<2x8xf32> to vector<2x8x1xf32>
    %324 = tpu.reciprocal %323 {approx = true} : vector<2x8x1xf32> -> vector<2x8x1xf32>
    %325 = vector.broadcast %324 : vector<2x8x1xf32> to vector<2x8x8xf32>
    %326 = arith.mulf %321, %325 : vector<2x8x8xf32>
    "tpu.trace_start"() <{level = 10 : i32, message = "bqk,bkd->bqd"}> : () -> ()
    %cst_268 = arith.constant dense<0.000000e+00> : vector<2x8x8xf32>
    %327 = tpu.matmul %326, %313, %cst_268 {dimension_numbers = #tpu.dot_dimension_numbers<[2], [1], [1], [2], [0, 0, 0, 1, 1, 2], [0], [0]>, precision = #tpu.contract_precision<fp32>} : vector<2x8x8xf32>, vector<2x8x8xf32>, vector<2x8x8xf32> -> vector<2x8x8xf32>
    "tpu.trace_stop"() : () -> ()
    %c0_269 = arith.constant 0 : index
    %c0_270 = arith.constant 0 : index
    %c24_271 = arith.constant 24 : index
    %328 = vector.load %arg11[%c0_269, %c0_270, %c24_271] : memref<2x8x32xf32, #tpu.memory_space<vmem>>, vector<2x8x8xf32>
    tpu.vector_store %arg11[%c0_269, %c0_270, %c24_271], %327 {strides = array<i32>} : memref<2x8x32xf32, #tpu.memory_space<vmem>>, vector<2x8x8xf32>,
    %c1_272 = arith.constant 1 : index
    %c0_273 = arith.constant 0 : index
    %c0_274 = arith.constant 0 : index
    %c96_275 = arith.constant 96 : index
    %329 = vector.load %arg2[%c1_272, %c0_273, %c0_274, %c96_275] : memref<2x2x32x128xf32, #tpu.memory_space<vmem>>, vector<1x2x32x32xf32>
    %330 = vector.shape_cast %329 : vector<1x2x32x32xf32> to vector<2x32x32xf32>
    %c1_276 = arith.constant 1 : index
    %c1_277 = arith.constant 1 : index
    %c0_278 = arith.constant 0 : index
    %331 = vector.load %arg5[%c1_276, %c1_277, %c0_278] : memref<2x8x128xf32, #tpu.memory_space<vmem>>, vector<1x1x32xf32>
    %332 = vector.shape_cast %331 : vector<1x1x32xf32> to vector<1x32xf32>
    %c0_279 = arith.constant 0 : index
    %c0_280 = arith.constant 0 : index
    %c0_281 = arith.constant 0 : index
    %333 = vector.load %arg11[%c0_279, %c0_280, %c0_281] : memref<2x8x32xf32, #tpu.memory_space<vmem>>, vector<2x8x32xf32>
    "tpu.trace_start"() <{level = 10 : i32, message = "bth,bhf->btf"}> : () -> ()
    %cst_282 = arith.constant dense<0.000000e+00> : vector<2x8x32xf32>
    %334 = tpu.matmul %333, %330, %cst_282 {dimension_numbers = #tpu.dot_dimension_numbers<[2], [1], [1], [2], [0, 0, 0, 1, 1, 2], [0], [0]>, precision = #tpu.contract_precision<fp32>} : vector<2x8x32xf32>, vector<2x32x32xf32>, vector<2x8x32xf32> -> vector<2x8x32xf32>
    "tpu.trace_stop"() : () -> ()
    %335 = vector.shape_cast %332 : vector<1x32xf32> to vector<1x1x32xf32>
    %336 = vector.broadcast %335 : vector<1x1x32xf32> to vector<2x8x32xf32>
    %337 = arith.addf %334, %336 : vector<2x8x32xf32>
    %c1_283 = arith.constant 1 : index
    %c4_284 = arith.constant 4 : index
    %c0_285 = arith.constant 0 : index
    %338 = vector.load %arg5[%c1_283, %c4_284, %c0_285] : memref<2x8x128xf32, #tpu.memory_space<vmem>>, vector<1x1x32xf32>
    %339 = vector.shape_cast %338 : vector<1x1x32xf32> to vector<1x32xf32>
    %c1_286 = arith.constant 1 : index
    %c5_287 = arith.constant 5 : index
    %c0_288 = arith.constant 0 : index
    %340 = vector.load %arg5[%c1_286, %c5_287, %c0_288] : memref<2x8x128xf32, #tpu.memory_space<vmem>>, vector<1x1x32xf32>
    %341 = vector.shape_cast %340 : vector<1x1x32xf32> to vector<1x32xf32>
    %342 = arith.addf %247, %337 : vector<2x8x32xf32>
    %cst_289 = arith.constant dense<0.000000e+00> : vector<2x8xf32>
    %343 = vector.multi_reduction <add>, %342, %cst_289 [2] : vector<2x8x32xf32> to vector<2x8xf32>
    %344 = vector.shape_cast %343 : vector<2x8xf32> to vector<2x8x1xf32>
    %cst_290 = arith.constant 3.200000e+01 : f32
    %345 = vector.broadcast %cst_290 : f32 to vector<2x8x1xf32>
    %346 = arith.divf %344, %345 : vector<2x8x1xf32>
    %347 = vector.broadcast %346 : vector<2x8x1xf32> to vector<2x8x32xf32>
    %348 = arith.subf %342, %347 : vector<2x8x32xf32>
    %349 = arith.mulf %348, %348 : vector<2x8x32xf32>
    %cst_291 = arith.constant dense<0.000000e+00> : vector<2x8xf32>
    %350 = vector.multi_reduction <add>, %349, %cst_291 [2] : vector<2x8x32xf32> to vector<2x8xf32>
    %351 = vector.shape_cast %350 : vector<2x8xf32> to vector<2x8x1xf32>
    %cst_292 = arith.constant 3.200000e+01 : f32
    %352 = vector.broadcast %cst_292 : f32 to vector<2x8x1xf32>
    %353 = arith.divf %351, %352 : vector<2x8x1xf32>
    %354 = vector.broadcast %346 : vector<2x8x1xf32> to vector<2x8x32xf32>
    %355 = arith.subf %342, %354 : vector<2x8x32xf32>
    %cst_293 = arith.constant 9.99999974E-6 : f32
    %356 = vector.broadcast %cst_293 : f32 to vector<2x8x1xf32>
    %357 = arith.addf %353, %356 : vector<2x8x1xf32>
    %358 = math.rsqrt %357 : vector<2x8x1xf32>
    %359 = vector.broadcast %358 : vector<2x8x1xf32> to vector<2x8x32xf32>
    %360 = arith.mulf %355, %359 : vector<2x8x32xf32>
    %361 = vector.shape_cast %339 : vector<1x32xf32> to vector<1x1x32xf32>
    %362 = vector.broadcast %361 : vector<1x1x32xf32> to vector<2x8x32xf32>
    %363 = arith.mulf %360, %362 : vector<2x8x32xf32>
    %364 = vector.shape_cast %341 : vector<1x32xf32> to vector<1x1x32xf32>
    %365 = vector.broadcast %364 : vector<1x1x32xf32> to vector<2x8x32xf32>
    %366 = arith.addf %363, %365 : vector<2x8x32xf32>
    %c1_294 = arith.constant 1 : index
    %c0_295 = arith.constant 0 : index
    %c0_296 = arith.constant 0 : index
    %c0_297 = arith.constant 0 : index
    %367 = vector.load %arg3[%c1_294, %c0_295, %c0_296, %c0_297] : memref<2x2x32x128xf32, #tpu.memory_space<vmem>>, vector<1x2x32x128xf32>
    %368 = vector.shape_cast %367 : vector<1x2x32x128xf32> to vector<2x32x128xf32>
    "tpu.trace_start"() <{level = 10 : i32, message = "bth,bhf->btf"}> : () -> ()
    %cst_298 = arith.constant dense<0.000000e+00> : vector<2x8x128xf32>
    %369 = tpu.matmul %366, %368, %cst_298 {dimension_numbers = #tpu.dot_dimension_numbers<[2], [1], [1], [2], [0, 0, 0, 1, 1, 2], [0], [0]>, precision = #tpu.contract_precision<fp32>} : vector<2x8x32xf32>, vector<2x32x128xf32>, vector<2x8x128xf32> -> vector<2x8x128xf32>
    "tpu.trace_stop"() : () -> ()
    %c1_299 = arith.constant 1 : index
    %c2_300 = arith.constant 2 : index
    %c0_301 = arith.constant 0 : index
    %370 = vector.load %arg5[%c1_299, %c2_300, %c0_301] : memref<2x8x128xf32, #tpu.memory_space<vmem>>, vector<1x1x128xf32>
    %371 = vector.shape_cast %370 : vector<1x1x128xf32> to vector<1x128xf32>
    %372 = vector.shape_cast %371 : vector<1x128xf32> to vector<1x1x128xf32>
    %373 = vector.broadcast %372 : vector<1x1x128xf32> to vector<2x8x128xf32>
    %374 = arith.addf %369, %373 : vector<2x8x128xf32>
    %cst_302 = arith.constant 0.000000e+00 : f32
    %375 = vector.broadcast %cst_302 : f32 to vector<2x8x128xf32>
    %376 = arith.maximumf %374, %375 : vector<2x8x128xf32>
    %c1_303 = arith.constant 1 : index
    %c0_304 = arith.constant 0 : index
    %c0_305 = arith.constant 0 : index
    %c0_306 = arith.constant 0 : index
    %377 = vector.load %arg4[%c1_303, %c0_304, %c0_305, %c0_306] : memref<2x2x128x32xf32, #tpu.memory_space<vmem>>, vector<1x2x128x32xf32>
    %378 = vector.shape_cast %377 : vector<1x2x128x32xf32> to vector<2x128x32xf32>
    "tpu.trace_start"() <{level = 10 : i32, message = "btf,bfh->bth"}> : () -> ()
    %cst_307 = arith.constant dense<0.000000e+00> : vector<2x8x32xf32>
    %379 = tpu.matmul %376, %378, %cst_307 {dimension_numbers = #tpu.dot_dimension_numbers<[2], [1], [1], [2], [0, 0, 0, 1, 1, 2], [0], [0]>, precision = #tpu.contract_precision<fp32>} : vector<2x8x128xf32>, vector<2x128x32xf32>, vector<2x8x32xf32> -> vector<2x8x32xf32>
    "tpu.trace_stop"() : () -> ()
    %c1_308 = arith.constant 1 : index
    %c3_309 = arith.constant 3 : index
    %c0_310 = arith.constant 0 : index
    %380 = vector.load %arg5[%c1_308, %c3_309, %c0_310] : memref<2x8x128xf32, #tpu.memory_space<vmem>>, vector<1x1x32xf32>
    %381 = vector.shape_cast %380 : vector<1x1x32xf32> to vector<1x32xf32>
    %382 = vector.shape_cast %381 : vector<1x32xf32> to vector<1x1x32xf32>
    %383 = vector.broadcast %382 : vector<1x1x32xf32> to vector<2x8x32xf32>
    %384 = arith.addf %379, %383 : vector<2x8x32xf32>
    %c1_311 = arith.constant 1 : index
    %c6_312 = arith.constant 6 : index
    %c0_313 = arith.constant 0 : index
    %385 = vector.load %arg5[%c1_311, %c6_312, %c0_313] : memref<2x8x128xf32, #tpu.memory_space<vmem>>, vector<1x1x32xf32>
    %386 = vector.shape_cast %385 : vector<1x1x32xf32> to vector<1x32xf32>
    %c1_314 = arith.constant 1 : index
    %c7_315 = arith.constant 7 : index
    %c0_316 = arith.constant 0 : index
    %387 = vector.load %arg5[%c1_314, %c7_315, %c0_316] : memref<2x8x128xf32, #tpu.memory_space<vmem>>, vector<1x1x32xf32>
    %388 = vector.shape_cast %387 : vector<1x1x32xf32> to vector<1x32xf32>
    %389 = arith.addf %366, %384 : vector<2x8x32xf32>
    %cst_317 = arith.constant dense<0.000000e+00> : vector<2x8xf32>
    %390 = vector.multi_reduction <add>, %389, %cst_317 [2] : vector<2x8x32xf32> to vector<2x8xf32>
    %391 = vector.shape_cast %390 : vector<2x8xf32> to vector<2x8x1xf32>
    %cst_318 = arith.constant 3.200000e+01 : f32
    %392 = vector.broadcast %cst_318 : f32 to vector<2x8x1xf32>
    %393 = arith.divf %391, %392 : vector<2x8x1xf32>
    %394 = vector.broadcast %393 : vector<2x8x1xf32> to vector<2x8x32xf32>
    %395 = arith.subf %389, %394 : vector<2x8x32xf32>
    %396 = arith.mulf %395, %395 : vector<2x8x32xf32>
    %cst_319 = arith.constant dense<0.000000e+00> : vector<2x8xf32>
    %397 = vector.multi_reduction <add>, %396, %cst_319 [2] : vector<2x8x32xf32> to vector<2x8xf32>
    %398 = vector.shape_cast %397 : vector<2x8xf32> to vector<2x8x1xf32>
    %cst_320 = arith.constant 3.200000e+01 : f32
    %399 = vector.broadcast %cst_320 : f32 to vector<2x8x1xf32>
    %400 = arith.divf %398, %399 : vector<2x8x1xf32>
    %401 = vector.broadcast %393 : vector<2x8x1xf32> to vector<2x8x32xf32>
    %402 = arith.subf %389, %401 : vector<2x8x32xf32>
    %cst_321 = arith.constant 9.99999974E-6 : f32
    %403 = vector.broadcast %cst_321 : f32 to vector<2x8x1xf32>
    %404 = arith.addf %400, %403 : vector<2x8x1xf32>
    %405 = math.rsqrt %404 : vector<2x8x1xf32>
    %406 = vector.broadcast %405 : vector<2x8x1xf32> to vector<2x8x32xf32>
    %407 = arith.mulf %402, %406 : vector<2x8x32xf32>
    %408 = vector.shape_cast %386 : vector<1x32xf32> to vector<1x1x32xf32>
    %409 = vector.broadcast %408 : vector<1x1x32xf32> to vector<2x8x32xf32>
    %410 = arith.mulf %407, %409 : vector<2x8x32xf32>
    %411 = vector.shape_cast %388 : vector<1x32xf32> to vector<1x1x32xf32>
    %412 = vector.broadcast %411 : vector<1x1x32xf32> to vector<2x8x32xf32>
    %413 = arith.addf %410, %412 : vector<2x8x32xf32>
    %cst_322 = arith.constant 1.250000e-01 : f32
    %414 = vector.broadcast %cst_322 : f32 to vector<2x1x8xf32>
    "tpu.trace_start"() <{level = 10 : i32, message = "bot,bth->boh"}> : () -> ()
    %cst_323 = arith.constant dense<0.000000e+00> : vector<2x1x32xf32>
    %415 = tpu.matmul %414, %413, %cst_323 {dimension_numbers = #tpu.dot_dimension_numbers<[2], [1], [1], [2], [0, 0, 0, 1, 1, 2], [0], [0]>, precision = #tpu.contract_precision<fp32>} : vector<2x1x8xf32>, vector<2x8x32xf32>, vector<2x1x32xf32> -> vector<2x1x32xf32>
    "tpu.trace_stop"() : () -> ()
    %c0_324 = arith.constant 0 : index
    %c0_325 = arith.constant 0 : index
    %c0_326 = arith.constant 0 : index
    %416 = vector.load %arg6[%c0_324, %c0_325, %c0_326] : memref<2x32x8xf32, #tpu.memory_space<vmem>>, vector<2x32x8xf32>
    "tpu.trace_start"() <{level = 10 : i32, message = "boh,bhf->bof"}> : () -> ()
    %cst_327 = arith.constant dense<0.000000e+00> : vector<2x1x8xf32>
    %417 = tpu.matmul %415, %416, %cst_327 {dimension_numbers = #tpu.dot_dimension_numbers<[2], [1], [1], [2], [0, 0, 0, 1, 1, 2], [0], [0]>, precision = #tpu.contract_precision<fp32>} : vector<2x1x32xf32>, vector<2x32x8xf32>, vector<2x1x8xf32> -> vector<2x1x8xf32>
    "tpu.trace_stop"() : () -> ()
    %c0_328 = arith.constant 0 : index
    %c0_329 = arith.constant 0 : index
    %c0_330 = arith.constant 0 : index
    %418 = vector.load %arg7[%c0_328, %c0_329, %c0_330] : memref<1x1x8xf32, #tpu.memory_space<vmem>>, vector<1x1x8xf32>
    %419 = vector.broadcast %418 : vector<1x1x8xf32> to vector<2x1x8xf32>
    %420 = arith.addf %417, %419 : vector<2x1x8xf32>
    %c0_331 = arith.constant 0 : index
    %c0_332 = arith.constant 0 : index
    %c0_333 = arith.constant 0 : index
    %421 = vector.load %arg8[%c0_331, %c0_332, %c0_333] : memref<2x1x8xf32, #tpu.memory_space<vmem>>, vector<2x1x8xf32>
    tpu.vector_store %arg8[%c0_331, %c0_332, %c0_333], %420 {strides = array<i32>} : memref<2x1x8xf32, #tpu.memory_space<vmem>>, vector<2x1x8xf32>,
    return
  }
}

</mosaic_0001>

<bundles_post_ra>
// kernel: transformer_encoder_aligner.1
= control target key start
LH: loop header
LB: loop body
LE: loop exit
PB: predicated region body
PF: predicated region fallthrough
CT: control target
= control target key end

     0   :  { %v34236_v3 = vmov 0.0   ;;  %vm38_vm0 = vcmask 130048   ;;  %vm34237_vm1 = vmmov 0   ;;  %s39385_s0 = inlined_call_operand.vmem [shape: f32[2,16], index: 0, kind: input, shape index: {}]   ;;  %s39386_s1 = inlined_call_operand.vmem [shape: f32[8,17,32], index: 1, kind: input, shape index: {}]   ;;  %s39387_s2 = inlined_call_operand.vmem [shape: f32[2,2,32,128], index: 2, kind: input, shape index: {}]   ;;  %s39388_s3 = inlined_call_operand.vmem [shape: f32[2,2,32,128], index: 3, kind: input, shape index: {}]   ;;  %s39389_s4 = inlined_call_operand.vmem [shape: f32[2,2,128,32], index: 4, kind: input, shape index: {}]   ;;  %s39390_s5 = inlined_call_operand.vmem [shape: f32[2,8,128], index: 5, kind: input, shape index: {}]   ;;  %s39391_s6 = inlined_call_operand.vmem [shape: f32[2,32,8], index: 6, kind: input, shape index: {}]   ;;  %s39392_s7 = inlined_call_operand.vmem [shape: f32[1,1,8], index: 7, kind: input, shape index: {}]   ;;  %s39393_s8 = inlined_call_operand.hbm [shape: f32[2,1,8], index: 8, kind: output, shape index: {}]  }
   0x1   :  { %v32_v0 = vld [vmem:[%s39386_s1 + $0x8] sm:$0xff]  ;;  %v31_v1 = vld [vmem:[%s39386_s1] sm:$0xff]  ;;  %30986 = vmatprep.subr.mxu0 %v34236_v3  ;;  %30993 = vmatprep.subr.mxu1 %v34236_v3 }
   0x2   :  { %v30_v2 = vld [vmem:[%s39385_s0] sm:$0x3]  ;;  %v71_v4 = vand.u32 4294901760, %v32_v0  ;;  %v74_v5 = vand.u32 4294901760, %v31_v1  ;;  %30990 = vmatprep.mubr.msk.f32.mxu0 %vm34237_vm1, %v34236_v3  ;;  %30997 = vmatprep.mubr.msk.f32.mxu1 %vm34237_vm1, %v34236_v3 }
   0x3   :  { %v40_v6 = vsel %vm38_vm0, %v30_v2, 0  ;;  %v29493_v13 = vld [vmem:[%s39386_s1 + $0x20] sm:$0xff] }
   0x4   :  { %30987 = vmatpush3.msra.mxu0 %v71_v4  ;;  %v149_v7 = vsub.f32 %v32_v0, %v71_v4  ;;  %v34318_v8 = vand.u32 4294901760, %v40_v6  ;;  %v156_v9 = vsub.f32 %v31_v1, %v74_v5 }
   0x5   :  { %30988 = vmatprep.subr.mxu0 %v34236_v3 }
   0x6   :  { %30989 = vmatpush3.msra.mxu0 %v74_v5  ;;  %v150_v10 = vand.u32 4294901760, %v149_v7  ;;  %v34322_v11 = vsub.f32 %v40_v6, %v34318_v8  ;;  %v157_v12 = vand.u32 4294901760, %v156_v9 }
   0x7   :  { %31000 = vmatprep.subr.mxu0 %v34236_v3 }
   0x8   :  { %13 = vsyncpa [#allocation6], 0  ;;  %v151_v14 = vsub.f32 %v149_v7, %v150_v10  ;;  %v34329_v15 = vand.u32 4294901760, %v34322_v11  ;;  %v158_v16 = vsub.f32 %v156_v9, %v157_v12  ;;  %v29492_v17 = vld [vmem:[%s39386_s1 + $0x18] sm:$0xff]  ;;  %v34336_v21 = vand.u32 4294901760, %v29493_v13  ;;  %v29496_v32 = vld [vmem:[%s39386_s1 + $0x30] sm:$0xff] }
   0x9   :  { %v34340_v23 = vand.u32 4294901760, %v29492_v17  ;;  %v29497_v30 = vld [vmem:[%s39386_s1 + $0x38] sm:$0xff]  ;;  %v34390_v35 = vand.u32 4294901760, %v29496_v32  ;;  %v29501_v42 = vld [vmem:[%s39386_s1 + $0x50] sm:$0xff]  ;;  %v29500_v44 = vld [vmem:[%s39386_s1 + $0x48] sm:$0xff]  ;;  %vm526_vm2 = vcmask 253952  }
   0xa   :  { %v152_v18 = vand.u32 4294901760, %v151_v14  ;;  %v112_v19 = vsub.f32 %v34322_v11, %v34329_v15  ;;  %v159_v20 = vand.u32 4294901760, %v158_v16  ;;  %v34345_v24 = vsub.f32 %v29493_v13, %v34336_v21  ;;  %v29505_v54 = vld [vmem:[%s39386_s1 + $0x68] sm:$0xff]  ;;  %v29504_v56 = vld [vmem:[%s39386_s1 + $0x60] sm:$0xff]  ;;  %s34239_s25 = smov 96   ;;  %s34240_s26 = smov 64  }
   0xb   :  { %v34351_v25 = vsub.f32 %v29492_v17, %v34340_v23  ;;  %v34384_v34 = vand.u32 4294901760, %v29497_v30  ;;  %v34404_v37 = vsub.f32 %v29496_v32, %v34390_v35  ;;  %v34442_v46 = vand.u32 4294901760, %v29501_v42  ;;  %v29509_v2 = vld [vmem:[%s39386_s1 + $0x80] sm:$0xff]  ;;  %s34241_s27 = smov 88   ;;  %s34242_s28 = smov 120  }
   0xc   :  { %30994 = vmatpush3.msra.mxu1 %v152_v18  ;;  %v34338_v22 = vand.u32 4294901760, %v112_v19  ;;  %v645_v26 = vand.u32 4294901760, %v34345_v24  ;;  %v34448_v47 = vand.u32 4294901760, %v29500_v44  ;;  %v34500_v58 = vand.u32 4294901760, %v29505_v54  ;;  %v29513_v18 = vld [vmem:[%s39386_s1 + $0x98] sm:$0xff]  ;;  %s34243_s29 = smov 56  }
   0xd   :  { %30995 = vmatprep.subr.mxu1 %v34236_v3  ;;  %v652_v27 = vand.u32 4294901760, %v34351_v25  ;;  %v34397_v36 = vsub.f32 %v29497_v30, %v34384_v34  ;;  %v1146_v39 = vand.u32 4294901760, %v34404_v37  ;;  %v34455_v48 = vsub.f32 %v29501_v42, %v34442_v46  ;;  %s34244_s30 = smov 80   ;;  %s34245_s9 = smov 112  }
   0xe   :  { %30991 = vmatmul.mubr.f32.vlgmr.msra.gmra.mxu0 %v34338_v22  ;;  %30996 = vmatpush3.msra.mxu1 %v159_v20  ;;  %v646_v28 = vsub.f32 %v34345_v24, %v645_v26  ;;  %v34462_v49 = vsub.f32 %v29500_v44, %v34448_v47  ;;  %v34506_v59 = vand.u32 4294901760, %v29504_v56  ;;  %v34513_v60 = vsub.f32 %v29505_v54, %v34500_v58  ;;  %v29512_v20 = vld [vmem:[%s39386_s1 + $0x90] sm:$0xff]  ;;  %s34246_s10 = smov 48   ;;  %s34247_s0 = smov 72  }
   0xf   :  { %31001 = vmatpush3.msra.mxu0 %v149_v7  ;;  %30998 = vmatmul.mubr.f32.vlgmr.msra.gmra.mxu1 %v34318_v8  ;;  %v653_v29 = vsub.f32 %v34351_v25, %v652_v27  ;;  %v1139_v38 = vand.u32 4294901760, %v34397_v36  ;;  %v1147_v41 = vsub.f32 %v34404_v37, %v1146_v39  ;;  %v1633_v50 = vand.u32 4294901760, %v34455_v48  ;;  %s34248_s11 = smov 104   ;;  %s34249_s12 = smov 40  }
  0x10   :  { %31002 = vmatprep.subr.mxu0 %v34236_v3  ;;  %31007 = vmatprep.subr.mxu1 %v34236_v3  ;;  %v647_v31 = vand.u32 4294901760, %v646_v28  ;;  %v1640_v51 = vand.u32 4294901760, %v34462_v49  ;;  %v34520_v61 = vsub.f32 %v29504_v56, %v34506_v59  ;;  %v2127_v62 = vand.u32 4294901760, %v34513_v60  ;;  %s34250_s13 = smov 8   ;;  %s34251_s14 = smov 16  }
  0x11   :  { %31003 = vmatpush3.msra.mxu0 %v156_v9  ;;  %31004 = vmatprep.mubr.msk.f32.mxu0 %vm34237_vm1, %v34236_v3  ;;  %v654_v33 = vand.u32 4294901760, %v653_v29  ;;  %v1140_v40 = vsub.f32 %v34397_v36, %v1139_v38  ;;  %v1148_v45 = vand.u32 4294901760, %v1147_v41  ;;  %v1634_v52 = vsub.f32 %v34455_v48, %v1633_v50  ;;  %s34252_s16 = smov 32   ;;  %s34253_s19 = smov 24  }
  0x12   :  { %31008 = vmatpush3.msra.mxu1 %v71_v4  ;;  %31005 = vmatmul.mubr.f32.vlgmr.msra.gmra.mxu0 %v34322_v11  ;;  %v1641_v53 = vsub.f32 %v34462_v49, %v1640_v51  ;;  %v2134_v63 = vand.u32 4294901760, %v34520_v61  ;;  %v2128_v0 = vsub.f32 %v34513_v60, %v2127_v62  ;;  %v34558_v7 = vand.u32 4294901760, %v29509_v2 }
  0x13   :  { %31009 = vmatprep.subr.mxu1 %v34236_v3  ;;  %31014 = vmatprep.subr.mxu0 %v34236_v3  ;;  %v1141_v43 = vand.u32 4294901760, %v1140_v40  ;;  %v1635_v55 = vand.u32 4294901760, %v1634_v52  ;;  %vm4002_vm3 = vcmask 261120   ;;  %vm4979_vm4 = vcmask 785408  }
  0x14   :  { %31010 = vmatpush3.msra.mxu1 %v74_v5  ;;  %31011 = vmatprep.mubr.msk.f32.mxu1 %vm34237_vm1, %v34236_v3  ;;  %v1642_v57 = vand.u32 4294901760, %v1641_v53  ;;  %v2135_v1 = vsub.f32 %v34520_v61, %v2134_v63  ;;  %vm4987_vm5 = vcmask 64512   ;;  %vm8669_vm6 = vcmask 130112  }
  0x15   :  { %31015 = vmatpush3.msra.mxu0 %v150_v10  ;;  %31012 = vmatmul.mubr.f32.vlgmr.msra.gmra.mxu1 %v34329_v15  ;;  %v34571_v10 = vsub.f32 %v29509_v2, %v34558_v7  ;;  %vm10520_vm7 = vcmask 195712   ;;  %vm12371_vm8 = vcmask 261312   ;;  %vm29472_vm9 = vcmask 57344  }
  0x16   :  { %31016 = vmatprep.subr.mxu0 %v34236_v3  ;;  %31021 = vmatprep.subr.mxu1 %v34236_v3  ;;  %v2136_v6 = vand.u32 4294901760, %v2135_v1  ;;  %v3991_v1 = vld [vmem:[%s39387_s2 + $0x10] sm:$0xff] }
  0x17   :  { %31017 = vmatpush3.msra.mxu0 %v157_v12  ;;  %31018 = vmatprep.mubr.msk.f32.mxu0 %vm34237_vm1, %v34236_v3  ;;  %v2621_v13 = vand.u32 4294901760, %v34571_v10 }
  0x18   :  { %31022 = vmatpush3.msra.mxu1 %v71_v4  ;;  %31019 = vmatmul.mubr.f32.vlgmr.msra.gmra.mxu0 %v34318_v8  ;;  %v2129_v4 = vand.u32 4294901760, %v2128_v0 }
  0x19   :  { %31023 = vmatprep.subr.mxu1 %v34236_v3  ;;  %31028 = vmatprep.subr.mxu0 %v34236_v3  ;;  %v2622_v16 = vsub.f32 %v34571_v10, %v2621_v13 }
  0x1a   :  { %31024 = vmatpush3.msra.mxu1 %v74_v5  ;;  %31025 = vmatprep.mubr.msk.f32.mxu1 %vm34237_vm1, %v34236_v3  ;;  %v29508_v5 = vld [vmem:[%s39386_s1 + $0x78] sm:$0xff] }
  0x1b   :  { %31029 = vmatpush3.msra.mxu0 %v34336_v21  ;;  %31026 = vmatmul.mubr.f32.vlgmr.msra.gmra.mxu1 %v34318_v8  ;;  %v34564_v9 = vand.u32 4294901760, %v29508_v5  ;;  %v2623_v19 = vand.u32 4294901760, %v2622_v16 }
  0x1c   :  { %31030 = vmatprep.subr.mxu0 %v34236_v3  ;;  %31035 = vmatprep.subr.mxu1 %v34236_v3 }
  0x1d   :  { %31031 = vmatpush3.msra.mxu0 %v34340_v23  ;;  %31032 = vmatprep.mubr.msk.f32.mxu0 %vm34237_vm1, %v34236_v3  ;;  %v34578_v12 = vsub.f32 %v29508_v5, %v34564_v9  ;;  %v34772_v5 = vand.u32 4294901760, %v3991_v1 }
  0x1e   :  { %31036 = vmatpush3.msra.mxu1 %v647_v31  ;;  %31033 = vmatmul.mubr.f32.vlgmr.msra.gmra.mxu0 %v34338_v22  ;;  %v29517_v31 = vld [vmem:[%s39386_s1 + $0xb0] sm:$0xff] }
  0x1f   :  { %31037 = vmatprep.subr.mxu1 %v34236_v3  ;;  %31042 = vmatprep.subr.mxu0 %v34236_v3  ;;  %v2628_v14 = vand.u32 4294901760, %v34578_v12 }
  0x20   :  { %31038 = vmatpush3.msra.mxu1 %v654_v33  ;;  %31039 = vmatprep.mubr.msk.f32.mxu1 %vm34237_vm1, %v34236_v3  ;;  %v29516_v33 = vld [vmem:[%s39386_s1 + $0xa8] sm:$0xff] }
  0x21   :  { %31043 = vmatpush3.msra.mxu0 %v34345_v24  ;;  %31040 = vmatmul.mubr.f32.vlgmr.msra.gmra.mxu1 %v34318_v8  ;;  %v2629_v17 = vsub.f32 %v34578_v12, %v2628_v14  ;;  %v34622_v24 = vand.u32 4294901760, %v29512_v20 }
  0x22   :  { %31044 = vmatprep.subr.mxu0 %v34236_v3  ;;  %31049 = vmatprep.subr.mxu1 %v34236_v3 }
  0x23   :  { %31045 = vmatpush3.msra.mxu0 %v34351_v25  ;;  %31046 = vmatprep.mubr.msk.f32.mxu0 %vm34237_vm1, %v34236_v3 }
  0x24   :  { %31050 = vmatpush3.msra.mxu1 %v34336_v21  ;;  %31047 = vmatmul.mubr.f32.vlgmr.msra.gmra.mxu0 %v34322_v11 }
  0x25   :  { %31051 = vmatprep.subr.mxu1 %v34236_v3  ;;  %31056 = vmatprep.subr.mxu0 %v34236_v3 }
  0x26   :  { %31052 = vmatpush3.msra.mxu1 %v34340_v23  ;;  %31053 = vmatprep.mubr.msk.f32.mxu1 %vm34237_vm1, %v34236_v3 }
  0x27   :  { %31057 = vmatpush3.msra.mxu0 %v645_v26  ;;  %31054 = vmatmul.mubr.f32.vlgmr.msra.gmra.mxu1 %v34329_v15  ;;  %v34636_v26 = vsub.f32 %v29512_v20, %v34622_v24 }
  0x28   :  { %31058 = vmatprep.subr.mxu0 %v34236_v3  ;;  %31063 = vmatprep.subr.mxu1 %v34236_v3 }
  0x29   :  { %31059 = vmatpush3.msra.mxu0 %v652_v27  ;;  %31060 = vmatprep.mubr.msk.f32.mxu0 %vm34237_vm1, %v34236_v3  ;;  %v3122_v28 = vand.u32 4294901760, %v34636_v26 }
  0x2a   :  { %31064 = vmatpush3.msra.mxu1 %v34336_v21  ;;  %31061 = vmatmul.mubr.f32.vlgmr.msra.gmra.mxu0 %v34318_v8  ;;  %v2630_v21 = vand.u32 4294901760, %v2629_v17 }
  0x2b   :  { %31065 = vmatprep.subr.mxu1 %v34236_v3  ;;  %31070 = vmatprep.subr.mxu0 %v34236_v3  ;;  %v3123_v30 = vsub.f32 %v34636_v26, %v3122_v28 }
  0x2c   :  { %31066 = vmatpush3.msra.mxu1 %v34340_v23  ;;  %31067 = vmatprep.mubr.msk.f32.mxu1 %vm34237_vm1, %v34236_v3  ;;  %v34616_v23 = vand.u32 4294901760, %v29513_v18 }
  0x2d   :  { %31071 = vmatpush3.msra.mxu0 %v34384_v34  ;;  %31068 = vmatmul.mubr.f32.vlgmr.msra.gmra.mxu1 %v34318_v8 }
  0x2e   :  { %31072 = vmatprep.subr.mxu0 %v34236_v3  ;;  %31077 = vmatprep.subr.mxu1 %v34236_v3  ;;  %v34629_v25 = vsub.f32 %v29513_v18, %v34616_v23  ;;  %v3989_v18 = vld [vmem:[%s39387_s2] sm:$0xff] }
  0x2f   :  { %31073 = vmatpush3.msra.mxu0 %v34390_v35  ;;  %31074 = vmatprep.mubr.msk.f32.mxu0 %vm34237_vm1, %v34236_v3 }
  0x30   :  { %31078 = vmatpush3.msra.mxu1 %v1141_v43  ;;  %31075 = vmatmul.mubr.f32.vlgmr.msra.gmra.mxu0 %v34338_v22  ;;  %v3115_v27 = vand.u32 4294901760, %v34629_v25 }
  0x31   :  { %31079 = vmatprep.subr.mxu1 %v34236_v3  ;;  %31084 = vmatprep.subr.mxu0 %v34236_v3 }
  0x32   :  { %31080 = vmatpush3.msra.mxu1 %v1148_v45  ;;  %31081 = vmatprep.mubr.msk.f32.mxu1 %vm34237_vm1, %v34236_v3  ;;  %v3116_v29 = vsub.f32 %v34629_v25, %v3115_v27 }
  0x33   :  { %31085 = vmatpush3.msra.mxu0 %v34397_v36  ;;  %31082 = vmatmul.mubr.f32.vlgmr.msra.gmra.mxu1 %v34318_v8  ;;  %v34680_v36 = vand.u32 4294901760, %v29516_v33 }
  0x34   :  { %31086 = vmatprep.subr.mxu0 %v34236_v3  ;;  %31091 = vmatprep.subr.mxu1 %v34236_v3  ;;  %v3117_v32 = vand.u32 4294901760, %v3116_v29 }
  0x35   :  { %31087 = vmatpush3.msra.mxu0 %v34404_v37  ;;  %31088 = vmatprep.mubr.msk.f32.mxu0 %vm34237_vm1, %v34236_v3 }
  0x36   :  { %31092 = vmatpush3.msra.mxu1 %v34384_v34  ;;  %31089 = vmatmul.mubr.f32.vlgmr.msra.gmra.mxu0 %v34322_v11 }
  0x37   :  { %31093 = vmatprep.subr.mxu1 %v34236_v3  ;;  %31098 = vmatprep.subr.mxu0 %v34236_v3 }
  0x38   :  { %31094 = vmatpush3.msra.mxu1 %v34390_v35  ;;  %31095 = vmatprep.mubr.msk.f32.mxu1 %vm34237_vm1, %v34236_v3 }
  0x39   :  { %31099 = vmatpush3.msra.mxu0 %v1139_v38  ;;  %31096 = vmatmul.mubr.f32.vlgmr.msra.gmra.mxu1 %v34329_v15  ;;  %v3615_v38 = vsub.f32 %v29516_v33, %v34680_v36 }
  0x3a   :  { %31100 = vmatprep.subr.mxu0 %v34236_v3  ;;  %31105 = vmatprep.subr.mxu1 %v34236_v3 }
  0x3b   :  { %31101 = vmatpush3.msra.mxu0 %v1146_v39  ;;  %31102 = vmatprep.mubr.msk.f32.mxu0 %vm34237_vm1, %v34236_v3  ;;  %v3616_v40 = vand.u32 4294901760, %v3615_v38 }
  0x3c   :  { %31106 = vmatpush3.msra.mxu1 %v34384_v34  ;;  %31103 = vmatmul.mubr.f32.vlgmr.msra.gmra.mxu0 %v34318_v8  ;;  %v3124_v34 = vand.u32 4294901760, %v3123_v30 }
  0x3d   :  { %31107 = vmatprep.subr.mxu1 %v34236_v3  ;;  %31112 = vmatprep.subr.mxu0 %v34236_v3  ;;  %v3617_v42 = vsub.f32 %v3615_v38, %v3616_v40 }
  0x3e   :  { %31108 = vmatpush3.msra.mxu1 %v34390_v35  ;;  %31109 = vmatprep.mubr.msk.f32.mxu1 %vm34237_vm1, %v34236_v3  ;;  %v34674_v35 = vand.u32 4294901760, %v29517_v31 }
  0x3f   :  { %31113 = vmatpush3.msra.mxu0 %v34442_v46  ;;  %31110 = vmatmul.mubr.f32.vlgmr.msra.gmra.mxu1 %v34318_v8  ;;  %v3618_v44 = vand.u32 4294901760, %v3617_v42 }
  0x40   :  { %31114 = vmatprep.subr.mxu0 %v34236_v3  ;;  %31119 = vmatprep.subr.mxu1 %v34236_v3  ;;  %v3608_v37 = vsub.f32 %v29517_v31, %v34674_v35 }
  0x41   :  { %31115 = vmatpush3.msra.mxu0 %v34448_v47  ;;  %31116 = vmatprep.mubr.msk.f32.mxu0 %vm34237_vm1, %v34236_v3 }
  0x42   :  { %31120 = vmatpush3.msra.mxu1 %v1635_v55  ;;  %31117 = vmatmul.mubr.f32.vlgmr.msra.gmra.mxu0 %v34338_v22  ;;  %v3609_v39 = vand.u32 4294901760, %v3608_v37 }
  0x43   :  { %31121 = vmatprep.subr.mxu1 %v34236_v3  ;;  %31126 = vmatprep.subr.mxu0 %v34236_v3 }
  0x44   :  { %31122 = vmatpush3.msra.mxu1 %v1642_v57  ;;  %31123 = vmatprep.mubr.msk.f32.mxu1 %vm34237_vm1, %v34236_v3  ;;  %v3610_v41 = vsub.f32 %v3608_v37, %v3609_v39 }
  0x45   :  { %31127 = vmatpush3.msra.mxu0 %v34455_v48  ;;  %31124 = vmatmul.mubr.f32.vlgmr.msra.gmra.mxu1 %v34318_v8 }
  0x46   :  { %31128 = vmatprep.subr.mxu0 %v34236_v3  ;;  %31133 = vmatprep.subr.mxu1 %v34236_v3  ;;  %v3611_v43 = vand.u32 4294901760, %v3610_v41 }
  0x47   :  { %31129 = vmatpush3.msra.mxu0 %v34462_v49  ;;  %31130 = vmatprep.mubr.msk.f32.mxu0 %vm34237_vm1, %v34236_v3 }
  0x48   :  { %31134 = vmatpush3.msra.mxu1 %v34442_v46  ;;  %31131 = vmatmul.mubr.f32.vlgmr.msra.gmra.mxu0 %v34322_v11 }
  0x49   :  { %31135 = vmatprep.subr.mxu1 %v34236_v3  ;;  %31140 = vmatprep.subr.mxu0 %v34236_v3 }
  0x4a   :  { %31136 = vmatpush3.msra.mxu1 %v34448_v47  ;;  %31137 = vmatprep.mubr.msk.f32.mxu1 %vm34237_vm1, %v34236_v3 }
  0x4b   :  { %31141 = vmatpush3.msra.mxu0 %v1633_v50  ;;  %31138 = vmatmul.mubr.f32.vlgmr.msra.gmra.mxu1 %v34329_v15 }
  0x4c   :  { %31142 = vmatprep.subr.mxu0 %v34236_v3  ;;  %31147 = vmatprep.subr.mxu1 %v34236_v3 }
  0x4d   :  { %31143 = vmatpush3.msra.mxu0 %v1640_v51  ;;  %31144 = vmatprep.mubr.msk.f32.mxu0 %vm34237_vm1, %v34236_v3  ;;  %v505_v51 = vlaneseq }
  0x4e   :  { %31148 = vmatpush3.msra.mxu1 %v34442_v46  ;;  %31145 = vmatmul.mubr.f32.vlgmr.msra.gmra.mxu0 %v34318_v8 }
  0x4f   :  { %31149 = vmatprep.subr.mxu1 %v34236_v3  ;;  %31154 = vmatprep.subr.mxu0 %v34236_v3  ;;  %v506_v57 = vshrl.u32 %v505_v51, 7 }
  0x50   :  { %31150 = vmatpush3.msra.mxu1 %v34448_v47  ;;  %31151 = vmatprep.mubr.msk.f32.mxu1 %vm34237_vm1, %v34236_v3 }
  0x51   :  { %31155 = vmatpush3.msra.mxu0 %v34500_v58  ;;  %31152 = vmatmul.mubr.f32.vlgmr.msra.gmra.mxu1 %v34318_v8 }
  0x52   :  { %31156 = vmatprep.subr.mxu0 %v34236_v3  ;;  %31161 = vmatprep.subr.mxu1 %v34236_v3 }
  0x53   :  { %31157 = vmatpush3.msra.mxu0 %v34506_v59  ;;  %31158 = vmatprep.mubr.msk.f32.mxu0 %vm34237_vm1, %v34236_v3 }
  0x54   :  { %31162 = vmatpush3.msra.mxu1 %v2129_v4  ;;  %31159 = vmatmul.mubr.f32.vlgmr.msra.gmra.mxu0 %v34338_v22 }
  0x55   :  { %31163 = vmatprep.subr.mxu1 %v34236_v3  ;;  %31168 = vmatprep.subr.mxu0 %v34236_v3 }
  0x56   :  { %31164 = vmatpush3.msra.mxu1 %v2136_v6  ;;  %31165 = vmatprep.mubr.msk.f32.mxu1 %vm34237_vm1, %v34236_v3 }
  0x57   :  { %31169 = vmatpush3.msra.mxu0 %v34513_v60  ;;  %31166 = vmatmul.mubr.f32.vlgmr.msra.gmra.mxu1 %v34318_v8  ;;  %v3992_v60 = vld [vmem:[%s39387_s2 + $0x18] sm:$0xff] }
  0x58   :  { %31170 = vmatprep.subr.mxu0 %v34236_v3  ;;  %31175 = vmatprep.subr.mxu1 %v34236_v3 }
  0x59   :  { %31171 = vmatpush3.msra.mxu0 %v34520_v61  ;;  %31172 = vmatprep.mubr.msk.f32.mxu0 %vm34237_vm1, %v34236_v3 }
  0x5a   :  { %31176 = vmatpush3.msra.mxu1 %v34500_v58  ;;  %31173 = vmatmul.mubr.f32.vlgmr.msra.gmra.mxu0 %v34322_v11 }
  0x5b   :  { %31177 = vmatprep.subr.mxu1 %v34236_v3  ;;  %31182 = vmatprep.subr.mxu0 %v34236_v3 }
  0x5c   :  { %31178 = vmatpush3.msra.mxu1 %v34506_v59  ;;  %31179 = vmatprep.mubr.msk.f32.mxu1 %vm34237_vm1, %v34236_v3 }
  0x5d   :  { %31183 = vmatpush3.msra.mxu0 %v2127_v62  ;;  %31180 = vmatmul.mubr.f32.vlgmr.msra.gmra.mxu1 %v34329_v15  ;;  %v34762_v62 = vand.u32 4294901760, %v3992_v60 }
  0x5e   :  { %31184 = vmatprep.subr.mxu0 %v34236_v3  ;;  %31189 = vmatprep.subr.mxu1 %v34236_v3 }
  0x5f   :  { %31185 = vmatpush3.msra.mxu0 %v2134_v63  ;;  %31186 = vmatprep.mubr.msk.f32.mxu0 %vm34237_vm1, %v34236_v3  ;;  %v34770_v4 = vsub.f32 %v3992_v60, %v34762_v62 }
  0x60   :  { %31190 = vmatpush3.msra.mxu1 %v34500_v58  ;;  %31187 = vmatmul.mubr.f32.vlgmr.msra.gmra.mxu0 %v34318_v8 }
  0x61   :  { %31191 = vmatprep.subr.mxu1 %v34236_v3  ;;  %31196 = vmatprep.subr.mxu0 %v34236_v3 }
  0x62   :  { %31192 = vmatpush3.msra.mxu1 %v34506_v59  ;;  %31193 = vmatprep.mubr.msk.f32.mxu1 %vm34237_vm1, %v34236_v3 }
  0x63   :  { %31197 = vmatpush3.msra.mxu0 %v34558_v7  ;;  %31194 = vmatmul.mubr.f32.vlgmr.msra.gmra.mxu1 %v34318_v8 }
  0x64   :  { %31198 = vmatprep.subr.mxu0 %v34236_v3  ;;  %31203 = vmatprep.subr.mxu1 %v34236_v3 }
  0x65   :  { %31199 = vmatpush3.msra.mxu0 %v34564_v9  ;;  %31200 = vmatprep.mubr.msk.f32.mxu0 %vm34237_vm1, %v34236_v3 }
  0x66   :  { %31204 = vmatpush3.msra.mxu1 %v2623_v19  ;;  %31201 = vmatmul.mubr.f32.vlgmr.msra.gmra.mxu0 %v34338_v22 }
  0x67   :  { %31205 = vmatprep.subr.mxu1 %v34236_v3  ;;  %31210 = vmatprep.subr.mxu0 %v34236_v3 }
  0x68   :  { %31206 = vmatpush3.msra.mxu1 %v2630_v21  ;;  %31207 = vmatprep.mubr.msk.f32.mxu1 %vm34237_vm1, %v34236_v3 }
  0x69   :  { %31211 = vmatpush3.msra.mxu0 %v34571_v10  ;;  %31208 = vmatmul.mubr.f32.vlgmr.msra.gmra.mxu1 %v34318_v8 }
  0x6a   :  { %31212 = vmatprep.subr.mxu0 %v34236_v3  ;;  %31217 = vmatprep.subr.mxu1 %v34236_v3 }
  0x6b   :  { %31213 = vmatpush3.msra.mxu0 %v34578_v12  ;;  %31214 = vmatprep.mubr.msk.f32.mxu0 %vm34237_vm1, %v34236_v3  ;;  %v4112_v12 = vand.u32 4294901760, %v34770_v4 }
  0x6c   :  { %31218 = vmatpush3.msra.mxu1 %v34558_v7  ;;  %31215 = vmatmul.mubr.f32.vlgmr.msra.gmra.mxu0 %v34322_v11 }
  0x6d   :  { %31219 = vmatprep.subr.mxu1 %v34236_v3  ;;  %31224 = vmatprep.subr.mxu0 %v34236_v3  ;;  %v4113_v20 = vsub.f32 %v34770_v4, %v4112_v12 }
  0x6e   :  { %31220 = vmatpush3.msra.mxu1 %v34564_v9  ;;  %31221 = vmatprep.mubr.msk.f32.mxu1 %vm34237_vm1, %v34236_v3 }
  0x6f   :  { %31225 = vmatpush3.msra.mxu0 %v2621_v13  ;;  %31222 = vmatmul.mubr.f32.vlgmr.msra.gmra.mxu1 %v34329_v15  ;;  %v34784_v13 = vsub.f32 %v3991_v1, %v34772_v5  ;;  %v4114_v29 = vand.u32 4294901760, %v4113_v20 }
  0x70   :  { %31226 = vmatprep.subr.mxu0 %v34236_v3  ;;  %31231 = vmatprep.subr.mxu1 %v34236_v3 }
  0x71   :  { %31227 = vmatpush3.msra.mxu0 %v2628_v14  ;;  %31228 = vmatprep.mubr.msk.f32.mxu0 %vm34237_vm1, %v34236_v3  ;;  %v4119_v21 = vand.u32 4294901760, %v34784_v13 }
  0x72   :  { %31232 = vmatpush3.msra.mxu1 %v34558_v7  ;;  %31229 = vmatmul.mubr.f32.vlgmr.msra.gmra.mxu0 %v34318_v8  ;;  %v29495_v7 = vld [vmem:[%s39386_s1 + $0x28] ss:$0 sm:$0xff] }
  0x73   :  { %31233 = vmatprep.subr.mxu1 %v34236_v3  ;;  %31238 = vmatprep.subr.mxu0 %v34236_v3  ;;  %v4120_v30 = vsub.f32 %v34784_v13, %v4119_v21 }
  0x74   :  { %31234 = vmatpush3.msra.mxu1 %v34564_v9  ;;  %31235 = vmatprep.mubr.msk.f32.mxu1 %vm34237_vm1, %v34236_v3  ;;  %v3990_v9 = vld [vmem:[%s39387_s2 + $0x8] sm:$0xff] }
  0x75   :  { %31239 = vmatpush3.msra.mxu0 %v34616_v23  ;;  %31236 = vmatmul.mubr.f32.vlgmr.msra.gmra.mxu1 %v34318_v8  ;;  %v34786_v14 = vand.u32 4294901760, %v3990_v9 }
  0x76   :  { %31240 = vmatprep.subr.mxu0 %v34236_v3  ;;  %31245 = vmatprep.subr.mxu1 %v34236_v3 }
  0x77   :  { %31241 = vmatpush3.msra.mxu0 %v34622_v24  ;;  %31242 = vmatprep.mubr.msk.f32.mxu0 %vm34237_vm1, %v34236_v3 }
  0x78   :  { %31246 = vmatpush3.msra.mxu1 %v3117_v32  ;;  %31243 = vmatmul.mubr.f32.vlgmr.msra.gmra.mxu0 %v34338_v22 }
  0x79   :  { %31247 = vmatprep.subr.mxu1 %v34236_v3  ;;  %31252 = vmatprep.subr.mxu0 %v34236_v3 }
  0x7a   :  { %31248 = vmatpush3.msra.mxu1 %v3124_v34  ;;  %31249 = vmatprep.mubr.msk.f32.mxu1 %vm34237_vm1, %v34236_v3 }
  0x7b   :  { %31253 = vmatpush3.msra.mxu0 %v34629_v25  ;;  %31250 = vmatmul.mubr.f32.vlgmr.msra.gmra.mxu1 %v34318_v8 }
  0x7c   :  { %31254 = vmatprep.subr.mxu0 %v34236_v3  ;;  %31259 = vmatprep.subr.mxu1 %v34236_v3 }
  0x7d   :  { %31255 = vmatpush3.msra.mxu0 %v34636_v26  ;;  %31256 = vmatprep.mubr.msk.f32.mxu0 %vm34237_vm1, %v34236_v3 }
  0x7e   :  { %31260 = vmatpush3.msra.mxu1 %v34616_v23  ;;  %31257 = vmatmul.mubr.f32.vlgmr.msra.gmra.mxu0 %v34322_v11 }
  0x7f   :  { %31261 = vmatprep.subr.mxu1 %v34236_v3  ;;  %31266 = vmatprep.subr.mxu0 %v34236_v3 }
  0x80   :  { %31262 = vmatpush3.msra.mxu1 %v34622_v24  ;;  %31263 = vmatprep.mubr.msk.f32.mxu1 %vm34237_vm1, %v34236_v3 }
  0x81   :  { %31267 = vmatpush3.msra.mxu0 %v3115_v27  ;;  %31264 = vmatmul.mubr.f32.vlgmr.msra.gmra.mxu1 %v34329_v15  ;;  %v34803_v27 = vand.u32 4294901760, %v3989_v18 }
  0x82   :  { %31268 = vmatprep.subr.mxu0 %v34236_v3  ;;  %31273 = vmatprep.subr.mxu1 %v34236_v3 }
  0x83   :  { %31269 = vmatpush3.msra.mxu0 %v3122_v28  ;;  %31270 = vmatprep.mubr.msk.f32.mxu0 %vm34237_vm1, %v34236_v3  ;;  %v34813_v34 = vsub.f32 %v3989_v18, %v34803_v27 }
  0x84   :  { %31274 = vmatpush3.msra.mxu1 %v34616_v23  ;;  %31271 = vmatmul.mubr.f32.vlgmr.msra.gmra.mxu0 %v34318_v8  ;;  %v34799_v23 = vsub.f32 %v3990_v9, %v34786_v14 }
  0x85   :  { %31275 = vmatprep.subr.mxu1 %v34236_v3  ;;  %31280 = vmatprep.subr.mxu0 %v34236_v3 }
  0x86   :  { %31276 = vmatpush3.msra.mxu1 %v34622_v24  ;;  %31277 = vmatprep.mubr.msk.f32.mxu1 %vm34237_vm1, %v34236_v3  ;;  %v4126_v31 = vand.u32 4294901760, %v34799_v23 }
  0x87   :  { %31281 = vmatpush3.msra.mxu0 %v34674_v35  ;;  %31278 = vmatmul.mubr.f32.vlgmr.msra.gmra.mxu1 %v34318_v8 }
  0x88   :  { %31282 = vmatprep.subr.mxu0 %v34236_v3  ;;  %31287 = vmatprep.subr.mxu1 %v34236_v3 }
  0x89   :  { %31283 = vmatpush3.msra.mxu0 %v34680_v36  ;;  %31284 = vmatprep.mubr.msk.f32.mxu0 %vm34237_vm1, %v34236_v3 }
  0x8a   :  { %31288 = vmatpush3.msra.mxu1 %v3611_v43  ;;  %31285 = vmatmul.mubr.f32.vlgmr.msra.gmra.mxu0 %v34338_v22 }
  0x8b   :  { %31289 = vmatprep.subr.mxu1 %v34236_v3  ;;  %31294 = vmatprep.subr.mxu0 %v34236_v3 }
  0x8c   :  { %31290 = vmatpush3.msra.mxu1 %v3618_v44  ;;  %31291 = vmatprep.mubr.msk.f32.mxu1 %vm34237_vm1, %v34236_v3 }
  0x8d   :  { %31295 = vmatpush3.msra.mxu0 %v3608_v37  ;;  %31292 = vmatmul.mubr.f32.vlgmr.msra.gmra.mxu1 %v34318_v8  ;;  %v4127_v37 = vsub.f32 %v34799_v23, %v4126_v31 }
  0x8e   :  { %31296 = vmatprep.subr.mxu0 %v34236_v3  ;;  %31301 = vmatprep.subr.mxu1 %v34236_v3 }
  0x8f   :  { %31297 = vmatpush3.msra.mxu0 %v3615_v38  ;;  %31298 = vmatprep.mubr.msk.f32.mxu0 %vm34237_vm1, %v34236_v3  ;;  %v4128_v41 = vand.u32 4294901760, %v4127_v37 }
  0x90   :  { %31302 = vmatpush3.msra.mxu1 %v34674_v35  ;;  %31299 = vmatmul.mubr.f32.vlgmr.msra.gmra.mxu0 %v34322_v11  ;;  %v29491_v11 = vld [vmem:[%s39386_s1 + $0x10] ss:$0 sm:$0xff] }
  0x91   :  { %31303 = vmatprep.subr.mxu1 %v34236_v3  ;;  %31308 = vmatprep.subr.mxu0 %v34236_v3 }
  0x92   :  { %31304 = vmatpush3.msra.mxu1 %v34680_v36  ;;  %31305 = vmatprep.mubr.msk.f32.mxu1 %vm34237_vm1, %v34236_v3 }
  0x93   :  { %31309 = vmatpush3.msra.mxu0 %v3609_v39  ;;  %31306 = vmatmul.mubr.f32.vlgmr.msra.gmra.mxu1 %v34329_v15  ;;  %v4133_v39 = vand.u32 4294901760, %v34813_v34 }
  0x94   :  { %31310 = vmatprep.subr.mxu0 %v34236_v3  ;;  %31315 = vmatprep.subr.mxu1 %v34236_v3 }
  0x95   :  { %31311 = vmatpush3.msra.mxu0 %v3616_v40  ;;  %31312 = vmatprep.mubr.msk.f32.mxu0 %vm34237_vm1, %v34236_v3  ;;  %v4134_v43 = vsub.f32 %v34813_v34, %v4133_v39 }
  0x96   :  { %31316 = vmatpush3.msra.mxu1 %v34674_v35  ;;  %31313 = vmatmul.mubr.f32.vlgmr.msra.gmra.mxu0 %v34318_v8 }
  0x97   :  { %31317 = vmatprep.subr.mxu1 %v34236_v3  ;;  %31319 = vmatprep.mubr.msk.f32.mxu1 %vm34237_vm1, %v34236_v3 }
  0x98   :  { %31318 = vmatpush3.msra.mxu1 %v34680_v36  ;;  %31322 = vmatprep.subr.mxu0 %v34236_v3  ;;  %v4121_v36 = vand.u32 4294901760, %v4120_v30 }
  0x99   :  { %31320 = vmatmul.mubr.f32.vlgmr.msra.gmra.mxu1 %v34318_v8  ;;  %31333 = vmatprep.subr.mxu1 %v34236_v3  ;;  %v34238_v8 = vmov 1966171168  }
  0x9a   :  { %31341 = vmatprep.mubr.msk.f32.mxu1 %vm34237_vm1, %v34236_v3  ;;  %31330 = vmatprep.mubr.msk.f32.mxu0 %vm34237_vm1, %v34236_v3  ;;  %v503_v50 = vunpack.c.l.s4 %v34238_v8  ;;  %v29499_v8 = vld [vmem:[%s39386_s1 + $0x40] ss:$0 sm:$0xff] }
  0x9b   :  { %31323 = vmatpush3.msra.mxu0 %v34762_v62  ;;  %31334 = vmatpush3.msra.mxu1 %v4114_v29 }
  0x9c   :  { %v504_v56 = vunpack.c.0.s8 %v503_v50  ;;  %31324 = vmatprep.subr.mxu0 %v34236_v3  ;;  %31335 = vmatprep.subr.mxu1 %v34236_v3 }
  0x9d   :  { %31325 = vmatpush3.msra.mxu0 %v34772_v5  ;;  %31336 = vmatpush3.msra.mxu1 %v4121_v36 }
  0x9e   :  { %v34764_v0 = vsub.s32 %v504_v56, %v506_v57  ;;  %31326 = vmatprep.subr.mxu0 %v34236_v3  ;;  %31337 = vmatprep.subr.mxu1 %v34236_v3 }
  0x9f   :  { %31327 = vmatpush3.msra.mxu0 %v34786_v14  ;;  %31338 = vmatpush3.msra.mxu1 %v4128_v41 }
  0xa0   :  { %31328 = vmatprep.subr.mxu0 %v34236_v3  ;;  %31339 = vmatprep.subr.mxu1 %v34236_v3 }
  0xa1   :  { %31329 = vmatpush3.msra.mxu0 %v34803_v27 }
  0xa2   :  { %31344 = vmatprep.subr.mxu0 %v34236_v3 }
  0xce   :  { %v115_v15 = vpop.f32.mrf.mxu0 }
  0xcf   :  { %v116_v22 = vadd.f32 %v29491_v11, %v115_v15  ;;  %v196_v45 = vpop.f32.mrf.mxu1  ;;  %v4135_v15 = vand.u32 4294901760, %v4134_v43 }
  0xd0   :  { %v30992_v46 = vpop.f32.mrf.mxu0 }
  0xd1   :  { %v197_v47 = vadd.f32 %v196_v45, %v116_v22  ;;  %v30999_v48 = vpop.f32.mrf.mxu1  ;;  %31340 = vmatpush3.msra.mxu1 %v4135_v15 }
  0xd2   :  { %v272_v49 = vpop.f32.mrf.mxu0  ;;  %31355 = vmatprep.subr.mxu1 %v34236_v3 }
  0xd3   :  { %v273_v52 = vadd.f32 %v272_v49, %v197_v47 }
  0xd4   :  { %v31006_v53 = vpop.f32.mrf.mxu0 }
  0xd5   :  { %v347_v54 = vpop.f32.mrf.mxu1 }
  0xd6   :  { %v348_v55 = vadd.f32 %v347_v54, %v273_v52 }
  0xd7   :  { %v31013_v58 = vpop.f32.mrf.mxu1 }
  0xd8   :  { %v424_v59 = vpop.f32.mrf.mxu0 }
  0xd9   :  { %v425_v61 = vadd.f32 %v424_v59, %v348_v55 }
  0xda   :  { %v31020_v63 = vpop.f32.mrf.mxu0 }
  0xdb   :  { %v497_v2 = vpop.f32.mrf.mxu1 }
  0xdc   :  { %v498_v6 = vadd.f32 %v497_v2, %v425_v61 }
  0xdd   :  { %v31027_v10 = vpop.f32.mrf.mxu1 }
  0xde   :  { %v508_v16 = vrot.slane %v498_v6, %v34764_v0  ;;  %v610_v17 = vpop.f32.mrf.mxu0 }
  0xdf   :  { %v611_v19 = vadd.f32 %v29495_v7, %v610_v17 }
  0xe0   :  { %v509_v24 = vcombine.high %v508_v16, %v508_v16  ;;  %v516_v25 = vrot.slane %v508_v16, %v34764_v0  ;;  %v31034_v26 = vpop.f32.mrf.mxu0 }
  0xe1   :  { %v691_v28 = vpop.f32.mrf.mxu1 }
  0xe2   :  { %v523_v32 = vrot.slane %v509_v24, %v34764_v0  ;;  %527 = vst.msk [vmem:[#allocation2] sm:$0x1] %vm526_vm2, %v516_v25  ;;  %v692_v33 = vadd.f32 %v691_v28, %v611_v19  ;;  %v29503_v19 = vld [vmem:[%s39386_s1 + $0x58] ss:$0 sm:$0xff] }
  0xe3   :  { %v31041_v35 = vpop.f32.mrf.mxu1 }
  0xe4   :  { %528 = vst.msk [vmem:[#allocation2 + $0x8] sm:$0x1] %vm526_vm2, %v523_v32  ;;  %v767_v38 = vpop.f32.mrf.mxu0 }
  0xe5   :  { %v768_v40 = vadd.f32 %v767_v38, %v692_v33 }
  0xe6   :  { %v31048_v42 = vpop.f32.mrf.mxu0 }
  0xe7   :  { %v842_v44 = vpop.f32.mrf.mxu1 }
  0xe8   :  { %v843_v11 = vadd.f32 %v842_v44, %v768_v40 }
  0xe9   :  { %v31055_v22 = vpop.f32.mrf.mxu1 }
  0xea   :  { %v919_v45 = vpop.f32.mrf.mxu0 }
  0xeb   :  { %v920_v46 = vadd.f32 %v919_v45, %v843_v11 }
  0xec   :  { %v31062_v47 = vpop.f32.mrf.mxu0 }
  0xed   :  { %v992_v48 = vpop.f32.mrf.mxu1 }
  0xee   :  { %v993_v49 = vadd.f32 %v992_v48, %v920_v46  ;;  %v29507_v46 = vld [vmem:[%s39386_s1 + $0x70] ss:$0 sm:$0xff] }
  0xef   :  { %v31069_v50 = vpop.f32.mrf.mxu1 }
  0xf0   :  { %v1003_v51 = vrot.slane %v993_v49, %v34764_v0  ;;  %v1104_v52 = vpop.f32.mrf.mxu0 }
  0xf1   :  { %v1105_v53 = vadd.f32 %v29499_v8, %v1104_v52 }
  0xf2   :  { %v1004_v54 = vcombine.high %v1003_v51, %v1003_v51  ;;  %v1011_v55 = vrot.slane %v1003_v51, %v34764_v0  ;;  %v31076_v56 = vpop.f32.mrf.mxu0 }
  0xf3   :  { %v1185_v57 = vpop.f32.mrf.mxu1 }
  0xf4   :  { %v1018_v58 = vrot.slane %v1004_v54, %v34764_v0  ;;  %1021 = vst.msk [vmem:[#allocation2 + $0x1] sm:$0x1] %vm526_vm2, %v1011_v55  ;;  %v1186_v59 = vadd.f32 %v1185_v57, %v1105_v53 }
  0xf5   :  { %v31083_v60 = vpop.f32.mrf.mxu1 }
  0xf6   :  { %1022 = vst.msk [vmem:[#allocation2 + $0x9] sm:$0x1] %vm526_vm2, %v1018_v58  ;;  %v1261_v61 = vpop.f32.mrf.mxu0 }
  0xf7   :  { %v1262_v63 = vadd.f32 %v1261_v61, %v1186_v59 }
  0xf8   :  { %v31090_v1 = vpop.f32.mrf.mxu0 }
  0xf9   :  { %v1336_v2 = vpop.f32.mrf.mxu1 }
  0xfa   :  { %v1337_v6 = vadd.f32 %v1336_v2, %v1262_v63 }
  0xfb   :  { %v31097_v7 = vpop.f32.mrf.mxu1 }
  0xfc   :  { %v1413_v9 = vpop.f32.mrf.mxu0 }
  0xfd   :  { %v1414_v10 = vadd.f32 %v1413_v9, %v1337_v6 }
  0xfe   :  { %v31104_v16 = vpop.f32.mrf.mxu0 }
  0xff   :  { %v1486_v17 = vpop.f32.mrf.mxu1 }
 0x100   :  { %v1487_v18 = vadd.f32 %v1486_v17, %v1414_v10  ;;  %v29511_v10 = vld [vmem:[%s39386_s1 + $0x88] ss:$0 sm:$0xff] }
 0x101   :  { %v31111_v20 = vpop.f32.mrf.mxu1 }
 0x102   :  { %v1497_v24 = vrot.slane %v1487_v18, %v34764_v0  ;;  %v1598_v25 = vpop.f32.mrf.mxu0 }
 0x103   :  { %v1599_v26 = vadd.f32 %v29503_v19, %v1598_v25 }
 0x104   :  { %v1498_v28 = vcombine.high %v1497_v24, %v1497_v24  ;;  %v1505_v29 = vrot.slane %v1497_v24, %v34764_v0  ;;  %v31118_v30 = vpop.f32.mrf.mxu0 }
 0x105   :  { %v1679_v32 = vpop.f32.mrf.mxu1 }
 0x106   :  { %v1512_v33 = vrot.slane %v1498_v28, %v34764_v0  ;;  %1515 = vst.msk [vmem:[#allocation2 + $0x2] sm:$0x1] %vm526_vm2, %v1505_v29  ;;  %v1680_v35 = vadd.f32 %v1679_v32, %v1599_v26 }
 0x107   :  { %v31125_v36 = vpop.f32.mrf.mxu1 }
 0x108   :  { %1516 = vst.msk [vmem:[#allocation2 + $0xa] sm:$0x1] %vm526_vm2, %v1512_v33  ;;  %v1755_v37 = vpop.f32.mrf.mxu0 }
 0x109   :  { %v1756_v38 = vadd.f32 %v1755_v37, %v1680_v35 }
 0x10a   :  { %v31132_v40 = vpop.f32.mrf.mxu0 }
 0x10b   :  { %v1830_v41 = vpop.f32.mrf.mxu1 }
 0x10c   :  { %v1831_v42 = vadd.f32 %v1830_v41, %v1756_v38 }
 0x10d   :  { %v31139_v43 = vpop.f32.mrf.mxu1 }
 0x10e   :  { %v1907_v44 = vpop.f32.mrf.mxu0 }
 0x10f   :  { %v1908_v11 = vadd.f32 %v1907_v44, %v1831_v42 }
 0x110   :  { %v31146_v15 = vpop.f32.mrf.mxu0 }
 0x111   :  { %v1980_v22 = vpop.f32.mrf.mxu1 }
 0x112   :  { %v1981_v45 = vadd.f32 %v1980_v22, %v1908_v11  ;;  %v29515_v11 = vld [vmem:[%s39386_s1 + $0xa0] ss:$0 sm:$0xff] }
 0x113   :  { %v31153_v47 = vpop.f32.mrf.mxu1 }
 0x114   :  { %v1991_v48 = vrot.slane %v1981_v45, %v34764_v0  ;;  %v2092_v49 = vpop.f32.mrf.mxu0 }
 0x115   :  { %v2093_v8 = vadd.f32 %v29507_v46, %v2092_v49 }
 0x116   :  { %v1992_v50 = vcombine.high %v1991_v48, %v1991_v48  ;;  %v1999_v51 = vrot.slane %v1991_v48, %v34764_v0  ;;  %v31160_v52 = vpop.f32.mrf.mxu0 }
 0x117   :  { %v2173_v53 = vpop.f32.mrf.mxu1 }
 0x118   :  { %v2006_v54 = vrot.slane %v1992_v50, %v34764_v0  ;;  %2009 = vst.msk [vmem:[#allocation2 + $0x3] sm:$0x1] %vm526_vm2, %v1999_v51  ;;  %v2174_v55 = vadd.f32 %v2173_v53, %v2093_v8 }
 0x119   :  { %v31167_v56 = vpop.f32.mrf.mxu1 }
 0x11a   :  { %2010 = vst.msk [vmem:[#allocation2 + $0xb] sm:$0x1] %vm526_vm2, %v2006_v54  ;;  %v2249_v57 = vpop.f32.mrf.mxu0 }
 0x11b   :  { %v2250_v58 = vadd.f32 %v2249_v57, %v2174_v55 }
 0x11c   :  { %v31174_v59 = vpop.f32.mrf.mxu0 }
 0x11d   :  { %v2324_v60 = vpop.f32.mrf.mxu1 }
 0x11e   :  { %v2325_v61 = vadd.f32 %v2324_v60, %v2250_v58 }
 0x11f   :  { %v31181_v63 = vpop.f32.mrf.mxu1 }
 0x120   :  { %v2401_v1 = vpop.f32.mrf.mxu0 }
 0x121   :  { %v2402_v2 = vadd.f32 %v2401_v1, %v2325_v61 }
 0x122   :  { %v31188_v6 = vpop.f32.mrf.mxu0 }
 0x123   :  { %v2474_v7 = vpop.f32.mrf.mxu1 }
 0x124   :  { %v2475_v9 = vadd.f32 %v2474_v7, %v2402_v2  ;;  %v29519_v2 = vld [vmem:[%s39386_s1 + $0xb8] ss:$0 sm:$0xff] }
 0x125   :  { %v31195_v16 = vpop.f32.mrf.mxu1 }
 0x126   :  { %v2485_v17 = vrot.slane %v2475_v9, %v34764_v0  ;;  %v2586_v18 = vpop.f32.mrf.mxu0 }
 0x127   :  { %v2587_v19 = vadd.f32 %v29511_v10, %v2586_v18 }
 0x128   :  { %v2486_v20 = vcombine.high %v2485_v17, %v2485_v17  ;;  %v2493_v24 = vrot.slane %v2485_v17, %v34764_v0  ;;  %v31202_v25 = vpop.f32.mrf.mxu0 }
 0x129   :  { %v2667_v26 = vpop.f32.mrf.mxu1 }
 0x12a   :  { %v2500_v28 = vrot.slane %v2486_v20, %v34764_v0  ;;  %2503 = vst.msk [vmem:[#allocation2 + $0x4] sm:$0x1] %vm526_vm2, %v2493_v24  ;;  %v2668_v29 = vadd.f32 %v2667_v26, %v2587_v19 }
 0x12b   :  { %v31209_v30 = vpop.f32.mrf.mxu1 }
 0x12c   :  { %2504 = vst.msk [vmem:[#allocation2 + $0xc] sm:$0x1] %vm526_vm2, %v2500_v28  ;;  %v2743_v32 = vpop.f32.mrf.mxu0 }
 0x12d   :  { %v2744_v33 = vadd.f32 %v2743_v32, %v2668_v29 }
 0x12e   :  { %v31216_v35 = vpop.f32.mrf.mxu0 }
 0x12f   :  { %v2818_v36 = vpop.f32.mrf.mxu1 }
 0x130   :  { %v2819_v37 = vadd.f32 %v2818_v36, %v2744_v33 }
 0x131   :  { %v31223_v38 = vpop.f32.mrf.mxu1 }
 0x132   :  { %v2895_v40 = vpop.f32.mrf.mxu0 }
 0x133   :  { %v2896_v41 = vadd.f32 %v2895_v40, %v2819_v37 }
 0x134   :  { %v31230_v42 = vpop.f32.mrf.mxu0 }
 0x135   :  { %v2968_v43 = vpop.f32.mrf.mxu1 }
 0x136   :  { %v2969_v44 = vadd.f32 %v2968_v43, %v2896_v41 }
 0x137   :  { %v31237_v15 = vpop.f32.mrf.mxu1 }
 0x138   :  { %v2979_v22 = vrot.slane %v2969_v44, %v34764_v0  ;;  %v3080_v45 = vpop.f32.mrf.mxu0 }
 0x139   :  { %v3081_v46 = vadd.f32 %v29515_v11, %v3080_v45  ;;  %v3996_v45 = vld [vmem:[%s39387_s2 + $0x38] sm:$0xff] }
 0x13a   :  { %v2980_v47 = vcombine.high %v2979_v22, %v2979_v22  ;;  %v2987_v48 = vrot.slane %v2979_v22, %v34764_v0  ;;  %v31244_v49 = vpop.f32.mrf.mxu0 }
 0x13b   :  { %v3161_v8 = vpop.f32.mrf.mxu1  ;;  %v3994_v49 = vld [vmem:[%s39387_s2 + $0x28] sm:$0xff] }
 0x13c   :  { %v2994_v50 = vrot.slane %v2980_v47, %v34764_v0  ;;  %2997 = vst.msk [vmem:[#allocation2 + $0x5] sm:$0x1] %vm526_vm2, %v2987_v48  ;;  %v3162_v51 = vadd.f32 %v3161_v8, %v3081_v46  ;;  %v3995_v47 = vld [vmem:[%s39387_s2 + $0x30] sm:$0xff]  ;;  %v34893_v48 = vand.u32 4294901760, %v3996_v45 }
 0x13d   :  { %v31251_v52 = vpop.f32.mrf.mxu1 }
 0x13e   :  { %2998 = vst.msk [vmem:[#allocation2 + $0xd] sm:$0x1] %vm526_vm2, %v2994_v50  ;;  %v3237_v53 = vpop.f32.mrf.mxu0  ;;  %v34902_v50 = vand.u32 4294901760, %v3995_v47 }
 0x13f   :  { %v3238_v54 = vadd.f32 %v3237_v53, %v3162_v51  ;;  %v3993_v51 = vld [vmem:[%s39387_s2 + $0x20] sm:$0xff]  ;;  %v34910_v53 = vsub.f32 %v3996_v45, %v34893_v48 }
 0x140   :  { %v31258_v55 = vpop.f32.mrf.mxu0 }
 0x141   :  { %v3312_v56 = vpop.f32.mrf.mxu1 }
 0x142   :  { %v3313_v57 = vadd.f32 %v3312_v56, %v3238_v54  ;;  %v34912_v54 = vand.u32 4294901760, %v3994_v49  ;;  %v34917_v56 = vsub.f32 %v3995_v47, %v34902_v50 }
 0x143   :  { %v31265_v58 = vpop.f32.mrf.mxu1 }
 0x144   :  { %v3389_v59 = vpop.f32.mrf.mxu0  ;;  %v4600_v58 = vand.u32 4294901760, %v34910_v53 }
 0x145   :  { %v3390_v60 = vadd.f32 %v3389_v59, %v3313_v57  ;;  %v34919_v57 = vand.u32 4294901760, %v3993_v51  ;;  %v34925_v59 = vsub.f32 %v3994_v49, %v34912_v54 }
 0x146   :  { %v31272_v61 = vpop.f32.mrf.mxu0 }
 0x147   :  { %v3462_v63 = vpop.f32.mrf.mxu1  ;;  %v34932_v61 = vsub.f32 %v3993_v51, %v34919_v57 }
 0x148   :  { %v3463_v1 = vadd.f32 %v3462_v63, %v3390_v60  ;;  %v4607_v60 = vand.u32 4294901760, %v34917_v56  ;;  %v4614_v63 = vand.u32 4294901760, %v34925_v59 }
 0x149   :  { %v31279_v6 = vpop.f32.mrf.mxu1 }
 0x14a   :  { %v3473_v7 = vrot.slane %v3463_v1, %v34764_v0  ;;  %v3574_v9 = vpop.f32.mrf.mxu0  ;;  %v4615_v6 = vsub.f32 %v34925_v59, %v4614_v63 }
 0x14b   :  { %v3575_v10 = vadd.f32 %v29519_v2, %v3574_v9  ;;  %v4621_v2 = vand.u32 4294901760, %v34932_v61 }
 0x14c   :  { %v3474_v16 = vcombine.high %v3473_v7, %v3473_v7  ;;  %v3481_v17 = vrot.slane %v3473_v7, %v34764_v0  ;;  %v31286_v18 = vpop.f32.mrf.mxu0 }
 0x14d   :  { %v3655_v19 = vpop.f32.mrf.mxu1 }
 0x14e   :  { %v3488_v20 = vrot.slane %v3474_v16, %v34764_v0  ;;  %3491 = vst.msk [vmem:[#allocation2 + $0x6] sm:$0x1] %vm526_vm2, %v3481_v17  ;;  %v3656_v24 = vadd.f32 %v3655_v19, %v3575_v10  ;;  %v4616_v16 = vand.u32 4294901760, %v4615_v6 }
 0x14f   :  { %v31293_v25 = vpop.f32.mrf.mxu1 }
 0x150   :  { %3492 = vst.msk [vmem:[#allocation2 + $0xe] sm:$0x1] %vm526_vm2, %v3488_v20  ;;  %v3731_v26 = vpop.f32.mrf.mxu0  ;;  %v29520_v20 = vld [vmem:[%s39390_s5] ss:$0 sm:$0xff] }
 0x151   :  { %v3732_v28 = vadd.f32 %v3731_v26, %v3656_v24 }
 0x152   :  { %v31300_v29 = vpop.f32.mrf.mxu0 }
 0x153   :  { %v3806_v30 = vpop.f32.mrf.mxu1 }
 0x154   :  { %v3807_v32 = vadd.f32 %v3806_v30, %v3732_v28 }
 0x155   :  { %v31307_v33 = vpop.f32.mrf.mxu1 }
 0x156   :  { %v3883_v35 = vpop.f32.mrf.mxu0 }
 0x157   :  { %v3884_v36 = vadd.f32 %v3883_v35, %v3807_v32 }
 0x158   :  { %v31314_v37 = vpop.f32.mrf.mxu0 }
 0x159   :  { %v3956_v38 = vpop.f32.mrf.mxu1 }
 0x15a   :  { %v3957_v40 = vadd.f32 %v3956_v38, %v3884_v36 }
 0x15b   :  { %v31321_v41 = vpop.f32.mrf.mxu1 }
 0x15c   :  { %v3967_v42 = vrot.slane %v3957_v40, %v34764_v0 }
 0x15e   :  { %v3968_v43 = vcombine.high %v3967_v42, %v3967_v42  ;;  %v3975_v44 = vrot.slane %v3967_v42, %v34764_v0 }
 0x160   :  { %v3982_v11 = vrot.slane %v3968_v43, %v34764_v0  ;;  %3985 = vst.msk [vmem:[#allocation2 + $0x7] sm:$0x1] %vm526_vm2, %v3975_v44 }
 0x162   :  { %3986 = vst.msk [vmem:[#allocation2 + $0xf] sm:$0x1] %vm526_vm2, %v3982_v11 }
 0x167   :  { %v3987_v15 = vld [vmem:[#allocation2] sm:$0xff] }
 0x168   :  { %v4004_v22 = vsel %vm4002_vm3, %v3987_v15, 0 }
 0x169   :  { %v34886_v46 = vand.u32 4294901760, %v4004_v22  ;;  %v3988_v1 = vld [vmem:[#allocation2 + $0x8] sm:$0xff] }
 0x16a   :  { %v4492_v7 = vsel %vm4002_vm3, %v3988_v1, 0 }
 0x16b   :  { %v4076_v0 = vsub.f32 %v4004_v22, %v34886_v46  ;;  %31342 = vmatmul.mubr.f32.vlgmr.msra.gmra.mxu1 %v34886_v46  ;;  %v34969_v10 = vand.u32 4294901760, %v4492_v7 }
 0x16c   :  { %31356 = vmatpush3.msra.mxu1 %v34762_v62  ;;  %31363 = vmatprep.mubr.msk.f32.mxu1 %vm34237_vm1, %v34236_v3 }
 0x16d   :  { %31357 = vmatprep.subr.mxu1 %v34236_v3  ;;  %v4077_v8 = vand.u32 4294901760, %v4076_v0 }
 0x16e   :  { %31358 = vmatpush3.msra.mxu1 %v34772_v5 }
 0x16f   :  { %31359 = vmatprep.subr.mxu1 %v34236_v3  ;;  %v4078_v52 = vsub.f32 %v4076_v0, %v4077_v8 }
 0x170   :  { %31360 = vmatpush3.msra.mxu1 %v34786_v14 }
 0x171   :  { %31361 = vmatprep.subr.mxu1 %v34236_v3  ;;  %v4079_v55 = vand.u32 4294901760, %v4078_v52 }
 0x172   :  { %31362 = vmatpush3.msra.mxu1 %v34803_v27 }
 0x173   :  { %31364 = vmatmul.mubr.f32.vlgmr.msra.gmra.mxu1 %v4077_v8  ;;  %31377 = vmatprep.subr.mxu1 %v34236_v3 }
 0x174   :  { %31331 = vmatmul.mubr.f32.vlgmr.msra.gmra.mxu0 %v4079_v55  ;;  %31378 = vmatpush3.msra.mxu1 %v34762_v62  ;;  %v4601_v62 = vsub.f32 %v34910_v53, %v4600_v58 }
 0x175   :  { %31345 = vmatpush3.msra.mxu0 %v34770_v4  ;;  %31379 = vmatprep.subr.mxu1 %v34236_v3  ;;  %v4564_v4 = vsub.f32 %v4492_v7, %v34969_v10 }
 0x176   :  { %31346 = vmatprep.subr.mxu0 %v34236_v3  ;;  %31380 = vmatpush3.msra.mxu1 %v34772_v5  ;;  %v4608_v5 = vsub.f32 %v34917_v56, %v4607_v60 }
 0x177   :  { %31347 = vmatpush3.msra.mxu0 %v34784_v13  ;;  %31381 = vmatprep.subr.mxu1 %v34236_v3 }
 0x178   :  { %31348 = vmatprep.subr.mxu0 %v34236_v3  ;;  %31382 = vmatpush3.msra.mxu1 %v34786_v14  ;;  %v4602_v14 = vand.u32 4294901760, %v4601_v62  ;;  %v4609_v9 = vand.u32 4294901760, %v4608_v5 }
 0x179   :  { %31349 = vmatpush3.msra.mxu0 %v34799_v23  ;;  %31383 = vmatprep.subr.mxu1 %v34236_v3 }
 0x17a   :  { %31350 = vmatprep.subr.mxu0 %v34236_v3  ;;  %31352 = vmatprep.mubr.msk.f32.mxu0 %vm34237_vm1, %v34236_v3 }
 0x17b   :  { %31351 = vmatpush3.msra.mxu0 %v34813_v34  ;;  %31384 = vmatpush3.msra.mxu1 %v34803_v27  ;;  %v4622_v27 = vsub.f32 %v34932_v61, %v4621_v2 }
 0x17c   :  { %31385 = vmatprep.mubr.msk.f32.mxu1 %vm34237_vm1, %v34236_v3  ;;  %31353 = vmatmul.mubr.f32.vlgmr.msra.gmra.mxu0 %v4076_v0 }
 0x17d   :  { %31366 = vmatprep.subr.mxu0 %v34236_v3  ;;  %31386 = vmatmul.mubr.f32.vlgmr.msra.gmra.mxu1 %v34886_v46  ;;  %v4623_v17 = vand.u32 4294901760, %v4622_v27 }
 0x17e   :  { %31399 = vmatprep.subr.mxu1 %v34236_v3  ;;  %31367 = vmatpush3.msra.mxu0 %v4112_v12  ;;  %v4565_v12 = vand.u32 4294901760, %v4564_v4 }
 0x17f   :  { %31400 = vmatpush3.msra.mxu1 %v4602_v14  ;;  %31368 = vmatprep.subr.mxu0 %v34236_v3 }
 0x180   :  { %31401 = vmatprep.subr.mxu1 %v34236_v3  ;;  %31369 = vmatpush3.msra.mxu0 %v4119_v21  ;;  %v4566_v13 = vsub.f32 %v4564_v4, %v4565_v12 }
 0x181   :  { %31402 = vmatpush3.msra.mxu1 %v4609_v9  ;;  %31370 = vmatprep.subr.mxu0 %v34236_v3 }
 0x182   :  { %31403 = vmatprep.subr.mxu1 %v34236_v3  ;;  %31371 = vmatpush3.msra.mxu0 %v4126_v31  ;;  %v4567_v21 = vand.u32 4294901760, %v4566_v13 }
 0x183   :  { %31404 = vmatpush3.msra.mxu1 %v4616_v16  ;;  %31372 = vmatprep.subr.mxu0 %v34236_v3 }
 0x184   :  { %31405 = vmatprep.subr.mxu1 %v34236_v3  ;;  %31373 = vmatpush3.msra.mxu0 %v4133_v39 }
 0x185   :  { %31374 = vmatprep.mubr.msk.f32.mxu0 %vm34237_vm1, %v34236_v3  ;;  %31406 = vmatpush3.msra.mxu1 %v4623_v17 }
 0x186   :  { %31407 = vmatprep.mubr.msk.f32.mxu1 %vm34237_vm1, %v34236_v3  ;;  %31375 = vmatmul.mubr.f32.vlgmr.msra.gmra.mxu0 %v34886_v46 }
 0x187   :  { %31388 = vmatprep.subr.mxu0 %v34236_v3  ;;  %31408 = vmatmul.mubr.f32.vlgmr.msra.gmra.mxu1 %v34969_v10 }
 0x188   :  { %31421 = vmatprep.subr.mxu1 %v34236_v3  ;;  %31389 = vmatpush3.msra.mxu0 %v34893_v48 }
 0x189   :  { %31422 = vmatpush3.msra.mxu1 %v34893_v48  ;;  %31390 = vmatprep.subr.mxu0 %v34236_v3 }
 0x18a   :  { %31423 = vmatprep.subr.mxu1 %v34236_v3  ;;  %31391 = vmatpush3.msra.mxu0 %v34902_v50 }
 0x18b   :  { %31424 = vmatpush3.msra.mxu1 %v34902_v50  ;;  %31392 = vmatprep.subr.mxu0 %v34236_v3 }
 0x18c   :  { %31425 = vmatprep.subr.mxu1 %v34236_v3  ;;  %31393 = vmatpush3.msra.mxu0 %v34912_v54 }
 0x18d   :  { %31426 = vmatpush3.msra.mxu1 %v34912_v54  ;;  %31394 = vmatprep.subr.mxu0 %v34236_v3 }
 0x18e   :  { %31427 = vmatprep.subr.mxu1 %v34236_v3  ;;  %31395 = vmatpush3.msra.mxu0 %v34919_v57 }
 0x18f   :  { %31396 = vmatprep.mubr.msk.f32.mxu0 %vm34237_vm1, %v34236_v3  ;;  %31428 = vmatpush3.msra.mxu1 %v34919_v57 }
 0x190   :  { %31429 = vmatprep.mubr.msk.f32.mxu1 %vm34237_vm1, %v34236_v3  ;;  %31397 = vmatmul.mubr.f32.vlgmr.msra.gmra.mxu0 %v4567_v21 }
 0x191   :  { %31410 = vmatprep.subr.mxu0 %v34236_v3  ;;  %31430 = vmatmul.mubr.f32.vlgmr.msra.gmra.mxu1 %v4565_v12 }
 0x192   :  { %31443 = vmatprep.subr.mxu1 %v34236_v3  ;;  %31411 = vmatpush3.msra.mxu0 %v34910_v53 }
 0x193   :  { %31444 = vmatpush3.msra.mxu1 %v34893_v48  ;;  %31412 = vmatprep.subr.mxu0 %v34236_v3 }
 0x194   :  { %31445 = vmatprep.subr.mxu1 %v34236_v3  ;;  %31413 = vmatpush3.msra.mxu0 %v34917_v56 }
 0x195   :  { %31446 = vmatpush3.msra.mxu1 %v34902_v50  ;;  %31414 = vmatprep.subr.mxu0 %v34236_v3 }
 0x196   :  { %31447 = vmatprep.subr.mxu1 %v34236_v3  ;;  %31415 = vmatpush3.msra.mxu0 %v34925_v59 }
 0x197   :  { %31448 = vmatpush3.msra.mxu1 %v34912_v54  ;;  %31416 = vmatprep.subr.mxu0 %v34236_v3 }
 0x198   :  { %31449 = vmatprep.subr.mxu1 %v34236_v3  ;;  %31417 = vmatpush3.msra.mxu0 %v34932_v61 }
 0x199   :  { %31418 = vmatprep.mubr.msk.f32.mxu0 %vm34237_vm1, %v34236_v3  ;;  %31450 = vmatpush3.msra.mxu1 %v34919_v57 }
 0x19a   :  { %31451 = vmatprep.mubr.msk.f32.mxu1 %vm34237_vm1, %v34236_v3  ;;  %31419 = vmatmul.mubr.f32.vlgmr.msra.gmra.mxu0 %v4564_v4 }
 0x19b   :  { %31432 = vmatprep.subr.mxu0 %v34236_v3  ;;  %31452 = vmatmul.mubr.f32.vlgmr.msra.gmra.mxu1 %v34969_v10 }
 0x19c   :  { %31433 = vmatpush3.msra.mxu0 %v4600_v58  ;;  %31440 = vmatprep.mubr.msk.f32.mxu0 %vm34237_vm1, %v34236_v3 }
 0x19d   :  { %31434 = vmatprep.subr.mxu0 %v34236_v3  ;;  %31459 = vmatprep.subr.mxu1 %v34236_v3 }
 0x19e   :  { %31435 = vmatpush3.msra.mxu0 %v4607_v60  ;;  %31461 = vmatprep.mubr.msk.f32.mxu1 %vm34237_vm1, %v34236_v3 }
 0x19f   :  { %31436 = vmatprep.subr.mxu0 %v34236_v3 }
 0x1a0   :  { %31437 = vmatpush3.msra.mxu0 %v4614_v63 }
 0x1a1   :  { %31438 = vmatprep.subr.mxu0 %v34236_v3 }
 0x1a2   :  { %31439 = vmatpush3.msra.mxu0 %v4621_v2 }
 0x1a3   :  { %31441 = vmatmul.mubr.f32.vlgmr.msra.gmra.mxu0 %v34969_v10  ;;  %31454 = vmatprep.subr.mxu0 %v34236_v3 }
 0x1a4   :  { %31456 = vmatprep.mubr.msk.f32.mxu0 %vm34237_vm1, %v34236_v3 }
 0x22b   :  { %v4172_v23 = vpop.f32.mrf.mxu1 }
 0x22d   :  { %v31343_v31 = vpop.f32.mrf.mxu1 }
 0x233   :  { %v4329_v34 = vpop.f32.mrf.mxu1 }
 0x234   :  { %v4081_v39 = vpop.f32.mrf.mxu0 }
 0x235   :  { %v31365_v18 = vpop.f32.mrf.mxu1  ;;  %v4082_v24 = vadd.f32 %v29520_v20, %v4081_v39 }
 0x236   :  { %v31332_v19 = vpop.f32.mrf.mxu0 }
 0x237   :  { %v4173_v29 = vadd.f32 %v4172_v23, %v4082_v24 }
 0x23c   :  { %v4252_v25 = vpop.f32.mrf.mxu0 }
 0x23d   :  { %v4487_v26 = vpop.f32.mrf.mxu1  ;;  %v4253_v32 = vadd.f32 %v4252_v25, %v4173_v29 }
 0x23e   :  { %v31354_v28 = vpop.f32.mrf.mxu0 }
 0x23f   :  { %v31387_v30 = vpop.f32.mrf.mxu1  ;;  %v4330_v33 = vadd.f32 %v4329_v34, %v4253_v32 }
 0x246   :  { %v4412_v35 = vpop.f32.mrf.mxu0 }
 0x247   :  { %v4413_v36 = vadd.f32 %v4412_v35, %v4330_v33  ;;  %v4660_v37 = vpop.f32.mrf.mxu1 }
 0x248   :  { %v31376_v38 = vpop.f32.mrf.mxu0 }
 0x249   :  { %v4488_v40 = vadd.f32 %v4487_v26, %v4413_v36  ;;  %v31409_v41 = vpop.f32.mrf.mxu1 }
 0x24b   :  { %4980 = vst.msk [vmem:[#allocation3] sm:$0xff] %vm4979_vm4, %v4488_v40 }
 0x250   :  { %v4569_v42 = vpop.f32.mrf.mxu0 }
 0x251   :  { %v4817_v43 = vpop.f32.mrf.mxu1  ;;  %v4570_v22 = vadd.f32 %v29520_v20, %v4569_v42 }
 0x252   :  { %v31398_v44 = vpop.f32.mrf.mxu0  ;;  %v35056_v11 = vld [vmem:[#allocation3] sm:$0xff] }
 0x253   :  { %v31431_v15 = vpop.f32.mrf.mxu1  ;;  %4985 = vrot.lane.b32.xlu0 %v35056_v11, %s34239_s25  ;;  %v4661_v47 = vadd.f32 %v4660_v37, %v4570_v22  ;;  %v4988_v55 = vsel %vm4987_vm5, %v35056_v11, 0 }
 0x254   :  { %v5058_v56 = vand.u32 4294901760, %v4988_v55 }
 0x256   :  { %v5059_v57 = vsub.f32 %v4988_v55, %v5058_v56 }
 0x258   :  { %v5060_v58 = vand.u32 4294901760, %v5059_v57 }
 0x25a   :  { %v4740_v45 = vpop.f32.mrf.mxu0  ;;  %v5061_v61 = vsub.f32 %v5059_v57, %v5060_v58 }
 0x25b   :  { %v4975_v46 = vpop.f32.mrf.mxu1  ;;  %v4741_v49 = vadd.f32 %v4740_v45, %v4661_v47 }
 0x25c   :  { %v31420_v0 = vpop.f32.mrf.mxu0  ;;  %v5062_v1 = vand.u32 4294901760, %v5061_v61 }
 0x25d   :  { %v31453_v48 = vpop.f32.mrf.mxu1  ;;  %v4818_v8 = vadd.f32 %v4817_v43, %v4741_v49 }
 0x263   :  { %v4900_v50 = vpop.f32.mrf.mxu0 }
 0x264   :  { %v4901_v51 = vadd.f32 %v4900_v50, %v4818_v8 }
 0x265   :  { %v31442_v52 = vpop.f32.mrf.mxu0 }
 0x266   :  { %v4976_v53 = vadd.f32 %v4975_v46, %v4901_v51 }
 0x268   :  { %4981 = vst.msk [vmem:[#allocation3 + $0x8] sm:$0xff] %vm4979_vm4, %v4976_v53 }
 0x26f   :  { %v35061_v54 = vld [vmem:[#allocation3 + $0x8] sm:$0xff] }
 0x270   :  { %5439 = vrot.lane.b32.xlu0 %v35061_v54, %s34239_s25  ;;  %v5441_v6 = vsel %vm4987_vm5, %v35061_v54, 0 }
 0x271   :  { %v5511_v7 = vand.u32 4294901760, %v5441_v6 }
 0x273   :  { %v5512_v9 = vsub.f32 %v5441_v6, %v5511_v7 }
 0x275   :  { %v5513_v27 = vand.u32 4294901760, %v5512_v9 }
 0x277   :  { %v5514_v17 = vsub.f32 %v5512_v9, %v5513_v27 }
 0x279   :  { %v5515_v13 = vand.u32 4294901760, %v5514_v17 }
 0x2c5   :  { %v4986_v59 = vpop.permute.xlu0 %4985 }
 0x2c6   :  { %v4990_v60 = vsel %vm4987_vm5, %v4986_v59, 0 }
 0x2c7   :  { %v5023_v62 = vand.u32 4294901760, %v4990_v60 }
 0x2c9   :  { %v5100_v63 = vsub.f32 %v4990_v60, %v5023_v62  ;;  %31455 = vmatpush3.xpose.msra.mxu0 %v5023_v62 }
 0x2ca   :  { %31464 = vmatprep.subr.mxu0 %v34236_v3 }
 0x2cb   :  { %v5101_v5 = vand.u32 4294901760, %v5100_v63 }
 0x2cc   :  { %31457 = vmatmul.mubr.f32.vlgmr.msra.gmra.mxu0 %v5062_v1 }
 0x2cd   :  { %v5102_v2 = vsub.f32 %v5100_v63, %v5101_v5  ;;  %31465 = vmatpush3.xpose.msra.mxu0 %v5100_v63  ;;  %31466 = vmatprep.mubr.msk.f32.mxu0 %vm34237_vm1, %v34236_v3 }
 0x2ce   :  { %31474 = vmatprep.subr.mxu0 %v34236_v3 }
 0x2cf   :  { %v5103_v14 = vand.u32 4294901760, %v5102_v2 }
 0x2d0   :  { %31467 = vmatmul.mubr.f32.vlgmr.msra.gmra.mxu0 %v5059_v57 }
 0x2d1   :  { %31460 = vmatpush3.xpose.msra.mxu1 %v5103_v14  ;;  %31475 = vmatpush3.xpose.msra.mxu0 %v5101_v5 }
 0x2d2   :  { %31476 = vmatprep.mubr.msk.f32.mxu0 %vm34237_vm1, %v34236_v3  ;;  %31469 = vmatprep.subr.mxu1 %v34236_v3 }
 0x2d3   :  { %31484 = vmatprep.subr.mxu0 %v34236_v3 }
 0x2d4   :  { %31462 = vmatmul.mubr.f32.vlgmr.msra.gmra.mxu1 %v5058_v56  ;;  %31477 = vmatmul.mubr.f32.vlgmr.msra.gmra.mxu0 %v5058_v56 }
 0x2d5   :  { %31470 = vmatpush3.xpose.msra.mxu1 %v5023_v62  ;;  %31471 = vmatprep.mubr.msk.f32.mxu1 %vm34237_vm1, %v34236_v3 }
 0x2d6   :  { %31479 = vmatprep.subr.mxu1 %v34236_v3  ;;  %31486 = vmatprep.mubr.msk.f32.mxu0 %vm34237_vm1, %v34236_v3 }
 0x2d8   :  { %31472 = vmatmul.mubr.f32.vlgmr.msra.gmra.mxu1 %v5060_v58 }
 0x2d9   :  { %31480 = vmatpush3.xpose.msra.mxu1 %v5023_v62  ;;  %31481 = vmatprep.mubr.msk.f32.mxu1 %vm34237_vm1, %v34236_v3 }
 0x2da   :  { %31489 = vmatprep.subr.mxu1 %v34236_v3 }
 0x2dc   :  { %31482 = vmatmul.mubr.f32.vlgmr.msra.gmra.mxu1 %v5058_v56 }
 0x2dd   :  { %31491 = vmatprep.mubr.msk.f32.mxu1 %vm34237_vm1, %v34236_v3 }
 0x2e2   :  { %v5440_v10 = vpop.permute.xlu0 %5439 }
 0x2e3   :  { %v5443_v16 = vsel %vm4987_vm5, %v5440_v10, 0 }
 0x2e4   :  { %v5476_v4 = vand.u32 4294901760, %v5443_v16 }
 0x2e6   :  { %v5553_v12 = vsub.f32 %v5443_v16, %v5476_v4  ;;  %31485 = vmatpush3.xpose.msra.mxu0 %v5476_v4 }
 0x2e7   :  { %31494 = vmatprep.subr.mxu0 %v34236_v3 }
 0x2e8   :  { %v5554_v21 = vand.u32 4294901760, %v5553_v12 }
 0x2e9   :  { %31487 = vmatmul.mubr.f32.vlgmr.msra.gmra.mxu0 %v5515_v13 }
 0x2ea   :  { %v5555_v23 = vsub.f32 %v5553_v12, %v5554_v21  ;;  %31495 = vmatpush3.xpose.msra.mxu0 %v5553_v12  ;;  %31496 = vmatprep.mubr.msk.f32.mxu0 %vm34237_vm1, %v34236_v3 }
 0x2eb   :  { %31504 = vmatprep.subr.mxu0 %v34236_v3 }
 0x2ec   :  { %v5556_v31 = vand.u32 4294901760, %v5555_v23 }
 0x2ed   :  { %31497 = vmatmul.mubr.f32.vlgmr.msra.gmra.mxu0 %v5512_v9 }
 0x2ee   :  { %31490 = vmatpush3.xpose.msra.mxu1 %v5556_v31  ;;  %31505 = vmatpush3.xpose.msra.mxu0 %v5554_v21 }
 0x2ef   :  { %31506 = vmatprep.mubr.msk.f32.mxu0 %vm34237_vm1, %v34236_v3  ;;  %31499 = vmatprep.subr.mxu1 %v34236_v3 }
 0x2f0   :  { %31514 = vmatprep.subr.mxu0 %v34236_v3 }
 0x2f1   :  { %31492 = vmatmul.mubr.f32.vlgmr.msra.gmra.mxu1 %v5511_v7  ;;  %31507 = vmatmul.mubr.f32.vlgmr.msra.gmra.mxu0 %v5511_v7 }
 0x2f2   :  { %31500 = vmatpush3.xpose.msra.mxu1 %v5476_v4  ;;  %31501 = vmatprep.mubr.msk.f32.mxu1 %vm34237_vm1, %v34236_v3 }
 0x2f3   :  { %31509 = vmatprep.subr.mxu1 %v34236_v3  ;;  %31516 = vmatprep.mubr.msk.f32.mxu0 %vm34237_vm1, %v34236_v3 }
 0x2f5   :  { %31502 = vmatmul.mubr.f32.vlgmr.msra.gmra.mxu1 %v5513_v27 }
 0x2f6   :  { %31510 = vmatpush3.xpose.msra.mxu1 %v5476_v4  ;;  %31511 = vmatprep.mubr.msk.f32.mxu1 %vm34237_vm1, %v34236_v3 }
 0x2f7   :  { %31519 = vmatprep.subr.mxu1 %v34236_v3 }
 0x2f9   :  { %31512 = vmatmul.mubr.f32.vlgmr.msra.gmra.mxu1 %v5511_v7 }
 0x2fa   :  { %31521 = vmatprep.mubr.msk.f32.mxu1 %vm34237_vm1, %v34236_v3 }
 0x38c   :  { %v5064_v34 = vpop.f32.mrf.mxu0 }
 0x38e   :  { %v31458_v39 = vpop.f32.mrf.mxu0 }
 0x390   :  { %v5214_v18 = vpop.f32.mrf.mxu0 }
 0x392   :  { %v31468_v19 = vpop.f32.mrf.mxu0 }
 0x394   :  { %v5140_v20 = vpop.f32.mrf.mxu1  ;;  %v5362_v24 = vpop.f32.mrf.mxu0 }
 0x395   :  { %v5141_v25 = vadd.f32 %v5140_v20, %v5064_v34 }
 0x396   :  { %v31463_v26 = vpop.f32.mrf.mxu1  ;;  %v31478_v28 = vpop.f32.mrf.mxu0 }
 0x397   :  { %v5215_v29 = vadd.f32 %v5214_v18, %v5141_v25 }
 0x398   :  { %v5288_v30 = vpop.f32.mrf.mxu1 }
 0x399   :  { %v5289_v32 = vadd.f32 %v5288_v30, %v5215_v29 }
 0x39a   :  { %v31473_v33 = vpop.f32.mrf.mxu1 }
 0x39b   :  { %v5363_v35 = vadd.f32 %v5362_v24, %v5289_v32 }
 0x39c   :  { %v5434_v36 = vpop.f32.mrf.mxu1 }
 0x39d   :  { %v5435_v37 = vadd.f32 %v5434_v36, %v5363_v35 }
 0x39e   :  { %v31483_v38 = vpop.f32.mrf.mxu1 }
 0x39f   :  { %v5891_v40 = vmul.f32 0.35355338, %v5435_v37 }
 0x3a1   :  { %v5893_v41 = vsel %vm4987_vm5, %v5891_v40, -inf }
 0x3a2   :  { %5894 = vmax.xlane.f32.xlu1 %v5893_v41 }
 0x3a9   :  { %v5517_v42 = vpop.f32.mrf.mxu0 }
 0x3ab   :  { %v31488_v43 = vpop.f32.mrf.mxu0 }
 0x3ad   :  { %v5667_v44 = vpop.f32.mrf.mxu0 }
 0x3af   :  { %v31498_v15 = vpop.f32.mrf.mxu0 }
 0x3b1   :  { %v5593_v22 = vpop.f32.mrf.mxu1  ;;  %v5815_v45 = vpop.f32.mrf.mxu0 }
 0x3b2   :  { %v5594_v46 = vadd.f32 %v5593_v22, %v5517_v42 }
 0x3b3   :  { %v31493_v47 = vpop.f32.mrf.mxu1  ;;  %v31508_v0 = vpop.f32.mrf.mxu0 }
 0x3b4   :  { %v5668_v48 = vadd.f32 %v5667_v44, %v5594_v46 }
 0x3b5   :  { %v5741_v49 = vpop.f32.mrf.mxu1 }
 0x3b6   :  { %v5742_v8 = vadd.f32 %v5741_v49, %v5668_v48 }
 0x3b7   :  { %v31503_v50 = vpop.f32.mrf.mxu1 }
 0x3b8   :  { %v5816_v51 = vadd.f32 %v5815_v45, %v5742_v8 }
 0x3b9   :  { %v5887_v52 = vpop.f32.mrf.mxu1 }
 0x3ba   :  { %v5888_v53 = vadd.f32 %v5887_v52, %v5816_v51 }
 0x3bb   :  { %v31513_v55 = vpop.f32.mrf.mxu1 }
 0x3bc   :  { %v5892_v56 = vmul.f32 0.35355338, %v5888_v53 }
 0x3be   :  { %v5896_v57 = vsel %vm4987_vm5, %v5892_v56, -inf }
 0x3bf   :  { %5897 = vmax.xlane.f32.xlu1 %v5896_v57 }
 0x3d0   :  { %5915 = vrot.lane.b32.xlu1 %v35056_v11, %s34240_s26 }
 0x3d4   :  { %6367 = vrot.lane.b32.xlu1 %v35061_v54, %s34240_s26 }
 0x42b   :  { %v5895_v58 = vpop.xlane.xlu1 %5894 }
 0x42c   :  { %v5899_v59 = vsub.f32 %v5891_v40, %v5895_v58 }
 0x42e   :  { %v5901_v60 = vmul.f32 1.442695, %v5899_v59 }
 0x430   :  { %34128 = vpow2.f32 %v5901_v60 }
 0x43d   :  { %v34129_v61 = vpop.eup %34128 }
 0x43e   :  { %v5905_v62 = vsel %vm4987_vm5, %v34129_v61, 0.0 }
 0x43f   :  { %5906 = vadd.xlane.f32.xlu0 %v5905_v62 }
 0x448   :  { %v5898_v63 = vpop.xlane.xlu1 %5897 }
 0x449   :  { %v5900_v1 = vsub.f32 %v5892_v56, %v5898_v63 }
 0x44b   :  { %v5903_v5 = vmul.f32 1.442695, %v5900_v1 }
 0x44c   :  { %v5916_v2 = vpop.permute.xlu1 %5915 }
 0x44d   :  { %34130 = vpow2.f32 %v5903_v5  ;;  %v5952_v14 = vand.u32 4294901760, %v5916_v2 }
 0x44f   :  { %v6029_v6 = vsub.f32 %v5916_v2, %v5952_v14  ;;  %31515 = vmatpush3.msra.mxu0 %v5952_v14 }
 0x450   :  { %31524 = vmatprep.subr.mxu0 %v34236_v3  ;;  %v6368_v4 = vpop.permute.xlu1 %6367 }
 0x451   :  { %v6030_v7 = vand.u32 4294901760, %v6029_v6  ;;  %v35125_v12 = vand.u32 4294901760, %v6368_v4 }
 0x453   :  { %v6031_v9 = vsub.f32 %v6029_v6, %v6030_v7  ;;  %v35128_v21 = vsub.f32 %v6368_v4, %v35125_v12 }
 0x455   :  { %v6032_v27 = vand.u32 4294901760, %v6031_v9  ;;  %7281 = vrot.lane.b32.xlu0 %v35061_v54, %s34241_s27  ;;  %v6482_v39 = vand.u32 4294901760, %v35128_v21 }
 0x457   :  { %31520 = vmatpush3.msra.mxu1 %v6032_v27  ;;  %v6483_v20 = vsub.f32 %v35128_v21, %v6482_v39 }
 0x458   :  { %31529 = vmatprep.subr.mxu1 %v34236_v3 }
 0x459   :  { %v6484_v26 = vand.u32 4294901760, %v6483_v20 }
 0x45a   :  { %v34131_v10 = vpop.eup %34130 }
 0x45b   :  { %v5908_v16 = vsel %vm4987_vm5, %v34131_v10, 0.0 }
 0x45c   :  { %5909 = vadd.xlane.f32.xlu1 %v5908_v16 }
 0x46d   :  { %6826 = vrot.lane.b32.xlu1 %v35056_v11, %s34241_s27 }
 0x471   :  { %6824 = vrot.lane.b32.xlu1 %v35056_v11, %s34242_s28 }
 0x475   :  { %7279 = vrot.lane.b32.xlu1 %v35061_v54, %s34242_s28 }
 0x4c8   :  { %v5907_v17 = vpop.xlane.xlu0 %5906 }
 0x4c9   :  { %34132 = vrcp.f32 %v5907_v17 }
 0x4cc   :  { %v7282_v38 = vpop.permute.xlu0 %7281 }
 0x4cd   :  { %v7285_v44 = vsel %vm4987_vm5, %v7282_v38, 0 }
 0x4ce   :  { %v35167_v46 = vand.u32 4294901760, %v7285_v44 }
 0x4d0   :  { %v35178_v8 = vsub.f32 %v7285_v44, %v35167_v46 }
 0x4d2   :  { %v7396_v53 = vand.u32 4294901760, %v35178_v8 }
 0x4d4   :  { %v7397_v58 = vsub.f32 %v35178_v8, %v7396_v53 }
 0x4d6   :  { %v34133_v13 = vpop.eup %34132 }
 0x4d7   :  { %v5913_v23 = vmul.f32 %v34133_v13, %v34129_v61  ;;  %v7398_v61 = vand.u32 4294901760, %v7397_v58 }
 0x4d9   :  { %v5919_v31 = vsel %vm4987_vm5, %v5913_v23, 0 }
 0x4da   :  { %v5987_v34 = vand.u32 4294901760, %v5919_v31 }
 0x4dc   :  { %v5988_v18 = vsub.f32 %v5919_v31, %v5987_v34  ;;  %31522 = vmatmul.mubr.f32.vlgmr.msra.gmra.mxu1 %v5987_v34 }
 0x4dd   :  { %31530 = vmatpush3.msra.mxu1 %v5952_v14  ;;  %31531 = vmatprep.mubr.msk.f32.mxu1 %vm34237_vm1, %v34236_v3 }
 0x4de   :  { %31539 = vmatprep.subr.mxu1 %v34236_v3  ;;  %v5989_v19 = vand.u32 4294901760, %v5988_v18 }
 0x4e0   :  { %31532 = vmatmul.mubr.f32.vlgmr.msra.gmra.mxu1 %v5989_v19  ;;  %v5990_v24 = vsub.f32 %v5988_v18, %v5989_v19 }
 0x4e1   :  { %31540 = vmatpush3.msra.mxu1 %v5952_v14  ;;  %31541 = vmatprep.mubr.msk.f32.mxu1 %vm34237_vm1, %v34236_v3 }
 0x4e2   :  { %31549 = vmatprep.subr.mxu1 %v34236_v3  ;;  %v5991_v25 = vand.u32 4294901760, %v5990_v24 }
 0x4e4   :  { %31517 = vmatmul.mubr.f32.vlgmr.msra.gmra.mxu0 %v5991_v25  ;;  %31542 = vmatmul.mubr.f32.vlgmr.msra.gmra.mxu1 %v5987_v34 }
 0x4e5   :  { %v5910_v28 = vpop.xlane.xlu1 %5909  ;;  %31525 = vmatpush3.msra.mxu0 %v6029_v6  ;;  %31550 = vmatpush3.msra.mxu1 %v6484_v26 }
 0x4e6   :  { %34134 = vrcp.f32 %v5910_v28  ;;  %31526 = vmatprep.mubr.msk.f32.mxu0 %vm34237_vm1, %v34236_v3  ;;  %31534 = vmatprep.subr.mxu0 %v34236_v3 }
 0x4e7   :  { %31551 = vmatprep.mubr.msk.f32.mxu1 %vm34237_vm1, %v34236_v3  ;;  %31559 = vmatprep.subr.mxu1 %v34236_v3 }
 0x4e8   :  { %31527 = vmatmul.mubr.f32.vlgmr.msra.gmra.mxu0 %v5988_v18 }
 0x4e9   :  { %31535 = vmatpush3.msra.mxu0 %v6030_v7  ;;  %31536 = vmatprep.mubr.msk.f32.mxu0 %vm34237_vm1, %v34236_v3  ;;  %v6827_v29 = vpop.permute.xlu1 %6826 }
 0x4ea   :  { %31544 = vmatprep.subr.mxu0 %v34236_v3  ;;  %v6830_v30 = vsel %vm4987_vm5, %v6827_v29, 0 }
 0x4eb   :  { %v6863_v32 = vand.u32 4294901760, %v6830_v30 }
 0x4ec   :  { %31537 = vmatmul.mubr.f32.vlgmr.msra.gmra.mxu0 %v5987_v34 }
 0x4ed   :  { %31545 = vmatpush3.msra.mxu0 %v35125_v12  ;;  %31546 = vmatprep.mubr.msk.f32.mxu0 %vm34237_vm1, %v34236_v3  ;;  %v35155_v35 = vsub.f32 %v6830_v30, %v6863_v32  ;;  %v6825_v37 = vpop.permute.xlu1 %6824 }
 0x4ee   :  { %31554 = vmatprep.subr.mxu0 %v34236_v3  ;;  %v6828_v43 = vsel %vm4987_vm5, %v6825_v37, 0 }
 0x4ef   :  { %v6941_v42 = vand.u32 4294901760, %v35155_v35  ;;  %v35164_v22 = vand.u32 4294901760, %v6828_v43 }
 0x4f1   :  { %v6942_v47 = vsub.f32 %v35155_v35, %v6941_v42  ;;  %v6899_v48 = vsub.f32 %v6828_v43, %v35164_v22  ;;  %v7280_v51 = vpop.permute.xlu1 %7279 }
 0x4f2   :  { %v7283_v55 = vsel %vm4987_vm5, %v7280_v51, 0 }
 0x4f3   :  { %v34135_v33 = vpop.eup %34134  ;;  %v6943_v50 = vand.u32 4294901760, %v6942_v47  ;;  %v6900_v52 = vand.u32 4294901760, %v6899_v48  ;;  %v7353_v57 = vand.u32 4294901760, %v7283_v55 }
 0x4f4   :  { %v5914_v36 = vmul.f32 %v34135_v33, %v34131_v10 }
 0x4f5   :  { %v6901_v56 = vsub.f32 %v6899_v48, %v6900_v52  ;;  %v7354_v59 = vsub.f32 %v7283_v55, %v7353_v57 }
 0x4f6   :  { %v6371_v40 = vsel %vm4987_vm5, %v5914_v36, 0 }
 0x4f7   :  { %v6439_v41 = vand.u32 4294901760, %v6371_v40  ;;  %v6902_v60 = vand.u32 4294901760, %v6901_v56  ;;  %v7355_v62 = vand.u32 4294901760, %v7354_v59 }
 0x4f9   :  { %v6440_v15 = vsub.f32 %v6371_v40, %v6439_v41  ;;  %31552 = vmatmul.mubr.f32.vlgmr.msra.gmra.mxu1 %v6439_v41  ;;  %v7356_v63 = vsub.f32 %v7354_v59, %v7355_v62 }
 0x4fa   :  { %31560 = vmatpush3.msra.mxu1 %v35125_v12  ;;  %31561 = vmatprep.mubr.msk.f32.mxu1 %vm34237_vm1, %v34236_v3 }
 0x4fb   :  { %31569 = vmatprep.subr.mxu1 %v34236_v3  ;;  %v6441_v45 = vand.u32 4294901760, %v6440_v15  ;;  %v7357_v1 = vand.u32 4294901760, %v7356_v63 }
 0x4fd   :  { %31562 = vmatmul.mubr.f32.vlgmr.msra.gmra.mxu1 %v6441_v45  ;;  %v6442_v0 = vsub.f32 %v6440_v15, %v6441_v45 }
 0x4fe   :  { %31570 = vmatpush3.msra.mxu1 %v35125_v12  ;;  %31571 = vmatprep.mubr.msk.f32.mxu1 %vm34237_vm1, %v34236_v3 }
 0x4ff   :  { %31579 = vmatprep.subr.mxu1 %v34236_v3  ;;  %v6443_v49 = vand.u32 4294901760, %v6442_v0 }
 0x501   :  { %31547 = vmatmul.mubr.f32.vlgmr.msra.gmra.mxu0 %v6443_v49  ;;  %31572 = vmatmul.mubr.f32.vlgmr.msra.gmra.mxu1 %v6439_v41 }
 0x502   :  { %31555 = vmatpush3.msra.mxu0 %v35128_v21  ;;  %31580 = vmatpush3.xpose.msra.mxu1 %v6943_v50 }
 0x503   :  { %31556 = vmatprep.mubr.msk.f32.mxu0 %vm34237_vm1, %v34236_v3  ;;  %31564 = vmatprep.subr.mxu0 %v34236_v3 }
 0x504   :  { %31581 = vmatprep.mubr.msk.f32.mxu1 %vm34237_vm1, %v34236_v3  ;;  %31589 = vmatprep.subr.mxu1 %v34236_v3 }
 0x505   :  { %31557 = vmatmul.mubr.f32.vlgmr.msra.gmra.mxu0 %v6440_v15  ;;  %31582 = vmatmul.mubr.f32.vlgmr.msra.gmra.mxu1 %v35164_v22 }
 0x506   :  { %31565 = vmatpush3.msra.mxu0 %v6482_v39  ;;  %31590 = vmatpush3.xpose.msra.mxu1 %v6863_v32 }
 0x507   :  { %31566 = vmatprep.mubr.msk.f32.mxu0 %vm34237_vm1, %v34236_v3  ;;  %31574 = vmatprep.subr.mxu0 %v34236_v3 }
 0x508   :  { %31591 = vmatprep.mubr.msk.f32.mxu1 %vm34237_vm1, %v34236_v3  ;;  %31599 = vmatprep.subr.mxu1 %v34236_v3 }
 0x509   :  { %31567 = vmatmul.mubr.f32.vlgmr.msra.gmra.mxu0 %v6439_v41  ;;  %31592 = vmatmul.mubr.f32.vlgmr.msra.gmra.mxu1 %v6900_v52 }
 0x50a   :  { %31575 = vmatpush3.xpose.msra.mxu0 %v6863_v32  ;;  %31600 = vmatpush3.xpose.msra.mxu1 %v6863_v32 }
 0x50b   :  { %31576 = vmatprep.mubr.msk.f32.mxu0 %vm34237_vm1, %v34236_v3  ;;  %31584 = vmatprep.subr.mxu0 %v34236_v3 }
 0x50c   :  { %31601 = vmatprep.mubr.msk.f32.mxu1 %vm34237_vm1, %v34236_v3  ;;  %31609 = vmatprep.subr.mxu1 %v34236_v3 }
 0x50d   :  { %31577 = vmatmul.mubr.f32.vlgmr.msra.gmra.mxu0 %v6902_v60  ;;  %31602 = vmatmul.mubr.f32.vlgmr.msra.gmra.mxu1 %v35164_v22 }
 0x50e   :  { %31585 = vmatpush3.xpose.msra.mxu0 %v35155_v35  ;;  %31610 = vmatpush3.xpose.msra.mxu1 %v7398_v61 }
 0x50f   :  { %31586 = vmatprep.mubr.msk.f32.mxu0 %vm34237_vm1, %v34236_v3  ;;  %31594 = vmatprep.subr.mxu0 %v34236_v3 }
 0x510   :  { %31611 = vmatprep.mubr.msk.f32.mxu1 %vm34237_vm1, %v34236_v3  ;;  %31619 = vmatprep.subr.mxu1 %v34236_v3 }
 0x511   :  { %31587 = vmatmul.mubr.f32.vlgmr.msra.gmra.mxu0 %v6899_v48  ;;  %31612 = vmatmul.mubr.f32.vlgmr.msra.gmra.mxu1 %v7353_v57 }
 0x512   :  { %31595 = vmatpush3.xpose.msra.mxu0 %v6941_v42  ;;  %31620 = vmatpush3.xpose.msra.mxu1 %v35167_v46 }
 0x513   :  { %31596 = vmatprep.mubr.msk.f32.mxu0 %vm34237_vm1, %v34236_v3  ;;  %31604 = vmatprep.subr.mxu0 %v34236_v3 }
 0x514   :  { %31621 = vmatprep.mubr.msk.f32.mxu1 %vm34237_vm1, %v34236_v3  ;;  %31629 = vmatprep.subr.mxu1 %v34236_v3 }
 0x515   :  { %31597 = vmatmul.mubr.f32.vlgmr.msra.gmra.mxu0 %v35164_v22  ;;  %31622 = vmatmul.mubr.f32.vlgmr.msra.gmra.mxu1 %v7355_v62 }
 0x516   :  { %31605 = vmatpush3.xpose.msra.mxu0 %v35167_v46  ;;  %31630 = vmatpush3.xpose.msra.mxu1 %v35167_v46 }
 0x517   :  { %31606 = vmatprep.mubr.msk.f32.mxu0 %vm34237_vm1, %v34236_v3  ;;  %31614 = vmatprep.subr.mxu0 %v34236_v3 }
 0x518   :  { %31631 = vmatprep.mubr.msk.f32.mxu1 %vm34237_vm1, %v34236_v3  ;;  %31639 = vmatprep.subr.mxu1 %v34236_v3 }
 0x519   :  { %31607 = vmatmul.mubr.f32.vlgmr.msra.gmra.mxu0 %v7357_v1  ;;  %31632 = vmatmul.mubr.f32.vlgmr.msra.gmra.mxu1 %v7353_v57 }
 0x51a   :  { %31615 = vmatpush3.xpose.msra.mxu0 %v35178_v8  ;;  %31616 = vmatprep.mubr.msk.f32.mxu0 %vm34237_vm1, %v34236_v3 }
 0x51b   :  { %31624 = vmatprep.subr.mxu0 %v34236_v3  ;;  %31641 = vmatprep.mubr.msk.f32.mxu1 %vm34237_vm1, %v34236_v3 }
 0x51d   :  { %31617 = vmatmul.mubr.f32.vlgmr.msra.gmra.mxu0 %v7354_v59 }
 0x51e   :  { %31625 = vmatpush3.xpose.msra.mxu0 %v7396_v53  ;;  %31626 = vmatprep.mubr.msk.f32.mxu0 %vm34237_vm1, %v34236_v3 }
 0x51f   :  { %31634 = vmatprep.subr.mxu0 %v34236_v3 }
 0x521   :  { %31627 = vmatmul.mubr.f32.vlgmr.msra.gmra.mxu0 %v7353_v57 }
 0x522   :  { %31636 = vmatprep.mubr.msk.f32.mxu0 %vm34237_vm1, %v34236_v3 }
 0x59c   :  { %v6069_v5 = vpop.f32.mrf.mxu1 }
 0x59e   :  { %v31523_v2 = vpop.f32.mrf.mxu1 }
 0x5a0   :  { %v6217_v14 = vpop.f32.mrf.mxu1 }
 0x5a2   :  { %v31533_v6 = vpop.f32.mrf.mxu1 }
 0x5a4   :  { %v5993_v7 = vpop.f32.mrf.mxu0  ;;  %v6363_v9 = vpop.f32.mrf.mxu1 }
 0x5a5   :  { %v6070_v16 = vadd.f32 %v6069_v5, %v5993_v7 }
 0x5a6   :  { %v31518_v27 = vpop.f32.mrf.mxu0  ;;  %v31543_v10 = vpop.f32.mrf.mxu1 }
 0x5a8   :  { %v6143_v17 = vpop.f32.mrf.mxu0 }
 0x5a9   :  { %v6144_v4 = vadd.f32 %v6143_v17, %v6070_v16 }
 0x5aa   :  { %v31528_v12 = vpop.f32.mrf.mxu0 }
 0x5ab   :  { %v6218_v13 = vadd.f32 %v6217_v14, %v6144_v4 }
 0x5ac   :  { %v6291_v21 = vpop.f32.mrf.mxu0 }
 0x5ad   :  { %v6292_v23 = vadd.f32 %v6291_v21, %v6218_v13 }
 0x5ae   :  { %v31538_v31 = vpop.f32.mrf.mxu0 }
 0x5af   :  { %v6364_v34 = vadd.f32 %v6363_v9, %v6292_v23 }
 0x5b1   :  { %6819 = vst.msk [vmem:[#allocation4] sm:$0xff] %vm4987_vm5, %v6364_v34 }
 0x5b9   :  { %v6521_v39 = vpop.f32.mrf.mxu1 }
 0x5bb   :  { %v31553_v18 = vpop.f32.mrf.mxu1 }
 0x5bd   :  { %v6669_v19 = vpop.f32.mrf.mxu1 }
 0x5bf   :  { %v31563_v20 = vpop.f32.mrf.mxu1 }
 0x5c1   :  { %v6445_v24 = vpop.f32.mrf.mxu0  ;;  %v6815_v25 = vpop.f32.mrf.mxu1 }
 0x5c2   :  { %v6522_v29 = vadd.f32 %v6521_v39, %v6445_v24 }
 0x5c3   :  { %v31548_v26 = vpop.f32.mrf.mxu0  ;;  %v31573_v28 = vpop.f32.mrf.mxu1 }
 0x5c5   :  { %v6595_v30 = vpop.f32.mrf.mxu0  ;;  %v6980_v32 = vpop.f32.mrf.mxu1 }
 0x5c6   :  { %v6596_v33 = vadd.f32 %v6595_v30, %v6522_v29 }
 0x5c7   :  { %v31558_v35 = vpop.f32.mrf.mxu0  ;;  %v31583_v36 = vpop.f32.mrf.mxu1 }
 0x5c8   :  { %v6670_v37 = vadd.f32 %v6669_v19, %v6596_v33 }
 0x5c9   :  { %v6743_v38 = vpop.f32.mrf.mxu0  ;;  %v7128_v40 = vpop.f32.mrf.mxu1 }
 0x5ca   :  { %v6744_v41 = vadd.f32 %v6743_v38, %v6670_v37 }
 0x5cb   :  { %v31568_v42 = vpop.f32.mrf.mxu0  ;;  %v31593_v43 = vpop.f32.mrf.mxu1 }
 0x5cc   :  { %v6816_v44 = vadd.f32 %v6815_v25, %v6744_v41 }
 0x5cd   :  { %v6904_v15 = vpop.f32.mrf.mxu0  ;;  %v7274_v22 = vpop.f32.mrf.mxu1 }
 0x5ce   :  { %6820 = vst.msk [vmem:[#allocation4 + $0x8] sm:$0xff] %vm4987_vm5, %v6816_v44  ;;  %v6981_v47 = vadd.f32 %v6980_v32, %v6904_v15 }
 0x5cf   :  { %v31578_v45 = vpop.f32.mrf.mxu0  ;;  %v31603_v46 = vpop.f32.mrf.mxu1 }
 0x5d1   :  { %v7054_v0 = vpop.f32.mrf.mxu0  ;;  %v7435_v48 = vpop.f32.mrf.mxu1 }
 0x5d2   :  { %v7055_v49 = vadd.f32 %v7054_v0, %v6981_v47 }
 0x5d3   :  { %v31588_v8 = vpop.f32.mrf.mxu0  ;;  %v31613_v50 = vpop.f32.mrf.mxu1 }
 0x5d4   :  { %v7129_v51 = vadd.f32 %v7128_v40, %v7055_v49 }
 0x5d5   :  { %v7202_v52 = vpop.f32.mrf.mxu0  ;;  %v7583_v53 = vpop.f32.mrf.mxu1 }
 0x5d6   :  { %v7203_v55 = vadd.f32 %v7202_v52, %v7129_v51 }
 0x5d7   :  { %v31598_v56 = vpop.f32.mrf.mxu0  ;;  %v31623_v57 = vpop.f32.mrf.mxu1 }
 0x5d8   :  { %v7275_v58 = vadd.f32 %v7274_v22, %v7203_v55 }
 0x5d9   :  { %v7359_v59 = vpop.f32.mrf.mxu0  ;;  %v7729_v60 = vpop.f32.mrf.mxu1 }
 0x5da   :  { %v7733_v61 = vmul.f32 0.35355338, %v7275_v58  ;;  %v7436_v1 = vadd.f32 %v7435_v48, %v7359_v59 }
 0x5db   :  { %v31608_v62 = vpop.f32.mrf.mxu0  ;;  %v31633_v63 = vpop.f32.mrf.mxu1 }
 0x5dc   :  { %v7735_v5 = vsel %vm4987_vm5, %v7733_v61, -inf }
 0x5dd   :  { %7736 = vmax.xlane.f32.xlu1 %v7735_v5  ;;  %v7509_v2 = vpop.f32.mrf.mxu0 }
 0x5de   :  { %v7510_v14 = vadd.f32 %v7509_v2, %v7436_v1 }
 0x5df   :  { %v31618_v6 = vpop.f32.mrf.mxu0 }
 0x5e0   :  { %v7584_v7 = vadd.f32 %v7583_v53, %v7510_v14 }
 0x5e1   :  { %v7657_v9 = vpop.f32.mrf.mxu0 }
 0x5e2   :  { %v7658_v27 = vadd.f32 %v7657_v9, %v7584_v7 }
 0x5e3   :  { %v31628_v10 = vpop.f32.mrf.mxu0 }
 0x5e4   :  { %v7730_v16 = vadd.f32 %v7729_v60, %v7658_v27 }
 0x5e6   :  { %v7734_v17 = vmul.f32 0.35355338, %v7730_v16 }
 0x5e8   :  { %v7738_v4 = vsel %vm4987_vm5, %v7734_v17, -inf }
 0x5e9   :  { %7739 = vmax.xlane.f32.xlu0 %v7738_v4 }
 0x5ff   :  { %8209 = vrot.lane.b32.xlu0 %v35061_v54, %s34243_s29 }
 0x603   :  { %9132 = vrot.lane.b32.xlu0 %v35061_v54, %s34244_s30 }
 0x666   :  { %v7737_v12 = vpop.xlane.xlu1 %7736 }
 0x667   :  { %v7741_v13 = vsub.f32 %v7733_v61, %v7737_v12 }
 0x669   :  { %v7743_v21 = vmul.f32 1.442695, %v7741_v13 }
 0x66b   :  { %34136 = vpow2.f32 %v7743_v21 }
 0x672   :  { %v7740_v34 = vpop.xlane.xlu0 %7739 }
 0x673   :  { %v7742_v39 = vsub.f32 %v7734_v17, %v7740_v34 }
 0x675   :  { %v7745_v18 = vmul.f32 1.442695, %v7742_v39 }
 0x676   :  { %v8210_v29 = vpop.permute.xlu0 %8209 }
 0x677   :  { %34138 = vpow2.f32 %v7745_v18  ;;  %v35264_v32 = vand.u32 4294901760, %v8210_v29 }
 0x678   :  { %v34137_v23 = vpop.eup %34136 }
 0x679   :  { %v7747_v31 = vsel %vm4987_vm5, %v34137_v23, 0.0 }
 0x67a   :  { %7748 = vadd.xlane.f32.xlu1 %v7747_v31  ;;  %v9133_v51 = vpop.permute.xlu0 %9132 }
 0x67b   :  { %v9136_v57 = vsel %vm4987_vm5, %v9133_v51, 0 }
 0x67c   :  { %v35308_v61 = vand.u32 4294901760, %v9136_v57 }
 0x67e   :  { %v35319_v2 = vsub.f32 %v9136_v57, %v35308_v61 }
 0x680   :  { %v9247_v9 = vand.u32 4294901760, %v35319_v2 }
 0x682   :  { %v9248_v17 = vsub.f32 %v35319_v2, %v9247_v9 }
 0x684   :  { %v35253_v19 = vpop.eup %34138  ;;  %v9249_v13 = vand.u32 4294901760, %v9248_v17 }
 0x685   :  { %v7750_v20 = vsel %vm4987_vm5, %v35253_v19, 0.0 }
 0x68b   :  { %7757 = vrot.lane.b32.xlu1 %v35056_v11, %s34243_s29 }
 0x6af   :  { %7751 = vadd.xlane.f32.xlu1 %v7750_v20 }
 0x6c0   :  { %8677 = vrot.lane.b32.xlu1 %v35056_v11, %s34244_s30 }
 0x6c4   :  { %8675 = vrot.lane.b32.xlu1 %v35056_v11, %s34245_s9  ;;  %v35267_v11 = vsub.f32 %v8210_v29, %v35264_v32 }
 0x6c6   :  { %v8324_v40 = vand.u32 4294901760, %v35267_v11 }
 0x6c8   :  { %9130 = vrot.lane.b32.xlu1 %v35061_v54, %s34245_s9  ;;  %v8325_v43 = vsub.f32 %v35267_v11, %v8324_v40 }
 0x6ca   :  { %v8326_v22 = vand.u32 4294901760, %v8325_v43 }
 0x703   :  { %v7749_v24 = vpop.xlane.xlu1 %7748 }
 0x704   :  { %34140 = vrcp.f32 %v7749_v24 }
 0x707   :  { %v7758_v25 = vpop.permute.xlu1 %7757 }
 0x708   :  { %v7794_v26 = vand.u32 4294901760, %v7758_v25 }
 0x70a   :  { %v7871_v28 = vsub.f32 %v7758_v25, %v7794_v26  ;;  %31635 = vmatpush3.msra.mxu0 %v7794_v26 }
 0x70b   :  { %31644 = vmatprep.subr.mxu0 %v34236_v3 }
 0x70c   :  { %v7872_v30 = vand.u32 4294901760, %v7871_v28 }
 0x70e   :  { %v7873_v33 = vsub.f32 %v7871_v28, %v7872_v30 }
 0x710   :  { %v7874_v35 = vand.u32 4294901760, %v7873_v33 }
 0x711   :  { %v34141_v36 = vpop.eup %34140 }
 0x712   :  { %31640 = vmatpush3.msra.mxu1 %v7874_v35  ;;  %v7755_v54 = vmul.f32 %v34141_v36, %v34137_v23 }
 0x713   :  { %31649 = vmatprep.subr.mxu1 %v34236_v3 }
 0x714   :  { %v7761_v37 = vsel %vm4987_vm5, %v7755_v54, 0 }
 0x715   :  { %v7829_v38 = vand.u32 4294901760, %v7761_v37 }
 0x717   :  { %v7830_v41 = vsub.f32 %v7761_v37, %v7829_v38  ;;  %31642 = vmatmul.mubr.f32.vlgmr.msra.gmra.mxu1 %v7829_v38 }
 0x718   :  { %31650 = vmatpush3.msra.mxu1 %v7794_v26  ;;  %31651 = vmatprep.mubr.msk.f32.mxu1 %vm34237_vm1, %v34236_v3 }
 0x719   :  { %31659 = vmatprep.subr.mxu1 %v34236_v3  ;;  %v7831_v42 = vand.u32 4294901760, %v7830_v41 }
 0x71b   :  { %31652 = vmatmul.mubr.f32.vlgmr.msra.gmra.mxu1 %v7831_v42  ;;  %v7832_v44 = vsub.f32 %v7830_v41, %v7831_v42 }
 0x71c   :  { %31660 = vmatpush3.msra.mxu1 %v7794_v26  ;;  %31661 = vmatprep.mubr.msk.f32.mxu1 %vm34237_vm1, %v34236_v3 }
 0x71d   :  { %31669 = vmatprep.subr.mxu1 %v34236_v3  ;;  %v7833_v15 = vand.u32 4294901760, %v7832_v44 }
 0x71f   :  { %31637 = vmatmul.mubr.f32.vlgmr.msra.gmra.mxu0 %v7833_v15  ;;  %31662 = vmatmul.mubr.f32.vlgmr.msra.gmra.mxu1 %v7829_v38 }
 0x720   :  { %31645 = vmatpush3.msra.mxu0 %v7871_v28  ;;  %31670 = vmatpush3.msra.mxu1 %v8326_v22 }
 0x721   :  { %31646 = vmatprep.mubr.msk.f32.mxu0 %vm34237_vm1, %v34236_v3  ;;  %31654 = vmatprep.subr.mxu0 %v34236_v3 }
 0x722   :  { %31671 = vmatprep.mubr.msk.f32.mxu1 %vm34237_vm1, %v34236_v3  ;;  %31679 = vmatprep.subr.mxu1 %v34236_v3 }
 0x723   :  { %31647 = vmatmul.mubr.f32.vlgmr.msra.gmra.mxu0 %v7830_v41 }
 0x724   :  { %31655 = vmatpush3.msra.mxu0 %v7872_v30  ;;  %31656 = vmatprep.mubr.msk.f32.mxu0 %vm34237_vm1, %v34236_v3 }
 0x725   :  { %31664 = vmatprep.subr.mxu0 %v34236_v3 }
 0x727   :  { %31657 = vmatmul.mubr.f32.vlgmr.msra.gmra.mxu0 %v7829_v38 }
 0x728   :  { %31665 = vmatpush3.msra.mxu0 %v35264_v32  ;;  %31666 = vmatprep.mubr.msk.f32.mxu0 %vm34237_vm1, %v34236_v3 }
 0x729   :  { %31674 = vmatprep.subr.mxu0 %v34236_v3 }
 0x738   :  { %v7752_v45 = vpop.xlane.xlu1 %7751 }
 0x739   :  { %34142 = vrcp.f32 %v7752_v45 }
 0x73c   :  { %v8678_v46 = vpop.permute.xlu1 %8677 }
 0x73d   :  { %v8681_v47 = vsel %vm4987_vm5, %v8678_v46, 0 }
 0x73e   :  { %v8714_v0 = vand.u32 4294901760, %v8681_v47 }
 0x740   :  { %v35295_v49 = vsub.f32 %v8681_v47, %v8714_v0  ;;  %v8676_v50 = vpop.permute.xlu1 %8675 }
 0x741   :  { %v8679_v56 = vsel %vm4987_vm5, %v8676_v50, 0 }
 0x742   :  { %v8792_v55 = vand.u32 4294901760, %v35295_v49  ;;  %v35305_v59 = vand.u32 4294901760, %v8679_v56 }
 0x744   :  { %v8793_v62 = vsub.f32 %v35295_v49, %v8792_v55  ;;  %v8750_v1 = vsub.f32 %v8679_v56, %v35305_v59  ;;  %v9131_v6 = vpop.permute.xlu1 %9130 }
 0x745   :  { %v9134_v27 = vsel %vm4987_vm5, %v9131_v6, 0 }
 0x746   :  { %v34143_v48 = vpop.eup %34142  ;;  %v8794_v14 = vand.u32 4294901760, %v8793_v62  ;;  %v8751_v7 = vand.u32 4294901760, %v8750_v1  ;;  %v9204_v16 = vand.u32 4294901760, %v9134_v27 }
 0x747   :  { %v7756_v8 = vmul.f32 %v34143_v48, %v35253_v19 }
 0x748   :  { %v8752_v10 = vsub.f32 %v8750_v1, %v8751_v7  ;;  %v9205_v4 = vsub.f32 %v9134_v27, %v9204_v16 }
 0x749   :  { %v8213_v52 = vsel %vm4987_vm5, %v7756_v8, 0 }
 0x74a   :  { %v8281_v53 = vand.u32 4294901760, %v8213_v52  ;;  %v8753_v12 = vand.u32 4294901760, %v8752_v10  ;;  %v9206_v21 = vand.u32 4294901760, %v9205_v4 }
 0x74c   :  { %v8282_v58 = vsub.f32 %v8213_v52, %v8281_v53  ;;  %31672 = vmatmul.mubr.f32.vlgmr.msra.gmra.mxu1 %v8281_v53  ;;  %v9207_v23 = vsub.f32 %v9205_v4, %v9206_v21 }
 0x74d   :  { %31680 = vmatpush3.msra.mxu1 %v35264_v32  ;;  %31681 = vmatprep.mubr.msk.f32.mxu1 %vm34237_vm1, %v34236_v3 }
 0x74e   :  { %31689 = vmatprep.subr.mxu1 %v34236_v3  ;;  %v8283_v60 = vand.u32 4294901760, %v8282_v58  ;;  %v9208_v31 = vand.u32 4294901760, %v9207_v23 }
 0x750   :  { %31682 = vmatmul.mubr.f32.vlgmr.msra.gmra.mxu1 %v8283_v60  ;;  %v8284_v63 = vsub.f32 %v8282_v58, %v8283_v60 }
 0x751   :  { %31690 = vmatpush3.msra.mxu1 %v35264_v32  ;;  %31691 = vmatprep.mubr.msk.f32.mxu1 %vm34237_vm1, %v34236_v3 }
 0x752   :  { %31699 = vmatprep.subr.mxu1 %v34236_v3  ;;  %v8285_v5 = vand.u32 4294901760, %v8284_v63 }
 0x754   :  { %31667 = vmatmul.mubr.f32.vlgmr.msra.gmra.mxu0 %v8285_v5  ;;  %31692 = vmatmul.mubr.f32.vlgmr.msra.gmra.mxu1 %v8281_v53 }
 0x755   :  { %31675 = vmatpush3.msra.mxu0 %v35267_v11  ;;  %31700 = vmatpush3.xpose.msra.mxu1 %v8794_v14 }
 0x756   :  { %31676 = vmatprep.mubr.msk.f32.mxu0 %vm34237_vm1, %v34236_v3  ;;  %31684 = vmatprep.subr.mxu0 %v34236_v3 }
 0x757   :  { %31701 = vmatprep.mubr.msk.f32.mxu1 %vm34237_vm1, %v34236_v3  ;;  %31709 = vmatprep.subr.mxu1 %v34236_v3 }
 0x758   :  { %31677 = vmatmul.mubr.f32.vlgmr.msra.gmra.mxu0 %v8282_v58  ;;  %31702 = vmatmul.mubr.f32.vlgmr.msra.gmra.mxu1 %v35305_v59 }
 0x759   :  { %31685 = vmatpush3.msra.mxu0 %v8324_v40  ;;  %31710 = vmatpush3.xpose.msra.mxu1 %v8714_v0 }
 0x75a   :  { %31686 = vmatprep.mubr.msk.f32.mxu0 %vm34237_vm1, %v34236_v3  ;;  %31694 = vmatprep.subr.mxu0 %v34236_v3 }
 0x75b   :  { %31711 = vmatprep.mubr.msk.f32.mxu1 %vm34237_vm1, %v34236_v3  ;;  %31719 = vmatprep.subr.mxu1 %v34236_v3 }
 0x75c   :  { %31687 = vmatmul.mubr.f32.vlgmr.msra.gmra.mxu0 %v8281_v53  ;;  %31712 = vmatmul.mubr.f32.vlgmr.msra.gmra.mxu1 %v8751_v7 }
 0x75d   :  { %31695 = vmatpush3.xpose.msra.mxu0 %v8714_v0  ;;  %31720 = vmatpush3.xpose.msra.mxu1 %v8714_v0 }
 0x75e   :  { %31696 = vmatprep.mubr.msk.f32.mxu0 %vm34237_vm1, %v34236_v3  ;;  %31704 = vmatprep.subr.mxu0 %v34236_v3 }
 0x75f   :  { %31721 = vmatprep.mubr.msk.f32.mxu1 %vm34237_vm1, %v34236_v3  ;;  %31729 = vmatprep.subr.mxu1 %v34236_v3 }
 0x760   :  { %31697 = vmatmul.mubr.f32.vlgmr.msra.gmra.mxu0 %v8753_v12  ;;  %31722 = vmatmul.mubr.f32.vlgmr.msra.gmra.mxu1 %v35305_v59 }
 0x761   :  { %31705 = vmatpush3.xpose.msra.mxu0 %v35295_v49  ;;  %31730 = vmatpush3.xpose.msra.mxu1 %v9249_v13 }
 0x762   :  { %31706 = vmatprep.mubr.msk.f32.mxu0 %vm34237_vm1, %v34236_v3  ;;  %31714 = vmatprep.subr.mxu0 %v34236_v3 }
 0x763   :  { %31731 = vmatprep.mubr.msk.f32.mxu1 %vm34237_vm1, %v34236_v3  ;;  %31739 = vmatprep.subr.mxu1 %v34236_v3 }
 0x764   :  { %31707 = vmatmul.mubr.f32.vlgmr.msra.gmra.mxu0 %v8750_v1  ;;  %31732 = vmatmul.mubr.f32.vlgmr.msra.gmra.mxu1 %v9204_v16 }
 0x765   :  { %31715 = vmatpush3.xpose.msra.mxu0 %v8792_v55  ;;  %31740 = vmatpush3.xpose.msra.mxu1 %v35308_v61 }
 0x766   :  { %31716 = vmatprep.mubr.msk.f32.mxu0 %vm34237_vm1, %v34236_v3  ;;  %31724 = vmatprep.subr.mxu0 %v34236_v3 }
 0x767   :  { %31741 = vmatprep.mubr.msk.f32.mxu1 %vm34237_vm1, %v34236_v3  ;;  %31749 = vmatprep.subr.mxu1 %v34236_v3 }
 0x768   :  { %31717 = vmatmul.mubr.f32.vlgmr.msra.gmra.mxu0 %v35305_v59  ;;  %31742 = vmatmul.mubr.f32.vlgmr.msra.gmra.mxu1 %v9206_v21 }
 0x769   :  { %31725 = vmatpush3.xpose.msra.mxu0 %v35308_v61  ;;  %31750 = vmatpush3.xpose.msra.mxu1 %v35308_v61 }
 0x76a   :  { %31726 = vmatprep.mubr.msk.f32.mxu0 %vm34237_vm1, %v34236_v3  ;;  %31734 = vmatprep.subr.mxu0 %v34236_v3 }
 0x76b   :  { %31751 = vmatprep.mubr.msk.f32.mxu1 %vm34237_vm1, %v34236_v3  ;;  %31759 = vmatprep.subr.mxu1 %v34236_v3 }
 0x76c   :  { %31727 = vmatmul.mubr.f32.vlgmr.msra.gmra.mxu0 %v9208_v31  ;;  %31752 = vmatmul.mubr.f32.vlgmr.msra.gmra.mxu1 %v9204_v16 }
 0x76d   :  { %31735 = vmatpush3.xpose.msra.mxu0 %v35319_v2  ;;  %31736 = vmatprep.mubr.msk.f32.mxu0 %vm34237_vm1, %v34236_v3 }
 0x76e   :  { %31744 = vmatprep.subr.mxu0 %v34236_v3  ;;  %31761 = vmatprep.mubr.msk.f32.mxu1 %vm34237_vm1, %v34236_v3 }
 0x770   :  { %31737 = vmatmul.mubr.f32.vlgmr.msra.gmra.mxu0 %v9205_v4 }
 0x771   :  { %31745 = vmatpush3.xpose.msra.mxu0 %v9247_v9  ;;  %31746 = vmatprep.mubr.msk.f32.mxu0 %vm34237_vm1, %v34236_v3 }
 0x772   :  { %31754 = vmatprep.subr.mxu0 %v34236_v3 }
 0x774   :  { %31747 = vmatmul.mubr.f32.vlgmr.msra.gmra.mxu0 %v9204_v16 }
 0x775   :  { %31756 = vmatprep.mubr.msk.f32.mxu0 %vm34237_vm1, %v34236_v3 }
 0x7d7   :  { %v7911_v34 = vpop.f32.mrf.mxu1 }
 0x7d9   :  { %v31643_v39 = vpop.f32.mrf.mxu1 }
 0x7db   :  { %v8059_v18 = vpop.f32.mrf.mxu1 }
 0x7dd   :  { %v31653_v19 = vpop.f32.mrf.mxu1 }
 0x7df   :  { %v7835_v20 = vpop.f32.mrf.mxu0  ;;  %v8205_v24 = vpop.f32.mrf.mxu1 }
 0x7e0   :  { %v7912_v25 = vadd.f32 %v7911_v34, %v7835_v20 }
 0x7e1   :  { %v31638_v26 = vpop.f32.mrf.mxu0  ;;  %v31663_v28 = vpop.f32.mrf.mxu1 }
 0x7e3   :  { %v7985_v29 = vpop.f32.mrf.mxu0 }
 0x7e4   :  { %v7986_v30 = vadd.f32 %v7985_v29, %v7912_v25  ;;  %v34208_v29 = vld [vmem:[#allocation3] sm:$0xff] }
 0x7e5   :  { %v31648_v32 = vpop.f32.mrf.mxu0 }
 0x7e6   :  { %v8060_v33 = vadd.f32 %v8059_v18, %v7986_v30  ;;  %v35390_v30 = vld [vmem:[#allocation3] sm:$0xff]  ;;  %v35396_v32 = vld [vmem:[#allocation3 + $0x8] sm:$0xff] }
 0x7e7   :  { %v8133_v35 = vpop.f32.mrf.mxu0 }
 0x7e8   :  { %v8134_v36 = vadd.f32 %v8133_v35, %v8060_v33 }
 0x7e9   :  { %v31658_v11 = vpop.f32.mrf.mxu0 }
 0x7ea   :  { %v35383_v54 = vadd.f32 %v8205_v24, %v8134_v36 }
 0x80c   :  { %v8363_v37 = vpop.f32.mrf.mxu1 }
 0x80e   :  { %v31673_v38 = vpop.f32.mrf.mxu1 }
 0x810   :  { %v8511_v40 = vpop.f32.mrf.mxu1 }
 0x812   :  { %v31683_v41 = vpop.f32.mrf.mxu1 }
 0x814   :  { %v8287_v42 = vpop.f32.mrf.mxu0  ;;  %v8657_v43 = vpop.f32.mrf.mxu1 }
 0x815   :  { %v8364_v44 = vadd.f32 %v8363_v37, %v8287_v42 }
 0x816   :  { %v31668_v15 = vpop.f32.mrf.mxu0  ;;  %v31693_v22 = vpop.f32.mrf.mxu1 }
 0x818   :  { %v8437_v45 = vpop.f32.mrf.mxu0  ;;  %v8831_v46 = vpop.f32.mrf.mxu1 }
 0x819   :  { %v8438_v47 = vadd.f32 %v8437_v45, %v8364_v44 }
 0x81a   :  { %v31678_v0 = vpop.f32.mrf.mxu0  ;;  %v31703_v48 = vpop.f32.mrf.mxu1 }
 0x81b   :  { %v8512_v49 = vadd.f32 %v8511_v40, %v8438_v47  ;;  %v34209_v0 = vld [vmem:[#allocation3 + $0x8] sm:$0xff] }
 0x81c   :  { %v8585_v8 = vpop.f32.mrf.mxu0  ;;  %v8979_v50 = vpop.f32.mrf.mxu1 }
 0x81d   :  { %v8586_v51 = vadd.f32 %v8585_v8, %v8512_v49 }
 0x81e   :  { %v31688_v52 = vpop.f32.mrf.mxu0  ;;  %v31713_v53 = vpop.f32.mrf.mxu1 }
 0x81f   :  { %v35385_v55 = vadd.f32 %v8657_v43, %v8586_v51 }
 0x820   :  { %v8755_v56 = vpop.f32.mrf.mxu0  ;;  %v9125_v57 = vpop.f32.mrf.mxu1 }
 0x821   :  { %v8832_v60 = vadd.f32 %v8831_v46, %v8755_v56 }
 0x822   :  { %v31698_v58 = vpop.f32.mrf.mxu0  ;;  %v31723_v59 = vpop.f32.mrf.mxu1 }
 0x824   :  { %v8905_v61 = vpop.f32.mrf.mxu0  ;;  %v9286_v62 = vpop.f32.mrf.mxu1 }
 0x825   :  { %v8906_v63 = vadd.f32 %v8905_v61, %v8832_v60 }
 0x826   :  { %v31708_v1 = vpop.f32.mrf.mxu0  ;;  %v31733_v5 = vpop.f32.mrf.mxu1 }
 0x827   :  { %v8980_v2 = vadd.f32 %v8979_v50, %v8906_v63 }
 0x828   :  { %v9053_v14 = vpop.f32.mrf.mxu0  ;;  %v9434_v6 = vpop.f32.mrf.mxu1 }
 0x829   :  { %v9054_v7 = vadd.f32 %v9053_v14, %v8980_v2 }
 0x82a   :  { %v31718_v9 = vpop.f32.mrf.mxu0  ;;  %v31743_v27 = vpop.f32.mrf.mxu1 }
 0x82b   :  { %v9126_v10 = vadd.f32 %v9125_v57, %v9054_v7 }
 0x82c   :  { %v9210_v16 = vpop.f32.mrf.mxu0  ;;  %v9580_v17 = vpop.f32.mrf.mxu1 }
 0x82d   :  { %v9584_v4 = vmul.f32 0.35355338, %v9126_v10  ;;  %v9287_v21 = vadd.f32 %v9286_v62, %v9210_v16 }
 0x82e   :  { %v31728_v12 = vpop.f32.mrf.mxu0  ;;  %v31753_v13 = vpop.f32.mrf.mxu1 }
 0x82f   :  { %v9586_v23 = vsel %vm4987_vm5, %v9584_v4, -inf }
 0x830   :  { %9587 = vmax.xlane.f32.xlu0 %v9586_v23  ;;  %v9360_v31 = vpop.f32.mrf.mxu0 }
 0x831   :  { %v9361_v34 = vadd.f32 %v9360_v31, %v9287_v21 }
 0x832   :  { %v31738_v39 = vpop.f32.mrf.mxu0 }
 0x833   :  { %v9435_v18 = vadd.f32 %v9434_v6, %v9361_v34 }
 0x834   :  { %v9508_v19 = vpop.f32.mrf.mxu0 }
 0x835   :  { %v9509_v20 = vadd.f32 %v9508_v19, %v9435_v18 }
 0x836   :  { %v31748_v24 = vpop.f32.mrf.mxu0 }
 0x837   :  { %v9581_v25 = vadd.f32 %v9580_v17, %v9509_v20 }
 0x839   :  { %v9585_v26 = vmul.f32 0.35355338, %v9581_v25 }
 0x83b   :  { %v9589_v28 = vsel %vm4987_vm5, %v9585_v26, -inf }
 0x83c   :  { %9590 = vmax.xlane.f32.xlu1 %v9589_v28 }
 0x84d   :  { %9608 = vrot.lane.b32.xlu1 %v34208_v29, %s34246_s10 }
 0x851   :  { %10528 = vrot.lane.b32.xlu1 %v35390_v30, %s34247_s0 }
 0x855   :  { %10526 = vrot.lane.b32.xlu1 %v35390_v30, %s34248_s11 }
 0x859   :  { %10981 = vrot.lane.b32.xlu1 %v35396_v32, %s34248_s11 }
 0x8b9   :  { %v9588_v33 = vpop.xlane.xlu0 %9587 }
 0x8ba   :  { %v9592_v35 = vsub.f32 %v9584_v4, %v9588_v33 }
 0x8bc   :  { %v9594_v36 = vmul.f32 1.442695, %v9592_v35 }
 0x8be   :  { %34144 = vpow2.f32 %v9594_v36 }
 0x8c5   :  { %v9591_v11 = vpop.xlane.xlu1 %9590 }
 0x8c6   :  { %v9593_v37 = vsub.f32 %v9585_v26, %v9591_v11 }
 0x8c8   :  { %v9596_v38 = vmul.f32 1.442695, %v9593_v37 }
 0x8c9   :  { %v9609_v40 = vpop.permute.xlu1 %9608 }
 0x8ca   :  { %34146 = vpow2.f32 %v9596_v38  ;;  %v9645_v41 = vand.u32 4294901760, %v9609_v40 }
 0x8cb   :  { %v34145_v42 = vpop.eup %34144 }
 0x8cc   :  { %v35400_v43 = vsub.f32 %v9609_v40, %v9645_v41  ;;  %31755 = vmatpush3.msra.mxu0 %v9645_v41  ;;  %v9598_v44 = vsel %vm4987_vm5, %v34145_v42, 0.0 }
 0x8cd   :  { %9599 = vadd.xlane.f32.xlu0 %v9598_v44  ;;  %31764 = vmatprep.subr.mxu0 %v34236_v3  ;;  %v10529_v52 = vpop.permute.xlu1 %10528 }
 0x8ce   :  { %v9723_v15 = vand.u32 4294901760, %v35400_v43  ;;  %v10532_v59 = vsel %vm4987_vm5, %v10529_v52, 0 }
 0x8cf   :  { %v35419_v63 = vand.u32 4294901760, %v10532_v59 }
 0x8d0   :  { %v9724_v22 = vsub.f32 %v35400_v43, %v9723_v15 }
 0x8d1   :  { %v35428_v7 = vsub.f32 %v10532_v59, %v35419_v63  ;;  %v10527_v27 = vpop.permute.xlu1 %10526 }
 0x8d2   :  { %v9725_v45 = vand.u32 4294901760, %v9724_v22  ;;  %v10530_v12 = vsel %vm4987_vm5, %v10527_v27, 0 }
 0x8d3   :  { %v10643_v4 = vand.u32 4294901760, %v35428_v7  ;;  %v35441_v23 = vand.u32 4294901760, %v10530_v12 }
 0x8d4   :  { %31760 = vmatpush3.msra.mxu1 %v9725_v45 }
 0x8d5   :  { %31769 = vmatprep.subr.mxu1 %v34236_v3  ;;  %v10644_v34 = vsub.f32 %v35428_v7, %v10643_v4  ;;  %v10601_v19 = vsub.f32 %v10530_v12, %v35441_v23  ;;  %v10982_v26 = vpop.permute.xlu1 %10981 }
 0x8d6   :  { %v10985_v29 = vsel %vm4987_vm5, %v10982_v26, 0 }
 0x8d7   :  { %v34147_v46 = vpop.eup %34146  ;;  %v10645_v24 = vand.u32 4294901760, %v10644_v34  ;;  %v10602_v28 = vand.u32 4294901760, %v10601_v19  ;;  %v11055_v36 = vand.u32 4294901760, %v10985_v29 }
 0x8d8   :  { %v9601_v47 = vsel %vm4987_vm5, %v34147_v46, 0.0 }
 0x8d9   :  { %9602 = vadd.xlane.f32.xlu0 %v9601_v47  ;;  %v10603_v35 = vsub.f32 %v10601_v19, %v10602_v28  ;;  %v11056_v38 = vsub.f32 %v10985_v29, %v11055_v36 }
 0x8db   :  { %v10604_v37 = vand.u32 4294901760, %v10603_v35 }
 0x8ef   :  { %10060 = vrot.lane.b32.xlu0 %v34209_v0, %s34246_s10 }
 0x8f3   :  { %10983 = vrot.lane.b32.xlu0 %v35396_v32, %s34247_s0 }
 0x956   :  { %v9600_v48 = vpop.xlane.xlu0 %9599 }
 0x957   :  { %34148 = vrcp.f32 %v9600_v48 }
 0x962   :  { %v9603_v49 = vpop.xlane.xlu0 %9602 }
 0x963   :  { %34150 = vrcp.f32 %v9603_v49 }
 0x964   :  { %v34149_v8 = vpop.eup %34148 }
 0x965   :  { %v9606_v50 = vmul.f32 %v34149_v8, %v34145_v42 }
 0x966   :  { %v10061_v51 = vpop.permute.xlu0 %10060 }
 0x967   :  { %v10097_v53 = vand.u32 4294901760, %v10061_v51  ;;  %v9612_v56 = vsel %vm4987_vm5, %v9606_v50, 0 }
 0x968   :  { %v9680_v57 = vand.u32 4294901760, %v9612_v56 }
 0x969   :  { %v35412_v58 = vsub.f32 %v10061_v51, %v10097_v53 }
 0x96a   :  { %v9681_v60 = vsub.f32 %v9612_v56, %v9680_v57  ;;  %31762 = vmatmul.mubr.f32.vlgmr.msra.gmra.mxu1 %v9680_v57  ;;  %v10984_v10 = vpop.permute.xlu0 %10983 }
 0x96b   :  { %v10175_v61 = vand.u32 4294901760, %v35412_v58  ;;  %31770 = vmatpush3.msra.mxu1 %v9645_v41  ;;  %31771 = vmatprep.mubr.msk.f32.mxu1 %vm34237_vm1, %v34236_v3  ;;  %v10987_v13 = vsel %vm4987_vm5, %v10984_v10, 0 }
 0x96c   :  { %31779 = vmatprep.subr.mxu1 %v34236_v3  ;;  %v9682_v62 = vand.u32 4294901760, %v9681_v60  ;;  %v35449_v39 = vand.u32 4294901760, %v10987_v13 }
 0x96d   :  { %v10176_v1 = vsub.f32 %v35412_v58, %v10175_v61 }
 0x96e   :  { %31772 = vmatmul.mubr.f32.vlgmr.msra.gmra.mxu1 %v9682_v62  ;;  %v9683_v5 = vsub.f32 %v9681_v60, %v9682_v62  ;;  %v35459_v25 = vsub.f32 %v10987_v13, %v35449_v39 }
 0x96f   :  { %v10177_v2 = vand.u32 4294901760, %v10176_v1  ;;  %31780 = vmatpush3.msra.mxu1 %v9645_v41  ;;  %31781 = vmatprep.mubr.msk.f32.mxu1 %vm34237_vm1, %v34236_v3  ;;  %v11057_v41 = vand.u32 4294901760, %v11056_v38 }
 0x970   :  { %v34151_v14 = vpop.eup %34150  ;;  %31789 = vmatprep.subr.mxu1 %v34236_v3  ;;  %v9684_v6 = vand.u32 4294901760, %v9683_v5  ;;  %v11098_v33 = vand.u32 4294901760, %v35459_v25 }
 0x971   :  { %v9607_v9 = vmul.f32 %v34151_v14, %v34147_v46  ;;  %v11058_v42 = vsub.f32 %v11056_v38, %v11057_v41 }
 0x972   :  { %31757 = vmatmul.mubr.f32.vlgmr.msra.gmra.mxu0 %v9684_v6  ;;  %31782 = vmatmul.mubr.f32.vlgmr.msra.gmra.mxu1 %v9680_v57  ;;  %v11099_v11 = vsub.f32 %v35459_v25, %v11098_v33 }
 0x973   :  { %31765 = vmatpush3.msra.mxu0 %v35400_v43  ;;  %31790 = vmatpush3.msra.mxu1 %v10177_v2  ;;  %v10064_v16 = vsel %vm4987_vm5, %v9607_v9, 0  ;;  %v11059_v43 = vand.u32 4294901760, %v11058_v42 }
 0x974   :  { %31766 = vmatprep.mubr.msk.f32.mxu0 %vm34237_vm1, %v34236_v3  ;;  %31774 = vmatprep.subr.mxu0 %v34236_v3  ;;  %v10132_v17 = vand.u32 4294901760, %v10064_v16  ;;  %v11100_v40 = vand.u32 4294901760, %v11099_v11 }
 0x975   :  { %31791 = vmatprep.mubr.msk.f32.mxu1 %vm34237_vm1, %v34236_v3  ;;  %31799 = vmatprep.subr.mxu1 %v34236_v3 }
 0x976   :  { %31767 = vmatmul.mubr.f32.vlgmr.msra.gmra.mxu0 %v9681_v60  ;;  %v10133_v21 = vsub.f32 %v10064_v16, %v10132_v17  ;;  %31792 = vmatmul.mubr.f32.vlgmr.msra.gmra.mxu1 %v10132_v17 }
 0x977   :  { %31775 = vmatpush3.msra.mxu0 %v9723_v15  ;;  %31800 = vmatpush3.msra.mxu1 %v10097_v53 }
 0x978   :  { %31776 = vmatprep.mubr.msk.f32.mxu0 %vm34237_vm1, %v34236_v3  ;;  %31784 = vmatprep.subr.mxu0 %v34236_v3  ;;  %v10134_v31 = vand.u32 4294901760, %v10133_v21 }
 0x979   :  { %31801 = vmatprep.mubr.msk.f32.mxu1 %vm34237_vm1, %v34236_v3  ;;  %31809 = vmatprep.subr.mxu1 %v34236_v3 }
 0x97a   :  { %31777 = vmatmul.mubr.f32.vlgmr.msra.gmra.mxu0 %v9680_v57  ;;  %31802 = vmatmul.mubr.f32.vlgmr.msra.gmra.mxu1 %v10134_v31  ;;  %v10135_v18 = vsub.f32 %v10133_v21, %v10134_v31 }
 0x97b   :  { %31785 = vmatpush3.msra.mxu0 %v10097_v53  ;;  %31810 = vmatpush3.msra.mxu1 %v10097_v53 }
 0x97c   :  { %31786 = vmatprep.mubr.msk.f32.mxu0 %vm34237_vm1, %v34236_v3  ;;  %31794 = vmatprep.subr.mxu0 %v34236_v3  ;;  %v10136_v20 = vand.u32 4294901760, %v10135_v18 }
 0x97d   :  { %31811 = vmatprep.mubr.msk.f32.mxu1 %vm34237_vm1, %v34236_v3  ;;  %31819 = vmatprep.subr.mxu1 %v34236_v3 }
 0x97e   :  { %31787 = vmatmul.mubr.f32.vlgmr.msra.gmra.mxu0 %v10136_v20  ;;  %31812 = vmatmul.mubr.f32.vlgmr.msra.gmra.mxu1 %v10132_v17 }
 0x97f   :  { %31795 = vmatpush3.msra.mxu0 %v35412_v58  ;;  %31820 = vmatpush3.xpose.msra.mxu1 %v10645_v24 }
 0x980   :  { %31796 = vmatprep.mubr.msk.f32.mxu0 %vm34237_vm1, %v34236_v3  ;;  %31804 = vmatprep.subr.mxu0 %v34236_v3 }
 0x981   :  { %31821 = vmatprep.mubr.msk.f32.mxu1 %vm34237_vm1, %v34236_v3  ;;  %31829 = vmatprep.subr.mxu1 %v34236_v3 }
 0x982   :  { %31797 = vmatmul.mubr.f32.vlgmr.msra.gmra.mxu0 %v10133_v21  ;;  %31822 = vmatmul.mubr.f32.vlgmr.msra.gmra.mxu1 %v35441_v23 }
 0x983   :  { %31805 = vmatpush3.msra.mxu0 %v10175_v61  ;;  %31830 = vmatpush3.xpose.msra.mxu1 %v35419_v63 }
 0x984   :  { %31806 = vmatprep.mubr.msk.f32.mxu0 %vm34237_vm1, %v34236_v3  ;;  %31814 = vmatprep.subr.mxu0 %v34236_v3 }
 0x985   :  { %31831 = vmatprep.mubr.msk.f32.mxu1 %vm34237_vm1, %v34236_v3  ;;  %31839 = vmatprep.subr.mxu1 %v34236_v3 }
 0x986   :  { %31807 = vmatmul.mubr.f32.vlgmr.msra.gmra.mxu0 %v10132_v17  ;;  %31832 = vmatmul.mubr.f32.vlgmr.msra.gmra.mxu1 %v10602_v28 }
 0x987   :  { %31815 = vmatpush3.xpose.msra.mxu0 %v35419_v63  ;;  %31840 = vmatpush3.xpose.msra.mxu1 %v35419_v63 }
 0x988   :  { %31816 = vmatprep.mubr.msk.f32.mxu0 %vm34237_vm1, %v34236_v3  ;;  %31824 = vmatprep.subr.mxu0 %v34236_v3 }
 0x989   :  { %31841 = vmatprep.mubr.msk.f32.mxu1 %vm34237_vm1, %v34236_v3  ;;  %31849 = vmatprep.subr.mxu1 %v34236_v3 }
 0x98a   :  { %31817 = vmatmul.mubr.f32.vlgmr.msra.gmra.mxu0 %v10604_v37  ;;  %31842 = vmatmul.mubr.f32.vlgmr.msra.gmra.mxu1 %v35441_v23 }
 0x98b   :  { %31825 = vmatpush3.xpose.msra.mxu0 %v35428_v7  ;;  %31850 = vmatpush3.xpose.msra.mxu1 %v11100_v40 }
 0x98c   :  { %31826 = vmatprep.mubr.msk.f32.mxu0 %vm34237_vm1, %v34236_v3  ;;  %31834 = vmatprep.subr.mxu0 %v34236_v3 }
 0x98d   :  { %31851 = vmatprep.mubr.msk.f32.mxu1 %vm34237_vm1, %v34236_v3  ;;  %31859 = vmatprep.subr.mxu1 %v34236_v3 }
 0x98e   :  { %31827 = vmatmul.mubr.f32.vlgmr.msra.gmra.mxu0 %v10601_v19  ;;  %31852 = vmatmul.mubr.f32.vlgmr.msra.gmra.mxu1 %v11055_v36 }
 0x98f   :  { %31835 = vmatpush3.xpose.msra.mxu0 %v10643_v4  ;;  %31860 = vmatpush3.xpose.msra.mxu1 %v35449_v39 }
 0x990   :  { %31836 = vmatprep.mubr.msk.f32.mxu0 %vm34237_vm1, %v34236_v3  ;;  %31844 = vmatprep.subr.mxu0 %v34236_v3 }
 0x991   :  { %31861 = vmatprep.mubr.msk.f32.mxu1 %vm34237_vm1, %v34236_v3  ;;  %31869 = vmatprep.subr.mxu1 %v34236_v3 }
 0x992   :  { %31837 = vmatmul.mubr.f32.vlgmr.msra.gmra.mxu0 %v35441_v23  ;;  %31862 = vmatmul.mubr.f32.vlgmr.msra.gmra.mxu1 %v11057_v41 }
 0x993   :  { %31845 = vmatpush3.xpose.msra.mxu0 %v35449_v39  ;;  %31870 = vmatpush3.xpose.msra.mxu1 %v35449_v39 }
 0x994   :  { %31846 = vmatprep.mubr.msk.f32.mxu0 %vm34237_vm1, %v34236_v3  ;;  %31854 = vmatprep.subr.mxu0 %v34236_v3 }
 0x995   :  { %31871 = vmatprep.mubr.msk.f32.mxu1 %vm34237_vm1, %v34236_v3  ;;  %31879 = vmatprep.subr.mxu1 %v34236_v3 }
 0x996   :  { %31847 = vmatmul.mubr.f32.vlgmr.msra.gmra.mxu0 %v11059_v43  ;;  %31872 = vmatmul.mubr.f32.vlgmr.msra.gmra.mxu1 %v11055_v36 }
 0x997   :  { %31855 = vmatpush3.xpose.msra.mxu0 %v35459_v25  ;;  %31856 = vmatprep.mubr.msk.f32.mxu0 %vm34237_vm1, %v34236_v3 }
 0x998   :  { %31864 = vmatprep.subr.mxu0 %v34236_v3  ;;  %31881 = vmatprep.mubr.msk.f32.mxu1 %vm34237_vm1, %v34236_v3 }
 0x99a   :  { %31857 = vmatmul.mubr.f32.vlgmr.msra.gmra.mxu0 %v11056_v38 }
 0x99b   :  { %31865 = vmatpush3.xpose.msra.mxu0 %v11098_v33  ;;  %31866 = vmatprep.mubr.msk.f32.mxu0 %vm34237_vm1, %v34236_v3 }
 0x99c   :  { %31874 = vmatprep.subr.mxu0 %v34236_v3 }
 0x99e   :  { %31867 = vmatmul.mubr.f32.vlgmr.msra.gmra.mxu0 %v11055_v36 }
 0x99f   :  { %31876 = vmatprep.mubr.msk.f32.mxu0 %vm34237_vm1, %v34236_v3 }
 0xa2a   :  { %v9762_v44 = vpop.f32.mrf.mxu1 }
 0xa2c   :  { %v31763_v15 = vpop.f32.mrf.mxu1 }
 0xa2e   :  { %v9910_v22 = vpop.f32.mrf.mxu1 }
 0xa30   :  { %v31773_v45 = vpop.f32.mrf.mxu1 }
 0xa32   :  { %v9686_v46 = vpop.f32.mrf.mxu0  ;;  %v10056_v47 = vpop.f32.mrf.mxu1 }
 0xa33   :  { %v9763_v0 = vadd.f32 %v9762_v44, %v9686_v46 }
 0xa34   :  { %v31758_v48 = vpop.f32.mrf.mxu0  ;;  %v31783_v49 = vpop.f32.mrf.mxu1 }
 0xa36   :  { %v9836_v8 = vpop.f32.mrf.mxu0  ;;  %v10214_v50 = vpop.f32.mrf.mxu1 }
 0xa37   :  { %v9837_v51 = vadd.f32 %v9836_v8, %v9763_v0 }
 0xa38   :  { %v31768_v52 = vpop.f32.mrf.mxu0  ;;  %v31793_v53 = vpop.f32.mrf.mxu1 }
 0xa39   :  { %v9911_v56 = vadd.f32 %v9910_v22, %v9837_v51 }
 0xa3a   :  { %v9984_v57 = vpop.f32.mrf.mxu0  ;;  %v10362_v58 = vpop.f32.mrf.mxu1 }
 0xa3b   :  { %v9985_v59 = vadd.f32 %v9984_v57, %v9911_v56 }
 0xa3c   :  { %v31778_v60 = vpop.f32.mrf.mxu0  ;;  %v31803_v61 = vpop.f32.mrf.mxu1 }
 0xa3d   :  { %v35529_v62 = vadd.f32 %v10056_v47, %v9985_v59 }
 0xa3e   :  { %v10138_v63 = vpop.f32.mrf.mxu0  ;;  %v10508_v1 = vpop.f32.mrf.mxu1 }
 0xa3f   :  { %v10215_v5 = vadd.f32 %v10214_v50, %v10138_v63 }
 0xa40   :  { %v31788_v2 = vpop.f32.mrf.mxu0  ;;  %v31813_v14 = vpop.f32.mrf.mxu1 }
 0xa42   :  { %v10288_v6 = vpop.f32.mrf.mxu0  ;;  %v10682_v7 = vpop.f32.mrf.mxu1 }
 0xa43   :  { %v10289_v9 = vadd.f32 %v10288_v6, %v10215_v5 }
 0xa44   :  { %v31798_v27 = vpop.f32.mrf.mxu0  ;;  %v31823_v10 = vpop.f32.mrf.mxu1 }
 0xa45   :  { %v10363_v16 = vadd.f32 %v10362_v58, %v10289_v9  ;;  %v12377_v27 = vld [vmem:[%s39387_s2 + $0x18] sm:$0xff]  ;;  %v12375_v10 = vld [vmem:[%s39387_s2 + $0x8] sm:$0xff] }
 0xa46   :  { %v10436_v17 = vpop.f32.mrf.mxu0  ;;  %v10830_v4 = vpop.f32.mrf.mxu1 }
 0xa47   :  { %v10437_v12 = vadd.f32 %v10436_v17, %v10363_v16 }
 0xa48   :  { %v31808_v13 = vpop.f32.mrf.mxu0  ;;  %v31833_v21 = vpop.f32.mrf.mxu1 }
 0xa49   :  { %v35531_v23 = vadd.f32 %v10508_v1, %v10437_v12 }
 0xa4a   :  { %v10606_v31 = vpop.f32.mrf.mxu0  ;;  %v10976_v34 = vpop.f32.mrf.mxu1 }
 0xa4b   :  { %v10683_v19 = vadd.f32 %v10682_v7, %v10606_v31 }
 0xa4c   :  { %v31818_v39 = vpop.f32.mrf.mxu0  ;;  %v31843_v18 = vpop.f32.mrf.mxu1 }
 0xa4e   :  { %v10756_v20 = vpop.f32.mrf.mxu0  ;;  %v11137_v24 = vpop.f32.mrf.mxu1 }
 0xa4f   :  { %v10757_v25 = vadd.f32 %v10756_v20, %v10683_v19 }
 0xa50   :  { %v31828_v26 = vpop.f32.mrf.mxu0  ;;  %v31853_v28 = vpop.f32.mrf.mxu1 }
 0xa51   :  { %v10831_v29 = vadd.f32 %v10830_v4, %v10757_v25 }
 0xa52   :  { %v10904_v33 = vpop.f32.mrf.mxu0  ;;  %v11285_v35 = vpop.f32.mrf.mxu1 }
 0xa53   :  { %v10905_v36 = vadd.f32 %v10904_v33, %v10831_v29 }
 0xa54   :  { %v31838_v11 = vpop.f32.mrf.mxu0  ;;  %v31863_v37 = vpop.f32.mrf.mxu1 }
 0xa55   :  { %v10977_v38 = vadd.f32 %v10976_v34, %v10905_v36 }
 0xa56   :  { %v11061_v40 = vpop.f32.mrf.mxu0  ;;  %v11431_v41 = vpop.f32.mrf.mxu1 }
 0xa57   :  { %v11435_v42 = vmul.f32 0.35355338, %v10977_v38  ;;  %v11138_v15 = vadd.f32 %v11137_v24, %v11061_v40 }
 0xa58   :  { %v31848_v43 = vpop.f32.mrf.mxu0  ;;  %v31873_v44 = vpop.f32.mrf.mxu1 }
 0xa59   :  { %v11437_v22 = vsel %vm4987_vm5, %v11435_v42, -inf }
 0xa5a   :  { %11438 = vmax.xlane.f32.xlu0 %v11437_v22  ;;  %v11211_v45 = vpop.f32.mrf.mxu0 }
 0xa5b   :  { %v11212_v46 = vadd.f32 %v11211_v45, %v11138_v15 }
 0xa5c   :  { %v31858_v47 = vpop.f32.mrf.mxu0 }
 0xa5d   :  { %v11286_v0 = vadd.f32 %v11285_v35, %v11212_v46 }
 0xa5e   :  { %v11359_v48 = vpop.f32.mrf.mxu0 }
 0xa5f   :  { %v11360_v49 = vadd.f32 %v11359_v48, %v11286_v0 }
 0xa60   :  { %v31868_v8 = vpop.f32.mrf.mxu0 }
 0xa61   :  { %v11432_v50 = vadd.f32 %v11431_v41, %v11360_v49 }
 0xa63   :  { %v11436_v51 = vmul.f32 0.35355338, %v11432_v50 }
 0xa65   :  { %v11440_v52 = vsel %vm4987_vm5, %v11436_v51, -inf }
 0xa66   :  { %11441 = vmax.xlane.f32.xlu0 %v11440_v52 }
 0xa7c   :  { %11459 = vrot.lane.b32.xlu0 %v35390_v30, %s34249_s12 }
 0xa80   :  { %8663 = vrot.lane.b32.xlu0 %v35383_v54, %s34250_s13 }
 0xae3   :  { %v11439_v53 = vpop.xlane.xlu0 %11438 }
 0xae4   :  { %v11443_v56 = vsub.f32 %v11435_v42, %v11439_v53 }
 0xae6   :  { %v11445_v57 = vmul.f32 1.442695, %v11443_v56 }
 0xae8   :  { %34152 = vpow2.f32 %v11445_v57 }
 0xaef   :  { %v11442_v58 = vpop.xlane.xlu0 %11441 }
 0xaf0   :  { %v11444_v59 = vsub.f32 %v11436_v51, %v11442_v58 }
 0xaf2   :  { %v11447_v60 = vmul.f32 1.442695, %v11444_v59 }
 0xaf3   :  { %v11460_v61 = vpop.permute.xlu0 %11459 }
 0xaf4   :  { %34154 = vpow2.f32 %v11447_v60  ;;  %v11496_v63 = vand.u32 4294901760, %v11460_v61 }
 0xaf5   :  { %v34153_v1 = vpop.eup %34152 }
 0xaf6   :  { %v35539_v5 = vsub.f32 %v11460_v61, %v11496_v63  ;;  %31875 = vmatpush3.msra.mxu0 %v11496_v63  ;;  %v11449_v30 = vsel %vm4987_vm5, %v34153_v1, 0.0 }
 0xaf7   :  { %11450 = vadd.xlane.f32.xlu1 %v11449_v30  ;;  %v8664_v2 = vpop.permute.xlu0 %8663  ;;  %31884 = vmatprep.subr.mxu0 %v34236_v3 }
 0xaf8   :  { %v11574_v54 = vand.u32 4294901760, %v35539_v5  ;;  %8670 = vst.msk [vmem:[#allocation4] sm:$0xff] %vm8669_vm6, %v8664_v2 }
 0xafa   :  { %v11575_v14 = vsub.f32 %v35539_v5, %v11574_v54 }
 0xafc   :  { %v11576_v6 = vand.u32 4294901760, %v11575_v14 }
 0xafe   :  { %31880 = vmatpush3.msra.mxu1 %v11576_v6 }
 0xaff   :  { %31889 = vmatprep.subr.mxu1 %v34236_v3 }
 0xb01   :  { %v34155_v7 = vpop.eup %34154 }
 0xb02   :  { %v11452_v9 = vsel %vm4987_vm5, %v34155_v7, 0.0 }
 0xb03   :  { %11453 = vadd.xlane.f32.xlu1 %v11452_v9 }
 0xb14   :  { %11911 = vrot.lane.b32.xlu1 %v35396_v32, %s34249_s12 }
 0xb18   :  { %10514 = vrot.lane.b32.xlu1 %v35529_v62, %s34251_s14 }
 0xb1c   :  { %12399 = vrot.lane.b32.xlu1 %v12377_v27, %s34252_s16 }
 0xb20   :  { %12395 = vrot.lane.b32.xlu1 %v12375_v10, %s34252_s16 }
 0xb24   :  { %8665 = vrot.lane.b32.xlu1 %v35385_v55, %s34250_s13 }
 0xb80   :  { %v11451_v32 = vpop.xlane.xlu1 %11450 }
 0xb81   :  { %34156 = vrcp.f32 %v11451_v32 }
 0xb8c   :  { %v11454_v16 = vpop.xlane.xlu1 %11453 }
 0xb8d   :  { %34158 = vrcp.f32 %v11454_v16  ;;  %v12374_v16 = vld [vmem:[%s39387_s2] sm:$0xff] }
 0xb8e   :  { %v34157_v62 = vpop.eup %34156 }
 0xb8f   :  { %v11457_v17 = vmul.f32 %v34157_v62, %v34153_v1 }
 0xb90   :  { %v11912_v4 = vpop.permute.xlu1 %11911 }
 0xb91   :  { %v11948_v12 = vand.u32 4294901760, %v11912_v4  ;;  %v11463_v13 = vsel %vm4987_vm5, %v11457_v17, 0 }
 0xb92   :  { %v11531_v21 = vand.u32 4294901760, %v11463_v13 }
 0xb93   :  { %v35565_v31 = vsub.f32 %v11912_v4, %v11948_v12 }
 0xb94   :  { %v10515_v34 = vpop.permute.xlu1 %10514  ;;  %v11532_v39 = vsub.f32 %v11463_v13, %v11531_v21  ;;  %31882 = vmatmul.mubr.f32.vlgmr.msra.gmra.mxu1 %v11531_v21 }
 0xb95   :  { %v12026_v18 = vand.u32 4294901760, %v35565_v31  ;;  %10521 = vst.msk [vmem:[#allocation4] sm:$0xff] %vm10520_vm7, %v10515_v34  ;;  %31890 = vmatpush3.msra.mxu1 %v11496_v63  ;;  %31891 = vmatprep.mubr.msk.f32.mxu1 %vm34237_vm1, %v34236_v3  ;;  %v12379_v34 = vld [vmem:[%s39387_s2 + $0x28] sm:$0xff] }
 0xb96   :  { %31899 = vmatprep.subr.mxu1 %v34236_v3  ;;  %v11533_v55 = vand.u32 4294901760, %v11532_v39 }
 0xb97   :  { %v12027_v19 = vsub.f32 %v35565_v31, %v12026_v18 }
 0xb98   :  { %v12400_v20 = vpop.permute.xlu1 %12399  ;;  %31892 = vmatmul.mubr.f32.vlgmr.msra.gmra.mxu1 %v11533_v55  ;;  %v11534_v24 = vsub.f32 %v11532_v39, %v11533_v55 }
 0xb99   :  { %v12028_v25 = vand.u32 4294901760, %v12027_v19  ;;  %v35575_v26 = vand.u32 4294901760, %v12400_v20  ;;  %31900 = vmatpush3.msra.mxu1 %v11496_v63  ;;  %31901 = vmatprep.mubr.msk.f32.mxu1 %vm34237_vm1, %v34236_v3 }
 0xb9a   :  { %v34159_v28 = vpop.eup %34158  ;;  %31909 = vmatprep.subr.mxu1 %v34236_v3  ;;  %v11535_v29 = vand.u32 4294901760, %v11534_v24 }
 0xb9b   :  { %v11458_v33 = vmul.f32 %v34159_v28, %v34155_v7  ;;  %v35581_v35 = vsub.f32 %v12400_v20, %v35575_v26  ;;  %v12376_v7 = vld [vmem:[%s39387_s2 + $0x10] sm:$0xff] }
 0xb9c   :  { %v35583_v36 = vpop.permute.xlu1 %12395  ;;  %31877 = vmatmul.mubr.f32.vlgmr.msra.gmra.mxu0 %v11535_v29  ;;  %31902 = vmatmul.mubr.f32.vlgmr.msra.gmra.mxu1 %v11531_v21 }
 0xb9d   :  { %31885 = vmatpush3.msra.mxu0 %v35539_v5  ;;  %31910 = vmatpush3.msra.mxu1 %v12028_v25  ;;  %v11915_v11 = vsel %vm4987_vm5, %v11458_v33, 0  ;;  %v12514_v37 = vand.u32 4294901760, %v35581_v35 }
 0xb9e   :  { %31886 = vmatprep.mubr.msk.f32.mxu0 %vm34237_vm1, %v34236_v3  ;;  %31894 = vmatprep.subr.mxu0 %v34236_v3  ;;  %v11983_v38 = vand.u32 4294901760, %v11915_v11 }
 0xb9f   :  { %31911 = vmatprep.mubr.msk.f32.mxu1 %vm34237_vm1, %v34236_v3  ;;  %31919 = vmatprep.subr.mxu1 %v34236_v3  ;;  %v12515_v42 = vsub.f32 %v35581_v35, %v12514_v37 }
 0xba0   :  { %v8666_v40 = vpop.permute.xlu1 %8665  ;;  %31887 = vmatmul.mubr.f32.vlgmr.msra.gmra.mxu0 %v11532_v39  ;;  %v11984_v41 = vsub.f32 %v11915_v11, %v11983_v38  ;;  %31912 = vmatmul.mubr.f32.vlgmr.msra.gmra.mxu1 %v11983_v38  ;;  %v35657_v39 = vand.u32 4294901760, %v35583_v36 }
 0xba1   :  { %8671 = vst.msk [vmem:[#allocation4 + $0x8] sm:$0xff] %vm8669_vm6, %v8666_v40  ;;  %31895 = vmatpush3.msra.mxu0 %v11574_v54  ;;  %31920 = vmatpush3.msra.mxu1 %v11948_v12  ;;  %v12516_v15 = vand.u32 4294901760, %v12515_v42 }
 0xba2   :  { %31896 = vmatprep.mubr.msk.f32.mxu0 %vm34237_vm1, %v34236_v3  ;;  %31904 = vmatprep.subr.mxu0 %v34236_v3  ;;  %v11985_v43 = vand.u32 4294901760, %v11984_v41  ;;  %v35662_v55 = vsub.f32 %v35583_v36, %v35657_v39 }
 0xba3   :  { %31921 = vmatprep.mubr.msk.f32.mxu1 %vm34237_vm1, %v34236_v3  ;;  %31929 = vmatprep.subr.mxu1 %v34236_v3 }
 0xba4   :  { %31897 = vmatmul.mubr.f32.vlgmr.msra.gmra.mxu0 %v11531_v21  ;;  %31922 = vmatmul.mubr.f32.vlgmr.msra.gmra.mxu1 %v11985_v43  ;;  %v11986_v44 = vsub.f32 %v11984_v41, %v11985_v43  ;;  %v12381_v21 = vld [vmem:[%s39387_s2 + $0x38] sm:$0xff]  ;;  %v12528_v24 = vand.u32 4294901760, %v35662_v55 }
 0xba5   :  { %31905 = vmatpush3.msra.mxu0 %v11948_v12  ;;  %31930 = vmatpush3.msra.mxu1 %v11948_v12 }
 0xba6   :  { %31906 = vmatprep.mubr.msk.f32.mxu0 %vm34237_vm1, %v34236_v3  ;;  %31914 = vmatprep.subr.mxu0 %v34236_v3  ;;  %v11987_v22 = vand.u32 4294901760, %v11986_v44  ;;  %v12529_v40 = vsub.f32 %v35662_v55, %v12528_v24 }
 0xba7   :  { %31931 = vmatprep.mubr.msk.f32.mxu1 %vm34237_vm1, %v34236_v3  ;;  %31945 = vmatprep.subr.mxu1 %v34236_v3 }
 0xba8   :  { %31907 = vmatmul.mubr.f32.vlgmr.msra.gmra.mxu0 %v11987_v22  ;;  %31932 = vmatmul.mubr.f32.vlgmr.msra.gmra.mxu1 %v11983_v38 }
 0xba9   :  { %31915 = vmatpush3.msra.mxu0 %v35565_v31  ;;  %31916 = vmatprep.mubr.msk.f32.mxu0 %vm34237_vm1, %v34236_v3  ;;  %v12380_v31 = vld [vmem:[%s39387_s2 + $0x30] sm:$0xff] }
 0xbaa   :  { %31924 = vmatprep.subr.mxu0 %v34236_v3  ;;  %31946 = vmatpush3.msra.mxu1 %v12516_v15 }
 0xbab   :  { %31947 = vmatprep.subr.mxu1 %v34236_v3  ;;  %31953 = vmatprep.mubr.msk.f32.mxu1 %vm34237_vm1, %v34236_v3 }
 0xbac   :  { %31917 = vmatmul.mubr.f32.vlgmr.msra.gmra.mxu0 %v11984_v41 }
 0xbad   :  { %31925 = vmatpush3.msra.mxu0 %v12026_v18  ;;  %31926 = vmatprep.mubr.msk.f32.mxu0 %vm34237_vm1, %v34236_v3 }
 0xbae   :  { %31934 = vmatprep.subr.mxu0 %v34236_v3 }
 0xbb0   :  { %31927 = vmatmul.mubr.f32.vlgmr.msra.gmra.mxu0 %v11983_v38 }
 0xbb1   :  { %31935 = vmatpush3.msra.mxu0 %v35575_v26  ;;  %31942 = vmatprep.mubr.msk.f32.mxu0 %vm34237_vm1, %v34236_v3 }
 0xbb2   :  { %31936 = vmatprep.subr.mxu0 %v34236_v3 }
 0xc54   :  { %v11613_v45 = vpop.f32.mrf.mxu1 }
 0xc56   :  { %v31883_v46 = vpop.f32.mrf.mxu1 }
 0xc58   :  { %v11761_v47 = vpop.f32.mrf.mxu1 }
 0xc5a   :  { %v31893_v0 = vpop.f32.mrf.mxu1 }
 0xc5c   :  { %v11537_v48 = vpop.f32.mrf.mxu0  ;;  %v11907_v49 = vpop.f32.mrf.mxu1 }
 0xc5d   :  { %v11614_v51 = vadd.f32 %v11613_v45, %v11537_v48 }
 0xc5e   :  { %v31878_v8 = vpop.f32.mrf.mxu0  ;;  %v31903_v50 = vpop.f32.mrf.mxu1 }
 0xc60   :  { %v11687_v52 = vpop.f32.mrf.mxu0  ;;  %v12065_v53 = vpop.f32.mrf.mxu1 }
 0xc61   :  { %v11688_v56 = vadd.f32 %v11687_v52, %v11614_v51 }
 0xc62   :  { %v31888_v57 = vpop.f32.mrf.mxu0  ;;  %v31913_v58 = vpop.f32.mrf.mxu1 }
 0xc63   :  { %v11762_v59 = vadd.f32 %v11761_v47, %v11688_v56  ;;  %v12530_v47 = vand.u32 4294901760, %v12529_v40 }
 0xc64   :  { %v11835_v60 = vpop.f32.mrf.mxu0  ;;  %v12213_v61 = vpop.f32.mrf.mxu1 }
 0xc65   :  { %v11836_v63 = vadd.f32 %v11835_v60, %v11762_v59 }
 0xc66   :  { %v31898_v1 = vpop.f32.mrf.mxu0  ;;  %v31923_v5 = vpop.f32.mrf.mxu1 }
 0xc67   :  { %v11908_v30 = vadd.f32 %v11907_v49, %v11836_v63 }
 0xc68   :  { %v11989_v2 = vpop.f32.mrf.mxu0  ;;  %v12359_v54 = vpop.f32.mrf.mxu1 }
 0xc69   :  { %12365 = vrot.lane.b32.xlu0 %v11908_v30, %s34253_s19  ;;  %v12066_v9 = vadd.f32 %v12065_v53, %v11989_v2 }
 0xc6a   :  { %v31908_v14 = vpop.f32.mrf.mxu0  ;;  %v31933_v6 = vpop.f32.mrf.mxu1 }
 0xc6c   :  { %v12139_v27 = vpop.f32.mrf.mxu0 }
 0xc6d   :  { %v12140_v10 = vadd.f32 %v12139_v27, %v12066_v9  ;;  %12397 = vrot.lane.b32.xlu0 %v12376_v7, %s34252_s16 }
 0xc6e   :  { %v31918_v32 = vpop.f32.mrf.mxu0 }
 0xc6f   :  { %v12214_v62 = vadd.f32 %v12213_v61, %v12140_v10 }
 0xc70   :  { %v12287_v17 = vpop.f32.mrf.mxu0 }
 0xc71   :  { %v12288_v4 = vadd.f32 %v12287_v17, %v12214_v62  ;;  %12393 = vrot.lane.b32.xlu0 %v12374_v16, %s34252_s16 }
 0xc72   :  { %v31928_v12 = vpop.f32.mrf.mxu0 }
 0xc73   :  { %v12360_v13 = vadd.f32 %v12359_v54, %v12288_v4 }
 0xc75   :  { %10516 = vrot.lane.b32.xlu0 %v35531_v23, %s34251_s14  ;;  %12367 = vrot.lane.b32.xlu1 %v12360_v13, %s34253_s19  ;;  %v12378_v23 = vld [vmem:[%s39387_s2 + $0x20] sm:$0xff] }
 0xc79   :  { %12903 = vrot.lane.b32.xlu0 %v12381_v21, %s34252_s16  ;;  %12901 = vrot.lane.b32.xlu1 %v12380_v31, %s34252_s16 }
 0xc7d   :  { %12899 = vrot.lane.b32.xlu0 %v12379_v34, %s34252_s16  ;;  %12897 = vrot.lane.b32.xlu1 %v12378_v23, %s34252_s16  ;;  %v29521_v23 = vld [vmem:[%s39390_s5 + $0x1] ss:$0 sm:$0xff] }
 0xcdb   :  { %v12366_v18 = vpop.permute.xlu0 %12365 }
 0xcdc   :  { %12372 = vst.msk [vmem:[#allocation4] sm:$0xff] %vm12371_vm8, %v12366_v18 }
 0xcdf   :  { %v12398_v19 = vpop.permute.xlu0 %12397 }
 0xce0   :  { %v35664_v20 = vand.u32 4294901760, %v12398_v19 }
 0xce2   :  { %v35668_v25 = vsub.f32 %v12398_v19, %v35664_v20  ;;  %31937 = vmatpush3.msra.mxu0 %v35664_v20 }
 0xce3   :  { %v12394_v28 = vpop.permute.xlu0 %12393  ;;  %31938 = vmatprep.subr.mxu0 %v34236_v3  ;;  %v12383_v29 = vld [vmem:[#allocation4] sm:$0xff] }
 0xce4   :  { %v12521_v33 = vand.u32 4294901760, %v35668_v25  ;;  %v35673_v11 = vand.u32 4294901760, %v12394_v28  ;;  %31939 = vmatpush3.msra.mxu0 %v35657_v39  ;;  %v12406_v36 = vsel %vm4002_vm3, %v12383_v29, 0 }
 0xce5   :  { %31940 = vmatprep.subr.mxu0 %v34236_v3  ;;  %v35678_v38 = vand.u32 4294901760, %v12406_v36 }
 0xce6   :  { %v12522_v41 = vsub.f32 %v35668_v25, %v12521_v33  ;;  %v35687_v42 = vsub.f32 %v12394_v28, %v35673_v11  ;;  %31941 = vmatpush3.msra.mxu0 %v35673_v11 }
 0xce7   :  { %v10517_v43 = vpop.permute.xlu0 %10516  ;;  %v12368_v44 = vpop.permute.xlu1 %12367  ;;  %31956 = vmatprep.subr.mxu0 %v34236_v3  ;;  %v12478_v15 = vsub.f32 %v12406_v36, %v35678_v38 }
 0xce8   :  { %v12523_v22 = vand.u32 4294901760, %v12522_v41  ;;  %v12535_v45 = vand.u32 4294901760, %v35687_v42  ;;  %10522 = vst.msk [vmem:[#allocation4 + $0x8] sm:$0xff] %vm10520_vm7, %v10517_v43  ;;  %v34210_v41 = vld [vmem:[#allocation2] sm:$0xff] }
 0xce9   :  { %12373 = vst.msk [vmem:[#allocation4 + $0x8] sm:$0xff] %vm12371_vm8, %v12368_v44  ;;  %v12479_v46 = vand.u32 4294901760, %v12478_v15 }
 0xcea   :  { %v12536_v0 = vsub.f32 %v35687_v42, %v12535_v45  ;;  %31948 = vmatpush3.msra.mxu1 %v12523_v22 }
 0xceb   :  { %31949 = vmatprep.subr.mxu1 %v34236_v3  ;;  %v12480_v48 = vsub.f32 %v12478_v15, %v12479_v46  ;;  %v12904_v8 = vpop.permute.xlu0 %12903  ;;  %v12902_v51 = vpop.permute.xlu1 %12901 }
 0xcec   :  { %v12537_v49 = vand.u32 4294901760, %v12536_v0  ;;  %31950 = vmatpush3.msra.mxu1 %v12530_v47  ;;  %v35705_v52 = vand.u32 4294901760, %v12904_v8  ;;  %v35711_v56 = vand.u32 4294901760, %v12902_v51 }
 0xced   :  { %31951 = vmatprep.subr.mxu1 %v34236_v3  ;;  %v12481_v50 = vand.u32 4294901760, %v12480_v48 }
 0xcee   :  { %31952 = vmatpush3.msra.mxu1 %v12537_v49  ;;  %v35718_v58 = vsub.f32 %v12904_v8, %v35705_v52  ;;  %v35728_v63 = vsub.f32 %v12902_v51, %v35711_v56 }
 0xcef   :  { %31943 = vmatmul.mubr.f32.vlgmr.msra.gmra.mxu0 %v12481_v50  ;;  %31954 = vmatmul.mubr.f32.vlgmr.msra.gmra.mxu1 %v35678_v38  ;;  %v12900_v53 = vpop.permute.xlu0 %12899  ;;  %v12898_v60 = vpop.permute.xlu1 %12897 }
 0xcf0   :  { %31957 = vmatpush3.msra.mxu0 %v35581_v35  ;;  %31967 = vmatprep.subr.mxu1 %v34236_v3  ;;  %v12384_v57 = vld [vmem:[#allocation4 + $0x8] sm:$0xff]  ;;  %v35720_v59 = vand.u32 4294901760, %v12900_v53  ;;  %v35733_v1 = vand.u32 4294901760, %v12898_v60  ;;  %v13018_v5 = vand.u32 4294901760, %v35718_v58  ;;  %v13025_v54 = vand.u32 4294901760, %v35728_v63 }
 0xcf1   :  { %31958 = vmatprep.subr.mxu0 %v34236_v3  ;;  %31968 = vmatpush3.msra.mxu1 %v35575_v26  ;;  %v12910_v61 = vsel %vm4002_vm3, %v12384_v57, 0 }
 0xcf2   :  { %31959 = vmatpush3.msra.mxu0 %v35668_v25  ;;  %31969 = vmatprep.subr.mxu1 %v34236_v3  ;;  %v35738_v30 = vsub.f32 %v12900_v53, %v35720_v59  ;;  %v35740_v2 = vand.u32 4294901760, %v12910_v61  ;;  %v35752_v14 = vsub.f32 %v12898_v60, %v35733_v1  ;;  %v13019_v35 = vsub.f32 %v35718_v58, %v13018_v5  ;;  %v34211_v60 = vld [vmem:[#allocation2 + $0x8] sm:$0xff] }
 0xcf3   :  { %31960 = vmatprep.subr.mxu0 %v34236_v3  ;;  %31970 = vmatpush3.msra.mxu1 %v35664_v20  ;;  %v13026_v6 = vsub.f32 %v35728_v63, %v13025_v54 }
 0xcf4   :  { %31961 = vmatpush3.msra.mxu0 %v35662_v55  ;;  %31971 = vmatprep.subr.mxu1 %v34236_v3  ;;  %v13039_v7 = vand.u32 4294901760, %v35752_v14  ;;  %v13020_v9 = vand.u32 4294901760, %v13019_v35 }
 0xcf5   :  { %31962 = vmatprep.subr.mxu0 %v34236_v3  ;;  %31972 = vmatpush3.msra.mxu1 %v35657_v39  ;;  %v13027_v32 = vand.u32 4294901760, %v13026_v6 }
 0xcf6   :  { %31963 = vmatpush3.msra.mxu0 %v35687_v42  ;;  %31964 = vmatprep.mubr.msk.f32.mxu0 %vm34237_vm1, %v34236_v3  ;;  %v13040_v16 = vsub.f32 %v35752_v14, %v13039_v7 }
 0xcf7   :  { %31973 = vmatprep.subr.mxu1 %v34236_v3  ;;  %31965 = vmatmul.mubr.f32.vlgmr.msra.gmra.mxu0 %v12478_v15 }
 0xcf8   :  { %31974 = vmatpush3.msra.mxu1 %v35673_v11  ;;  %31975 = vmatprep.mubr.msk.f32.mxu1 %vm34237_vm1, %v34236_v3  ;;  %v13041_v4 = vand.u32 4294901760, %v13040_v16 }
 0xcf9   :  { %31978 = vmatprep.subr.mxu0 %v34236_v3  ;;  %31976 = vmatmul.mubr.f32.vlgmr.msra.gmra.mxu1 %v12479_v46 }
 0xcfa   :  { %31979 = vmatpush3.msra.mxu0 %v12514_v37  ;;  %31989 = vmatprep.subr.mxu1 %v34236_v3  ;;  %v13032_v37 = vand.u32 4294901760, %v35738_v30 }
 0xcfb   :  { %31980 = vmatprep.subr.mxu0 %v34236_v3  ;;  %31990 = vmatpush3.msra.mxu1 %v35575_v26  ;;  %v35761_v26 = vsub.f32 %v12910_v61, %v35740_v2 }
 0xcfc   :  { %31981 = vmatpush3.msra.mxu0 %v12521_v33  ;;  %31991 = vmatprep.subr.mxu1 %v34236_v3  ;;  %v13033_v27 = vsub.f32 %v35738_v30, %v13032_v37 }
 0xcfd   :  { %31982 = vmatprep.subr.mxu0 %v34236_v3  ;;  %31992 = vmatpush3.msra.mxu1 %v35664_v20  ;;  %v12983_v10 = vand.u32 4294901760, %v35761_v26 }
 0xcfe   :  { %31983 = vmatpush3.msra.mxu0 %v12528_v24  ;;  %31993 = vmatprep.subr.mxu1 %v34236_v3  ;;  %v13034_v62 = vand.u32 4294901760, %v13033_v27 }
 0xcff   :  { %31984 = vmatprep.subr.mxu0 %v34236_v3  ;;  %31994 = vmatpush3.msra.mxu1 %v35657_v39  ;;  %v12984_v17 = vsub.f32 %v35761_v26, %v12983_v10 }
 0xd00   :  { %31985 = vmatpush3.msra.mxu0 %v12535_v45  ;;  %31986 = vmatprep.mubr.msk.f32.mxu0 %vm34237_vm1, %v34236_v3 }
 0xd01   :  { %31995 = vmatprep.subr.mxu1 %v34236_v3  ;;  %31987 = vmatmul.mubr.f32.vlgmr.msra.gmra.mxu0 %v35678_v38  ;;  %v12985_v12 = vand.u32 4294901760, %v12984_v17 }
 0xd02   :  { %31996 = vmatpush3.msra.mxu1 %v35673_v11  ;;  %31997 = vmatprep.mubr.msk.f32.mxu1 %vm34237_vm1, %v34236_v3 }
 0xd03   :  { %32000 = vmatprep.subr.mxu0 %v34236_v3  ;;  %31998 = vmatmul.mubr.f32.vlgmr.msra.gmra.mxu1 %v35678_v38 }
 0xd04   :  { %32001 = vmatpush3.msra.mxu0 %v35705_v52  ;;  %32011 = vmatprep.subr.mxu1 %v34236_v3 }
 0xd05   :  { %32002 = vmatprep.subr.mxu0 %v34236_v3  ;;  %32012 = vmatpush3.msra.mxu1 %v13020_v9  ;;  %v13442_v9 = vld [vmem:[%s39388_s3 + $0x10] sm:$0xff] }
 0xd06   :  { %32003 = vmatpush3.msra.mxu0 %v35711_v56  ;;  %32013 = vmatprep.subr.mxu1 %v34236_v3 }
 0xd07   :  { %32004 = vmatprep.subr.mxu0 %v34236_v3  ;;  %32014 = vmatpush3.msra.mxu1 %v13027_v32  ;;  %v13441_v32 = vld [vmem:[%s39388_s3 + $0x8] sm:$0xff] }
 0xd08   :  { %32005 = vmatpush3.msra.mxu0 %v35720_v59  ;;  %32015 = vmatprep.subr.mxu1 %v34236_v3 }
 0xd09   :  { %32006 = vmatprep.subr.mxu0 %v34236_v3  ;;  %32016 = vmatpush3.msra.mxu1 %v13034_v62  ;;  %v35888_v62 = vand.u32 4294901760, %v13441_v32 }
 0xd0a   :  { %32007 = vmatpush3.msra.mxu0 %v35733_v1  ;;  %32008 = vmatprep.mubr.msk.f32.mxu0 %vm34237_vm1, %v34236_v3 }
 0xd0b   :  { %32017 = vmatprep.subr.mxu1 %v34236_v3  ;;  %32009 = vmatmul.mubr.f32.vlgmr.msra.gmra.mxu0 %v12985_v12  ;;  %v35897_v12 = vsub.f32 %v13441_v32, %v35888_v62 }
 0xd0c   :  { %32018 = vmatpush3.msra.mxu1 %v13041_v4  ;;  %32019 = vmatprep.mubr.msk.f32.mxu1 %vm34237_vm1, %v34236_v3 }
 0xd0d   :  { %32022 = vmatprep.subr.mxu0 %v34236_v3  ;;  %32020 = vmatmul.mubr.f32.vlgmr.msra.gmra.mxu1 %v35740_v2 }
 0xd0e   :  { %32023 = vmatpush3.msra.mxu0 %v35718_v58  ;;  %32033 = vmatprep.subr.mxu1 %v34236_v3 }
 0xd0f   :  { %32024 = vmatprep.subr.mxu0 %v34236_v3  ;;  %32034 = vmatpush3.msra.mxu1 %v35705_v52 }
 0xd10   :  { %32025 = vmatpush3.msra.mxu0 %v35728_v63  ;;  %32035 = vmatprep.subr.mxu1 %v34236_v3 }
 0xd11   :  { %32026 = vmatprep.subr.mxu0 %v34236_v3  ;;  %32036 = vmatpush3.msra.mxu1 %v35711_v56 }
 0xd12   :  { %32027 = vmatpush3.msra.mxu0 %v35738_v30  ;;  %32037 = vmatprep.subr.mxu1 %v34236_v3 }
 0xd13   :  { %32028 = vmatprep.subr.mxu0 %v34236_v3  ;;  %32038 = vmatpush3.msra.mxu1 %v35720_v59 }
 0xd14   :  { %32029 = vmatpush3.msra.mxu0 %v35752_v14  ;;  %32030 = vmatprep.mubr.msk.f32.mxu0 %vm34237_vm1, %v34236_v3 }
 0xd15   :  { %32039 = vmatprep.subr.mxu1 %v34236_v3  ;;  %32031 = vmatmul.mubr.f32.vlgmr.msra.gmra.mxu0 %v35761_v26  ;;  %v13443_v26 = vld [vmem:[%s39388_s3 + $0x18] sm:$0xff] }
 0xd16   :  { %32040 = vmatpush3.msra.mxu1 %v35733_v1  ;;  %32041 = vmatprep.mubr.msk.f32.mxu1 %vm34237_vm1, %v34236_v3  ;;  %v35871_v6 = vand.u32 4294901760, %v13443_v26 }
 0xd17   :  { %32044 = vmatprep.subr.mxu0 %v34236_v3  ;;  %32042 = vmatmul.mubr.f32.vlgmr.msra.gmra.mxu1 %v12983_v10  ;;  %v35881_v10 = vand.u32 4294901760, %v13442_v9 }
 0xd18   :  { %32045 = vmatpush3.msra.mxu0 %v13018_v5  ;;  %32055 = vmatprep.subr.mxu1 %v34236_v3  ;;  %v35879_v27 = vsub.f32 %v13443_v26, %v35871_v6 }
 0xd19   :  { %32046 = vmatprep.subr.mxu0 %v34236_v3  ;;  %32056 = vmatpush3.msra.mxu1 %v35705_v52  ;;  %v35893_v4 = vsub.f32 %v13442_v9, %v35881_v10 }
 0xd1a   :  { %32047 = vmatpush3.msra.mxu0 %v13025_v54  ;;  %32057 = vmatprep.subr.mxu1 %v34236_v3  ;;  %v13562_v17 = vand.u32 4294901760, %v35879_v27 }
 0xd1b   :  { %32048 = vmatprep.subr.mxu0 %v34236_v3  ;;  %32058 = vmatpush3.msra.mxu1 %v35711_v56 }
 0xd1c   :  { %32049 = vmatpush3.msra.mxu0 %v13032_v37  ;;  %32059 = vmatprep.subr.mxu1 %v34236_v3 }
 0xd1d   :  { %32050 = vmatprep.subr.mxu0 %v34236_v3  ;;  %32060 = vmatpush3.msra.mxu1 %v35720_v59 }
 0xd1e   :  { %32051 = vmatpush3.msra.mxu0 %v13039_v7  ;;  %32052 = vmatprep.mubr.msk.f32.mxu0 %vm34237_vm1, %v34236_v3 }
 0xd1f   :  { %32061 = vmatprep.subr.mxu1 %v34236_v3  ;;  %32053 = vmatmul.mubr.f32.vlgmr.msra.gmra.mxu0 %v35740_v2 }
 0xd20   :  { %32062 = vmatpush3.msra.mxu1 %v35733_v1  ;;  %32063 = vmatprep.mubr.msk.f32.mxu1 %vm34237_vm1, %v34236_v3 }
 0xd21   :  { %32064 = vmatmul.mubr.f32.vlgmr.msra.gmra.mxu1 %v35740_v2  ;;  %32077 = vmatprep.subr.mxu1 %v34236_v3 }
 0xd22   :  { %32066 = vmatprep.subr.mxu0 %v34236_v3  ;;  %32085 = vmatprep.mubr.msk.f32.mxu1 %vm34237_vm1, %v34236_v3 }
 0xd23   :  { %32074 = vmatprep.mubr.msk.f32.mxu0 %vm34237_vm1, %v34236_v3  ;;  %32067 = vmatpush3.msra.mxu0 %v35871_v6 }
 0xd24   :  { %32068 = vmatprep.subr.mxu0 %v34236_v3 }
 0xd25   :  { %32069 = vmatpush3.msra.mxu0 %v35881_v10 }
 0xd26   :  { %32070 = vmatprep.subr.mxu0 %v34236_v3 }
 0xd27   :  { %32071 = vmatpush3.msra.mxu0 %v35888_v62 }
 0xd28   :  { %32072 = vmatprep.subr.mxu0 %v34236_v3 }
 0xdaf   :  { %v12483_v13 = vpop.f32.mrf.mxu0  ;;  %v12574_v21 = vpop.f32.mrf.mxu1 }
 0xdb0   :  { %v12484_v39 = vadd.f32 %v29521_v23, %v12483_v13  ;;  %v13440_v13 = vld [vmem:[%s39388_s3] sm:$0xff] }
 0xdb1   :  { %v31944_v31 = vpop.f32.mrf.mxu0  ;;  %v31955_v34 = vpop.f32.mrf.mxu1 }
 0xdb2   :  { %v12575_v20 = vadd.f32 %v12574_v21, %v12484_v39  ;;  %v13563_v21 = vsub.f32 %v35879_v27, %v13562_v17  ;;  %v13569_v31 = vand.u32 4294901760, %v35893_v4  ;;  %v35907_v34 = vand.u32 4294901760, %v13440_v13 }
 0xdb4   :  { %v13564_v39 = vand.u32 4294901760, %v13563_v21  ;;  %32073 = vmatpush3.msra.mxu0 %v35907_v34 }
 0xdb5   :  { %32088 = vmatprep.subr.mxu0 %v34236_v3 }
 0xdb6   :  { %32078 = vmatpush3.msra.mxu1 %v13564_v39  ;;  %v14445_v39 = vld [vmem:[%s39389_s4 + $0x70] sm:$0xff] }
 0xdb7   :  { %v12654_v18 = vpop.f32.mrf.mxu0  ;;  %32079 = vmatprep.subr.mxu1 %v34236_v3 }
 0xdb8   :  { %v12655_v25 = vadd.f32 %v12654_v18, %v12575_v20  ;;  %v13570_v18 = vsub.f32 %v35893_v4, %v13569_v31 }
 0xdb9   :  { %v12731_v55 = vpop.f32.mrf.mxu1  ;;  %v31966_v19 = vpop.f32.mrf.mxu0 }
 0xdba   :  { %v12732_v28 = vadd.f32 %v12731_v55, %v12655_v25  ;;  %v35916_v55 = vsub.f32 %v13440_v13, %v35907_v34  ;;  %v13571_v20 = vand.u32 4294901760, %v13570_v18 }
 0xdbb   :  { %v31977_v24 = vpop.f32.mrf.mxu1 }
 0xdbc   :  { %v13583_v24 = vand.u32 4294901760, %v35916_v55  ;;  %32080 = vmatpush3.msra.mxu1 %v13571_v20  ;;  %v14443_v20 = vld [vmem:[%s39389_s4 + $0x60] sm:$0xff] }
 0xdbd   :  { %32081 = vmatprep.subr.mxu1 %v34236_v3 }
 0xdc1   :  { %v12814_v29 = vpop.f32.mrf.mxu0 }
 0xdc2   :  { %v12815_v33 = vadd.f32 %v12814_v29, %v12732_v28  ;;  %v13584_v28 = vsub.f32 %v35916_v55, %v13583_v24 }
 0xdc3   :  { %v12889_v11 = vpop.f32.mrf.mxu1  ;;  %v31988_v36 = vpop.f32.mrf.mxu0 }
 0xdc4   :  { %v12890_v38 = vadd.f32 %v12889_v11, %v12815_v33  ;;  %v13585_v29 = vand.u32 4294901760, %v13584_v28 }
 0xdc5   :  { %v31999_v40 = vpop.f32.mrf.mxu1 }
 0xdc6   :  { %v13399_v42 = vadd.f32 %v34210_v41, %v12890_v38  ;;  %v35934_v40 = vld [vmem:[%s39390_s5 + $0x4] ss:$0 sm:$0xff] }
 0xdc8   :  { %v13401_v43 = vsel %vm4002_vm3, %v13399_v42, 0.0 }
 0xdc9   :  { %13402 = vadd.xlane.f32.xlu0 %v13401_v43 }
 0xdcb   :  { %v12987_v44 = vpop.f32.mrf.mxu0 }
 0xdcc   :  { %v12988_v46 = vadd.f32 %v29521_v23, %v12987_v44  ;;  %v13576_v23 = vand.u32 4294901760, %v35897_v12 }
 0xdcd   :  { %v13078_v15 = vpop.f32.mrf.mxu1  ;;  %v32010_v22 = vpop.f32.mrf.mxu0 }
 0xdce   :  { %v13079_v49 = vadd.f32 %v13078_v15, %v12988_v46  ;;  %v13577_v19 = vsub.f32 %v35897_v12, %v13576_v23  ;;  %v13447_v22 = vld [vmem:[%s39388_s3 + $0x38] sm:$0xff]  ;;  %v13446_v46 = vld [vmem:[%s39388_s3 + $0x30] sm:$0xff] }
 0xdcf   :  { %v32021_v45 = vpop.f32.mrf.mxu1 }
 0xdd0   :  { %v13578_v25 = vand.u32 4294901760, %v13577_v19  ;;  %v14444_v19 = vld [vmem:[%s39389_s4 + $0x68] sm:$0xff] }
 0xdd1   :  { %v36141_v28 = vand.u32 4294901760, %v14444_v19 }
 0xdd2   :  { %32082 = vmatpush3.msra.mxu1 %v13578_v25 }
 0xdd3   :  { %32083 = vmatprep.subr.mxu1 %v34236_v3 }
 0xdd4   :  { %32084 = vmatpush3.msra.mxu1 %v13585_v29  ;;  %v36143_v29 = vand.u32 4294901760, %v14443_v20 }
 0xdd5   :  { %v13158_v47 = vpop.f32.mrf.mxu0  ;;  %32099 = vmatprep.subr.mxu1 %v34236_v3 }
 0xdd6   :  { %v13159_v50 = vadd.f32 %v13158_v47, %v13079_v49 }
 0xdd7   :  { %v13235_v0 = vpop.f32.mrf.mxu1  ;;  %v32032_v48 = vpop.f32.mrf.mxu0 }
 0xdd8   :  { %v13236_v51 = vadd.f32 %v13235_v0, %v13159_v50  ;;  %v35957_v0 = vand.u32 4294901760, %v13447_v22  ;;  %v13445_v48 = vld [vmem:[%s39388_s3 + $0x28] sm:$0xff]  ;;  %v35966_v50 = vand.u32 4294901760, %v13446_v46 }
 0xdd9   :  { %v32043_v8 = vpop.f32.mrf.mxu1 }
 0xddf   :  { %v13318_v52 = vpop.f32.mrf.mxu0 }
 0xde0   :  { %v13319_v53 = vadd.f32 %v13318_v52, %v13236_v51  ;;  %v13444_v52 = vld [vmem:[%s39388_s3 + $0x20] sm:$0xff] }
 0xde1   :  { %v13393_v56 = vpop.f32.mrf.mxu1  ;;  %v32054_v57 = vpop.f32.mrf.mxu0 }
 0xde2   :  { %v13394_v58 = vadd.f32 %v13393_v56, %v13319_v53  ;;  %v35974_v56 = vsub.f32 %v13447_v22, %v35957_v0  ;;  %v35976_v57 = vand.u32 4294901760, %v13445_v48 }
 0xde3   :  { %v32065_v59 = vpop.f32.mrf.mxu1 }
 0xde4   :  { %v13400_v61 = vadd.f32 %v34211_v60, %v13394_v58  ;;  %v35981_v60 = vsub.f32 %v13446_v46, %v35966_v50 }
 0xde6   :  { %v13404_v63 = vsel %vm4002_vm3, %v13400_v61, 0.0 }
 0xde7   :  { %13405 = vadd.xlane.f32.xlu0 %v13404_v63  ;;  %v14050_v63 = vand.u32 4294901760, %v35974_v56 }
 0xe52   :  { %v13403_v1 = vpop.xlane.xlu0 %13402 }
 0xe53   :  { %v13408_v5 = vmul.f32 0.03125, %v13403_v1  ;;  %v35989_v1 = vsub.f32 %v13445_v48, %v35976_v57 }
 0xe55   :  { %v13410_v30 = vsub.f32 %v13399_v42, %v13408_v5  ;;  %v35939_v42 = vld [vmem:[%s39390_s5 + $0x5] ss:$0 sm:$0xff]  ;;  %v14057_v5 = vand.u32 4294901760, %v35981_v60 }
 0xe57   :  { %v13412_v2 = vmul.f32 %v13410_v30, %v13410_v30 }
 0xe59   :  { %v13414_v54 = vsel %vm4002_vm3, %v13412_v2, 0.0  ;;  %v14051_v2 = vsub.f32 %v35974_v56, %v14050_v63 }
 0xe5a   :  { %13415 = vadd.xlane.f32.xlu1 %v13414_v54  ;;  %v14064_v54 = vand.u32 4294901760, %v35989_v1 }
 0xe5b   :  { %v14052_v26 = vand.u32 4294901760, %v14051_v2 }
 0xe70   :  { %v13406_v14 = vpop.xlane.xlu0 %13405 }
 0xe71   :  { %v13409_v35 = vmul.f32 0.03125, %v13406_v14  ;;  %v14058_v14 = vsub.f32 %v35981_v60, %v14057_v5 }
 0xe73   :  { %v35866_v37 = vsub.f32 %v13400_v61, %v13409_v35  ;;  %v35983_v61 = vand.u32 4294901760, %v13444_v52 }
 0xe75   :  { %v13413_v7 = vmul.f32 %v35866_v37, %v35866_v37 }
 0xe77   :  { %v13417_v16 = vsel %vm4002_vm3, %v13413_v7, 0.0  ;;  %v14059_v7 = vand.u32 4294901760, %v14058_v14 }
 0xe78   :  { %13418 = vadd.xlane.f32.xlu0 %v13417_v16 }
 0xee3   :  { %v13416_v33 = vpop.xlane.xlu1 %13415 }
 0xee4   :  { %v13420_v11 = vmul.f32 0.03125, %v13416_v33 }
 0xee6   :  { %v13422_v36 = vadd.f32 1e-05, %v13420_v11 }
 0xee8   :  { %34160 = vrsqrt.f32 %v13422_v36  ;;  %v36152_v36 = vsub.f32 %v14444_v19, %v36141_v28 }
 0xef5   :  { %v34161_v38 = vpop.eup %34160 }
 0xef6   :  { %v13426_v41 = vmul.f32 %v34161_v38, %v13410_v30  ;;  %v35996_v30 = vsub.f32 %v13444_v52, %v35983_v61  ;;  %v36155_v38 = vsub.f32 %v14443_v20, %v36143_v29 }
 0xef8   :  { %v13432_v43 = vmul.f32 %v35934_v40, %v13426_v41  ;;  %v14071_v35 = vand.u32 4294901760, %v35996_v30 }
 0xefa   :  { %v35943_v44 = vadd.f32 %v35939_v42, %v13432_v43  ;;  %v14072_v9 = vsub.f32 %v35996_v30, %v14071_v35  ;;  %v14576_v43 = vand.u32 4294901760, %v36152_v36 }
 0xefc   :  { %v13454_v15 = vsel %vm4002_vm3, %v35943_v44, 0 }
 0xefd   :  { %v35950_v45 = vand.u32 4294901760, %v13454_v15 }
 0xeff   :  { %v13526_v47 = vsub.f32 %v13454_v15, %v35950_v45  ;;  %32086 = vmatmul.mubr.f32.vlgmr.msra.gmra.mxu1 %v35950_v45  ;;  %v14583_v15 = vand.u32 4294901760, %v36155_v38 }
 0xf00   :  { %32100 = vmatpush3.msra.mxu1 %v35871_v6  ;;  %32107 = vmatprep.mubr.msk.f32.mxu1 %vm34237_vm1, %v34236_v3 }
 0xf01   :  { %v13419_v49 = vpop.xlane.xlu0 %13418  ;;  %32101 = vmatprep.subr.mxu1 %v34236_v3  ;;  %v13527_v8 = vand.u32 4294901760, %v13526_v47 }
 0xf02   :  { %v13421_v51 = vmul.f32 0.03125, %v13419_v49  ;;  %32102 = vmatpush3.msra.mxu1 %v35881_v10 }
 0xf03   :  { %32103 = vmatprep.subr.mxu1 %v34236_v3  ;;  %v13528_v53 = vsub.f32 %v13526_v47, %v13527_v8 }
 0xf04   :  { %v13423_v58 = vadd.f32 1e-05, %v13421_v51  ;;  %32104 = vmatpush3.msra.mxu1 %v35888_v62 }
 0xf05   :  { %32105 = vmatprep.subr.mxu1 %v34236_v3  ;;  %v13529_v59 = vand.u32 4294901760, %v13528_v53 }
 0xf06   :  { %34162 = vrsqrt.f32 %v13423_v58  ;;  %32106 = vmatpush3.msra.mxu1 %v35907_v34 }
 0xf07   :  { %32108 = vmatmul.mubr.f32.vlgmr.msra.gmra.mxu1 %v13527_v8  ;;  %32121 = vmatprep.subr.mxu1 %v34236_v3  ;;  %v14440_v8 = vld [vmem:[%s39389_s4 + $0x48] sm:$0xff] }
 0xf08   :  { %32075 = vmatmul.mubr.f32.vlgmr.msra.gmra.mxu0 %v13529_v59  ;;  %32122 = vmatpush3.msra.mxu1 %v35871_v6  ;;  %v14065_v6 = vsub.f32 %v35989_v1, %v14064_v54  ;;  %v36193_v53 = vand.u32 4294901760, %v14440_v8 }
 0xf09   :  { %32089 = vmatpush3.msra.mxu0 %v35879_v27  ;;  %32123 = vmatprep.subr.mxu1 %v34236_v3 }
 0xf0a   :  { %32090 = vmatprep.subr.mxu0 %v34236_v3  ;;  %32124 = vmatpush3.msra.mxu1 %v35881_v10  ;;  %v14066_v32 = vand.u32 4294901760, %v14065_v6 }
 0xf0b   :  { %32091 = vmatpush3.msra.mxu0 %v35893_v4  ;;  %32125 = vmatprep.subr.mxu1 %v34236_v3 }
 0xf0c   :  { %32092 = vmatprep.subr.mxu0 %v34236_v3  ;;  %32126 = vmatpush3.msra.mxu1 %v35888_v62  ;;  %v14073_v62 = vand.u32 4294901760, %v14072_v9 }
 0xf0d   :  { %32093 = vmatpush3.msra.mxu0 %v35897_v12  ;;  %32127 = vmatprep.subr.mxu1 %v34236_v3 }
 0xf0e   :  { %32094 = vmatprep.subr.mxu0 %v34236_v3  ;;  %32096 = vmatprep.mubr.msk.f32.mxu0 %vm34237_vm1, %v34236_v3 }
 0xf0f   :  { %32095 = vmatpush3.msra.mxu0 %v35916_v55  ;;  %32128 = vmatpush3.msra.mxu1 %v35907_v34  ;;  %v14446_v34 = vld [vmem:[%s39389_s4 + $0x78] sm:$0xff]  ;;  %v36127_v55 = vand.u32 4294901760, %v14445_v39 }
 0xf10   :  { %32129 = vmatprep.mubr.msk.f32.mxu1 %vm34237_vm1, %v34236_v3  ;;  %32097 = vmatmul.mubr.f32.vlgmr.msra.gmra.mxu0 %v13526_v47  ;;  %v14577_v47 = vsub.f32 %v36152_v36, %v14576_v43 }
 0xf11   :  { %32110 = vmatprep.subr.mxu0 %v34236_v3  ;;  %32130 = vmatmul.mubr.f32.vlgmr.msra.gmra.mxu1 %v35950_v45  ;;  %v36139_v25 = vsub.f32 %v14445_v39, %v36127_v55  ;;  %v14434_v39 = vld [vmem:[%s39389_s4 + $0x18] sm:$0xff] }
 0xf12   :  { %32143 = vmatprep.subr.mxu1 %v34236_v3  ;;  %32111 = vmatpush3.msra.mxu0 %v13562_v17 }
 0xf13   :  { %v34163_v10 = vpop.eup %34162  ;;  %32144 = vmatpush3.msra.mxu1 %v14052_v26  ;;  %32112 = vmatprep.subr.mxu0 %v34236_v3  ;;  %v14569_v11 = vand.u32 4294901760, %v36139_v25 }
 0xf14   :  { %v13427_v16 = vmul.f32 %v34163_v10, %v35866_v37  ;;  %32145 = vmatprep.subr.mxu1 %v34236_v3  ;;  %32113 = vmatpush3.msra.mxu0 %v13569_v31 }
 0xf15   :  { %32146 = vmatpush3.msra.mxu1 %v14059_v7  ;;  %32114 = vmatprep.subr.mxu0 %v34236_v3 }
 0xf16   :  { %32147 = vmatprep.subr.mxu1 %v34236_v3  ;;  %32115 = vmatpush3.msra.mxu0 %v13576_v23  ;;  %v13433_v27 = vmul.f32 %v35934_v40, %v13427_v16  ;;  %v36119_v23 = vand.u32 4294901760, %v14446_v34  ;;  %v14442_v40 = vld [vmem:[%s39389_s4 + $0x58] sm:$0xff] }
 0xf17   :  { %32148 = vmatpush3.msra.mxu1 %v14066_v32  ;;  %32116 = vmatprep.subr.mxu0 %v34236_v3  ;;  %v36168_v22 = vand.u32 4294901760, %v14442_v40  ;;  %v14436_v32 = vld [vmem:[%s39389_s4 + $0x28] sm:$0xff] }
 0xf18   :  { %32149 = vmatprep.subr.mxu1 %v34236_v3  ;;  %32117 = vmatpush3.msra.mxu0 %v13583_v24  ;;  %v36047_v37 = vadd.f32 %v35939_v42, %v13433_v27  ;;  %v36125_v18 = vsub.f32 %v14446_v34, %v36119_v23  ;;  %v14570_v42 = vsub.f32 %v36139_v25, %v14569_v11 }
 0xf19   :  { %32118 = vmatprep.mubr.msk.f32.mxu0 %vm34237_vm1, %v34236_v3  ;;  %32150 = vmatpush3.msra.mxu1 %v14073_v62  ;;  %v36184_v49 = vsub.f32 %v14442_v40, %v36168_v22 }
 0xf1a   :  { %32119 = vmatmul.mubr.f32.vlgmr.msra.gmra.mxu0 %v35950_v45  ;;  %32132 = vmatprep.subr.mxu0 %v34236_v3  ;;  %v13942_v17 = vsel %vm4002_vm3, %v36047_v37, 0  ;;  %v14562_v24 = vand.u32 4294901760, %v36125_v18  ;;  %v14441_v45 = vld [vmem:[%s39389_s4 + $0x50] sm:$0xff]  ;;  %v14571_v46 = vand.u32 4294901760, %v14570_v42 }
 0xf1b   :  { %32151 = vmatprep.mubr.msk.f32.mxu1 %vm34237_vm1, %v34236_v3  ;;  %32165 = vmatprep.subr.mxu1 %v34236_v3  ;;  %v14013_v4 = vand.u32 4294901760, %v13942_v17  ;;  %v36180_v48 = vand.u32 4294901760, %v14441_v45  ;;  %v14433_v42 = vld [vmem:[%s39389_s4 + $0x10] sm:$0xff] }
 0xf1c   :  { %32133 = vmatpush3.msra.mxu0 %v35957_v0  ;;  %32140 = vmatprep.mubr.msk.f32.mxu0 %vm34237_vm1, %v34236_v3  ;;  %v14563_v33 = vsub.f32 %v36125_v18, %v14562_v24 }
 0xf1d   :  { %v14014_v12 = vsub.f32 %v13942_v17, %v14013_v4  ;;  %32152 = vmatmul.mubr.f32.vlgmr.msra.gmra.mxu1 %v14013_v4  ;;  %32134 = vmatprep.subr.mxu0 %v34236_v3  ;;  %v36191_v52 = vsub.f32 %v14441_v45, %v36180_v48  ;;  %v36254_v17 = vand.u32 4294901760, %v14436_v32 }
 0xf1e   :  { %32166 = vmatpush3.msra.mxu1 %v35957_v0  ;;  %32135 = vmatpush3.msra.mxu0 %v35966_v50  ;;  %v14564_v41 = vand.u32 4294901760, %v14563_v33 }
 0xf1f   :  { %32167 = vmatprep.subr.mxu1 %v34236_v3  ;;  %32136 = vmatprep.subr.mxu0 %v34236_v3  ;;  %v14015_v13 = vand.u32 4294901760, %v14014_v12  ;;  %v14597_v59 = vand.u32 4294901760, %v36191_v52 }
 0xf20   :  { %32168 = vmatpush3.msra.mxu1 %v35966_v50  ;;  %32137 = vmatpush3.msra.mxu0 %v35976_v57 }
 0xf21   :  { %32169 = vmatprep.subr.mxu1 %v34236_v3  ;;  %32138 = vmatprep.subr.mxu0 %v34236_v3  ;;  %v14016_v21 = vsub.f32 %v14014_v12, %v14015_v13 }
 0xf22   :  { %32170 = vmatpush3.msra.mxu1 %v35976_v57  ;;  %32139 = vmatpush3.msra.mxu0 %v35983_v61 }
 0xf23   :  { %32171 = vmatprep.subr.mxu1 %v34236_v3  ;;  %32173 = vmatprep.mubr.msk.f32.mxu1 %vm34237_vm1, %v34236_v3  ;;  %v14017_v31 = vand.u32 4294901760, %v14016_v21 }
 0xf24   :  { %32172 = vmatpush3.msra.mxu1 %v35983_v61  ;;  %32154 = vmatprep.subr.mxu0 %v34236_v3 }
 0xf25   :  { %32174 = vmatmul.mubr.f32.vlgmr.msra.gmra.mxu1 %v14015_v13  ;;  %32187 = vmatprep.subr.mxu1 %v34236_v3 }
 0xf26   :  { %32141 = vmatmul.mubr.f32.vlgmr.msra.gmra.mxu0 %v14017_v31  ;;  %32188 = vmatpush3.msra.mxu1 %v35957_v0  ;;  %v14584_v0 = vsub.f32 %v36155_v38, %v14583_v15  ;;  %v36267_v31 = vsub.f32 %v14436_v32, %v36254_v17 }
 0xf27   :  { %32155 = vmatpush3.msra.mxu0 %v35974_v56  ;;  %32189 = vmatprep.subr.mxu1 %v34236_v3  ;;  %v14439_v56 = vld [vmem:[%s39389_s4 + $0x40] sm:$0xff] }
 0xf28   :  { %32156 = vmatprep.subr.mxu0 %v34236_v3  ;;  %32190 = vmatpush3.msra.mxu1 %v35966_v50  ;;  %v14578_v50 = vand.u32 4294901760, %v14577_v47  ;;  %v14585_v51 = vand.u32 4294901760, %v14584_v0  ;;  %v36201_v58 = vand.u32 4294901760, %v14439_v56  ;;  %v39399_v33 = vand.u32 4294901760, %v36267_v31 }
 0xf29   :  { %32157 = vmatpush3.msra.mxu0 %v35981_v60  ;;  %32191 = vmatprep.subr.mxu1 %v34236_v3  ;;  %v36206_v60 = vsub.f32 %v14440_v8, %v36193_v53  ;;  %v36296_v0 = vand.u32 4294901760, %v14433_v42 }
 0xf2a   :  { %32158 = vmatprep.subr.mxu0 %v34236_v3  ;;  %32192 = vmatpush3.msra.mxu1 %v35976_v57  ;;  %v14590_v57 = vand.u32 4294901760, %v36184_v49 }
 0xf2b   :  { %32159 = vmatpush3.msra.mxu0 %v35989_v1  ;;  %32193 = vmatprep.subr.mxu1 %v34236_v3  ;;  %v14438_v1 = vld [vmem:[%s39389_s4 + $0x38] sm:$0xff] }
 0xf2c   :  { %32160 = vmatprep.subr.mxu0 %v34236_v3  ;;  %32162 = vmatprep.mubr.msk.f32.mxu0 %vm34237_vm1, %v34236_v3  ;;  %v36224_v2 = vand.u32 4294901760, %v14438_v1 }
 0xf2d   :  { %32161 = vmatpush3.msra.mxu0 %v35996_v30  ;;  %32194 = vmatpush3.msra.mxu1 %v35983_v61  ;;  %v14591_v61 = vsub.f32 %v36184_v49, %v14590_v57  ;;  %v14604_v30 = vand.u32 4294901760, %v36206_v60 }
 0xf2e   :  { %32195 = vmatprep.mubr.msk.f32.mxu1 %vm34237_vm1, %v34236_v3  ;;  %32163 = vmatmul.mubr.f32.vlgmr.msra.gmra.mxu0 %v14014_v12  ;;  %v36237_v7 = vsub.f32 %v14438_v1, %v36224_v2  ;;  %v14435_v12 = vld [vmem:[%s39389_s4 + $0x20] sm:$0xff] }
 0xf2f   :  { %32176 = vmatprep.subr.mxu0 %v34236_v3  ;;  %32196 = vmatmul.mubr.f32.vlgmr.msra.gmra.mxu1 %v14013_v4  ;;  %v14605_v6 = vsub.f32 %v36206_v60, %v14604_v30  ;;  %v36269_v34 = vand.u32 4294901760, %v14435_v12 }
 0xf30   :  { %32177 = vmatpush3.msra.mxu0 %v14050_v63  ;;  %32184 = vmatprep.mubr.msk.f32.mxu0 %vm34237_vm1, %v34236_v3  ;;  %v36214_v63 = vsub.f32 %v14439_v56, %v36201_v58  ;;  %v39401_v62 = vand.u32 4294901760, %v36237_v7 }
 0xf31   :  { %32178 = vmatprep.subr.mxu0 %v34236_v3  ;;  %32233 = vmatprep.subr.mxu1 %v34236_v3  ;;  %v14606_v16 = vand.u32 4294901760, %v14605_v6  ;;  %v36282_v40 = vsub.f32 %v14435_v12, %v36269_v34 }
 0xf32   :  { %32179 = vmatpush3.msra.mxu0 %v14057_v5  ;;  %32265 = vmatprep.mubr.msk.f32.mxu1 %vm34237_vm1, %v34236_v3  ;;  %v14598_v5 = vsub.f32 %v36191_v52, %v14597_v59  ;;  %v14611_v14 = vand.u32 4294901760, %v36214_v63  ;;  %v14619_v13 = vsub.f32 %v36237_v7, %v39401_v62 }
 0xf33   :  { %32180 = vmatprep.subr.mxu0 %v34236_v3  ;;  %32234 = vmatpush3.msra.mxu1 %v14564_v41  ;;  %v36285_v41 = vand.u32 4294901760, %v14434_v39  ;;  %v39398_v47 = vand.u32 4294901760, %v36282_v40 }
 0xf34   :  { %32181 = vmatpush3.msra.mxu0 %v14064_v54  ;;  %32235 = vmatprep.subr.mxu1 %v34236_v3  ;;  %v14592_v54 = vand.u32 4294901760, %v14591_v61  ;;  %v14599_v26 = vand.u32 4294901760, %v14598_v5  ;;  %v14612_v10 = vsub.f32 %v36214_v63, %v14611_v14  ;;  %v14620_v19 = vand.u32 4294901760, %v14619_v13 }
 0xf35   :  { %32182 = vmatprep.subr.mxu0 %v34236_v3  ;;  %32236 = vmatpush3.msra.mxu1 %v14571_v46  ;;  %v14633_v46 = vsub.f32 %v36267_v31, %v39399_v33  ;;  %v36300_v8 = vsub.f32 %v14434_v39, %v36285_v41  ;;  %v14640_v56 = vsub.f32 %v36282_v40, %v39398_v47 }
 0xf36   :  { %32183 = vmatpush3.msra.mxu0 %v14071_v35  ;;  %32237 = vmatprep.subr.mxu1 %v34236_v3  ;;  %v14437_v35 = vld [vmem:[%s39389_s4 + $0x30] sm:$0xff]  ;;  %v36311_v61 = vsub.f32 %v14433_v42, %v36296_v0 }
 0xf37   :  { %32185 = vmatmul.mubr.f32.vlgmr.msra.gmra.mxu0 %v14013_v4  ;;  %32198 = vmatprep.subr.mxu0 %v34236_v3  ;;  %v36239_v9 = vand.u32 4294901760, %v14437_v35  ;;  %v14613_v4 = vand.u32 4294901760, %v14612_v10  ;;  %v39397_v5 = vand.u32 4294901760, %v36300_v8 }
 0xf38   :  { %32230 = vmatprep.mubr.msk.f32.mxu0 %vm34237_vm1, %v34236_v3  ;;  %32199 = vmatpush3.msra.mxu0 %v36119_v23 }
 0xf39   :  { %32200 = vmatprep.subr.mxu0 %v34236_v3  ;;  %32238 = vmatpush3.msra.mxu1 %v14578_v50  ;;  %v36252_v27 = vsub.f32 %v14437_v35, %v36239_v9  ;;  %v14432_v50 = vld [vmem:[%s39389_s4 + $0x8] sm:$0xff]  ;;  %v14641_v35 = vand.u32 4294901760, %v14640_v56  ;;  %v14647_v32 = vsub.f32 %v36300_v8, %v39397_v5 }
 0xf3a   :  { %32201 = vmatpush3.msra.mxu0 %v36127_v55  ;;  %32239 = vmatprep.subr.mxu1 %v34236_v3  ;;  %v36313_v1 = vand.u32 4294901760, %v14432_v50 }
 0xf3b   :  { %32202 = vmatprep.subr.mxu0 %v34236_v3  ;;  %32240 = vmatpush3.msra.mxu1 %v14585_v51  ;;  %v39400_v21 = vand.u32 4294901760, %v36252_v27  ;;  %v14634_v51 = vand.u32 4294901760, %v14633_v46  ;;  %v14648_v13 = vand.u32 4294901760, %v14647_v32 }
 0xf3c   :  { %32203 = vmatpush3.msra.mxu0 %v36141_v28  ;;  %32241 = vmatprep.subr.mxu1 %v34236_v3  ;;  %v36324_v6 = vsub.f32 %v14432_v50, %v36313_v1 }
 0xf3d   :  { %32204 = vmatprep.subr.mxu0 %v34236_v3  ;;  %32242 = vmatpush3.msra.mxu1 %v14592_v54  ;;  %v14626_v20 = vsub.f32 %v36252_v27, %v39400_v21  ;;  %v14431_v54 = vld [vmem:[%s39389_s4] sm:$0xff] }
 0xf3e   :  { %32205 = vmatpush3.msra.mxu0 %v36143_v29  ;;  %32243 = vmatprep.subr.mxu1 %v34236_v3  ;;  %v36326_v10 = vand.u32 4294901760, %v14431_v54 }
 0xf3f   :  { %32206 = vmatprep.subr.mxu0 %v34236_v3  ;;  %32244 = vmatpush3.msra.mxu1 %v14599_v26  ;;  %v14627_v45 = vand.u32 4294901760, %v14626_v20  ;;  %v39396_v26 = vand.u32 4294901760, %v36311_v61 }
 0xf40   :  { %32207 = vmatpush3.msra.mxu0 %v36168_v22  ;;  %32245 = vmatprep.subr.mxu1 %v34236_v3  ;;  %v36339_v12 = vsub.f32 %v14431_v54, %v36326_v10 }
 0xf41   :  { %32208 = vmatprep.subr.mxu0 %v34236_v3  ;;  %32246 = vmatpush3.msra.mxu1 %v14606_v16  ;;  %v14654_v16 = vsub.f32 %v36311_v61, %v39396_v26 }
 0xf42   :  { %32209 = vmatpush3.msra.mxu0 %v36180_v48  ;;  %32247 = vmatprep.subr.mxu1 %v34236_v3  ;;  %v39394_v20 = vand.u32 4294901760, %v36339_v12 }
 0xf43   :  { %32210 = vmatprep.subr.mxu0 %v34236_v3  ;;  %32248 = vmatpush3.msra.mxu1 %v14613_v4  ;;  %v39395_v4 = vand.u32 4294901760, %v36324_v6  ;;  %v14655_v39 = vand.u32 4294901760, %v14654_v16  ;;  %v29524_v16 = vld [vmem:[%s39390_s5 + $0x2] ss:$0 sm:$0xff] }
 0xf44   :  { %32211 = vmatpush3.msra.mxu0 %v36193_v53  ;;  %32249 = vmatprep.subr.mxu1 %v34236_v3 }
 0xf45   :  { %32212 = vmatprep.subr.mxu0 %v34236_v3  ;;  %32250 = vmatpush3.msra.mxu1 %v14620_v19  ;;  %v14661_v19 = vsub.f32 %v36324_v6, %v39395_v4 }
 0xf46   :  { %32213 = vmatpush3.msra.mxu0 %v36201_v58  ;;  %32251 = vmatprep.subr.mxu1 %v34236_v3 }
 0xf47   :  { %32214 = vmatprep.subr.mxu0 %v34236_v3  ;;  %32252 = vmatpush3.msra.mxu1 %v14627_v45  ;;  %v14662_v42 = vand.u32 4294901760, %v14661_v19  ;;  %v14668_v45 = vsub.f32 %v36339_v12, %v39394_v20 }
 0xf48   :  { %32215 = vmatpush3.msra.mxu0 %v36224_v2  ;;  %32253 = vmatprep.subr.mxu1 %v34236_v3 }
 0xf49   :  { %32216 = vmatprep.subr.mxu0 %v34236_v3  ;;  %32254 = vmatpush3.msra.mxu1 %v14634_v51  ;;  %v14669_v46 = vand.u32 4294901760, %v14668_v45 }
 0xf4a   :  { %32217 = vmatpush3.msra.mxu0 %v36239_v9  ;;  %32255 = vmatprep.subr.mxu1 %v34236_v3 }
 0xf4b   :  { %32218 = vmatprep.subr.mxu0 %v34236_v3  ;;  %32256 = vmatpush3.msra.mxu1 %v14641_v35 }
 0xf4c   :  { %32219 = vmatpush3.msra.mxu0 %v36254_v17  ;;  %32257 = vmatprep.subr.mxu1 %v34236_v3 }
 0xf4d   :  { %32220 = vmatprep.subr.mxu0 %v34236_v3  ;;  %32258 = vmatpush3.msra.mxu1 %v14648_v13 }
 0xf4e   :  { %32221 = vmatpush3.msra.mxu0 %v36269_v34  ;;  %32259 = vmatprep.subr.mxu1 %v34236_v3 }
 0xf4f   :  { %32222 = vmatprep.subr.mxu0 %v34236_v3  ;;  %32260 = vmatpush3.msra.mxu1 %v14655_v39 }
 0xf50   :  { %32223 = vmatpush3.msra.mxu0 %v36285_v41  ;;  %32261 = vmatprep.subr.mxu1 %v34236_v3 }
 0xf51   :  { %32224 = vmatprep.subr.mxu0 %v34236_v3  ;;  %32262 = vmatpush3.msra.mxu1 %v14662_v42 }
 0xf52   :  { %32225 = vmatpush3.msra.mxu0 %v36296_v0  ;;  %32263 = vmatprep.subr.mxu1 %v34236_v3 }
 0xf53   :  { %32226 = vmatprep.subr.mxu0 %v34236_v3  ;;  %32264 = vmatpush3.msra.mxu1 %v14669_v46 }
 0xf54   :  { %32227 = vmatpush3.msra.mxu0 %v36313_v1  ;;  %32303 = vmatprep.subr.mxu1 %v34236_v3 }
 0xf55   :  { %32228 = vmatprep.subr.mxu0 %v34236_v3 }
 0xf56   :  { %32229 = vmatpush3.msra.mxu0 %v36326_v10 }
 0xf57   :  { %32268 = vmatprep.subr.mxu0 %v34236_v3 }
 0xfbf   :  { %v13622_v50 = vpop.f32.mrf.mxu1 }
 0xfc1   :  { %v32087_v51 = vpop.f32.mrf.mxu1 }
 0xfc7   :  { %v13779_v56 = vpop.f32.mrf.mxu1 }
 0xfc8   :  { %v13531_v54 = vpop.f32.mrf.mxu0 }
 0xfc9   :  { %v32109_v35 = vpop.f32.mrf.mxu1  ;;  %v13532_v13 = vadd.f32 %v29524_v16, %v13531_v54 }
 0xfca   :  { %v32076_v32 = vpop.f32.mrf.mxu0 }
 0xfcb   :  { %v13623_v42 = vadd.f32 %v13622_v50, %v13532_v13 }
 0xfd0   :  { %v13702_v39 = vpop.f32.mrf.mxu0 }
 0xfd1   :  { %v13937_v19 = vpop.f32.mrf.mxu1  ;;  %v13703_v4 = vadd.f32 %v13702_v39, %v13623_v42 }
 0xfd2   :  { %v32098_v45 = vpop.f32.mrf.mxu0 }
 0xfd3   :  { %v32131_v20 = vpop.f32.mrf.mxu1  ;;  %v13780_v46 = vadd.f32 %v13779_v56, %v13703_v4 }
 0xfda   :  { %v13862_v26 = vpop.f32.mrf.mxu0 }
 0xfdb   :  { %v13863_v5 = vadd.f32 %v13862_v26, %v13780_v46 }
 0xfdc   :  { %v32120_v47 = vpop.f32.mrf.mxu0 }
 0xfdd   :  { %v13938_v51 = vadd.f32 %v13937_v19, %v13863_v5  ;;  %v14110_v33 = vpop.f32.mrf.mxu1 }
 0xfdf   :  { %v14429_v21 = vmax.f32 %v13938_v51, 0.0  ;;  %v32153_v35 = vpop.f32.mrf.mxu1 }
 0xfe1   :  { %v36359_v32 = vand.u32 4294901760, %v14429_v21 }
 0xfe3   :  { %v36362_v62 = vsub.f32 %v14429_v21, %v36359_v32  ;;  %32266 = vmatmul.mubr.f32.vlgmr.msra.gmra.mxu1 %v36359_v32 }
 0xfe4   :  { %32304 = vmatpush3.msra.mxu1 %v36119_v23  ;;  %32335 = vmatprep.mubr.msk.f32.mxu1 %vm34237_vm1, %v34236_v3 }
 0xfe5   :  { %v14551_v4 = vand.u32 4294901760, %v36362_v62  ;;  %v14267_v26 = vpop.f32.mrf.mxu1  ;;  %32305 = vmatprep.subr.mxu1 %v34236_v3 }
 0xfe6   :  { %v14019_v47 = vpop.f32.mrf.mxu0  ;;  %32306 = vmatpush3.msra.mxu1 %v36127_v55 }
 0xfe7   :  { %v14552_v21 = vsub.f32 %v36362_v62, %v14551_v4  ;;  %v14020_v5 = vadd.f32 %v29524_v16, %v14019_v47  ;;  %v32175_v20 = vpop.f32.mrf.mxu1  ;;  %32307 = vmatprep.subr.mxu1 %v34236_v3 }
 0xfe8   :  { %v32142_v50 = vpop.f32.mrf.mxu0  ;;  %32308 = vmatpush3.msra.mxu1 %v36141_v28 }
 0xfe9   :  { %v14553_v56 = vand.u32 4294901760, %v14552_v21  ;;  %32309 = vmatprep.subr.mxu1 %v34236_v3  ;;  %v14111_v54 = vadd.f32 %v14110_v33, %v14020_v5  ;;  %v39414_v50 = vand.u32 4294901760, %v36300_v8 }
 0xfea   :  { %32310 = vmatpush3.msra.mxu1 %v36143_v29 }
 0xfeb   :  { %32311 = vmatprep.subr.mxu1 %v34236_v3  ;;  %32231 = vmatmul.mubr.f32.vlgmr.msra.gmra.mxu0 %v14553_v56 }
 0xfec   :  { %32269 = vmatpush3.msra.mxu0 %v36125_v18  ;;  %32312 = vmatpush3.msra.mxu1 %v36168_v22  ;;  %v14461_v18 = vld [vmem:[%s39389_s4 + $0xf0] sm:$0xff] }
 0xfed   :  { %32270 = vmatprep.subr.mxu0 %v34236_v3  ;;  %32313 = vmatprep.subr.mxu1 %v34236_v3 }
 0xfee   :  { %v14190_v16 = vpop.f32.mrf.mxu0  ;;  %32271 = vmatpush3.msra.mxu0 %v36139_v25  ;;  %32314 = vmatpush3.msra.mxu1 %v36180_v48  ;;  %v36483_v25 = vand.u32 4294901760, %v14461_v18 }
 0xfef   :  { %v14191_v13 = vadd.f32 %v14190_v16, %v14111_v54  ;;  %v14425_v33 = vpop.f32.mrf.mxu1  ;;  %32272 = vmatprep.subr.mxu0 %v34236_v3  ;;  %32315 = vmatprep.subr.mxu1 %v34236_v3 }
 0xff0   :  { %v32164_v39 = vpop.f32.mrf.mxu0  ;;  %32273 = vmatpush3.msra.mxu0 %v36152_v36  ;;  %32316 = vmatpush3.msra.mxu1 %v36193_v53  ;;  %v36504_v36 = vsub.f32 %v14461_v18, %v36483_v25 }
 0xff1   :  { %v32197_v19 = vpop.f32.mrf.mxu1  ;;  %32274 = vmatprep.subr.mxu0 %v34236_v3  ;;  %32317 = vmatprep.subr.mxu1 %v34236_v3  ;;  %v14268_v45 = vadd.f32 %v14267_v26, %v14191_v13  ;;  %v39415_v39 = vand.u32 4294901760, %v36311_v61 }
 0xff2   :  { %32275 = vmatpush3.msra.mxu0 %v36155_v38  ;;  %32318 = vmatpush3.msra.mxu1 %v36201_v58 }
 0xff3   :  { %32276 = vmatprep.subr.mxu0 %v34236_v3  ;;  %32319 = vmatprep.subr.mxu1 %v34236_v3 }
 0xff4   :  { %32277 = vmatpush3.msra.mxu0 %v36184_v49  ;;  %32320 = vmatpush3.msra.mxu1 %v36224_v2 }
 0xff5   :  { %32278 = vmatprep.subr.mxu0 %v34236_v3  ;;  %32321 = vmatprep.subr.mxu1 %v34236_v3 }
 0xff6   :  { %32279 = vmatpush3.msra.mxu0 %v36191_v52  ;;  %32322 = vmatpush3.msra.mxu1 %v36239_v9  ;;  %v14456_v52 = vld [vmem:[%s39389_s4 + $0xc8] sm:$0xff] }
 0xff7   :  { %v14350_v42 = vpop.f32.mrf.mxu0  ;;  %32280 = vmatprep.subr.mxu0 %v34236_v3  ;;  %32323 = vmatprep.subr.mxu1 %v34236_v3 }
 0xff8   :  { %v14351_v46 = vadd.f32 %v14350_v42, %v14268_v45  ;;  %32281 = vmatpush3.msra.mxu0 %v36206_v60  ;;  %32324 = vmatpush3.msra.mxu1 %v36254_v17  ;;  %v14455_v60 = vld [vmem:[%s39389_s4 + $0xc0] sm:$0xff] }
 0xff9   :  { %v32186_v51 = vpop.f32.mrf.mxu0  ;;  %32282 = vmatprep.subr.mxu0 %v34236_v3  ;;  %32325 = vmatprep.subr.mxu1 %v34236_v3 }
 0xffa   :  { %v36407_v35 = vadd.f32 %v14425_v33, %v14351_v46  ;;  %32283 = vmatpush3.msra.mxu0 %v36214_v63  ;;  %32326 = vmatpush3.msra.mxu1 %v36269_v34  ;;  %v39411_v63 = vand.u32 4294901760, %v36252_v27  ;;  %v14451_v33 = vld [vmem:[%s39389_s4 + $0xa0] sm:$0xff]  ;;  %v39416_v51 = vand.u32 4294901760, %v36324_v6 }
 0xffb   :  { %32284 = vmatprep.subr.mxu0 %v34236_v3  ;;  %32327 = vmatprep.subr.mxu1 %v34236_v3 }
 0xffc   :  { %32285 = vmatpush3.msra.mxu0 %v36237_v7  ;;  %32328 = vmatpush3.msra.mxu1 %v36285_v41 }
 0xffd   :  { %32286 = vmatprep.subr.mxu0 %v34236_v3  ;;  %32329 = vmatprep.subr.mxu1 %v34236_v3 }
 0xffe   :  { %32287 = vmatpush3.msra.mxu0 %v36252_v27  ;;  %32330 = vmatpush3.msra.mxu1 %v36296_v0 }
 0xfff   :  { %32288 = vmatprep.subr.mxu0 %v34236_v3  ;;  %32331 = vmatprep.subr.mxu1 %v34236_v3 }
0x1000   :  { %32289 = vmatpush3.msra.mxu0 %v36267_v31  ;;  %32332 = vmatpush3.msra.mxu1 %v36313_v1 }
0x1001   :  { %32290 = vmatprep.subr.mxu0 %v34236_v3  ;;  %32333 = vmatprep.subr.mxu1 %v34236_v3 }
0x1002   :  { %32291 = vmatpush3.msra.mxu0 %v36282_v40  ;;  %32334 = vmatpush3.msra.mxu1 %v36326_v10 }
0x1003   :  { %32292 = vmatprep.subr.mxu0 %v34236_v3  ;;  %32336 = vmatmul.mubr.f32.vlgmr.msra.gmra.mxu1 %v14551_v4 }
0x1004   :  { %32373 = vmatprep.subr.mxu1 %v34236_v3  ;;  %32293 = vmatpush3.msra.mxu0 %v36300_v8 }
0x1005   :  { %32374 = vmatpush3.msra.mxu1 %v36119_v23  ;;  %32294 = vmatprep.subr.mxu0 %v34236_v3  ;;  %v14462_v23 = vld [vmem:[%s39389_s4 + $0xf8] sm:$0xff] }
0x1006   :  { %32375 = vmatprep.subr.mxu1 %v34236_v3  ;;  %32295 = vmatpush3.msra.mxu0 %v36311_v61  ;;  %v14450_v61 = vld [vmem:[%s39389_s4 + $0x98] sm:$0xff] }
0x1007   :  { %32376 = vmatpush3.msra.mxu1 %v36127_v55  ;;  %32296 = vmatprep.subr.mxu0 %v34236_v3  ;;  %v36473_v55 = vand.u32 4294901760, %v14462_v23 }
0x1008   :  { %32377 = vmatprep.subr.mxu1 %v34236_v3  ;;  %32297 = vmatpush3.msra.mxu0 %v36324_v6  ;;  %v14449_v6 = vld [vmem:[%s39389_s4 + $0x90] sm:$0xff] }
0x1009   :  { %32378 = vmatpush3.msra.mxu1 %v36141_v28  ;;  %32298 = vmatprep.subr.mxu0 %v34236_v3  ;;  %v14459_v28 = vld [vmem:[%s39389_s4 + $0xe0] sm:$0xff] }
0x100a   :  { %32379 = vmatprep.subr.mxu1 %v34236_v3  ;;  %32299 = vmatpush3.msra.mxu0 %v36339_v12  ;;  %v36506_v38 = vand.u32 4294901760, %v14459_v28 }
0x100b   :  { %32300 = vmatprep.mubr.msk.f32.mxu0 %vm34237_vm1, %v34236_v3  ;;  %32380 = vmatpush3.msra.mxu1 %v36143_v29  ;;  %v36494_v29 = vsub.f32 %v14462_v23, %v36473_v55 }
0x100c   :  { %32301 = vmatmul.mubr.f32.vlgmr.msra.gmra.mxu0 %v36362_v62  ;;  %32338 = vmatprep.subr.mxu0 %v34236_v3 }
0x100d   :  { %32381 = vmatprep.subr.mxu1 %v34236_v3  ;;  %32339 = vmatpush3.msra.mxu0 %v14562_v24  ;;  %v14460_v24 = vld [vmem:[%s39389_s4 + $0xe8] sm:$0xff] }
0x100e   :  { %32382 = vmatpush3.msra.mxu1 %v36168_v22  ;;  %32340 = vmatprep.subr.mxu0 %v34236_v3 }
0x100f   :  { %32383 = vmatprep.subr.mxu1 %v34236_v3  ;;  %32341 = vmatpush3.msra.mxu0 %v14569_v11  ;;  %v36496_v11 = vand.u32 4294901760, %v14460_v24 }
0x1010   :  { %32384 = vmatpush3.msra.mxu1 %v36180_v48  ;;  %32342 = vmatprep.subr.mxu0 %v34236_v3  ;;  %v14457_v48 = vld [vmem:[%s39389_s4 + $0xd0] sm:$0xff] }
0x1011   :  { %32385 = vmatprep.subr.mxu1 %v34236_v3  ;;  %32343 = vmatpush3.msra.mxu0 %v14576_v43  ;;  %v14458_v43 = vld [vmem:[%s39389_s4 + $0xd8] sm:$0xff]  ;;  %v36518_v22 = vsub.f32 %v14460_v24, %v36496_v11  ;;  %v36640_v24 = vand.u32 4294901760, %v14451_v33 }
0x1012   :  { %32386 = vmatpush3.msra.mxu1 %v36193_v53  ;;  %32344 = vmatprep.subr.mxu0 %v34236_v3  ;;  %v36525_v49 = vand.u32 4294901760, %v14458_v43  ;;  %v39410_v53 = vand.u32 4294901760, %v36237_v7 }
0x1013   :  { %32387 = vmatprep.subr.mxu1 %v34236_v3  ;;  %32345 = vmatpush3.msra.mxu0 %v14583_v15  ;;  %v15203_v15 = vand.u32 4294901760, %v36494_v29 }
0x1014   :  { %32388 = vmatpush3.msra.mxu1 %v36201_v58  ;;  %32346 = vmatprep.subr.mxu0 %v34236_v3  ;;  %v36535_v58 = vsub.f32 %v14459_v28, %v36506_v38  ;;  %v36556_v7 = vsub.f32 %v14458_v43, %v36525_v49  ;;  %v39417_v43 = vand.u32 4294901760, %v36339_v12  ;;  %v14448_v12 = vld [vmem:[%s39389_s4 + $0x88] sm:$0xff] }
0x1015   :  { %32389 = vmatprep.subr.mxu1 %v34236_v3  ;;  %32347 = vmatpush3.msra.mxu0 %v14590_v57  ;;  %v15210_v57 = vand.u32 4294901760, %v36504_v36 }
0x1016   :  { %32390 = vmatpush3.msra.mxu1 %v36224_v2  ;;  %32348 = vmatprep.subr.mxu0 %v34236_v3  ;;  %v15217_v2 = vand.u32 4294901760, %v36518_v22  ;;  %v15224_v27 = vand.u32 4294901760, %v36535_v58 }
0x1017   :  { %32391 = vmatprep.subr.mxu1 %v34236_v3  ;;  %32349 = vmatpush3.msra.mxu0 %v14597_v59  ;;  %v36539_v59 = vand.u32 4294901760, %v14457_v48  ;;  %v15211_v62 = vsub.f32 %v36504_v36, %v15210_v57 }
0x1018   :  { %32392 = vmatpush3.msra.mxu1 %v36239_v9  ;;  %32350 = vmatprep.subr.mxu0 %v34236_v3  ;;  %v39412_v9 = vand.u32 4294901760, %v36267_v31  ;;  %v39413_v31 = vand.u32 4294901760, %v36282_v40  ;;  %v15218_v4 = vsub.f32 %v36518_v22, %v15217_v2  ;;  %v15231_v40 = vand.u32 4294901760, %v36556_v7 }
0x1019   :  { %32393 = vmatprep.subr.mxu1 %v34236_v3  ;;  %32351 = vmatpush3.msra.mxu0 %v14604_v30  ;;  %v15204_v30 = vsub.f32 %v36494_v29, %v15203_v15  ;;  %v15212_v21 = vand.u32 4294901760, %v15211_v62  ;;  %v15225_v5 = vsub.f32 %v36535_v58, %v15224_v27  ;;  %v36670_v62 = vsub.f32 %v14451_v33, %v36640_v24 }
0x101a   :  { %32394 = vmatpush3.msra.mxu1 %v36254_v17  ;;  %32352 = vmatprep.subr.mxu0 %v34236_v3  ;;  %v36565_v17 = vand.u32 4294901760, %v14455_v60  ;;  %v15219_v16 = vand.u32 4294901760, %v15218_v4  ;;  %v15232_v8 = vsub.f32 %v36556_v7, %v15231_v40 }
0x101b   :  { %32395 = vmatprep.subr.mxu1 %v34236_v3  ;;  %32353 = vmatpush3.msra.mxu0 %v14611_v14  ;;  %v36551_v14 = vand.u32 4294901760, %v14456_v52  ;;  %v15226_v42 = vand.u32 4294901760, %v15225_v5 }
0x101c   :  { %32396 = vmatpush3.msra.mxu1 %v36269_v34  ;;  %32354 = vmatprep.subr.mxu0 %v34236_v3  ;;  %v14454_v34 = vld [vmem:[%s39389_s4 + $0xb8] sm:$0xff]  ;;  %v36599_v20 = vsub.f32 %v14455_v60, %v36565_v17  ;;  %v36656_v60 = vand.u32 4294901760, %v14450_v61 }
0x101d   :  { %32397 = vmatprep.subr.mxu1 %v34236_v3  ;;  %32355 = vmatpush3.msra.mxu0 %v39410_v53  ;;  %v36582_v26 = vsub.f32 %v14456_v52, %v36551_v14  ;;  %v36591_v47 = vand.u32 4294901760, %v14454_v34 }
0x101e   :  { %32398 = vmatpush3.msra.mxu1 %v36285_v41  ;;  %32356 = vmatprep.subr.mxu0 %v34236_v3  ;;  %v36573_v41 = vsub.f32 %v14457_v48, %v36539_v59  ;;  %v15252_v46 = vand.u32 4294901760, %v36599_v20  ;;  %v15233_v48 = vand.u32 4294901760, %v15232_v8 }
0x101f   :  { %32399 = vmatprep.subr.mxu1 %v34236_v3  ;;  %32357 = vmatpush3.msra.mxu0 %v39411_v63  ;;  %v15245_v13 = vand.u32 4294901760, %v36582_v26  ;;  %v36622_v19 = vsub.f32 %v14454_v34, %v36591_v47  ;;  %v36672_v34 = vand.u32 4294901760, %v14449_v6 }
0x1020   :  { %32400 = vmatpush3.msra.mxu1 %v36296_v0  ;;  %32358 = vmatprep.subr.mxu0 %v34236_v3  ;;  %v15205_v0 = vand.u32 4294901760, %v15204_v30  ;;  %v15238_v56 = vand.u32 4294901760, %v36573_v41  ;;  %v15253_v63 = vsub.f32 %v36599_v20, %v15252_v46 }
0x1021   :  { %32401 = vmatprep.subr.mxu1 %v34236_v3  ;;  %32359 = vmatpush3.msra.mxu0 %v39412_v9  ;;  %v15246_v28 = vsub.f32 %v36582_v26, %v15245_v13  ;;  %v15259_v52 = vand.u32 4294901760, %v36622_v19 }
0x1022   :  { %32402 = vmatpush3.msra.mxu1 %v36313_v1  ;;  %32360 = vmatprep.subr.mxu0 %v34236_v3  ;;  %v14453_v1 = vld [vmem:[%s39389_s4 + $0xb0] sm:$0xff]  ;;  %v15239_v23 = vsub.f32 %v36573_v41, %v15238_v56  ;;  %v15254_v5 = vand.u32 4294901760, %v15253_v63 }
0x1023   :  { %32403 = vmatprep.subr.mxu1 %v34236_v3  ;;  %32361 = vmatpush3.msra.mxu0 %v39413_v31  ;;  %v36608_v54 = vand.u32 4294901760, %v14453_v1  ;;  %v15247_v31 = vand.u32 4294901760, %v15246_v28 }
0x1024   :  { %32404 = vmatpush3.msra.mxu1 %v36326_v10  ;;  %32405 = vmatprep.mubr.msk.f32.mxu1 %vm34237_vm1, %v34236_v3  ;;  %v14452_v10 = vld [vmem:[%s39389_s4 + $0xa8] sm:$0xff]  ;;  %v15240_v30 = vand.u32 4294901760, %v15239_v23 }
0x1025   :  { %32362 = vmatprep.subr.mxu0 %v34236_v3  ;;  %32406 = vmatmul.mubr.f32.vlgmr.msra.gmra.mxu1 %v36359_v32  ;;  %v36624_v45 = vand.u32 4294901760, %v14452_v10  ;;  %v36638_v18 = vsub.f32 %v14453_v1, %v36608_v54  ;;  %v36685_v1 = vsub.f32 %v14450_v61, %v36656_v60 }
0x1026   :  { %32443 = vmatprep.subr.mxu1 %v34236_v3  ;;  %32363 = vmatpush3.msra.mxu0 %v39414_v50  ;;  %v15280_v50 = vand.u32 4294901760, %v36670_v62 }
0x1027   :  { %32444 = vmatpush3.msra.mxu1 %v15205_v0  ;;  %32364 = vmatprep.subr.mxu0 %v34236_v3  ;;  %v36654_v53 = vsub.f32 %v14452_v10, %v36624_v45  ;;  %v15266_v9 = vand.u32 4294901760, %v36638_v18  ;;  %v14447_v0 = vld [vmem:[%s39389_s4 + $0x80] sm:$0xff] }
0x1028   :  { %32445 = vmatprep.subr.mxu1 %v34236_v3  ;;  %32365 = vmatpush3.msra.mxu0 %v39415_v39  ;;  %v36699_v33 = vand.u32 4294901760, %v14447_v0  ;;  %v15281_v23 = vsub.f32 %v36670_v62, %v15280_v50 }
0x1029   :  { %32446 = vmatpush3.msra.mxu1 %v15212_v21  ;;  %32366 = vmatprep.subr.mxu0 %v34236_v3  ;;  %v15273_v4 = vand.u32 4294901760, %v36654_v53  ;;  %v36687_v21 = vand.u32 4294901760, %v14448_v12  ;;  %v15267_v10 = vsub.f32 %v36638_v18, %v15266_v9 }
0x102a   :  { %32447 = vmatprep.subr.mxu1 %v34236_v3  ;;  %32367 = vmatpush3.msra.mxu0 %v39416_v51 }
0x102b   :  { %32448 = vmatpush3.msra.mxu1 %v15219_v16  ;;  %32368 = vmatprep.subr.mxu0 %v34236_v3  ;;  %v36697_v16 = vsub.f32 %v14449_v6, %v36672_v34  ;;  %v15274_v8 = vsub.f32 %v36654_v53, %v15273_v4  ;;  %v36709_v61 = vsub.f32 %v14448_v12, %v36687_v21  ;;  %v15268_v51 = vand.u32 4294901760, %v15267_v10 }
0x102c   :  { %32449 = vmatprep.subr.mxu1 %v34236_v3  ;;  %32369 = vmatpush3.msra.mxu0 %v39417_v43  ;;  %v36719_v6 = vsub.f32 %v14447_v0, %v36699_v33  ;;  %v14430_v12 = vmax.f32 %v36407_v35, 0.0 }
0x102d   :  { %32370 = vmatprep.mubr.msk.f32.mxu0 %vm34237_vm1, %v34236_v3  ;;  %32450 = vmatpush3.msra.mxu1 %v15226_v42  ;;  %v15287_v42 = vand.u32 4294901760, %v36685_v1  ;;  %v15294_v28 = vand.u32 4294901760, %v36697_v16  ;;  %v15275_v43 = vand.u32 4294901760, %v15274_v8  ;;  %v15301_v63 = vand.u32 4294901760, %v36709_v61 }
0x102e   :  { %32371 = vmatmul.mubr.f32.vlgmr.msra.gmra.mxu0 %v36359_v32  ;;  %32408 = vmatprep.subr.mxu0 %v34236_v3  ;;  %v15260_v32 = vsub.f32 %v36622_v19, %v15259_v52  ;;  %v15308_v0 = vand.u32 4294901760, %v36719_v6 }
0x102f   :  { %32451 = vmatprep.subr.mxu1 %v34236_v3  ;;  %32409 = vmatpush3.msra.mxu0 %v36473_v55  ;;  %v15302_v35 = vsub.f32 %v36709_v61, %v15301_v63 }
0x1030   :  { %32452 = vmatpush3.msra.mxu1 %v15233_v48  ;;  %32410 = vmatprep.subr.mxu0 %v34236_v3  ;;  %v15261_v39 = vand.u32 4294901760, %v15260_v32  ;;  %v15288_v48 = vsub.f32 %v36685_v1, %v15287_v42 }
0x1031   :  { %32453 = vmatprep.subr.mxu1 %v34236_v3  ;;  %32411 = vmatpush3.msra.mxu0 %v36483_v25  ;;  %v15303_v8 = vand.u32 4294901760, %v15302_v35 }
0x1032   :  { %32454 = vmatpush3.msra.mxu1 %v15240_v30  ;;  %32412 = vmatprep.subr.mxu0 %v34236_v3  ;;  %v15282_v30 = vand.u32 4294901760, %v15281_v23  ;;  %v15289_v32 = vand.u32 4294901760, %v15288_v48 }
0x1033   :  { %32455 = vmatprep.subr.mxu1 %v34236_v3  ;;  %32413 = vmatpush3.msra.mxu0 %v36496_v11 }
0x1034   :  { %32456 = vmatpush3.msra.mxu1 %v15247_v31  ;;  %32414 = vmatprep.subr.mxu0 %v34236_v3  ;;  %v15295_v31 = vsub.f32 %v36697_v16, %v15294_v28 }
0x1035   :  { %32457 = vmatprep.subr.mxu1 %v34236_v3  ;;  %32415 = vmatpush3.msra.mxu0 %v36506_v38 }
0x1036   :  { %32458 = vmatpush3.msra.mxu1 %v15254_v5  ;;  %32416 = vmatprep.subr.mxu0 %v34236_v3  ;;  %v36744_v5 = vand.u32 4294901760, %v14430_v12  ;;  %v15296_v10 = vand.u32 4294901760, %v15295_v31 }
0x1037   :  { %32459 = vmatprep.subr.mxu1 %v34236_v3  ;;  %32417 = vmatpush3.msra.mxu0 %v36525_v49 }
0x1038   :  { %32460 = vmatpush3.msra.mxu1 %v15261_v39  ;;  %32418 = vmatprep.subr.mxu0 %v34236_v3  ;;  %v15309_v39 = vsub.f32 %v36719_v6, %v15308_v0 }
0x1039   :  { %32461 = vmatprep.subr.mxu1 %v34236_v3  ;;  %32419 = vmatpush3.msra.mxu0 %v36539_v59 }
0x103a   :  { %32462 = vmatpush3.msra.mxu1 %v15268_v51  ;;  %32420 = vmatprep.subr.mxu0 %v34236_v3  ;;  %v36756_v51 = vsub.f32 %v14430_v12, %v36744_v5  ;;  %v15310_v23 = vand.u32 4294901760, %v15309_v39 }
0x103b   :  { %32463 = vmatprep.subr.mxu1 %v34236_v3  ;;  %32421 = vmatpush3.msra.mxu0 %v36551_v14 }
0x103c   :  { %32464 = vmatpush3.msra.mxu1 %v15275_v43  ;;  %32422 = vmatprep.subr.mxu0 %v34236_v3  ;;  %v15192_v43 = vand.u32 4294901760, %v36756_v51 }
0x103d   :  { %32465 = vmatprep.subr.mxu1 %v34236_v3  ;;  %32423 = vmatpush3.msra.mxu0 %v36565_v17 }
0x103e   :  { %32466 = vmatpush3.msra.mxu1 %v15282_v30  ;;  %32424 = vmatprep.subr.mxu0 %v34236_v3  ;;  %v15193_v48 = vsub.f32 %v36756_v51, %v15192_v43 }
0x103f   :  { %32467 = vmatprep.subr.mxu1 %v34236_v3  ;;  %32425 = vmatpush3.msra.mxu0 %v36591_v47 }
0x1040   :  { %32468 = vmatpush3.msra.mxu1 %v15289_v32  ;;  %32426 = vmatprep.subr.mxu0 %v34236_v3  ;;  %v15194_v12 = vand.u32 4294901760, %v15193_v48 }
0x1041   :  { %32469 = vmatprep.subr.mxu1 %v34236_v3  ;;  %32427 = vmatpush3.msra.mxu0 %v36608_v54 }
0x1042   :  { %32470 = vmatpush3.msra.mxu1 %v15296_v10  ;;  %32428 = vmatprep.subr.mxu0 %v34236_v3  ;;  %v29528_v10 = vld [vmem:[%s39387_s2 + $0x40] sm:$0xff] }
0x1043   :  { %32471 = vmatprep.subr.mxu1 %v34236_v3  ;;  %32429 = vmatpush3.msra.mxu0 %v36624_v45  ;;  %v36980_v39 = vand.u32 4294901760, %v29528_v10 }
0x1044   :  { %32472 = vmatpush3.msra.mxu1 %v15303_v8  ;;  %32430 = vmatprep.subr.mxu0 %v34236_v3 }
0x1045   :  { %32473 = vmatprep.subr.mxu1 %v34236_v3  ;;  %32431 = vmatpush3.msra.mxu0 %v36640_v24 }
0x1046   :  { %32474 = vmatpush3.msra.mxu1 %v15310_v23  ;;  %32475 = vmatprep.mubr.msk.f32.mxu1 %vm34237_vm1, %v34236_v3 }
0x1047   :  { %32432 = vmatprep.subr.mxu0 %v34236_v3  ;;  %32476 = vmatmul.mubr.f32.vlgmr.msra.gmra.mxu1 %v36744_v5 }
0x1048   :  { %32513 = vmatprep.subr.mxu1 %v34236_v3  ;;  %32433 = vmatpush3.msra.mxu0 %v36656_v60 }
0x1049   :  { %32514 = vmatpush3.msra.mxu1 %v36473_v55  ;;  %32434 = vmatprep.subr.mxu0 %v34236_v3 }
0x104a   :  { %32515 = vmatprep.subr.mxu1 %v34236_v3  ;;  %32435 = vmatpush3.msra.mxu0 %v36672_v34 }
0x104b   :  { %32516 = vmatpush3.msra.mxu1 %v36483_v25  ;;  %32436 = vmatprep.subr.mxu0 %v34236_v3 }
0x104c   :  { %32517 = vmatprep.subr.mxu1 %v34236_v3  ;;  %32437 = vmatpush3.msra.mxu0 %v36687_v21 }
0x104d   :  { %32518 = vmatpush3.msra.mxu1 %v36496_v11  ;;  %32438 = vmatprep.subr.mxu0 %v34236_v3 }
0x104e   :  { %32519 = vmatprep.subr.mxu1 %v34236_v3  ;;  %32439 = vmatpush3.msra.mxu0 %v36699_v33 }
0x104f   :  { %32440 = vmatprep.mubr.msk.f32.mxu0 %vm34237_vm1, %v34236_v3  ;;  %32520 = vmatpush3.msra.mxu1 %v36506_v38 }
0x1050   :  { %32441 = vmatmul.mubr.f32.vlgmr.msra.gmra.mxu0 %v15194_v12  ;;  %32478 = vmatprep.subr.mxu0 %v34236_v3 }
0x1051   :  { %32521 = vmatprep.subr.mxu1 %v34236_v3  ;;  %32479 = vmatpush3.msra.mxu0 %v36494_v29 }
0x1052   :  { %32522 = vmatpush3.msra.mxu1 %v36525_v49  ;;  %32480 = vmatprep.subr.mxu0 %v34236_v3 }
0x1053   :  { %32523 = vmatprep.subr.mxu1 %v34236_v3  ;;  %32481 = vmatpush3.msra.mxu0 %v36504_v36 }
0x1054   :  { %32524 = vmatpush3.msra.mxu1 %v36539_v59  ;;  %32482 = vmatprep.subr.mxu0 %v34236_v3 }
0x1055   :  { %32525 = vmatprep.subr.mxu1 %v34236_v3  ;;  %32483 = vmatpush3.msra.mxu0 %v36518_v22 }
0x1056   :  { %32526 = vmatpush3.msra.mxu1 %v36551_v14  ;;  %32484 = vmatprep.subr.mxu0 %v34236_v3 }
0x1057   :  { %32527 = vmatprep.subr.mxu1 %v34236_v3  ;;  %32485 = vmatpush3.msra.mxu0 %v36535_v58 }
0x1058   :  { %32528 = vmatpush3.msra.mxu1 %v36565_v17  ;;  %32486 = vmatprep.subr.mxu0 %v34236_v3 }
0x1059   :  { %32529 = vmatprep.subr.mxu1 %v34236_v3  ;;  %32487 = vmatpush3.msra.mxu0 %v36556_v7 }
0x105a   :  { %32530 = vmatpush3.msra.mxu1 %v36591_v47  ;;  %32488 = vmatprep.subr.mxu0 %v34236_v3 }
0x105b   :  { %32531 = vmatprep.subr.mxu1 %v34236_v3  ;;  %32489 = vmatpush3.msra.mxu0 %v36573_v41 }
0x105c   :  { %32532 = vmatpush3.msra.mxu1 %v36608_v54  ;;  %32490 = vmatprep.subr.mxu0 %v34236_v3 }
0x105d   :  { %32533 = vmatprep.subr.mxu1 %v34236_v3  ;;  %32491 = vmatpush3.msra.mxu0 %v36582_v26 }
0x105e   :  { %32534 = vmatpush3.msra.mxu1 %v36624_v45  ;;  %32492 = vmatprep.subr.mxu0 %v34236_v3 }
0x105f   :  { %32535 = vmatprep.subr.mxu1 %v34236_v3  ;;  %32493 = vmatpush3.msra.mxu0 %v36599_v20 }
0x1060   :  { %32536 = vmatpush3.msra.mxu1 %v36640_v24  ;;  %32494 = vmatprep.subr.mxu0 %v34236_v3 }
0x1061   :  { %32537 = vmatprep.subr.mxu1 %v34236_v3  ;;  %32495 = vmatpush3.msra.mxu0 %v36622_v19 }
0x1062   :  { %32538 = vmatpush3.msra.mxu1 %v36656_v60  ;;  %32496 = vmatprep.subr.mxu0 %v34236_v3 }
0x1063   :  { %32539 = vmatprep.subr.mxu1 %v34236_v3  ;;  %32497 = vmatpush3.msra.mxu0 %v36638_v18 }
0x1064   :  { %32540 = vmatpush3.msra.mxu1 %v36672_v34  ;;  %32498 = vmatprep.subr.mxu0 %v34236_v3 }
0x1065   :  { %32541 = vmatprep.subr.mxu1 %v34236_v3  ;;  %32499 = vmatpush3.msra.mxu0 %v36654_v53 }
0x1066   :  { %32542 = vmatpush3.msra.mxu1 %v36687_v21  ;;  %32500 = vmatprep.subr.mxu0 %v34236_v3 }
0x1067   :  { %32543 = vmatprep.subr.mxu1 %v34236_v3  ;;  %32501 = vmatpush3.msra.mxu0 %v36670_v62 }
0x1068   :  { %32544 = vmatpush3.msra.mxu1 %v36699_v33  ;;  %32545 = vmatprep.mubr.msk.f32.mxu1 %vm34237_vm1, %v34236_v3 }
0x1069   :  { %32502 = vmatprep.subr.mxu0 %v34236_v3  ;;  %32546 = vmatmul.mubr.f32.vlgmr.msra.gmra.mxu1 %v15192_v43  ;;  %v36992_v43 = vsub.f32 %v29528_v10, %v36980_v39 }
0x106a   :  { %32583 = vmatprep.subr.mxu1 %v34236_v3  ;;  %32503 = vmatpush3.msra.mxu0 %v36685_v1 }
0x106b   :  { %32584 = vmatpush3.msra.mxu1 %v36473_v55  ;;  %32504 = vmatprep.subr.mxu0 %v34236_v3 }
0x106c   :  { %32585 = vmatprep.subr.mxu1 %v34236_v3  ;;  %32505 = vmatpush3.msra.mxu0 %v36697_v16 }
0x106d   :  { %32586 = vmatpush3.msra.mxu1 %v36483_v25  ;;  %32506 = vmatprep.subr.mxu0 %v34236_v3 }
0x106e   :  { %32587 = vmatprep.subr.mxu1 %v34236_v3  ;;  %32507 = vmatpush3.msra.mxu0 %v36709_v61 }
0x106f   :  { %32588 = vmatpush3.msra.mxu1 %v36496_v11  ;;  %32508 = vmatprep.subr.mxu0 %v34236_v3 }
0x1070   :  { %32589 = vmatprep.subr.mxu1 %v34236_v3  ;;  %32509 = vmatpush3.msra.mxu0 %v36719_v6  ;;  %v29531_v6 = vld [vmem:[%s39387_s2 + $0x58] sm:$0xff] }
0x1071   :  { %32510 = vmatprep.mubr.msk.f32.mxu0 %vm34237_vm1, %v34236_v3  ;;  %32590 = vmatpush3.msra.mxu1 %v36506_v38 }
0x1072   :  { %32511 = vmatmul.mubr.f32.vlgmr.msra.gmra.mxu0 %v36756_v51  ;;  %32548 = vmatprep.subr.mxu0 %v34236_v3 }
0x1073   :  { %32591 = vmatprep.subr.mxu1 %v34236_v3  ;;  %32549 = vmatpush3.msra.mxu0 %v15203_v15 }
0x1074   :  { %32592 = vmatpush3.msra.mxu1 %v36525_v49  ;;  %32550 = vmatprep.subr.mxu0 %v34236_v3  ;;  %v29525_v49 = vld [vmem:[%s39390_s5 + $0x3] ss:$0 sm:$0xff] }
0x1075   :  { %32593 = vmatprep.subr.mxu1 %v34236_v3  ;;  %32551 = vmatpush3.msra.mxu0 %v15210_v57 }
0x1076   :  { %32594 = vmatpush3.msra.mxu1 %v36539_v59  ;;  %32552 = vmatprep.subr.mxu0 %v34236_v3 }
0x1077   :  { %32595 = vmatprep.subr.mxu1 %v34236_v3  ;;  %32553 = vmatpush3.msra.mxu0 %v15217_v2 }
0x1078   :  { %32596 = vmatpush3.msra.mxu1 %v36551_v14  ;;  %32554 = vmatprep.subr.mxu0 %v34236_v3 }
0x1079   :  { %32597 = vmatprep.subr.mxu1 %v34236_v3  ;;  %32555 = vmatpush3.msra.mxu0 %v15224_v27 }
0x107a   :  { %32598 = vmatpush3.msra.mxu1 %v36565_v17  ;;  %32556 = vmatprep.subr.mxu0 %v34236_v3 }
0x107b   :  { %32599 = vmatprep.subr.mxu1 %v34236_v3  ;;  %32557 = vmatpush3.msra.mxu0 %v15231_v40 }
0x107c   :  { %32600 = vmatpush3.msra.mxu1 %v36591_v47  ;;  %32558 = vmatprep.subr.mxu0 %v34236_v3 }
0x107d   :  { %32601 = vmatprep.subr.mxu1 %v34236_v3  ;;  %32559 = vmatpush3.msra.mxu0 %v15238_v56 }
0x107e   :  { %32602 = vmatpush3.msra.mxu1 %v36608_v54  ;;  %32560 = vmatprep.subr.mxu0 %v34236_v3 }
0x107f   :  { %32603 = vmatprep.subr.mxu1 %v34236_v3  ;;  %32561 = vmatpush3.msra.mxu0 %v15245_v13 }
0x1080   :  { %32604 = vmatpush3.msra.mxu1 %v36624_v45  ;;  %32562 = vmatprep.subr.mxu0 %v34236_v3 }
0x1081   :  { %32605 = vmatprep.subr.mxu1 %v34236_v3  ;;  %32563 = vmatpush3.msra.mxu0 %v15252_v46 }
0x1082   :  { %32606 = vmatpush3.msra.mxu1 %v36640_v24  ;;  %32564 = vmatprep.subr.mxu0 %v34236_v3 }
0x1083   :  { %32607 = vmatprep.subr.mxu1 %v34236_v3  ;;  %32565 = vmatpush3.msra.mxu0 %v15259_v52 }
0x1084   :  { %32608 = vmatpush3.msra.mxu1 %v36656_v60  ;;  %32566 = vmatprep.subr.mxu0 %v34236_v3 }
0x1085   :  { %32609 = vmatprep.subr.mxu1 %v34236_v3  ;;  %32567 = vmatpush3.msra.mxu0 %v15266_v9 }
0x1086   :  { %32610 = vmatpush3.msra.mxu1 %v36672_v34  ;;  %32568 = vmatprep.subr.mxu0 %v34236_v3 }
0x1087   :  { %32611 = vmatprep.subr.mxu1 %v34236_v3  ;;  %32569 = vmatpush3.msra.mxu0 %v15273_v4 }
0x1088   :  { %32612 = vmatpush3.msra.mxu1 %v36687_v21  ;;  %32570 = vmatprep.subr.mxu0 %v34236_v3 }
0x1089   :  { %32613 = vmatprep.subr.mxu1 %v34236_v3  ;;  %32571 = vmatpush3.msra.mxu0 %v15280_v50 }
0x108a   :  { %32614 = vmatpush3.msra.mxu1 %v36699_v33  ;;  %32615 = vmatprep.mubr.msk.f32.mxu1 %vm34237_vm1, %v34236_v3 }
0x108b   :  { %32572 = vmatprep.subr.mxu0 %v34236_v3  ;;  %32616 = vmatmul.mubr.f32.vlgmr.msra.gmra.mxu1 %v36744_v5 }
0x108c   :  { %32573 = vmatpush3.msra.mxu0 %v15287_v42  ;;  %32580 = vmatprep.mubr.msk.f32.mxu0 %vm34237_vm1, %v34236_v3 }
0x108d   :  { %32574 = vmatprep.subr.mxu0 %v34236_v3  ;;  %32629 = vmatprep.subr.mxu1 %v34236_v3 }
0x108e   :  { %32575 = vmatpush3.msra.mxu0 %v15294_v28  ;;  %32637 = vmatprep.mubr.msk.f32.mxu1 %vm34237_vm1, %v34236_v3 }
0x108f   :  { %32576 = vmatprep.subr.mxu0 %v34236_v3 }
0x1090   :  { %32577 = vmatpush3.msra.mxu0 %v15301_v63  ;;  %v36955_v63 = vand.u32 4294901760, %v29531_v6 }
0x1091   :  { %32578 = vmatprep.subr.mxu0 %v34236_v3 }
0x1092   :  { %32579 = vmatpush3.msra.mxu0 %v15308_v0  ;;  %v36961_v30 = vsub.f32 %v29531_v6, %v36955_v63  ;;  %v29529_v0 = vld [vmem:[%s39387_s2 + $0x48] sm:$0xff] }
0x1093   :  { %32581 = vmatmul.mubr.f32.vlgmr.msra.gmra.mxu0 %v36744_v5  ;;  %32618 = vmatprep.subr.mxu0 %v34236_v3  ;;  %v36974_v5 = vand.u32 4294901760, %v29529_v0 }
0x1094   :  { %32626 = vmatprep.mubr.msk.f32.mxu0 %vm34237_vm1, %v34236_v3  ;;  %32619 = vmatpush3.msra.mxu0 %v36955_v63  ;;  %v15916_v32 = vand.u32 4294901760, %v36961_v30 }
0x1095   :  { %32620 = vmatprep.subr.mxu0 %v34236_v3  ;;  %v36988_v23 = vsub.f32 %v29529_v0, %v36974_v5 }
0x1096   :  { %v15917_v8 = vsub.f32 %v36961_v30, %v15916_v32 }
0x1098   :  { %v15918_v48 = vand.u32 4294901760, %v15917_v8 }
0x109a   :  { %32630 = vmatpush3.msra.mxu1 %v15918_v48 }
0x109b   :  { %32631 = vmatprep.subr.mxu1 %v34236_v3 }
0x10a3   :  { %v14706_v55 = vpop.f32.mrf.mxu1 }
0x10a5   :  { %v32267_v25 = vpop.f32.mrf.mxu1 }
0x10a6   :  { %v15937_v25 = vand.u32 4294901760, %v36992_v43 }
0x10ab   :  { %v14555_v29 = vpop.f32.mrf.mxu0 }
0x10ac   :  { %v14556_v57 = vadd.f32 %v29525_v49, %v14555_v29 }
0x10ad   :  { %v32232_v11 = vpop.f32.mrf.mxu0 }
0x10ae   :  { %v14707_v59 = vadd.f32 %v14706_v55, %v14556_v57  ;;  %v15930_v55 = vand.u32 4294901760, %v36988_v23 }
0x10b0   :  { %v15931_v11 = vsub.f32 %v36988_v23, %v15930_v55 }
0x10c3   :  { %v14899_v36 = vpop.f32.mrf.mxu1 }
0x10c5   :  { %v32337_v38 = vpop.f32.mrf.mxu1 }
0x10c6   :  { %v15932_v38 = vand.u32 4294901760, %v15931_v11 }
0x10cc   :  { %v14810_v15 = vpop.f32.mrf.mxu0 }
0x10cd   :  { %v14811_v14 = vadd.f32 %v14810_v15, %v14707_v59 }
0x10ce   :  { %v32302_v22 = vpop.f32.mrf.mxu0 }
0x10cf   :  { %v14900_v7 = vadd.f32 %v14899_v36, %v14811_v14  ;;  %v15938_v36 = vsub.f32 %v36992_v43, %v15937_v25 }
0x10d1   :  { %v15939_v15 = vand.u32 4294901760, %v15938_v36 }
0x10e5   :  { %v15105_v58 = vpop.f32.mrf.mxu1 }
0x10e7   :  { %v32407_v2 = vpop.f32.mrf.mxu1 }
0x10ee   :  { %v15018_v27 = vpop.f32.mrf.mxu0 }
0x10ef   :  { %v15019_v17 = vadd.f32 %v15018_v27, %v14900_v7 }
0x10f0   :  { %v32372_v41 = vpop.f32.mrf.mxu0 }
0x10f1   :  { %v15106_v26 = vadd.f32 %v15105_v58, %v15019_v17  ;;  %v37020_v17 = vld [vmem:[%s39390_s5 + $0x6] ss:$0 sm:$0xff] }
0x10f3   :  { %v15752_v40 = vadd.f32 %v15106_v26, %v35943_v44  ;;  %v37025_v26 = vld [vmem:[%s39390_s5 + $0x7] ss:$0 sm:$0xff] }
0x10f5   :  { %v15754_v47 = vsel %vm4002_vm3, %v15752_v40, 0.0 }
0x10f6   :  { %15755 = vadd.xlane.f32.xlu1 %v15754_v47 }
0x1107   :  { %v15347_v20 = vpop.f32.mrf.mxu1 }
0x1109   :  { %v32477_v56 = vpop.f32.mrf.mxu1 }
0x1110   :  { %v15196_v54 = vpop.f32.mrf.mxu0 }
0x1111   :  { %v15197_v24 = vadd.f32 %v29525_v49, %v15196_v54  ;;  %v29535_v54 = vld [vmem:[%s39387_s2 + $0x78] sm:$0xff] }
0x1112   :  { %v32442_v13 = vpop.f32.mrf.mxu0 }
0x1113   :  { %v15348_v53 = vadd.f32 %v15347_v20, %v15197_v24 }
0x1129   :  { %v15540_v19 = vpop.f32.mrf.mxu1 }
0x112b   :  { %v32547_v45 = vpop.f32.mrf.mxu1 }
0x112c   :  { %v37046_v45 = vand.u32 4294901760, %v29535_v54 }
0x1132   :  { %v15451_v46 = vpop.f32.mrf.mxu0 }
0x1133   :  { %v15452_v9 = vadd.f32 %v15451_v46, %v15348_v53  ;;  %v29532_v53 = vld [vmem:[%s39387_s2 + $0x60] sm:$0xff] }
0x1134   :  { %v32512_v18 = vpop.f32.mrf.mxu0 }
0x1135   :  { %v15541_v62 = vadd.f32 %v15540_v19, %v15452_v9  ;;  %v29534_v19 = vld [vmem:[%s39387_s2 + $0x70] sm:$0xff]  ;;  %v29533_v18 = vld [vmem:[%s39387_s2 + $0x68] sm:$0xff] }
0x1136   :  { %v37053_v24 = vand.u32 4294901760, %v29534_v19  ;;  %v37063_v9 = vand.u32 4294901760, %v29533_v18 }
0x114b   :  { %v15746_v52 = vpop.f32.mrf.mxu1 }
0x114d   :  { %v32617_v60 = vpop.f32.mrf.mxu1 }
0x114e   :  { %v37061_v60 = vsub.f32 %v29535_v54, %v37046_v45 }
0x1153   :  { %v15659_v34 = vpop.f32.mrf.mxu0 }
0x1154   :  { %v15660_v4 = vadd.f32 %v15659_v34, %v15541_v62  ;;  %v37068_v34 = vsub.f32 %v29534_v19, %v37053_v24 }
0x1155   :  { %v32582_v44 = vpop.f32.mrf.mxu0 }
0x1156   :  { %v15747_v1 = vadd.f32 %v15746_v52, %v15660_v4  ;;  %v37070_v4 = vand.u32 4294901760, %v29532_v53  ;;  %v16404_v44 = vand.u32 4294901760, %v37061_v60 }
0x1158   :  { %v15753_v21 = vadd.f32 %v15747_v1, %v36047_v37  ;;  %v29530_v37 = vld [vmem:[%s39387_s2 + $0x50] sm:$0xff]  ;;  %v37076_v1 = vsub.f32 %v29533_v18, %v37063_v9 }
0x1159   :  { %v36963_v31 = vand.u32 4294901760, %v29530_v37 }
0x115a   :  { %v15757_v50 = vsel %vm4002_vm3, %v15753_v21, 0.0 }
0x115b   :  { %15758 = vadd.xlane.f32.xlu0 %v15757_v50  ;;  %v36972_v35 = vsub.f32 %v29530_v37, %v36963_v31  ;;  %32621 = vmatpush3.msra.mxu0 %v36963_v31  ;;  %v37084_v50 = vsub.f32 %v29532_v53, %v37070_v4 }
0x115c   :  { %32622 = vmatprep.subr.mxu0 %v34236_v3 }
0x115d   :  { %v15923_v51 = vand.u32 4294901760, %v36972_v35  ;;  %32623 = vmatpush3.msra.mxu0 %v36974_v5 }
0x115e   :  { %32624 = vmatprep.subr.mxu0 %v34236_v3 }
0x115f   :  { %v15924_v12 = vsub.f32 %v36972_v35, %v15923_v51  ;;  %32625 = vmatpush3.msra.mxu0 %v36980_v39 }
0x1160   :  { %32640 = vmatprep.subr.mxu0 %v34236_v3 }
0x1161   :  { %v15925_v29 = vand.u32 4294901760, %v15924_v12 }
0x1163   :  { %32632 = vmatpush3.msra.mxu1 %v15925_v29 }
0x1164   :  { %32633 = vmatprep.subr.mxu1 %v34236_v3 }
0x1165   :  { %32634 = vmatpush3.msra.mxu1 %v15932_v38 }
0x1166   :  { %32635 = vmatprep.subr.mxu1 %v34236_v3 }
0x1167   :  { %32636 = vmatpush3.msra.mxu1 %v15939_v15 }
0x1168   :  { %32651 = vmatprep.subr.mxu1 %v34236_v3 }
0x117f   :  { %v15756_v16 = vpop.xlane.xlu1 %15755 }
0x1180   :  { %v15760_v33 = vmul.f32 0.03125, %v15756_v16  ;;  %v16405_v16 = vsub.f32 %v37061_v60, %v16404_v44 }
0x1182   :  { %v15762_v42 = vsub.f32 %v15752_v40, %v15760_v33  ;;  %v16418_v33 = vand.u32 4294901760, %v37076_v1 }
0x1184   :  { %v15764_v61 = vmul.f32 %v15762_v42, %v15762_v42  ;;  %v16419_v6 = vsub.f32 %v37076_v1, %v16418_v33 }
0x1186   :  { %v15766_v28 = vsel %vm4002_vm3, %v15764_v61, 0.0  ;;  %v16425_v61 = vand.u32 4294901760, %v37084_v50 }
0x1187   :  { %15767 = vadd.xlane.f32.xlu1 %v15766_v28  ;;  %v16406_v28 = vand.u32 4294901760, %v16405_v16 }
0x1188   :  { %v16426_v37 = vsub.f32 %v37084_v50, %v16425_v61 }
0x11e4   :  { %v15759_v22 = vpop.xlane.xlu0 %15758 }
0x11e5   :  { %v15761_v49 = vmul.f32 0.03125, %v15759_v22  ;;  %v29537_v22 = vld [vmem:[%s39390_s5 + $0x8] ss:$0 sm:$0xff] }
0x11e7   :  { %v37012_v57 = vsub.f32 %v15753_v21, %v15761_v49  ;;  %v16411_v21 = vand.u32 4294901760, %v37068_v34 }
0x11e9   :  { %v15765_v58 = vmul.f32 %v37012_v57, %v37012_v57 }
0x11eb   :  { %v15769_v59 = vsel %vm4002_vm3, %v15765_v58, 0.0 }
0x11ec   :  { %15770 = vadd.xlane.f32.xlu0 %v15769_v59 }
0x1210   :  { %v15768_v2 = vpop.xlane.xlu1 %15767 }
0x1211   :  { %v15772_v14 = vmul.f32 0.03125, %v15768_v2 }
0x1213   :  { %v15774_v7 = vadd.f32 1e-05, %v15772_v14 }
0x1215   :  { %34164 = vrsqrt.f32 %v15774_v7 }
0x1222   :  { %v34165_v27 = vpop.eup %34164 }
0x1223   :  { %v15778_v41 = vmul.f32 %v34165_v27, %v15762_v42  ;;  %v16412_v42 = vsub.f32 %v37068_v34, %v16411_v21 }
0x1225   :  { %v15784_v40 = vmul.f32 %v37020_v17, %v15778_v41 }
0x1227   :  { %v37029_v47 = vadd.f32 %v37025_v26, %v15784_v40 }
0x1229   :  { %v15808_v20 = vsel %vm4002_vm3, %v37029_v47, 0 }
0x122a   :  { %v37033_v56 = vand.u32 4294901760, %v15808_v20 }
0x122c   :  { %v15880_v13 = vsub.f32 %v15808_v20, %v37033_v56  ;;  %32638 = vmatmul.mubr.f32.vlgmr.msra.gmra.mxu1 %v37033_v56 }
0x122d   :  { %32652 = vmatpush3.msra.mxu1 %v36955_v63  ;;  %32659 = vmatprep.mubr.msk.f32.mxu1 %vm34237_vm1, %v34236_v3 }
0x122e   :  { %32653 = vmatprep.subr.mxu1 %v34236_v3  ;;  %v15881_v46 = vand.u32 4294901760, %v15880_v13 }
0x122f   :  { %32654 = vmatpush3.msra.mxu1 %v36963_v31 }
0x1230   :  { %32655 = vmatprep.subr.mxu1 %v34236_v3  ;;  %v15882_v52 = vsub.f32 %v15880_v13, %v15881_v46 }
0x1231   :  { %32656 = vmatpush3.msra.mxu1 %v36974_v5 }
0x1232   :  { %32657 = vmatprep.subr.mxu1 %v34236_v3  ;;  %v15883_v62 = vand.u32 4294901760, %v15882_v52 }
0x1233   :  { %32658 = vmatpush3.msra.mxu1 %v36980_v39 }
0x1234   :  { %32660 = vmatmul.mubr.f32.vlgmr.msra.gmra.mxu1 %v15881_v46  ;;  %32673 = vmatprep.subr.mxu1 %v34236_v3 }
0x1235   :  { %32627 = vmatmul.mubr.f32.vlgmr.msra.gmra.mxu0 %v15883_v62  ;;  %32674 = vmatpush3.msra.mxu1 %v36955_v63  ;;  %v16413_v63 = vand.u32 4294901760, %v16412_v42 }
0x1236   :  { %32641 = vmatpush3.msra.mxu0 %v36961_v30  ;;  %32675 = vmatprep.subr.mxu1 %v34236_v3  ;;  %v16427_v30 = vand.u32 4294901760, %v16426_v37 }
0x1237   :  { %32642 = vmatprep.subr.mxu0 %v34236_v3  ;;  %32676 = vmatpush3.msra.mxu1 %v36963_v31  ;;  %v16420_v31 = vand.u32 4294901760, %v16419_v6 }
0x1238   :  { %32643 = vmatpush3.msra.mxu0 %v36972_v35  ;;  %32677 = vmatprep.subr.mxu1 %v34236_v3 }
0x1239   :  { %32644 = vmatprep.subr.mxu0 %v34236_v3  ;;  %32678 = vmatpush3.msra.mxu1 %v36974_v5 }
0x123a   :  { %32645 = vmatpush3.msra.mxu0 %v36988_v23  ;;  %32679 = vmatprep.subr.mxu1 %v34236_v3 }
0x123b   :  { %32646 = vmatprep.subr.mxu0 %v34236_v3  ;;  %32648 = vmatprep.mubr.msk.f32.mxu0 %vm34237_vm1, %v34236_v3 }
0x123c   :  { %32647 = vmatpush3.msra.mxu0 %v36992_v43  ;;  %32680 = vmatpush3.msra.mxu1 %v36980_v39 }
0x123d   :  { %32681 = vmatprep.mubr.msk.f32.mxu1 %vm34237_vm1, %v34236_v3  ;;  %32649 = vmatmul.mubr.f32.vlgmr.msra.gmra.mxu0 %v15880_v13 }
0x123e   :  { %32662 = vmatprep.subr.mxu0 %v34236_v3  ;;  %32682 = vmatmul.mubr.f32.vlgmr.msra.gmra.mxu1 %v37033_v56 }
0x123f   :  { %32663 = vmatpush3.msra.mxu0 %v15916_v32  ;;  %32670 = vmatprep.mubr.msk.f32.mxu0 %vm34237_vm1, %v34236_v3 }
0x1240   :  { %32664 = vmatprep.subr.mxu0 %v34236_v3  ;;  %32695 = vmatprep.subr.mxu1 %v34236_v3 }
0x1241   :  { %32665 = vmatpush3.msra.mxu0 %v15923_v51  ;;  %32696 = vmatpush3.msra.mxu1 %v16406_v28 }
0x1242   :  { %32666 = vmatprep.subr.mxu0 %v34236_v3  ;;  %32697 = vmatprep.subr.mxu1 %v34236_v3 }
0x1243   :  { %32667 = vmatpush3.msra.mxu0 %v15930_v55  ;;  %32698 = vmatpush3.msra.mxu1 %v16413_v63 }
0x1244   :  { %32668 = vmatprep.subr.mxu0 %v34236_v3  ;;  %32699 = vmatprep.subr.mxu1 %v34236_v3 }
0x1245   :  { %32669 = vmatpush3.msra.mxu0 %v15937_v25  ;;  %32700 = vmatpush3.msra.mxu1 %v16420_v31 }
0x1246   :  { %32671 = vmatmul.mubr.f32.vlgmr.msra.gmra.mxu0 %v37033_v56  ;;  %32701 = vmatprep.subr.mxu1 %v34236_v3 }
0x1247   :  { %32702 = vmatpush3.msra.mxu1 %v16427_v30  ;;  %32684 = vmatprep.subr.mxu0 %v34236_v3 }
0x1248   :  { %32703 = vmatprep.mubr.msk.f32.mxu1 %vm34237_vm1, %v34236_v3  ;;  %32717 = vmatprep.subr.mxu1 %v34236_v3 }
0x1249   :  { %32685 = vmatpush3.msra.mxu0 %v37046_v45  ;;  %32692 = vmatprep.mubr.msk.f32.mxu0 %vm34237_vm1, %v34236_v3 }
0x124a   :  { %32686 = vmatprep.subr.mxu0 %v34236_v3 }
0x124b   :  { %32687 = vmatpush3.msra.mxu0 %v37053_v24 }
0x124c   :  { %32688 = vmatprep.subr.mxu0 %v34236_v3 }
0x124d   :  { %32689 = vmatpush3.msra.mxu0 %v37063_v9 }
0x124e   :  { %32690 = vmatprep.subr.mxu0 %v34236_v3 }
0x124f   :  { %32691 = vmatpush3.msra.mxu0 %v37070_v4 }
0x1250   :  { %32706 = vmatprep.subr.mxu0 %v34236_v3 }
0x1275   :  { %v15771_v0 = vpop.xlane.xlu0 %15770 }
0x1276   :  { %v15773_v32 = vmul.f32 0.03125, %v15771_v0 }
0x1278   :  { %v15775_v35 = vadd.f32 1e-05, %v15773_v32 }
0x127a   :  { %34166 = vrsqrt.f32 %v15775_v35 }
0x1287   :  { %v34167_v5 = vpop.eup %34166 }
0x1288   :  { %v15779_v10 = vmul.f32 %v34167_v5, %v37012_v57 }
0x128a   :  { %v15785_v39 = vmul.f32 %v37020_v17, %v15779_v10 }
0x128c   :  { %v37150_v8 = vadd.f32 %v37025_v26, %v15785_v39 }
0x128e   :  { %v16296_v51 = vsel %vm4002_vm3, %v37150_v8, 0 }
0x128f   :  { %v16367_v23 = vand.u32 4294901760, %v16296_v51 }
0x1291   :  { %v16368_v43 = vsub.f32 %v16296_v51, %v16367_v23  ;;  %32704 = vmatmul.mubr.f32.vlgmr.msra.gmra.mxu1 %v16367_v23 }
0x1292   :  { %32718 = vmatpush3.msra.mxu1 %v37046_v45  ;;  %32725 = vmatprep.mubr.msk.f32.mxu1 %vm34237_vm1, %v34236_v3 }
0x1293   :  { %32719 = vmatprep.subr.mxu1 %v34236_v3  ;;  %v16369_v48 = vand.u32 4294901760, %v16368_v43 }
0x1294   :  { %32720 = vmatpush3.msra.mxu1 %v37053_v24 }
0x1295   :  { %32721 = vmatprep.subr.mxu1 %v34236_v3  ;;  %v16370_v12 = vsub.f32 %v16368_v43, %v16369_v48 }
0x1296   :  { %32722 = vmatpush3.msra.mxu1 %v37063_v9 }
0x1297   :  { %32723 = vmatprep.subr.mxu1 %v34236_v3  ;;  %v16371_v55 = vand.u32 4294901760, %v16370_v12 }
0x1298   :  { %32724 = vmatpush3.msra.mxu1 %v37070_v4 }
0x1299   :  { %32726 = vmatmul.mubr.f32.vlgmr.msra.gmra.mxu1 %v16369_v48  ;;  %32739 = vmatprep.subr.mxu1 %v34236_v3 }
0x129a   :  { %32693 = vmatmul.mubr.f32.vlgmr.msra.gmra.mxu0 %v16371_v55  ;;  %32740 = vmatpush3.msra.mxu1 %v37046_v45 }
0x129b   :  { %32707 = vmatpush3.msra.mxu0 %v37061_v60  ;;  %32741 = vmatprep.subr.mxu1 %v34236_v3 }
0x129c   :  { %32708 = vmatprep.subr.mxu0 %v34236_v3  ;;  %32742 = vmatpush3.msra.mxu1 %v37053_v24 }
0x129d   :  { %32709 = vmatpush3.msra.mxu0 %v37068_v34  ;;  %32743 = vmatprep.subr.mxu1 %v34236_v3 }
0x129e   :  { %32710 = vmatprep.subr.mxu0 %v34236_v3  ;;  %32744 = vmatpush3.msra.mxu1 %v37063_v9 }
0x129f   :  { %32711 = vmatpush3.msra.mxu0 %v37076_v1  ;;  %32745 = vmatprep.subr.mxu1 %v34236_v3 }
0x12a0   :  { %32712 = vmatprep.subr.mxu0 %v34236_v3  ;;  %32714 = vmatprep.mubr.msk.f32.mxu0 %vm34237_vm1, %v34236_v3 }
0x12a1   :  { %32713 = vmatpush3.msra.mxu0 %v37084_v50  ;;  %32746 = vmatpush3.msra.mxu1 %v37070_v4 }
0x12a2   :  { %32747 = vmatprep.mubr.msk.f32.mxu1 %vm34237_vm1, %v34236_v3  ;;  %32715 = vmatmul.mubr.f32.vlgmr.msra.gmra.mxu0 %v16368_v43 }
0x12a3   :  { %32728 = vmatprep.subr.mxu0 %v34236_v3  ;;  %32748 = vmatmul.mubr.f32.vlgmr.msra.gmra.mxu1 %v16367_v23 }
0x12a4   :  { %32729 = vmatpush3.msra.mxu0 %v16404_v44  ;;  %32736 = vmatprep.mubr.msk.f32.mxu0 %vm34237_vm1, %v34236_v3 }
0x12a5   :  { %32730 = vmatprep.subr.mxu0 %v34236_v3  ;;  %32755 = vmatprep.subr.mxu1 %v34236_v3 }
0x12a6   :  { %32731 = vmatpush3.msra.mxu0 %v16411_v21  ;;  %32757 = vmatprep.mubr.msk.f32.mxu1 %vm34237_vm1, %v34236_v3 }
0x12a7   :  { %32732 = vmatprep.subr.mxu0 %v34236_v3 }
0x12a8   :  { %32733 = vmatpush3.msra.mxu0 %v16418_v33 }
0x12a9   :  { %32734 = vmatprep.subr.mxu0 %v34236_v3 }
0x12aa   :  { %32735 = vmatpush3.msra.mxu0 %v16425_v61 }
0x12ab   :  { %32737 = vmatmul.mubr.f32.vlgmr.msra.gmra.mxu0 %v16367_v23  ;;  %32750 = vmatprep.subr.mxu0 %v34236_v3 }
0x12ac   :  { %32752 = vmatprep.mubr.msk.f32.mxu0 %vm34237_vm1, %v34236_v3 }
0x12ec   :  { %v15976_v25 = vpop.f32.mrf.mxu1 }
0x12ee   :  { %v32639_v29 = vpop.f32.mrf.mxu1 }
0x12f4   :  { %v16133_v11 = vpop.f32.mrf.mxu1 }
0x12f5   :  { %v15885_v36 = vpop.f32.mrf.mxu0 }
0x12f6   :  { %v32661_v38 = vpop.f32.mrf.mxu1  ;;  %v15886_v49 = vadd.f32 %v29537_v22, %v15885_v36 }
0x12f7   :  { %v32628_v15 = vpop.f32.mrf.mxu0 }
0x12f8   :  { %v15977_v59 = vadd.f32 %v15976_v25, %v15886_v49 }
0x12fd   :  { %v16056_v57 = vpop.f32.mrf.mxu0 }
0x12fe   :  { %v16291_v58 = vpop.f32.mrf.mxu1  ;;  %v16057_v7 = vadd.f32 %v16056_v57, %v15977_v59 }
0x12ff   :  { %v32650_v2 = vpop.f32.mrf.mxu0 }
0x1300   :  { %v32683_v14 = vpop.f32.mrf.mxu1  ;;  %v16134_v27 = vadd.f32 %v16133_v11, %v16057_v7 }
0x1306   :  { %v16216_v17 = vpop.f32.mrf.mxu0 }
0x1307   :  { %v16217_v41 = vadd.f32 %v16216_v17, %v16134_v27 }
0x1308   :  { %v32672_v26 = vpop.f32.mrf.mxu0 }
0x1309   :  { %v16292_v40 = vadd.f32 %v16291_v58, %v16217_v41 }
0x130b   :  { %16783 = vst.msk [vmem:[#allocation3] sm:$0xff] %vm4979_vm4, %v16292_v40 }
0x1312   :  { %v37206_v20 = vld [vmem:[#allocation3] sm:$0xff] }
0x1313   :  { %16788 = vrot.lane.b32.xlu1 %v37206_v20, %s34239_s25  ;;  %v16790_v50 = vsel %vm4987_vm5, %v37206_v20, 0 }
0x1314   :  { %v16860_v33 = vand.u32 4294901760, %v16790_v50 }
0x1316   :  { %v16861_v42 = vsub.f32 %v16790_v50, %v16860_v33 }
0x1318   :  { %v16862_v61 = vand.u32 4294901760, %v16861_v42 }
0x131a   :  { %v16863_v6 = vsub.f32 %v16861_v42, %v16862_v61 }
0x131c   :  { %v16864_v30 = vand.u32 4294901760, %v16863_v6 }
0x1351   :  { %v16464_v56 = vpop.f32.mrf.mxu1 }
0x1353   :  { %v32705_v54 = vpop.f32.mrf.mxu1 }
0x1359   :  { %v16621_v13 = vpop.f32.mrf.mxu1 }
0x135a   :  { %v16373_v19 = vpop.f32.mrf.mxu0 }
0x135b   :  { %v32727_v45 = vpop.f32.mrf.mxu1  ;;  %v16374_v18 = vadd.f32 %v29537_v22, %v16373_v19 }
0x135c   :  { %v32694_v46 = vpop.f32.mrf.mxu0 }
0x135d   :  { %v16465_v53 = vadd.f32 %v16464_v56, %v16374_v18 }
0x1362   :  { %v16544_v24 = vpop.f32.mrf.mxu0 }
0x1363   :  { %v16779_v52 = vpop.f32.mrf.mxu1  ;;  %v16545_v62 = vadd.f32 %v16544_v24, %v16465_v53 }
0x1364   :  { %v32716_v60 = vpop.f32.mrf.mxu0 }
0x1365   :  { %v32749_v9 = vpop.f32.mrf.mxu1  ;;  %v16622_v34 = vadd.f32 %v16621_v13, %v16545_v62 }
0x136b   :  { %v16704_v4 = vpop.f32.mrf.mxu0 }
0x136c   :  { %v16705_v44 = vadd.f32 %v16704_v4, %v16622_v34 }
0x136d   :  { %v32738_v1 = vpop.f32.mrf.mxu0 }
0x136e   :  { %v16780_v21 = vadd.f32 %v16779_v52, %v16705_v44 }
0x1370   :  { %16784 = vst.msk [vmem:[#allocation3 + $0x8] sm:$0xff] %vm4979_vm4, %v16780_v21 }
0x1377   :  { %v37213_v16 = vld [vmem:[#allocation3 + $0x8] sm:$0xff] }
0x1378   :  { %17241 = vrot.lane.b32.xlu0 %v37213_v16, %s34239_s25  ;;  %v17243_v5 = vsel %vm4987_vm5, %v37213_v16, 0 }
0x1379   :  { %v17313_v10 = vand.u32 4294901760, %v17243_v5 }
0x137b   :  { %v17314_v39 = vsub.f32 %v17243_v5, %v17313_v10 }
0x137d   :  { %v17315_v51 = vand.u32 4294901760, %v17314_v39 }
0x137f   :  { %v17316_v43 = vsub.f32 %v17314_v39, %v17315_v51 }
0x1381   :  { %v17317_v25 = vand.u32 4294901760, %v17316_v43 }
0x1385   :  { %v16789_v28 = vpop.permute.xlu1 %16788 }
0x1386   :  { %v16792_v63 = vsel %vm4987_vm5, %v16789_v28, 0 }
0x1387   :  { %v16825_v37 = vand.u32 4294901760, %v16792_v63 }
0x1389   :  { %v16902_v31 = vsub.f32 %v16792_v63, %v16825_v37  ;;  %32751 = vmatpush3.xpose.msra.mxu0 %v16825_v37 }
0x138a   :  { %32760 = vmatprep.subr.mxu0 %v34236_v3 }
0x138b   :  { %v16903_v0 = vand.u32 4294901760, %v16902_v31 }
0x138c   :  { %32753 = vmatmul.mubr.f32.vlgmr.msra.gmra.mxu0 %v16864_v30 }
0x138d   :  { %v16904_v32 = vsub.f32 %v16902_v31, %v16903_v0  ;;  %32761 = vmatpush3.xpose.msra.mxu0 %v16902_v31  ;;  %32762 = vmatprep.mubr.msk.f32.mxu0 %vm34237_vm1, %v34236_v3 }
0x138e   :  { %32770 = vmatprep.subr.mxu0 %v34236_v3 }
0x138f   :  { %v16905_v35 = vand.u32 4294901760, %v16904_v32 }
0x1390   :  { %32763 = vmatmul.mubr.f32.vlgmr.msra.gmra.mxu0 %v16861_v42 }
0x1391   :  { %32756 = vmatpush3.xpose.msra.mxu1 %v16905_v35  ;;  %32771 = vmatpush3.xpose.msra.mxu0 %v16903_v0 }
0x1392   :  { %32772 = vmatprep.mubr.msk.f32.mxu0 %vm34237_vm1, %v34236_v3  ;;  %32765 = vmatprep.subr.mxu1 %v34236_v3 }
0x1393   :  { %32780 = vmatprep.subr.mxu0 %v34236_v3 }
0x1394   :  { %32758 = vmatmul.mubr.f32.vlgmr.msra.gmra.mxu1 %v16860_v33  ;;  %32773 = vmatmul.mubr.f32.vlgmr.msra.gmra.mxu0 %v16860_v33 }
0x1395   :  { %32766 = vmatpush3.xpose.msra.mxu1 %v16825_v37  ;;  %32767 = vmatprep.mubr.msk.f32.mxu1 %vm34237_vm1, %v34236_v3 }
0x1396   :  { %32775 = vmatprep.subr.mxu1 %v34236_v3  ;;  %32782 = vmatprep.mubr.msk.f32.mxu0 %vm34237_vm1, %v34236_v3 }
0x1398   :  { %32768 = vmatmul.mubr.f32.vlgmr.msra.gmra.mxu1 %v16862_v61 }
0x1399   :  { %32776 = vmatpush3.xpose.msra.mxu1 %v16825_v37  ;;  %32777 = vmatprep.mubr.msk.f32.mxu1 %vm34237_vm1, %v34236_v3 }
0x139a   :  { %32785 = vmatprep.subr.mxu1 %v34236_v3 }
0x139c   :  { %32778 = vmatmul.mubr.f32.vlgmr.msra.gmra.mxu1 %v16860_v33 }
0x139d   :  { %32787 = vmatprep.mubr.msk.f32.mxu1 %vm34237_vm1, %v34236_v3 }
0x13ea   :  { %v17242_v23 = vpop.permute.xlu0 %17241 }
0x13eb   :  { %v17245_v48 = vsel %vm4987_vm5, %v17242_v23, 0 }
0x13ec   :  { %v17278_v12 = vand.u32 4294901760, %v17245_v48 }
0x13ee   :  { %v17355_v55 = vsub.f32 %v17245_v48, %v17278_v12  ;;  %32781 = vmatpush3.xpose.msra.mxu0 %v17278_v12 }
0x13ef   :  { %32790 = vmatprep.subr.mxu0 %v34236_v3 }
0x13f0   :  { %v17356_v29 = vand.u32 4294901760, %v17355_v55 }
0x13f1   :  { %32783 = vmatmul.mubr.f32.vlgmr.msra.gmra.mxu0 %v17317_v25 }
0x13f2   :  { %v17357_v11 = vsub.f32 %v17355_v55, %v17356_v29  ;;  %32791 = vmatpush3.xpose.msra.mxu0 %v17355_v55  ;;  %32792 = vmatprep.mubr.msk.f32.mxu0 %vm34237_vm1, %v34236_v3 }
0x13f3   :  { %32800 = vmatprep.subr.mxu0 %v34236_v3 }
0x13f4   :  { %v17358_v36 = vand.u32 4294901760, %v17357_v11 }
0x13f5   :  { %32793 = vmatmul.mubr.f32.vlgmr.msra.gmra.mxu0 %v17314_v39 }
0x13f6   :  { %32786 = vmatpush3.xpose.msra.mxu1 %v17358_v36  ;;  %32801 = vmatpush3.xpose.msra.mxu0 %v17356_v29 }
0x13f7   :  { %32802 = vmatprep.mubr.msk.f32.mxu0 %vm34237_vm1, %v34236_v3  ;;  %32795 = vmatprep.subr.mxu1 %v34236_v3 }
0x13f8   :  { %32810 = vmatprep.subr.mxu0 %v34236_v3 }
0x13f9   :  { %32788 = vmatmul.mubr.f32.vlgmr.msra.gmra.mxu1 %v17313_v10  ;;  %32803 = vmatmul.mubr.f32.vlgmr.msra.gmra.mxu0 %v17313_v10 }
0x13fa   :  { %32796 = vmatpush3.xpose.msra.mxu1 %v17278_v12  ;;  %32797 = vmatprep.mubr.msk.f32.mxu1 %vm34237_vm1, %v34236_v3 }
0x13fb   :  { %32805 = vmatprep.subr.mxu1 %v34236_v3  ;;  %32812 = vmatprep.mubr.msk.f32.mxu0 %vm34237_vm1, %v34236_v3 }
0x13fd   :  { %32798 = vmatmul.mubr.f32.vlgmr.msra.gmra.mxu1 %v17315_v51 }
0x13fe   :  { %32806 = vmatpush3.xpose.msra.mxu1 %v17278_v12  ;;  %32807 = vmatprep.mubr.msk.f32.mxu1 %vm34237_vm1, %v34236_v3 }
0x13ff   :  { %32815 = vmatprep.subr.mxu1 %v34236_v3 }
0x1401   :  { %32808 = vmatmul.mubr.f32.vlgmr.msra.gmra.mxu1 %v17313_v10 }
0x1402   :  { %32817 = vmatprep.mubr.msk.f32.mxu1 %vm34237_vm1, %v34236_v3 }
0x144c   :  { %v16866_v38 = vpop.f32.mrf.mxu0 }
0x144e   :  { %v32754_v15 = vpop.f32.mrf.mxu0 }
0x1450   :  { %v17016_v22 = vpop.f32.mrf.mxu0 }
0x1452   :  { %v32764_v49 = vpop.f32.mrf.mxu0 }
0x1454   :  { %v16942_v57 = vpop.f32.mrf.mxu1  ;;  %v17164_v58 = vpop.f32.mrf.mxu0 }
0x1455   :  { %v16943_v59 = vadd.f32 %v16942_v57, %v16866_v38 }
0x1456   :  { %v32759_v2 = vpop.f32.mrf.mxu1  ;;  %v32774_v14 = vpop.f32.mrf.mxu0 }
0x1457   :  { %v17017_v7 = vadd.f32 %v17016_v22, %v16943_v59 }
0x1458   :  { %v17090_v27 = vpop.f32.mrf.mxu1 }
0x1459   :  { %v17091_v17 = vadd.f32 %v17090_v27, %v17017_v7 }
0x145a   :  { %v32769_v41 = vpop.f32.mrf.mxu1 }
0x145b   :  { %v17165_v26 = vadd.f32 %v17164_v58, %v17091_v17 }
0x145c   :  { %v17236_v40 = vpop.f32.mrf.mxu1 }
0x145d   :  { %v17237_v56 = vadd.f32 %v17236_v40, %v17165_v26 }
0x145e   :  { %v32779_v54 = vpop.f32.mrf.mxu1 }
0x145f   :  { %v17693_v13 = vmul.f32 0.35355338, %v17237_v56 }
0x1461   :  { %v17695_v19 = vsel %vm4987_vm5, %v17693_v13, -inf }
0x1462   :  { %17696 = vmax.xlane.f32.xlu1 %v17695_v19 }
0x14b1   :  { %v17319_v45 = vpop.f32.mrf.mxu0 }
0x14b3   :  { %v32784_v46 = vpop.f32.mrf.mxu0 }
0x14b5   :  { %v17469_v18 = vpop.f32.mrf.mxu0 }
0x14b7   :  { %v32794_v24 = vpop.f32.mrf.mxu0 }
0x14b9   :  { %v17395_v52 = vpop.f32.mrf.mxu1  ;;  %v17617_v53 = vpop.f32.mrf.mxu0 }
0x14ba   :  { %v17396_v60 = vadd.f32 %v17395_v52, %v17319_v45 }
0x14bb   :  { %v32789_v9 = vpop.f32.mrf.mxu1  ;;  %v32804_v62 = vpop.f32.mrf.mxu0 }
0x14bc   :  { %v17470_v34 = vadd.f32 %v17469_v18, %v17396_v60 }
0x14bd   :  { %v17543_v4 = vpop.f32.mrf.mxu1 }
0x14be   :  { %v17544_v44 = vadd.f32 %v17543_v4, %v17470_v34 }
0x14bf   :  { %v32799_v1 = vpop.f32.mrf.mxu1 }
0x14c0   :  { %v17618_v21 = vadd.f32 %v17617_v53, %v17544_v44 }
0x14c1   :  { %v17689_v50 = vpop.f32.mrf.mxu1 }
0x14c2   :  { %v17690_v33 = vadd.f32 %v17689_v50, %v17618_v21 }
0x14c3   :  { %v32809_v42 = vpop.f32.mrf.mxu1 }
0x14c4   :  { %v17694_v61 = vmul.f32 0.35355338, %v17690_v33 }
0x14c6   :  { %v17698_v28 = vsel %vm4987_vm5, %v17694_v61, -inf }
0x14c7   :  { %17699 = vmax.xlane.f32.xlu0 %v17698_v28 }
0x14eb   :  { %v17697_v6 = vpop.xlane.xlu1 %17696 }
0x14ec   :  { %v17701_v63 = vsub.f32 %v17693_v13, %v17697_v6 }
0x14ee   :  { %v17703_v37 = vmul.f32 1.442695, %v17701_v63 }
0x14f0   :  { %34168 = vpow2.f32 %v17703_v37 }
0x14fd   :  { %v34169_v31 = vpop.eup %34168 }
0x14fe   :  { %v17707_v30 = vsel %vm4987_vm5, %v34169_v31, 0.0 }
0x14ff   :  { %17708 = vadd.xlane.f32.xlu1 %v17707_v30 }
0x1510   :  { %17717 = vrot.lane.b32.xlu1 %v37206_v20, %s34240_s26 }
0x1514   :  { %18628 = vrot.lane.b32.xlu1 %v37206_v20, %s34241_s27 }
0x1518   :  { %18626 = vrot.lane.b32.xlu1 %v37206_v20, %s34242_s28 }
0x151c   :  { %19081 = vrot.lane.b32.xlu1 %v37213_v16, %s34242_s28 }
0x1550   :  { %v17700_v0 = vpop.xlane.xlu0 %17699 }
0x1551   :  { %v17702_v32 = vsub.f32 %v17694_v61, %v17700_v0 }
0x1553   :  { %v17705_v35 = vmul.f32 1.442695, %v17702_v32 }
0x1555   :  { %34170 = vpow2.f32 %v17705_v35 }
0x1562   :  { %v34171_v5 = vpop.eup %34170 }
0x1563   :  { %v17710_v10 = vsel %vm4987_vm5, %v34171_v5, 0.0 }
0x1564   :  { %17711 = vadd.xlane.f32.xlu0 %v17710_v10 }
0x157a   :  { %18169 = vrot.lane.b32.xlu0 %v37213_v16, %s34240_s26 }
0x157e   :  { %19083 = vrot.lane.b32.xlu0 %v37213_v16, %s34241_s27 }
0x1588   :  { %v17709_v39 = vpop.xlane.xlu1 %17708 }
0x1589   :  { %34172 = vrcp.f32 %v17709_v39 }
0x158c   :  { %v17718_v51 = vpop.permute.xlu1 %17717 }
0x158d   :  { %v17754_v23 = vand.u32 4294901760, %v17718_v51 }
0x158f   :  { %v17831_v43 = vsub.f32 %v17718_v51, %v17754_v23  ;;  %32811 = vmatpush3.msra.mxu0 %v17754_v23 }
0x1590   :  { %32820 = vmatprep.subr.mxu0 %v34236_v3  ;;  %v18629_v59 = vpop.permute.xlu1 %18628 }
0x1591   :  { %v17832_v48 = vand.u32 4294901760, %v17831_v43  ;;  %v18632_v7 = vsel %vm4987_vm5, %v18629_v59, 0 }
0x1592   :  { %v18665_v17 = vand.u32 4294901760, %v18632_v7 }
0x1593   :  { %v17833_v12 = vsub.f32 %v17831_v43, %v17832_v48 }
0x1594   :  { %v37294_v56 = vsub.f32 %v18632_v7, %v18665_v17  ;;  %v18627_v13 = vpop.permute.xlu1 %18626 }
0x1595   :  { %v17834_v55 = vand.u32 4294901760, %v17833_v12  ;;  %v18630_v24 = vsel %vm4987_vm5, %v18627_v13, 0 }
0x1596   :  { %v34173_v25 = vpop.eup %34172  ;;  %v18743_v18 = vand.u32 4294901760, %v37294_v56  ;;  %v37303_v60 = vand.u32 4294901760, %v18630_v24 }
0x1597   :  { %v17715_v29 = vmul.f32 %v34173_v25, %v34169_v31  ;;  %32816 = vmatpush3.msra.mxu1 %v17834_v55 }
0x1598   :  { %32825 = vmatprep.subr.mxu1 %v34236_v3  ;;  %v18744_v62 = vsub.f32 %v37294_v56, %v18743_v18  ;;  %v18701_v44 = vsub.f32 %v18630_v24, %v37303_v60  ;;  %v19082_v33 = vpop.permute.xlu1 %19081 }
0x1599   :  { %v17721_v11 = vsel %vm4987_vm5, %v17715_v29, 0  ;;  %v19085_v61 = vsel %vm4987_vm5, %v19082_v33, 0 }
0x159a   :  { %v17789_v36 = vand.u32 4294901760, %v17721_v11  ;;  %v18745_v21 = vand.u32 4294901760, %v18744_v62  ;;  %v18702_v42 = vand.u32 4294901760, %v18701_v44  ;;  %v19155_v63 = vand.u32 4294901760, %v19085_v61 }
0x159c   :  { %v17790_v38 = vsub.f32 %v17721_v11, %v17789_v36  ;;  %32818 = vmatmul.mubr.f32.vlgmr.msra.gmra.mxu1 %v17789_v36  ;;  %v18703_v6 = vsub.f32 %v18701_v44, %v18702_v42  ;;  %v19156_v30 = vsub.f32 %v19085_v61, %v19155_v63 }
0x159d   :  { %32826 = vmatpush3.msra.mxu1 %v17754_v23  ;;  %32827 = vmatprep.mubr.msk.f32.mxu1 %vm34237_vm1, %v34236_v3 }
0x159e   :  { %32835 = vmatprep.subr.mxu1 %v34236_v3  ;;  %v17791_v15 = vand.u32 4294901760, %v17790_v38  ;;  %v18704_v31 = vand.u32 4294901760, %v18703_v6  ;;  %v19157_v32 = vand.u32 4294901760, %v19156_v30 }
0x15a0   :  { %32828 = vmatmul.mubr.f32.vlgmr.msra.gmra.mxu1 %v17791_v15  ;;  %v17792_v22 = vsub.f32 %v17790_v38, %v17791_v15  ;;  %v19158_v35 = vsub.f32 %v19156_v30, %v19157_v32 }
0x15a1   :  { %32836 = vmatpush3.msra.mxu1 %v17754_v23  ;;  %32837 = vmatprep.mubr.msk.f32.mxu1 %vm34237_vm1, %v34236_v3 }
0x15a2   :  { %v17793_v49 = vand.u32 4294901760, %v17792_v22  ;;  %32845 = vmatprep.subr.mxu1 %v34236_v3 }
0x15a4   :  { %32813 = vmatmul.mubr.f32.vlgmr.msra.gmra.mxu0 %v17793_v49  ;;  %32838 = vmatmul.mubr.f32.vlgmr.msra.gmra.mxu1 %v17789_v36 }
0x15a5   :  { %32821 = vmatpush3.msra.mxu0 %v17831_v43  ;;  %32822 = vmatprep.mubr.msk.f32.mxu0 %vm34237_vm1, %v34236_v3 }
0x15a6   :  { %32830 = vmatprep.subr.mxu0 %v34236_v3  ;;  %32847 = vmatprep.mubr.msk.f32.mxu1 %vm34237_vm1, %v34236_v3 }
0x15a8   :  { %32823 = vmatmul.mubr.f32.vlgmr.msra.gmra.mxu0 %v17790_v38 }
0x15a9   :  { %32831 = vmatpush3.msra.mxu0 %v17832_v48  ;;  %32832 = vmatprep.mubr.msk.f32.mxu0 %vm34237_vm1, %v34236_v3 }
0x15aa   :  { %32840 = vmatprep.subr.mxu0 %v34236_v3 }
0x15ac   :  { %32833 = vmatmul.mubr.f32.vlgmr.msra.gmra.mxu0 %v17789_v36 }
0x15ad   :  { %32842 = vmatprep.mubr.msk.f32.mxu0 %vm34237_vm1, %v34236_v3 }
0x15ed   :  { %v17712_v57 = vpop.xlane.xlu0 %17711 }
0x15ee   :  { %34174 = vrcp.f32 %v17712_v57 }
0x15f1   :  { %v18170_v58 = vpop.permute.xlu0 %18169 }
0x15f2   :  { %v18206_v2 = vand.u32 4294901760, %v18170_v58 }
0x15f4   :  { %v18283_v14 = vsub.f32 %v18170_v58, %v18206_v2  ;;  %32841 = vmatpush3.msra.mxu0 %v18206_v2 }
0x15f5   :  { %32850 = vmatprep.subr.mxu0 %v34236_v3  ;;  %v19084_v19 = vpop.permute.xlu0 %19083 }
0x15f6   :  { %v18284_v27 = vand.u32 4294901760, %v18283_v14  ;;  %v19087_v52 = vsel %vm4987_vm5, %v19084_v19, 0 }
0x15f7   :  { %v37309_v34 = vand.u32 4294901760, %v19087_v52 }
0x15f8   :  { %v18285_v41 = vsub.f32 %v18283_v14, %v18284_v27 }
0x15f9   :  { %v37316_v50 = vsub.f32 %v19087_v52, %v37309_v34 }
0x15fa   :  { %v18286_v26 = vand.u32 4294901760, %v18285_v41 }
0x15fb   :  { %v34175_v40 = vpop.eup %34174  ;;  %v19198_v28 = vand.u32 4294901760, %v37316_v50 }
0x15fc   :  { %v17716_v54 = vmul.f32 %v34175_v40, %v34171_v5  ;;  %32846 = vmatpush3.msra.mxu1 %v18286_v26  ;;  %v19159_v5 = vand.u32 4294901760, %v19158_v35 }
0x15fd   :  { %32855 = vmatprep.subr.mxu1 %v34236_v3  ;;  %v19199_v37 = vsub.f32 %v37316_v50, %v19198_v28 }
0x15fe   :  { %v18173_v45 = vsel %vm4987_vm5, %v17716_v54, 0 }
0x15ff   :  { %v18241_v46 = vand.u32 4294901760, %v18173_v45  ;;  %v19200_v0 = vand.u32 4294901760, %v19199_v37 }
0x1601   :  { %v18242_v53 = vsub.f32 %v18173_v45, %v18241_v46  ;;  %32848 = vmatmul.mubr.f32.vlgmr.msra.gmra.mxu1 %v18241_v46 }
0x1602   :  { %32856 = vmatpush3.msra.mxu1 %v18206_v2  ;;  %32857 = vmatprep.mubr.msk.f32.mxu1 %vm34237_vm1, %v34236_v3 }
0x1603   :  { %32865 = vmatprep.subr.mxu1 %v34236_v3  ;;  %v18243_v9 = vand.u32 4294901760, %v18242_v53 }
0x1605   :  { %32858 = vmatmul.mubr.f32.vlgmr.msra.gmra.mxu1 %v18243_v9  ;;  %v18244_v4 = vsub.f32 %v18242_v53, %v18243_v9 }
0x1606   :  { %32866 = vmatpush3.msra.mxu1 %v18206_v2  ;;  %32867 = vmatprep.mubr.msk.f32.mxu1 %vm34237_vm1, %v34236_v3 }
0x1607   :  { %32875 = vmatprep.subr.mxu1 %v34236_v3  ;;  %v18245_v1 = vand.u32 4294901760, %v18244_v4 }
0x1609   :  { %32843 = vmatmul.mubr.f32.vlgmr.msra.gmra.mxu0 %v18245_v1  ;;  %32868 = vmatmul.mubr.f32.vlgmr.msra.gmra.mxu1 %v18241_v46 }
0x160a   :  { %32851 = vmatpush3.msra.mxu0 %v18283_v14  ;;  %32876 = vmatpush3.xpose.msra.mxu1 %v18745_v21 }
0x160b   :  { %32852 = vmatprep.mubr.msk.f32.mxu0 %vm34237_vm1, %v34236_v3  ;;  %32860 = vmatprep.subr.mxu0 %v34236_v3 }
0x160c   :  { %32877 = vmatprep.mubr.msk.f32.mxu1 %vm34237_vm1, %v34236_v3  ;;  %32885 = vmatprep.subr.mxu1 %v34236_v3 }
0x160d   :  { %32853 = vmatmul.mubr.f32.vlgmr.msra.gmra.mxu0 %v18242_v53  ;;  %32878 = vmatmul.mubr.f32.vlgmr.msra.gmra.mxu1 %v37303_v60 }
0x160e   :  { %32861 = vmatpush3.msra.mxu0 %v18284_v27  ;;  %32886 = vmatpush3.xpose.msra.mxu1 %v18665_v17 }
0x160f   :  { %32862 = vmatprep.mubr.msk.f32.mxu0 %vm34237_vm1, %v34236_v3  ;;  %32870 = vmatprep.subr.mxu0 %v34236_v3 }
0x1610   :  { %32887 = vmatprep.mubr.msk.f32.mxu1 %vm34237_vm1, %v34236_v3  ;;  %32895 = vmatprep.subr.mxu1 %v34236_v3 }
0x1611   :  { %32863 = vmatmul.mubr.f32.vlgmr.msra.gmra.mxu0 %v18241_v46  ;;  %32888 = vmatmul.mubr.f32.vlgmr.msra.gmra.mxu1 %v18702_v42 }
0x1612   :  { %32871 = vmatpush3.xpose.msra.mxu0 %v18665_v17  ;;  %32896 = vmatpush3.xpose.msra.mxu1 %v18665_v17 }
0x1613   :  { %32872 = vmatprep.mubr.msk.f32.mxu0 %vm34237_vm1, %v34236_v3  ;;  %32880 = vmatprep.subr.mxu0 %v34236_v3 }
0x1614   :  { %32897 = vmatprep.mubr.msk.f32.mxu1 %vm34237_vm1, %v34236_v3  ;;  %32905 = vmatprep.subr.mxu1 %v34236_v3 }
0x1615   :  { %32873 = vmatmul.mubr.f32.vlgmr.msra.gmra.mxu0 %v18704_v31  ;;  %32898 = vmatmul.mubr.f32.vlgmr.msra.gmra.mxu1 %v37303_v60 }
0x1616   :  { %32881 = vmatpush3.xpose.msra.mxu0 %v37294_v56  ;;  %32906 = vmatpush3.xpose.msra.mxu1 %v19200_v0 }
0x1617   :  { %32882 = vmatprep.mubr.msk.f32.mxu0 %vm34237_vm1, %v34236_v3  ;;  %32890 = vmatprep.subr.mxu0 %v34236_v3 }
0x1618   :  { %32907 = vmatprep.mubr.msk.f32.mxu1 %vm34237_vm1, %v34236_v3  ;;  %32915 = vmatprep.subr.mxu1 %v34236_v3 }
0x1619   :  { %32883 = vmatmul.mubr.f32.vlgmr.msra.gmra.mxu0 %v18701_v44  ;;  %32908 = vmatmul.mubr.f32.vlgmr.msra.gmra.mxu1 %v19155_v63 }
0x161a   :  { %32891 = vmatpush3.xpose.msra.mxu0 %v18743_v18  ;;  %32916 = vmatpush3.xpose.msra.mxu1 %v37309_v34 }
0x161b   :  { %32892 = vmatprep.mubr.msk.f32.mxu0 %vm34237_vm1, %v34236_v3  ;;  %32900 = vmatprep.subr.mxu0 %v34236_v3 }
0x161c   :  { %32917 = vmatprep.mubr.msk.f32.mxu1 %vm34237_vm1, %v34236_v3  ;;  %32925 = vmatprep.subr.mxu1 %v34236_v3 }
0x161d   :  { %32893 = vmatmul.mubr.f32.vlgmr.msra.gmra.mxu0 %v37303_v60  ;;  %32918 = vmatmul.mubr.f32.vlgmr.msra.gmra.mxu1 %v19157_v32 }
0x161e   :  { %32901 = vmatpush3.xpose.msra.mxu0 %v37309_v34  ;;  %32926 = vmatpush3.xpose.msra.mxu1 %v37309_v34 }
0x161f   :  { %32902 = vmatprep.mubr.msk.f32.mxu0 %vm34237_vm1, %v34236_v3  ;;  %32910 = vmatprep.subr.mxu0 %v34236_v3 }
0x1620   :  { %32927 = vmatprep.mubr.msk.f32.mxu1 %vm34237_vm1, %v34236_v3  ;;  %32935 = vmatprep.subr.mxu1 %v34236_v3 }
0x1621   :  { %32903 = vmatmul.mubr.f32.vlgmr.msra.gmra.mxu0 %v19159_v5  ;;  %32928 = vmatmul.mubr.f32.vlgmr.msra.gmra.mxu1 %v19155_v63 }
0x1622   :  { %32911 = vmatpush3.xpose.msra.mxu0 %v37316_v50  ;;  %32912 = vmatprep.mubr.msk.f32.mxu0 %vm34237_vm1, %v34236_v3 }
0x1623   :  { %32920 = vmatprep.subr.mxu0 %v34236_v3  ;;  %32937 = vmatprep.mubr.msk.f32.mxu1 %vm34237_vm1, %v34236_v3 }
0x1625   :  { %32913 = vmatmul.mubr.f32.vlgmr.msra.gmra.mxu0 %v19156_v30 }
0x1626   :  { %32921 = vmatpush3.xpose.msra.mxu0 %v19198_v28  ;;  %32922 = vmatprep.mubr.msk.f32.mxu0 %vm34237_vm1, %v34236_v3 }
0x1627   :  { %32930 = vmatprep.subr.mxu0 %v34236_v3 }
0x1629   :  { %32923 = vmatmul.mubr.f32.vlgmr.msra.gmra.mxu0 %v19155_v63 }
0x162a   :  { %32932 = vmatprep.mubr.msk.f32.mxu0 %vm34237_vm1, %v34236_v3 }
0x165c   :  { %v17871_v10 = vpop.f32.mrf.mxu1 }
0x165e   :  { %v32819_v39 = vpop.f32.mrf.mxu1 }
0x1660   :  { %v18019_v51 = vpop.f32.mrf.mxu1 }
0x1662   :  { %v32829_v23 = vpop.f32.mrf.mxu1 }
0x1664   :  { %v17795_v43 = vpop.f32.mrf.mxu0  ;;  %v18165_v48 = vpop.f32.mrf.mxu1 }
0x1665   :  { %v17872_v25 = vadd.f32 %v17871_v10, %v17795_v43 }
0x1666   :  { %v32814_v12 = vpop.f32.mrf.mxu0  ;;  %v32839_v55 = vpop.f32.mrf.mxu1 }
0x1668   :  { %v17945_v29 = vpop.f32.mrf.mxu0 }
0x1669   :  { %v17946_v11 = vadd.f32 %v17945_v29, %v17872_v25 }
0x166a   :  { %v32824_v36 = vpop.f32.mrf.mxu0 }
0x166b   :  { %v18020_v38 = vadd.f32 %v18019_v51, %v17946_v11 }
0x166c   :  { %v18093_v15 = vpop.f32.mrf.mxu0 }
0x166d   :  { %v18094_v22 = vadd.f32 %v18093_v15, %v18020_v38 }
0x166e   :  { %v32834_v49 = vpop.f32.mrf.mxu0 }
0x166f   :  { %v18166_v57 = vadd.f32 %v18165_v48, %v18094_v22 }
0x1671   :  { %18621 = vst.msk [vmem:[#allocation4] sm:$0xff] %vm4987_vm5, %v18166_v57 }
0x16c1   :  { %v18323_v58 = vpop.f32.mrf.mxu1 }
0x16c3   :  { %v32849_v59 = vpop.f32.mrf.mxu1 }
0x16c5   :  { %v18471_v2 = vpop.f32.mrf.mxu1 }
0x16c7   :  { %v32859_v14 = vpop.f32.mrf.mxu1 }
0x16c9   :  { %v18247_v7 = vpop.f32.mrf.mxu0  ;;  %v18617_v27 = vpop.f32.mrf.mxu1 }
0x16ca   :  { %v18324_v26 = vadd.f32 %v18323_v58, %v18247_v7 }
0x16cb   :  { %v32844_v17 = vpop.f32.mrf.mxu0  ;;  %v32869_v41 = vpop.f32.mrf.mxu1 }
0x16cd   :  { %v18397_v40 = vpop.f32.mrf.mxu0  ;;  %v18782_v56 = vpop.f32.mrf.mxu1 }
0x16ce   :  { %v18398_v54 = vadd.f32 %v18397_v40, %v18324_v26 }
0x16cf   :  { %v32854_v13 = vpop.f32.mrf.mxu0  ;;  %v32879_v19 = vpop.f32.mrf.mxu1 }
0x16d0   :  { %v18472_v45 = vadd.f32 %v18471_v2, %v18398_v54 }
0x16d1   :  { %v18545_v46 = vpop.f32.mrf.mxu0  ;;  %v18930_v18 = vpop.f32.mrf.mxu1 }
0x16d2   :  { %v18546_v24 = vadd.f32 %v18545_v46, %v18472_v45 }
0x16d3   :  { %v32864_v52 = vpop.f32.mrf.mxu0  ;;  %v32889_v53 = vpop.f32.mrf.mxu1 }
0x16d4   :  { %v18618_v60 = vadd.f32 %v18617_v27, %v18546_v24 }
0x16d5   :  { %v18706_v9 = vpop.f32.mrf.mxu0  ;;  %v19076_v62 = vpop.f32.mrf.mxu1 }
0x16d6   :  { %18622 = vst.msk [vmem:[#allocation4 + $0x8] sm:$0xff] %vm4987_vm5, %v18618_v60  ;;  %v18783_v44 = vadd.f32 %v18782_v56, %v18706_v9 }
0x16d7   :  { %v32874_v34 = vpop.f32.mrf.mxu0  ;;  %v32899_v4 = vpop.f32.mrf.mxu1 }
0x16d9   :  { %v18856_v1 = vpop.f32.mrf.mxu0  ;;  %v19237_v21 = vpop.f32.mrf.mxu1 }
0x16da   :  { %v18857_v50 = vadd.f32 %v18856_v1, %v18783_v44 }
0x16db   :  { %v32884_v33 = vpop.f32.mrf.mxu0  ;;  %v32909_v42 = vpop.f32.mrf.mxu1 }
0x16dc   :  { %v18931_v61 = vadd.f32 %v18930_v18, %v18857_v50 }
0x16dd   :  { %v19004_v28 = vpop.f32.mrf.mxu0  ;;  %v19385_v6 = vpop.f32.mrf.mxu1 }
0x16de   :  { %v19005_v63 = vadd.f32 %v19004_v28, %v18931_v61 }
0x16df   :  { %v32894_v37 = vpop.f32.mrf.mxu0  ;;  %v32919_v31 = vpop.f32.mrf.mxu1 }
0x16e0   :  { %v19077_v30 = vadd.f32 %v19076_v62, %v19005_v63 }
0x16e1   :  { %v19161_v0 = vpop.f32.mrf.mxu0  ;;  %v19531_v32 = vpop.f32.mrf.mxu1 }
0x16e2   :  { %v19535_v35 = vmul.f32 0.35355338, %v19077_v30  ;;  %v19238_v39 = vadd.f32 %v19237_v21, %v19161_v0 }
0x16e3   :  { %v32904_v5 = vpop.f32.mrf.mxu0  ;;  %v32929_v10 = vpop.f32.mrf.mxu1 }
0x16e4   :  { %v19537_v51 = vsel %vm4987_vm5, %v19535_v35, -inf }
0x16e5   :  { %19538 = vmax.xlane.f32.xlu0 %v19537_v51  ;;  %v19311_v23 = vpop.f32.mrf.mxu0 }
0x16e6   :  { %v19312_v43 = vadd.f32 %v19311_v23, %v19238_v39 }
0x16e7   :  { %v32914_v48 = vpop.f32.mrf.mxu0 }
0x16e8   :  { %v19386_v12 = vadd.f32 %v19385_v6, %v19312_v43 }
0x16e9   :  { %v19459_v55 = vpop.f32.mrf.mxu0 }
0x16ea   :  { %v19460_v25 = vadd.f32 %v19459_v55, %v19386_v12 }
0x16eb   :  { %v32924_v29 = vpop.f32.mrf.mxu0 }
0x16ec   :  { %v19532_v11 = vadd.f32 %v19531_v32, %v19460_v25 }
0x16ee   :  { %v19536_v36 = vmul.f32 0.35355338, %v19532_v11 }
0x16f0   :  { %v19540_v38 = vsel %vm4987_vm5, %v19536_v36, -inf }
0x16f1   :  { %19541 = vmax.xlane.f32.xlu1 %v19540_v38 }
0x1702   :  { %19559 = vrot.lane.b32.xlu1 %v37206_v20, %s34243_s29 }
0x1706   :  { %20478 = vrot.lane.b32.xlu1 %v37206_v20, %s34244_s30 }
0x170a   :  { %20476 = vrot.lane.b32.xlu1 %v37206_v20, %s34245_s9 }
0x170e   :  { %20931 = vrot.lane.b32.xlu1 %v37213_v16, %s34245_s9 }
0x176e   :  { %v19539_v15 = vpop.xlane.xlu0 %19538 }
0x176f   :  { %v19543_v22 = vsub.f32 %v19535_v35, %v19539_v15 }
0x1771   :  { %v19545_v49 = vmul.f32 1.442695, %v19543_v22 }
0x1773   :  { %34176 = vpow2.f32 %v19545_v49 }
0x177a   :  { %v19542_v57 = vpop.xlane.xlu1 %19541 }
0x177b   :  { %v19544_v58 = vsub.f32 %v19536_v36, %v19542_v57 }
0x177d   :  { %v19547_v59 = vmul.f32 1.442695, %v19544_v58 }
0x177e   :  { %v19560_v2 = vpop.permute.xlu1 %19559 }
0x177f   :  { %34178 = vpow2.f32 %v19547_v59  ;;  %v19596_v14 = vand.u32 4294901760, %v19560_v2 }
0x1780   :  { %v34177_v7 = vpop.eup %34176 }
0x1781   :  { %v37389_v27 = vsub.f32 %v19560_v2, %v19596_v14  ;;  %32931 = vmatpush3.msra.mxu0 %v19596_v14  ;;  %v19549_v17 = vsel %vm4987_vm5, %v34177_v7, 0.0 }
0x1782   :  { %19550 = vadd.xlane.f32.xlu0 %v19549_v17  ;;  %32940 = vmatprep.subr.mxu0 %v34236_v3  ;;  %v20479_v18 = vpop.permute.xlu1 %20478 }
0x1783   :  { %v19674_v20 = vand.u32 4294901760, %v37389_v27  ;;  %v20482_v9 = vsel %vm4987_vm5, %v20479_v18, 0 }
0x1784   :  { %v37409_v4 = vand.u32 4294901760, %v20482_v9 }
0x1785   :  { %v19675_v41 = vsub.f32 %v37389_v27, %v19674_v20 }
0x1786   :  { %v37418_v42 = vsub.f32 %v20482_v9, %v37409_v4  ;;  %v20477_v28 = vpop.permute.xlu1 %20476 }
0x1787   :  { %v19676_v26 = vand.u32 4294901760, %v19675_v41  ;;  %v20480_v30 = vsel %vm4987_vm5, %v20477_v28, 0 }
0x1788   :  { %v20593_v31 = vand.u32 4294901760, %v37418_v42  ;;  %v37431_v35 = vand.u32 4294901760, %v20480_v30 }
0x1789   :  { %32936 = vmatpush3.msra.mxu1 %v19676_v26 }
0x178a   :  { %32945 = vmatprep.subr.mxu1 %v34236_v3  ;;  %v20594_v10 = vsub.f32 %v37418_v42, %v20593_v31  ;;  %v20551_v23 = vsub.f32 %v20480_v30, %v37431_v35  ;;  %v20932_v55 = vpop.permute.xlu1 %20931 }
0x178b   :  { %v20935_v29 = vsel %vm4987_vm5, %v20932_v55, 0 }
0x178c   :  { %v34179_v40 = vpop.eup %34178  ;;  %v20595_v48 = vand.u32 4294901760, %v20594_v10  ;;  %v20552_v25 = vand.u32 4294901760, %v20551_v23  ;;  %v21005_v38 = vand.u32 4294901760, %v20935_v29 }
0x178d   :  { %v19552_v56 = vsel %vm4987_vm5, %v34179_v40, 0.0 }
0x178e   :  { %19553 = vadd.xlane.f32.xlu0 %v19552_v56  ;;  %v20553_v36 = vsub.f32 %v20551_v23, %v20552_v25  ;;  %v21006_v49 = vsub.f32 %v20935_v29, %v21005_v38 }
0x1790   :  { %v20554_v22 = vand.u32 4294901760, %v20553_v36  ;;  %v21007_v58 = vand.u32 4294901760, %v21006_v49 }
0x1792   :  { %v21008_v59 = vsub.f32 %v21006_v49, %v21007_v58 }
0x1794   :  { %v21009_v2 = vand.u32 4294901760, %v21008_v59 }
0x17a4   :  { %20011 = vrot.lane.b32.xlu0 %v37213_v16, %s34243_s29 }
0x17a8   :  { %20933 = vrot.lane.b32.xlu0 %v37213_v16, %s34244_s30 }
0x180b   :  { %v19551_v54 = vpop.xlane.xlu0 %19550 }
0x180c   :  { %34180 = vrcp.f32 %v19551_v54 }
0x1817   :  { %v19554_v13 = vpop.xlane.xlu0 %19553 }
0x1818   :  { %34182 = vrcp.f32 %v19554_v13 }
0x1819   :  { %v34181_v19 = vpop.eup %34180 }
0x181a   :  { %v19557_v45 = vmul.f32 %v34181_v19, %v34177_v7 }
0x181b   :  { %v20012_v46 = vpop.permute.xlu0 %20011 }
0x181c   :  { %v20048_v24 = vand.u32 4294901760, %v20012_v46  ;;  %v19563_v52 = vsel %vm4987_vm5, %v19557_v45, 0 }
0x181d   :  { %v19631_v53 = vand.u32 4294901760, %v19563_v52 }
0x181e   :  { %v37402_v60 = vsub.f32 %v20012_v46, %v20048_v24 }
0x181f   :  { %v19632_v62 = vsub.f32 %v19563_v52, %v19631_v53  ;;  %32938 = vmatmul.mubr.f32.vlgmr.msra.gmra.mxu1 %v19631_v53  ;;  %v20934_v6 = vpop.permute.xlu0 %20933 }
0x1820   :  { %v20126_v16 = vand.u32 4294901760, %v37402_v60  ;;  %32946 = vmatpush3.msra.mxu1 %v19596_v14  ;;  %32947 = vmatprep.mubr.msk.f32.mxu1 %vm34237_vm1, %v34236_v3  ;;  %v20937_v0 = vsel %vm4987_vm5, %v20934_v6, 0 }
0x1821   :  { %32955 = vmatprep.subr.mxu1 %v34236_v3  ;;  %v19633_v34 = vand.u32 4294901760, %v19632_v62  ;;  %v37439_v39 = vand.u32 4294901760, %v20937_v0 }
0x1822   :  { %v20127_v44 = vsub.f32 %v37402_v60, %v20126_v16 }
0x1823   :  { %32948 = vmatmul.mubr.f32.vlgmr.msra.gmra.mxu1 %v19633_v34  ;;  %v19634_v1 = vsub.f32 %v19632_v62, %v19633_v34  ;;  %v37449_v12 = vsub.f32 %v20937_v0, %v37439_v39 }
0x1824   :  { %v20128_v21 = vand.u32 4294901760, %v20127_v44  ;;  %32956 = vmatpush3.msra.mxu1 %v19596_v14  ;;  %32957 = vmatprep.mubr.msk.f32.mxu1 %vm34237_vm1, %v34236_v3 }
0x1825   :  { %v34183_v50 = vpop.eup %34182  ;;  %32965 = vmatprep.subr.mxu1 %v34236_v3  ;;  %v19635_v33 = vand.u32 4294901760, %v19634_v1  ;;  %v21048_v11 = vand.u32 4294901760, %v37449_v12 }
0x1826   :  { %v19558_v61 = vmul.f32 %v34183_v50, %v34179_v40 }
0x1827   :  { %32933 = vmatmul.mubr.f32.vlgmr.msra.gmra.mxu0 %v19635_v33  ;;  %32958 = vmatmul.mubr.f32.vlgmr.msra.gmra.mxu1 %v19631_v53  ;;  %v21049_v15 = vsub.f32 %v37449_v12, %v21048_v11 }
0x1828   :  { %32941 = vmatpush3.msra.mxu0 %v37389_v27  ;;  %32966 = vmatpush3.msra.mxu1 %v20128_v21  ;;  %v20015_v63 = vsel %vm4987_vm5, %v19558_v61, 0 }
0x1829   :  { %32942 = vmatprep.mubr.msk.f32.mxu0 %vm34237_vm1, %v34236_v3  ;;  %32950 = vmatprep.subr.mxu0 %v34236_v3  ;;  %v20083_v37 = vand.u32 4294901760, %v20015_v63  ;;  %v21050_v57 = vand.u32 4294901760, %v21049_v15 }
0x182a   :  { %32967 = vmatprep.mubr.msk.f32.mxu1 %vm34237_vm1, %v34236_v3  ;;  %32975 = vmatprep.subr.mxu1 %v34236_v3 }
0x182b   :  { %32943 = vmatmul.mubr.f32.vlgmr.msra.gmra.mxu0 %v19632_v62  ;;  %v20084_v32 = vsub.f32 %v20015_v63, %v20083_v37  ;;  %32968 = vmatmul.mubr.f32.vlgmr.msra.gmra.mxu1 %v20083_v37 }
0x182c   :  { %32951 = vmatpush3.msra.mxu0 %v19674_v20  ;;  %32976 = vmatpush3.msra.mxu1 %v20048_v24 }
0x182d   :  { %32952 = vmatprep.mubr.msk.f32.mxu0 %vm34237_vm1, %v34236_v3  ;;  %32960 = vmatprep.subr.mxu0 %v34236_v3  ;;  %v20085_v5 = vand.u32 4294901760, %v20084_v32 }
0x182e   :  { %32977 = vmatprep.mubr.msk.f32.mxu1 %vm34237_vm1, %v34236_v3  ;;  %32985 = vmatprep.subr.mxu1 %v34236_v3 }
0x182f   :  { %32953 = vmatmul.mubr.f32.vlgmr.msra.gmra.mxu0 %v19631_v53  ;;  %32978 = vmatmul.mubr.f32.vlgmr.msra.gmra.mxu1 %v20085_v5  ;;  %v20086_v51 = vsub.f32 %v20084_v32, %v20085_v5 }
0x1830   :  { %32961 = vmatpush3.msra.mxu0 %v20048_v24  ;;  %32986 = vmatpush3.msra.mxu1 %v20048_v24 }
0x1831   :  { %32962 = vmatprep.mubr.msk.f32.mxu0 %vm34237_vm1, %v34236_v3  ;;  %32970 = vmatprep.subr.mxu0 %v34236_v3  ;;  %v20087_v43 = vand.u32 4294901760, %v20086_v51 }
0x1832   :  { %32987 = vmatprep.mubr.msk.f32.mxu1 %vm34237_vm1, %v34236_v3  ;;  %32995 = vmatprep.subr.mxu1 %v34236_v3 }
0x1833   :  { %32963 = vmatmul.mubr.f32.vlgmr.msra.gmra.mxu0 %v20087_v43  ;;  %32988 = vmatmul.mubr.f32.vlgmr.msra.gmra.mxu1 %v20083_v37 }
0x1834   :  { %32971 = vmatpush3.msra.mxu0 %v37402_v60  ;;  %32996 = vmatpush3.xpose.msra.mxu1 %v20595_v48 }
0x1835   :  { %32972 = vmatprep.mubr.msk.f32.mxu0 %vm34237_vm1, %v34236_v3  ;;  %32980 = vmatprep.subr.mxu0 %v34236_v3 }
0x1836   :  { %32997 = vmatprep.mubr.msk.f32.mxu1 %vm34237_vm1, %v34236_v3  ;;  %33005 = vmatprep.subr.mxu1 %v34236_v3 }
0x1837   :  { %32973 = vmatmul.mubr.f32.vlgmr.msra.gmra.mxu0 %v20084_v32  ;;  %32998 = vmatmul.mubr.f32.vlgmr.msra.gmra.mxu1 %v37431_v35 }
0x1838   :  { %32981 = vmatpush3.msra.mxu0 %v20126_v16  ;;  %33006 = vmatpush3.xpose.msra.mxu1 %v37409_v4 }
0x1839   :  { %32982 = vmatprep.mubr.msk.f32.mxu0 %vm34237_vm1, %v34236_v3  ;;  %32990 = vmatprep.subr.mxu0 %v34236_v3 }
0x183a   :  { %33007 = vmatprep.mubr.msk.f32.mxu1 %vm34237_vm1, %v34236_v3  ;;  %33015 = vmatprep.subr.mxu1 %v34236_v3 }
0x183b   :  { %32983 = vmatmul.mubr.f32.vlgmr.msra.gmra.mxu0 %v20083_v37  ;;  %33008 = vmatmul.mubr.f32.vlgmr.msra.gmra.mxu1 %v20552_v25 }
0x183c   :  { %32991 = vmatpush3.xpose.msra.mxu0 %v37409_v4  ;;  %33016 = vmatpush3.xpose.msra.mxu1 %v37409_v4 }
0x183d   :  { %32992 = vmatprep.mubr.msk.f32.mxu0 %vm34237_vm1, %v34236_v3  ;;  %33000 = vmatprep.subr.mxu0 %v34236_v3 }
0x183e   :  { %33017 = vmatprep.mubr.msk.f32.mxu1 %vm34237_vm1, %v34236_v3  ;;  %33025 = vmatprep.subr.mxu1 %v34236_v3 }
0x183f   :  { %32993 = vmatmul.mubr.f32.vlgmr.msra.gmra.mxu0 %v20554_v22  ;;  %33018 = vmatmul.mubr.f32.vlgmr.msra.gmra.mxu1 %v37431_v35 }
0x1840   :  { %33001 = vmatpush3.xpose.msra.mxu0 %v37418_v42  ;;  %33026 = vmatpush3.xpose.msra.mxu1 %v21050_v57 }
0x1841   :  { %33002 = vmatprep.mubr.msk.f32.mxu0 %vm34237_vm1, %v34236_v3  ;;  %33010 = vmatprep.subr.mxu0 %v34236_v3 }
0x1842   :  { %33027 = vmatprep.mubr.msk.f32.mxu1 %vm34237_vm1, %v34236_v3  ;;  %33035 = vmatprep.subr.mxu1 %v34236_v3 }
0x1843   :  { %33003 = vmatmul.mubr.f32.vlgmr.msra.gmra.mxu0 %v20551_v23  ;;  %33028 = vmatmul.mubr.f32.vlgmr.msra.gmra.mxu1 %v21005_v38 }
0x1844   :  { %33011 = vmatpush3.xpose.msra.mxu0 %v20593_v31  ;;  %33036 = vmatpush3.xpose.msra.mxu1 %v37439_v39 }
0x1845   :  { %33012 = vmatprep.mubr.msk.f32.mxu0 %vm34237_vm1, %v34236_v3  ;;  %33020 = vmatprep.subr.mxu0 %v34236_v3 }
0x1846   :  { %33037 = vmatprep.mubr.msk.f32.mxu1 %vm34237_vm1, %v34236_v3  ;;  %33045 = vmatprep.subr.mxu1 %v34236_v3 }
0x1847   :  { %33013 = vmatmul.mubr.f32.vlgmr.msra.gmra.mxu0 %v37431_v35  ;;  %33038 = vmatmul.mubr.f32.vlgmr.msra.gmra.mxu1 %v21007_v58 }
0x1848   :  { %33021 = vmatpush3.xpose.msra.mxu0 %v37439_v39  ;;  %33046 = vmatpush3.xpose.msra.mxu1 %v37439_v39 }
0x1849   :  { %33022 = vmatprep.mubr.msk.f32.mxu0 %vm34237_vm1, %v34236_v3  ;;  %33030 = vmatprep.subr.mxu0 %v34236_v3 }
0x184a   :  { %33047 = vmatprep.mubr.msk.f32.mxu1 %vm34237_vm1, %v34236_v3  ;;  %33055 = vmatprep.subr.mxu1 %v34236_v3 }
0x184b   :  { %33023 = vmatmul.mubr.f32.vlgmr.msra.gmra.mxu0 %v21009_v2  ;;  %33048 = vmatmul.mubr.f32.vlgmr.msra.gmra.mxu1 %v21005_v38 }
0x184c   :  { %33031 = vmatpush3.xpose.msra.mxu0 %v37449_v12  ;;  %33032 = vmatprep.mubr.msk.f32.mxu0 %vm34237_vm1, %v34236_v3 }
0x184d   :  { %33040 = vmatprep.subr.mxu0 %v34236_v3  ;;  %33057 = vmatprep.mubr.msk.f32.mxu1 %vm34237_vm1, %v34236_v3 }
0x184f   :  { %33033 = vmatmul.mubr.f32.vlgmr.msra.gmra.mxu0 %v21006_v49 }
0x1850   :  { %33041 = vmatpush3.xpose.msra.mxu0 %v21048_v11  ;;  %33042 = vmatprep.mubr.msk.f32.mxu0 %vm34237_vm1, %v34236_v3 }
0x1851   :  { %33050 = vmatprep.subr.mxu0 %v34236_v3 }
0x1853   :  { %33043 = vmatmul.mubr.f32.vlgmr.msra.gmra.mxu0 %v21005_v38 }
0x1854   :  { %33052 = vmatprep.mubr.msk.f32.mxu0 %vm34237_vm1, %v34236_v3 }
0x18df   :  { %v19713_v14 = vpop.f32.mrf.mxu1 }
0x18e1   :  { %v32939_v7 = vpop.f32.mrf.mxu1 }
0x18e3   :  { %v19861_v27 = vpop.f32.mrf.mxu1 }
0x18e5   :  { %v32949_v17 = vpop.f32.mrf.mxu1 }
0x18e7   :  { %v19637_v20 = vpop.f32.mrf.mxu0  ;;  %v20007_v41 = vpop.f32.mrf.mxu1 }
0x18e8   :  { %v19714_v26 = vadd.f32 %v19713_v14, %v19637_v20 }
0x18e9   :  { %v32934_v40 = vpop.f32.mrf.mxu0  ;;  %v32959_v56 = vpop.f32.mrf.mxu1 }
0x18eb   :  { %v19787_v54 = vpop.f32.mrf.mxu0  ;;  %v20165_v13 = vpop.f32.mrf.mxu1 }
0x18ec   :  { %v19788_v19 = vadd.f32 %v19787_v54, %v19714_v26 }
0x18ed   :  { %v32944_v45 = vpop.f32.mrf.mxu0  ;;  %v32969_v46 = vpop.f32.mrf.mxu1 }
0x18ee   :  { %v19862_v18 = vadd.f32 %v19861_v27, %v19788_v19  ;;  %v34212_v19 = vld [vmem:[#allocation3] sm:$0xff]  ;;  %v37532_v46 = vld [vmem:[#allocation3 + $0x8] sm:$0xff] }
0x18ef   :  { %v19935_v24 = vpop.f32.mrf.mxu0  ;;  %v20313_v52 = vpop.f32.mrf.mxu1  ;;  %v37526_v45 = vld [vmem:[#allocation3] sm:$0xff] }
0x18f0   :  { %v19936_v53 = vadd.f32 %v19935_v24, %v19862_v18 }
0x18f1   :  { %v32954_v60 = vpop.f32.mrf.mxu0  ;;  %v32979_v9 = vpop.f32.mrf.mxu1 }
0x18f2   :  { %v37519_v62 = vadd.f32 %v20007_v41, %v19936_v53 }
0x18f3   :  { %v20089_v16 = vpop.f32.mrf.mxu0  ;;  %v20459_v34 = vpop.f32.mrf.mxu1 }
0x18f4   :  { %v20166_v4 = vadd.f32 %v20165_v13, %v20089_v16 }
0x18f5   :  { %v32964_v44 = vpop.f32.mrf.mxu0  ;;  %v32989_v1 = vpop.f32.mrf.mxu1 }
0x18f7   :  { %v20239_v21 = vpop.f32.mrf.mxu0  ;;  %v20632_v50 = vpop.f32.mrf.mxu1 }
0x18f8   :  { %v20240_v33 = vadd.f32 %v20239_v21, %v20166_v4 }
0x18f9   :  { %v32974_v42 = vpop.f32.mrf.mxu0  ;;  %v32999_v61 = vpop.f32.mrf.mxu1 }
0x18fa   :  { %v20314_v28 = vadd.f32 %v20313_v52, %v20240_v33 }
0x18fb   :  { %v20387_v6 = vpop.f32.mrf.mxu0  ;;  %v20780_v63 = vpop.f32.mrf.mxu1 }
0x18fc   :  { %v20388_v37 = vadd.f32 %v20387_v6, %v20314_v28  ;;  %v34213_v28 = vld [vmem:[#allocation3 + $0x8] sm:$0xff] }
0x18fd   :  { %v32984_v31 = vpop.f32.mrf.mxu0  ;;  %v33009_v30 = vpop.f32.mrf.mxu1 }
0x18fe   :  { %v37521_v0 = vadd.f32 %v20459_v34, %v20388_v37 }
0x18ff   :  { %v20556_v32 = vpop.f32.mrf.mxu0  ;;  %v20926_v35 = vpop.f32.mrf.mxu1 }
0x1900   :  { %v20633_v39 = vadd.f32 %v20632_v50, %v20556_v32 }
0x1901   :  { %v32994_v5 = vpop.f32.mrf.mxu0  ;;  %v33019_v10 = vpop.f32.mrf.mxu1 }
0x1903   :  { %v20706_v51 = vpop.f32.mrf.mxu0  ;;  %v21087_v23 = vpop.f32.mrf.mxu1 }
0x1904   :  { %v20707_v43 = vadd.f32 %v20706_v51, %v20633_v39 }
0x1905   :  { %v33004_v48 = vpop.f32.mrf.mxu0  ;;  %v33029_v12 = vpop.f32.mrf.mxu1 }
0x1906   :  { %v20781_v55 = vadd.f32 %v20780_v63, %v20707_v43 }
0x1907   :  { %v20854_v25 = vpop.f32.mrf.mxu0  ;;  %v21235_v29 = vpop.f32.mrf.mxu1 }
0x1908   :  { %v20855_v11 = vadd.f32 %v20854_v25, %v20781_v55 }
0x1909   :  { %v33014_v36 = vpop.f32.mrf.mxu0  ;;  %v33039_v38 = vpop.f32.mrf.mxu1 }
0x190a   :  { %v20927_v15 = vadd.f32 %v20926_v35, %v20855_v11 }
0x190b   :  { %v21011_v22 = vpop.f32.mrf.mxu0  ;;  %v21381_v49 = vpop.f32.mrf.mxu1 }
0x190c   :  { %v21385_v57 = vmul.f32 0.35355338, %v20927_v15  ;;  %v21088_v2 = vadd.f32 %v21087_v23, %v21011_v22 }
0x190d   :  { %v33024_v58 = vpop.f32.mrf.mxu0  ;;  %v33049_v59 = vpop.f32.mrf.mxu1 }
0x190e   :  { %v21387_v14 = vsel %vm4987_vm5, %v21385_v57, -inf }
0x190f   :  { %21388 = vmax.xlane.f32.xlu0 %v21387_v14  ;;  %v21161_v7 = vpop.f32.mrf.mxu0 }
0x1910   :  { %v21162_v27 = vadd.f32 %v21161_v7, %v21088_v2 }
0x1911   :  { %v33034_v17 = vpop.f32.mrf.mxu0 }
0x1912   :  { %v21236_v20 = vadd.f32 %v21235_v29, %v21162_v27 }
0x1913   :  { %v21309_v41 = vpop.f32.mrf.mxu0 }
0x1914   :  { %v21310_v26 = vadd.f32 %v21309_v41, %v21236_v20 }
0x1915   :  { %v33044_v40 = vpop.f32.mrf.mxu0 }
0x1916   :  { %v21382_v56 = vadd.f32 %v21381_v49, %v21310_v26 }
0x1918   :  { %v21386_v54 = vmul.f32 0.35355338, %v21382_v56 }
0x191a   :  { %v21390_v13 = vsel %vm4987_vm5, %v21386_v54, -inf }
0x191b   :  { %21391 = vmax.xlane.f32.xlu1 %v21390_v13 }
0x192c   :  { %21409 = vrot.lane.b32.xlu1 %v34212_v19, %s34246_s10 }
0x1930   :  { %22328 = vrot.lane.b32.xlu1 %v37526_v45, %s34247_s0 }
0x1934   :  { %22326 = vrot.lane.b32.xlu1 %v37526_v45, %s34248_s11 }
0x1938   :  { %22781 = vrot.lane.b32.xlu1 %v37532_v46, %s34248_s11 }
0x1998   :  { %v21389_v18 = vpop.xlane.xlu0 %21388 }
0x1999   :  { %v21393_v24 = vsub.f32 %v21385_v57, %v21389_v18 }
0x199b   :  { %v21395_v52 = vmul.f32 1.442695, %v21393_v24 }
0x199d   :  { %34184 = vpow2.f32 %v21395_v52 }
0x19a4   :  { %v21392_v53 = vpop.xlane.xlu1 %21391 }
0x19a5   :  { %v21394_v60 = vsub.f32 %v21386_v54, %v21392_v53 }
0x19a7   :  { %v21397_v9 = vmul.f32 1.442695, %v21394_v60 }
0x19a8   :  { %v21410_v16 = vpop.permute.xlu1 %21409 }
0x19a9   :  { %34186 = vpow2.f32 %v21397_v9  ;;  %v21446_v34 = vand.u32 4294901760, %v21410_v16 }
0x19aa   :  { %v34185_v4 = vpop.eup %34184 }
0x19ab   :  { %v37536_v44 = vsub.f32 %v21410_v16, %v21446_v34  ;;  %33051 = vmatpush3.msra.mxu0 %v21446_v34  ;;  %v21399_v1 = vsel %vm4987_vm5, %v34185_v4, 0.0 }
0x19ac   :  { %21400 = vadd.xlane.f32.xlu0 %v21399_v1  ;;  %33060 = vmatprep.subr.mxu0 %v34236_v3  ;;  %v22329_v32 = vpop.permute.xlu1 %22328 }
0x19ad   :  { %v21524_v21 = vand.u32 4294901760, %v37536_v44  ;;  %v22332_v51 = vsel %vm4987_vm5, %v22329_v32, 0 }
0x19ae   :  { %v37555_v12 = vand.u32 4294901760, %v22332_v51 }
0x19af   :  { %v21525_v50 = vsub.f32 %v37536_v44, %v21524_v21 }
0x19b0   :  { %v37564_v38 = vsub.f32 %v22332_v51, %v37555_v12  ;;  %v22327_v22 = vpop.permute.xlu1 %22326 }
0x19b1   :  { %v21526_v33 = vand.u32 4294901760, %v21525_v50  ;;  %v22330_v2 = vsel %vm4987_vm5, %v22327_v22, 0 }
0x19b2   :  { %v22443_v59 = vand.u32 4294901760, %v37564_v38  ;;  %v37577_v27 = vand.u32 4294901760, %v22330_v2 }
0x19b3   :  { %33056 = vmatpush3.msra.mxu1 %v21526_v33 }
0x19b4   :  { %33065 = vmatprep.subr.mxu1 %v34236_v3  ;;  %v22444_v20 = vsub.f32 %v37564_v38, %v22443_v59  ;;  %v22401_v40 = vsub.f32 %v22330_v2, %v37577_v27  ;;  %v22782_v19 = vpop.permute.xlu1 %22781 }
0x19b5   :  { %v22785_v24 = vsel %vm4987_vm5, %v22782_v19, 0 }
0x19b6   :  { %v34187_v42 = vpop.eup %34186  ;;  %v22445_v54 = vand.u32 4294901760, %v22444_v20  ;;  %v22402_v18 = vand.u32 4294901760, %v22401_v40  ;;  %v22855_v60 = vand.u32 4294901760, %v22785_v24 }
0x19b7   :  { %v21402_v61 = vsel %vm4987_vm5, %v34187_v42, 0.0 }
0x19b8   :  { %21403 = vadd.xlane.f32.xlu0 %v21402_v61  ;;  %v22403_v53 = vsub.f32 %v22401_v40, %v22402_v18 }
0x19ba   :  { %v22404_v16 = vand.u32 4294901760, %v22403_v53 }
0x19ce   :  { %21861 = vrot.lane.b32.xlu0 %v34213_v28, %s34246_s10 }
0x19d2   :  { %22783 = vrot.lane.b32.xlu0 %v37532_v46, %s34247_s0 }
0x1a35   :  { %v21401_v6 = vpop.xlane.xlu0 %21400 }
0x1a36   :  { %34188 = vrcp.f32 %v21401_v6 }
0x1a41   :  { %v21404_v63 = vpop.xlane.xlu0 %21403 }
0x1a42   :  { %34190 = vrcp.f32 %v21404_v63 }
0x1a43   :  { %v34189_v37 = vpop.eup %34188 }
0x1a44   :  { %v21407_v31 = vmul.f32 %v34189_v37, %v34185_v4 }
0x1a45   :  { %v21862_v30 = vpop.permute.xlu0 %21861 }
0x1a46   :  { %v21898_v35 = vand.u32 4294901760, %v21862_v30  ;;  %v21413_v5 = vsel %vm4987_vm5, %v21407_v31, 0 }
0x1a47   :  { %v21481_v10 = vand.u32 4294901760, %v21413_v5 }
0x1a48   :  { %v37548_v39 = vsub.f32 %v21862_v30, %v21898_v35 }
0x1a49   :  { %v21482_v23 = vsub.f32 %v21413_v5, %v21481_v10  ;;  %33058 = vmatmul.mubr.f32.vlgmr.msra.gmra.mxu1 %v21481_v10  ;;  %v22784_v49 = vpop.permute.xlu0 %22783 }
0x1a4a   :  { %v21976_v43 = vand.u32 4294901760, %v37548_v39  ;;  %33066 = vmatpush3.msra.mxu1 %v21446_v34  ;;  %33067 = vmatprep.mubr.msk.f32.mxu1 %vm34237_vm1, %v34236_v3  ;;  %v22787_v14 = vsel %vm4987_vm5, %v22784_v49, 0 }
0x1a4b   :  { %33075 = vmatprep.subr.mxu1 %v34236_v3  ;;  %v21483_v48 = vand.u32 4294901760, %v21482_v23  ;;  %v37585_v41 = vand.u32 4294901760, %v22787_v14 }
0x1a4c   :  { %v21977_v55 = vsub.f32 %v37548_v39, %v21976_v43 }
0x1a4d   :  { %33068 = vmatmul.mubr.f32.vlgmr.msra.gmra.mxu1 %v21483_v48  ;;  %v21484_v25 = vsub.f32 %v21482_v23, %v21483_v48  ;;  %v37595_v13 = vsub.f32 %v22787_v14, %v37585_v41 }
0x1a4e   :  { %v21978_v29 = vand.u32 4294901760, %v21977_v55  ;;  %33076 = vmatpush3.msra.mxu1 %v21446_v34  ;;  %33077 = vmatprep.mubr.msk.f32.mxu1 %vm34237_vm1, %v34236_v3  ;;  %v22856_v34 = vsub.f32 %v22785_v24, %v22855_v60 }
0x1a4f   :  { %v34191_v11 = vpop.eup %34190  ;;  %33085 = vmatprep.subr.mxu1 %v34236_v3  ;;  %v21485_v36 = vand.u32 4294901760, %v21484_v25  ;;  %v22898_v52 = vand.u32 4294901760, %v37595_v13 }
0x1a50   :  { %v21408_v15 = vmul.f32 %v34191_v11, %v34187_v42 }
0x1a51   :  { %33053 = vmatmul.mubr.f32.vlgmr.msra.gmra.mxu0 %v21485_v36  ;;  %33078 = vmatmul.mubr.f32.vlgmr.msra.gmra.mxu1 %v21481_v10  ;;  %v22899_v9 = vsub.f32 %v37595_v13, %v22898_v52 }
0x1a52   :  { %33061 = vmatpush3.msra.mxu0 %v37536_v44  ;;  %33086 = vmatpush3.msra.mxu1 %v21978_v29  ;;  %v21865_v57 = vsel %vm4987_vm5, %v21408_v15, 0  ;;  %v22857_v44 = vand.u32 4294901760, %v22856_v34 }
0x1a53   :  { %33062 = vmatprep.mubr.msk.f32.mxu0 %vm34237_vm1, %v34236_v3  ;;  %33070 = vmatprep.subr.mxu0 %v34236_v3  ;;  %v21933_v58 = vand.u32 4294901760, %v21865_v57  ;;  %v22900_v4 = vand.u32 4294901760, %v22899_v9 }
0x1a54   :  { %33087 = vmatprep.mubr.msk.f32.mxu1 %vm34237_vm1, %v34236_v3  ;;  %33095 = vmatprep.subr.mxu1 %v34236_v3  ;;  %v22858_v1 = vsub.f32 %v22856_v34, %v22857_v44 }
0x1a55   :  { %33063 = vmatmul.mubr.f32.vlgmr.msra.gmra.mxu0 %v21482_v23  ;;  %v21934_v7 = vsub.f32 %v21865_v57, %v21933_v58  ;;  %33088 = vmatmul.mubr.f32.vlgmr.msra.gmra.mxu1 %v21933_v58 }
0x1a56   :  { %33071 = vmatpush3.msra.mxu0 %v21524_v21  ;;  %33096 = vmatpush3.msra.mxu1 %v21898_v35  ;;  %v22859_v21 = vand.u32 4294901760, %v22858_v1 }
0x1a57   :  { %33072 = vmatprep.mubr.msk.f32.mxu0 %vm34237_vm1, %v34236_v3  ;;  %33080 = vmatprep.subr.mxu0 %v34236_v3  ;;  %v21935_v17 = vand.u32 4294901760, %v21934_v7 }
0x1a58   :  { %33097 = vmatprep.mubr.msk.f32.mxu1 %vm34237_vm1, %v34236_v3  ;;  %33105 = vmatprep.subr.mxu1 %v34236_v3 }
0x1a59   :  { %33073 = vmatmul.mubr.f32.vlgmr.msra.gmra.mxu0 %v21481_v10  ;;  %33098 = vmatmul.mubr.f32.vlgmr.msra.gmra.mxu1 %v21935_v17  ;;  %v21936_v26 = vsub.f32 %v21934_v7, %v21935_v17 }
0x1a5a   :  { %33081 = vmatpush3.msra.mxu0 %v21898_v35  ;;  %33106 = vmatpush3.msra.mxu1 %v21898_v35 }
0x1a5b   :  { %33082 = vmatprep.mubr.msk.f32.mxu0 %vm34237_vm1, %v34236_v3  ;;  %33090 = vmatprep.subr.mxu0 %v34236_v3  ;;  %v21937_v56 = vand.u32 4294901760, %v21936_v26 }
0x1a5c   :  { %33107 = vmatprep.mubr.msk.f32.mxu1 %vm34237_vm1, %v34236_v3  ;;  %33115 = vmatprep.subr.mxu1 %v34236_v3 }
0x1a5d   :  { %33083 = vmatmul.mubr.f32.vlgmr.msra.gmra.mxu0 %v21937_v56  ;;  %33108 = vmatmul.mubr.f32.vlgmr.msra.gmra.mxu1 %v21933_v58 }
0x1a5e   :  { %33091 = vmatpush3.msra.mxu0 %v37548_v39  ;;  %33116 = vmatpush3.xpose.msra.mxu1 %v22445_v54 }
0x1a5f   :  { %33092 = vmatprep.mubr.msk.f32.mxu0 %vm34237_vm1, %v34236_v3  ;;  %33100 = vmatprep.subr.mxu0 %v34236_v3 }
0x1a60   :  { %33117 = vmatprep.mubr.msk.f32.mxu1 %vm34237_vm1, %v34236_v3  ;;  %33125 = vmatprep.subr.mxu1 %v34236_v3 }
0x1a61   :  { %33093 = vmatmul.mubr.f32.vlgmr.msra.gmra.mxu0 %v21934_v7  ;;  %33118 = vmatmul.mubr.f32.vlgmr.msra.gmra.mxu1 %v37577_v27 }
0x1a62   :  { %33101 = vmatpush3.msra.mxu0 %v21976_v43  ;;  %33126 = vmatpush3.xpose.msra.mxu1 %v37555_v12 }
0x1a63   :  { %33102 = vmatprep.mubr.msk.f32.mxu0 %vm34237_vm1, %v34236_v3  ;;  %33110 = vmatprep.subr.mxu0 %v34236_v3 }
0x1a64   :  { %33127 = vmatprep.mubr.msk.f32.mxu1 %vm34237_vm1, %v34236_v3  ;;  %33135 = vmatprep.subr.mxu1 %v34236_v3 }
0x1a65   :  { %33103 = vmatmul.mubr.f32.vlgmr.msra.gmra.mxu0 %v21933_v58  ;;  %33128 = vmatmul.mubr.f32.vlgmr.msra.gmra.mxu1 %v22402_v18 }
0x1a66   :  { %33111 = vmatpush3.xpose.msra.mxu0 %v37555_v12  ;;  %33136 = vmatpush3.xpose.msra.mxu1 %v37555_v12 }
0x1a67   :  { %33112 = vmatprep.mubr.msk.f32.mxu0 %vm34237_vm1, %v34236_v3  ;;  %33120 = vmatprep.subr.mxu0 %v34236_v3 }
0x1a68   :  { %33137 = vmatprep.mubr.msk.f32.mxu1 %vm34237_vm1, %v34236_v3  ;;  %33145 = vmatprep.subr.mxu1 %v34236_v3 }
0x1a69   :  { %33113 = vmatmul.mubr.f32.vlgmr.msra.gmra.mxu0 %v22404_v16  ;;  %33138 = vmatmul.mubr.f32.vlgmr.msra.gmra.mxu1 %v37577_v27 }
0x1a6a   :  { %33121 = vmatpush3.xpose.msra.mxu0 %v37564_v38  ;;  %33146 = vmatpush3.xpose.msra.mxu1 %v22900_v4 }
0x1a6b   :  { %33122 = vmatprep.mubr.msk.f32.mxu0 %vm34237_vm1, %v34236_v3  ;;  %33130 = vmatprep.subr.mxu0 %v34236_v3 }
0x1a6c   :  { %33147 = vmatprep.mubr.msk.f32.mxu1 %vm34237_vm1, %v34236_v3  ;;  %33155 = vmatprep.subr.mxu1 %v34236_v3 }
0x1a6d   :  { %33123 = vmatmul.mubr.f32.vlgmr.msra.gmra.mxu0 %v22401_v40  ;;  %33148 = vmatmul.mubr.f32.vlgmr.msra.gmra.mxu1 %v22855_v60 }
0x1a6e   :  { %33131 = vmatpush3.xpose.msra.mxu0 %v22443_v59  ;;  %33156 = vmatpush3.xpose.msra.mxu1 %v37585_v41 }
0x1a6f   :  { %33132 = vmatprep.mubr.msk.f32.mxu0 %vm34237_vm1, %v34236_v3  ;;  %33140 = vmatprep.subr.mxu0 %v34236_v3 }
0x1a70   :  { %33157 = vmatprep.mubr.msk.f32.mxu1 %vm34237_vm1, %v34236_v3  ;;  %33165 = vmatprep.subr.mxu1 %v34236_v3 }
0x1a71   :  { %33133 = vmatmul.mubr.f32.vlgmr.msra.gmra.mxu0 %v37577_v27  ;;  %33158 = vmatmul.mubr.f32.vlgmr.msra.gmra.mxu1 %v22857_v44 }
0x1a72   :  { %33141 = vmatpush3.xpose.msra.mxu0 %v37585_v41  ;;  %33166 = vmatpush3.xpose.msra.mxu1 %v37585_v41 }
0x1a73   :  { %33142 = vmatprep.mubr.msk.f32.mxu0 %vm34237_vm1, %v34236_v3  ;;  %33150 = vmatprep.subr.mxu0 %v34236_v3 }
0x1a74   :  { %33167 = vmatprep.mubr.msk.f32.mxu1 %vm34237_vm1, %v34236_v3  ;;  %33175 = vmatprep.subr.mxu1 %v34236_v3 }
0x1a75   :  { %33143 = vmatmul.mubr.f32.vlgmr.msra.gmra.mxu0 %v22859_v21  ;;  %33168 = vmatmul.mubr.f32.vlgmr.msra.gmra.mxu1 %v22855_v60 }
0x1a76   :  { %33151 = vmatpush3.xpose.msra.mxu0 %v37595_v13  ;;  %33152 = vmatprep.mubr.msk.f32.mxu0 %vm34237_vm1, %v34236_v3 }
0x1a77   :  { %33160 = vmatprep.subr.mxu0 %v34236_v3  ;;  %33177 = vmatprep.mubr.msk.f32.mxu1 %vm34237_vm1, %v34236_v3 }
0x1a79   :  { %33153 = vmatmul.mubr.f32.vlgmr.msra.gmra.mxu0 %v22856_v34 }
0x1a7a   :  { %33161 = vmatpush3.xpose.msra.mxu0 %v22898_v52  ;;  %33162 = vmatprep.mubr.msk.f32.mxu0 %vm34237_vm1, %v34236_v3 }
0x1a7b   :  { %33170 = vmatprep.subr.mxu0 %v34236_v3 }
0x1a7d   :  { %33163 = vmatmul.mubr.f32.vlgmr.msra.gmra.mxu0 %v22855_v60 }
0x1a7e   :  { %33172 = vmatprep.mubr.msk.f32.mxu0 %vm34237_vm1, %v34236_v3 }
0x1b09   :  { %v21563_v50 = vpop.f32.mrf.mxu1 }
0x1b0b   :  { %v33059_v33 = vpop.f32.mrf.mxu1 }
0x1b0d   :  { %v21711_v42 = vpop.f32.mrf.mxu1 }
0x1b0f   :  { %v33069_v61 = vpop.f32.mrf.mxu1 }
0x1b11   :  { %v21487_v28 = vpop.f32.mrf.mxu0  ;;  %v21857_v6 = vpop.f32.mrf.mxu1 }
0x1b12   :  { %v21564_v63 = vadd.f32 %v21563_v50, %v21487_v28 }
0x1b13   :  { %v33054_v37 = vpop.f32.mrf.mxu0  ;;  %v33079_v31 = vpop.f32.mrf.mxu1 }
0x1b15   :  { %v21637_v30 = vpop.f32.mrf.mxu0  ;;  %v22015_v32 = vpop.f32.mrf.mxu1 }
0x1b16   :  { %v21638_v35 = vadd.f32 %v21637_v30, %v21564_v63 }
0x1b17   :  { %v33064_v5 = vpop.f32.mrf.mxu0  ;;  %v33089_v10 = vpop.f32.mrf.mxu1 }
0x1b18   :  { %v21712_v39 = vadd.f32 %v21711_v42, %v21638_v35 }
0x1b19   :  { %v21785_v51 = vpop.f32.mrf.mxu0  ;;  %v22163_v23 = vpop.f32.mrf.mxu1 }
0x1b1a   :  { %v21786_v43 = vadd.f32 %v21785_v51, %v21712_v39 }
0x1b1b   :  { %v33074_v48 = vpop.f32.mrf.mxu0  ;;  %v33099_v12 = vpop.f32.mrf.mxu1 }
0x1b1c   :  { %v37665_v55 = vadd.f32 %v21857_v6, %v21786_v43 }
0x1b1d   :  { %v21939_v25 = vpop.f32.mrf.mxu0  ;;  %v22309_v29 = vpop.f32.mrf.mxu1 }
0x1b1e   :  { %v22016_v11 = vadd.f32 %v22015_v32, %v21939_v25 }
0x1b1f   :  { %v33084_v36 = vpop.f32.mrf.mxu0  ;;  %v33109_v38 = vpop.f32.mrf.mxu1 }
0x1b21   :  { %v22089_v15 = vpop.f32.mrf.mxu0  ;;  %v22482_v22 = vpop.f32.mrf.mxu1 }
0x1b22   :  { %v22090_v49 = vadd.f32 %v22089_v15, %v22016_v11 }
0x1b23   :  { %v33094_v57 = vpop.f32.mrf.mxu0  ;;  %v33119_v58 = vpop.f32.mrf.mxu1 }
0x1b24   :  { %v22164_v59 = vadd.f32 %v22163_v23, %v22090_v49 }
0x1b25   :  { %v22237_v2 = vpop.f32.mrf.mxu0  ;;  %v22630_v14 = vpop.f32.mrf.mxu1 }
0x1b26   :  { %v22238_v7 = vadd.f32 %v22237_v2, %v22164_v59  ;;  %v29541_v59 = vld [vmem:[%s39387_s2 + $0x58] sm:$0xff]  ;;  %v29539_v2 = vld [vmem:[%s39387_s2 + $0x48] sm:$0xff] }
0x1b27   :  { %v33104_v27 = vpop.f32.mrf.mxu0  ;;  %v33129_v17 = vpop.f32.mrf.mxu1 }
0x1b28   :  { %v37667_v20 = vadd.f32 %v22309_v29, %v22238_v7 }
0x1b29   :  { %v22406_v41 = vpop.f32.mrf.mxu0  ;;  %v22776_v26 = vpop.f32.mrf.mxu1 }
0x1b2a   :  { %v22483_v54 = vadd.f32 %v22482_v22, %v22406_v41 }
0x1b2b   :  { %v33114_v40 = vpop.f32.mrf.mxu0  ;;  %v33139_v56 = vpop.f32.mrf.mxu1 }
0x1b2d   :  { %v22556_v13 = vpop.f32.mrf.mxu0  ;;  %v22937_v19 = vpop.f32.mrf.mxu1 }
0x1b2e   :  { %v22557_v18 = vadd.f32 %v22556_v13, %v22483_v54 }
0x1b2f   :  { %v33124_v24 = vpop.f32.mrf.mxu0  ;;  %v33149_v52 = vpop.f32.mrf.mxu1 }
0x1b30   :  { %v22631_v53 = vadd.f32 %v22630_v14, %v22557_v18 }
0x1b31   :  { %v22704_v60 = vpop.f32.mrf.mxu0  ;;  %v23085_v9 = vpop.f32.mrf.mxu1 }
0x1b32   :  { %v22705_v16 = vadd.f32 %v22704_v60, %v22631_v53 }
0x1b33   :  { %v33134_v34 = vpop.f32.mrf.mxu0  ;;  %v33159_v4 = vpop.f32.mrf.mxu1 }
0x1b34   :  { %v22777_v44 = vadd.f32 %v22776_v26, %v22705_v16 }
0x1b35   :  { %v22861_v1 = vpop.f32.mrf.mxu0  ;;  %v23231_v21 = vpop.f32.mrf.mxu1 }
0x1b36   :  { %v23235_v50 = vmul.f32 0.35355338, %v22777_v44  ;;  %v22938_v61 = vadd.f32 %v22937_v19, %v22861_v1 }
0x1b37   :  { %v33144_v33 = vpop.f32.mrf.mxu0  ;;  %v33169_v42 = vpop.f32.mrf.mxu1 }
0x1b38   :  { %v23237_v28 = vsel %vm4987_vm5, %v23235_v50, -inf }
0x1b39   :  { %23238 = vmax.xlane.f32.xlu0 %v23237_v28  ;;  %v23011_v6 = vpop.f32.mrf.mxu0 }
0x1b3a   :  { %v23012_v63 = vadd.f32 %v23011_v6, %v22938_v61 }
0x1b3b   :  { %v33154_v37 = vpop.f32.mrf.mxu0 }
0x1b3c   :  { %v23086_v31 = vadd.f32 %v23085_v9, %v23012_v63 }
0x1b3d   :  { %v23159_v30 = vpop.f32.mrf.mxu0 }
0x1b3e   :  { %v23160_v32 = vadd.f32 %v23159_v30, %v23086_v31 }
0x1b3f   :  { %v33164_v35 = vpop.f32.mrf.mxu0 }
0x1b40   :  { %v23232_v5 = vadd.f32 %v23231_v21, %v23160_v32 }
0x1b42   :  { %v23236_v10 = vmul.f32 0.35355338, %v23232_v5 }
0x1b44   :  { %v23240_v39 = vsel %vm4987_vm5, %v23236_v10, -inf }
0x1b45   :  { %23241 = vmax.xlane.f32.xlu0 %v23240_v39 }
0x1b5b   :  { %23259 = vrot.lane.b32.xlu0 %v37526_v45, %s34249_s12 }
0x1b5f   :  { %20465 = vrot.lane.b32.xlu0 %v37519_v62, %s34250_s13 }
0x1bc2   :  { %v23239_v51 = vpop.xlane.xlu0 %23238 }
0x1bc3   :  { %v23243_v23 = vsub.f32 %v23235_v50, %v23239_v51 }
0x1bc5   :  { %v23245_v43 = vmul.f32 1.442695, %v23243_v23 }
0x1bc7   :  { %34192 = vpow2.f32 %v23245_v43 }
0x1bce   :  { %v23242_v48 = vpop.xlane.xlu0 %23241 }
0x1bcf   :  { %v23244_v12 = vsub.f32 %v23236_v10, %v23242_v48 }
0x1bd1   :  { %v23247_v25 = vmul.f32 1.442695, %v23244_v12 }
0x1bd2   :  { %v23260_v29 = vpop.permute.xlu0 %23259 }
0x1bd3   :  { %34194 = vpow2.f32 %v23247_v25  ;;  %v23296_v11 = vand.u32 4294901760, %v23260_v29 }
0x1bd4   :  { %v34193_v36 = vpop.eup %34192 }
0x1bd5   :  { %v37675_v38 = vsub.f32 %v23260_v29, %v23296_v11  ;;  %33171 = vmatpush3.msra.mxu0 %v23296_v11  ;;  %v23249_v15 = vsel %vm4987_vm5, %v34193_v36, 0.0 }
0x1bd6   :  { %23250 = vadd.xlane.f32.xlu1 %v23249_v15  ;;  %v20466_v45 = vpop.permute.xlu0 %20465  ;;  %33180 = vmatprep.subr.mxu0 %v34236_v3 }
0x1bd7   :  { %v23374_v62 = vand.u32 4294901760, %v37675_v38  ;;  %20471 = vst.msk [vmem:[#allocation4] sm:$0xff] %vm8669_vm6, %v20466_v45 }
0x1bd9   :  { %v23375_v22 = vsub.f32 %v37675_v38, %v23374_v62 }
0x1bdb   :  { %v23376_v49 = vand.u32 4294901760, %v23375_v22 }
0x1bdd   :  { %33176 = vmatpush3.msra.mxu1 %v23376_v49 }
0x1bde   :  { %33185 = vmatprep.subr.mxu1 %v34236_v3 }
0x1be0   :  { %v34195_v57 = vpop.eup %34194 }
0x1be1   :  { %v23252_v58 = vsel %vm4987_vm5, %v34195_v57, 0.0 }
0x1be2   :  { %23253 = vadd.xlane.f32.xlu1 %v23252_v58 }
0x1bf3   :  { %23711 = vrot.lane.b32.xlu1 %v37532_v46, %s34249_s12 }
0x1bf7   :  { %22315 = vrot.lane.b32.xlu1 %v37665_v55, %s34251_s14 }
0x1bfb   :  { %24198 = vrot.lane.b32.xlu1 %v29541_v59, %s34252_s16  ;;  %v29540_v59 = vld [vmem:[%s39387_s2 + $0x50] sm:$0xff] }
0x1bff   :  { %24194 = vrot.lane.b32.xlu1 %v29539_v2, %s34252_s16 }
0x1c03   :  { %20467 = vrot.lane.b32.xlu1 %v37521_v0, %s34250_s13 }
0x1c5f   :  { %v23251_v14 = vpop.xlane.xlu1 %23250 }
0x1c60   :  { %34196 = vrcp.f32 %v23251_v14 }
0x1c6b   :  { %v23254_v46 = vpop.xlane.xlu1 %23253 }
0x1c6c   :  { %34198 = vrcp.f32 %v23254_v46 }
0x1c6d   :  { %v34197_v55 = vpop.eup %34196 }
0x1c6e   :  { %v23257_v7 = vmul.f32 %v34197_v55, %v34193_v36 }
0x1c6f   :  { %v23712_v27 = vpop.permute.xlu1 %23711 }
0x1c70   :  { %v23748_v17 = vand.u32 4294901760, %v23712_v27  ;;  %v23263_v41 = vsel %vm4987_vm5, %v23257_v7, 0  ;;  %v29538_v7 = vld [vmem:[%s39387_s2 + $0x40] sm:$0xff] }
0x1c71   :  { %v23331_v26 = vand.u32 4294901760, %v23263_v41 }
0x1c72   :  { %v37701_v40 = vsub.f32 %v23712_v27, %v23748_v17 }
0x1c73   :  { %v22316_v56 = vpop.permute.xlu1 %22315  ;;  %v23332_v54 = vsub.f32 %v23263_v41, %v23331_v26  ;;  %33178 = vmatmul.mubr.f32.vlgmr.msra.gmra.mxu1 %v23331_v26 }
0x1c74   :  { %v23826_v13 = vand.u32 4294901760, %v37701_v40  ;;  %22321 = vst.msk [vmem:[#allocation4] sm:$0xff] %vm10520_vm7, %v22316_v56  ;;  %33186 = vmatpush3.msra.mxu1 %v23296_v11  ;;  %33187 = vmatprep.mubr.msk.f32.mxu1 %vm34237_vm1, %v34236_v3  ;;  %v29545_v56 = vld [vmem:[%s39387_s2 + $0x78] sm:$0xff] }
0x1c75   :  { %33195 = vmatprep.subr.mxu1 %v34236_v3  ;;  %v23333_v0 = vand.u32 4294901760, %v23332_v54 }
0x1c76   :  { %v23827_v19 = vsub.f32 %v37701_v40, %v23826_v13 }
0x1c77   :  { %v24199_v18 = vpop.permute.xlu1 %24198  ;;  %33188 = vmatmul.mubr.f32.vlgmr.msra.gmra.mxu1 %v23333_v0  ;;  %v23334_v24 = vsub.f32 %v23332_v54, %v23333_v0 }
0x1c78   :  { %v23828_v52 = vand.u32 4294901760, %v23827_v19  ;;  %v37711_v53 = vand.u32 4294901760, %v24199_v18  ;;  %33196 = vmatpush3.msra.mxu1 %v23296_v11  ;;  %33197 = vmatprep.mubr.msk.f32.mxu1 %vm34237_vm1, %v34236_v3 }
0x1c79   :  { %v34199_v60 = vpop.eup %34198  ;;  %33205 = vmatprep.subr.mxu1 %v34236_v3  ;;  %v23335_v9 = vand.u32 4294901760, %v23334_v24 }
0x1c7a   :  { %v23258_v16 = vmul.f32 %v34199_v60, %v34195_v57  ;;  %v37717_v34 = vsub.f32 %v24199_v18, %v37711_v53 }
0x1c7b   :  { %v37719_v4 = vpop.permute.xlu1 %24194  ;;  %33173 = vmatmul.mubr.f32.vlgmr.msra.gmra.mxu0 %v23335_v9  ;;  %33198 = vmatmul.mubr.f32.vlgmr.msra.gmra.mxu1 %v23331_v26 }
0x1c7c   :  { %33181 = vmatpush3.msra.mxu0 %v37675_v38  ;;  %33206 = vmatpush3.msra.mxu1 %v23828_v52  ;;  %v23715_v44 = vsel %vm4987_vm5, %v23258_v16, 0  ;;  %v24313_v1 = vand.u32 4294901760, %v37717_v34  ;;  %v37793_v0 = vand.u32 4294901760, %v37719_v4 }
0x1c7d   :  { %33182 = vmatprep.mubr.msk.f32.mxu0 %vm34237_vm1, %v34236_v3  ;;  %33190 = vmatprep.subr.mxu0 %v34236_v3  ;;  %v23783_v21 = vand.u32 4294901760, %v23715_v44 }
0x1c7e   :  { %33207 = vmatprep.mubr.msk.f32.mxu1 %vm34237_vm1, %v34236_v3  ;;  %33215 = vmatprep.subr.mxu1 %v34236_v3  ;;  %v24314_v42 = vsub.f32 %v37717_v34, %v24313_v1  ;;  %v37798_v18 = vsub.f32 %v37719_v4, %v37793_v0 }
0x1c7f   :  { %v20468_v50 = vpop.permute.xlu1 %20467  ;;  %33183 = vmatmul.mubr.f32.vlgmr.msra.gmra.mxu0 %v23332_v54  ;;  %v23784_v33 = vsub.f32 %v23715_v44, %v23783_v21  ;;  %33208 = vmatmul.mubr.f32.vlgmr.msra.gmra.mxu1 %v23783_v21  ;;  %v29544_v54 = vld [vmem:[%s39387_s2 + $0x70] sm:$0xff] }
0x1c80   :  { %20472 = vst.msk [vmem:[#allocation4 + $0x8] sm:$0xff] %vm8669_vm6, %v20468_v50  ;;  %33191 = vmatpush3.msra.mxu0 %v23374_v62  ;;  %33216 = vmatpush3.msra.mxu1 %v23748_v17  ;;  %v24315_v6 = vand.u32 4294901760, %v24314_v42  ;;  %v24327_v60 = vand.u32 4294901760, %v37798_v18 }
0x1c81   :  { %33192 = vmatprep.mubr.msk.f32.mxu0 %vm34237_vm1, %v34236_v3  ;;  %33200 = vmatprep.subr.mxu0 %v34236_v3  ;;  %v23785_v61 = vand.u32 4294901760, %v23784_v33 }
0x1c82   :  { %33217 = vmatprep.mubr.msk.f32.mxu1 %vm34237_vm1, %v34236_v3  ;;  %33225 = vmatprep.subr.mxu1 %v34236_v3  ;;  %v24328_v42 = vsub.f32 %v37798_v18, %v24327_v60 }
0x1c83   :  { %33193 = vmatmul.mubr.f32.vlgmr.msra.gmra.mxu0 %v23331_v26  ;;  %33218 = vmatmul.mubr.f32.vlgmr.msra.gmra.mxu1 %v23785_v61  ;;  %v23786_v28 = vsub.f32 %v23784_v33, %v23785_v61 }
0x1c84   :  { %33201 = vmatpush3.msra.mxu0 %v23748_v17  ;;  %33226 = vmatpush3.msra.mxu1 %v23748_v17 }
0x1c85   :  { %33202 = vmatprep.mubr.msk.f32.mxu0 %vm34237_vm1, %v34236_v3  ;;  %33210 = vmatprep.subr.mxu0 %v34236_v3  ;;  %v23787_v63 = vand.u32 4294901760, %v23786_v28 }
0x1c86   :  { %33227 = vmatprep.mubr.msk.f32.mxu1 %vm34237_vm1, %v34236_v3  ;;  %33241 = vmatprep.subr.mxu1 %v34236_v3 }
0x1c87   :  { %33203 = vmatmul.mubr.f32.vlgmr.msra.gmra.mxu0 %v23787_v63  ;;  %33228 = vmatmul.mubr.f32.vlgmr.msra.gmra.mxu1 %v23783_v21 }
0x1c88   :  { %33211 = vmatpush3.msra.mxu0 %v37701_v40  ;;  %33212 = vmatprep.mubr.msk.f32.mxu0 %vm34237_vm1, %v34236_v3 }
0x1c89   :  { %33220 = vmatprep.subr.mxu0 %v34236_v3  ;;  %33242 = vmatpush3.msra.mxu1 %v24315_v6 }
0x1c8a   :  { %33243 = vmatprep.subr.mxu1 %v34236_v3  ;;  %33249 = vmatprep.mubr.msk.f32.mxu1 %vm34237_vm1, %v34236_v3 }
0x1c8b   :  { %33213 = vmatmul.mubr.f32.vlgmr.msra.gmra.mxu0 %v23784_v33 }
0x1c8c   :  { %33221 = vmatpush3.msra.mxu0 %v23826_v13  ;;  %33222 = vmatprep.mubr.msk.f32.mxu0 %vm34237_vm1, %v34236_v3  ;;  %v29543_v13 = vld [vmem:[%s39387_s2 + $0x68] sm:$0xff] }
0x1c8d   :  { %33230 = vmatprep.subr.mxu0 %v34236_v3 }
0x1c8f   :  { %33223 = vmatmul.mubr.f32.vlgmr.msra.gmra.mxu0 %v23783_v21 }
0x1c90   :  { %33231 = vmatpush3.msra.mxu0 %v37711_v53  ;;  %33238 = vmatprep.mubr.msk.f32.mxu0 %vm34237_vm1, %v34236_v3 }
0x1c91   :  { %33232 = vmatprep.subr.mxu0 %v34236_v3 }
0x1d33   :  { %v23413_v37 = vpop.f32.mrf.mxu1 }
0x1d35   :  { %v33179_v31 = vpop.f32.mrf.mxu1 }
0x1d37   :  { %v23561_v30 = vpop.f32.mrf.mxu1 }
0x1d39   :  { %v33189_v32 = vpop.f32.mrf.mxu1 }
0x1d3b   :  { %v23337_v35 = vpop.f32.mrf.mxu0  ;;  %v23707_v5 = vpop.f32.mrf.mxu1 }
0x1d3c   :  { %v23414_v51 = vadd.f32 %v23413_v37, %v23337_v35  ;;  %v24329_v35 = vand.u32 4294901760, %v24328_v42 }
0x1d3d   :  { %v33174_v10 = vpop.f32.mrf.mxu0  ;;  %v33199_v39 = vpop.f32.mrf.mxu1 }
0x1d3f   :  { %v23487_v23 = vpop.f32.mrf.mxu0  ;;  %v23865_v43 = vpop.f32.mrf.mxu1 }
0x1d40   :  { %v23488_v48 = vadd.f32 %v23487_v23, %v23414_v51 }
0x1d41   :  { %v33184_v12 = vpop.f32.mrf.mxu0  ;;  %v33209_v25 = vpop.f32.mrf.mxu1 }
0x1d42   :  { %v23562_v29 = vadd.f32 %v23561_v30, %v23488_v48 }
0x1d43   :  { %v23635_v11 = vpop.f32.mrf.mxu0  ;;  %v24013_v36 = vpop.f32.mrf.mxu1 }
0x1d44   :  { %v23636_v38 = vadd.f32 %v23635_v11, %v23562_v29 }
0x1d45   :  { %v33194_v15 = vpop.f32.mrf.mxu0  ;;  %v33219_v45 = vpop.f32.mrf.mxu1 }
0x1d46   :  { %v23708_v62 = vadd.f32 %v23707_v5, %v23636_v38 }
0x1d47   :  { %v23789_v22 = vpop.f32.mrf.mxu0  ;;  %v24159_v49 = vpop.f32.mrf.mxu1 }
0x1d48   :  { %24165 = vrot.lane.b32.xlu0 %v23708_v62, %s34253_s19  ;;  %v23866_v2 = vadd.f32 %v23865_v43, %v23789_v22 }
0x1d49   :  { %v33204_v57 = vpop.f32.mrf.mxu0  ;;  %v33229_v58 = vpop.f32.mrf.mxu1 }
0x1d4b   :  { %v23939_v14 = vpop.f32.mrf.mxu0 }
0x1d4c   :  { %v23940_v46 = vadd.f32 %v23939_v14, %v23866_v2  ;;  %24196 = vrot.lane.b32.xlu0 %v29540_v59, %s34252_s16 }
0x1d4d   :  { %v33214_v55 = vpop.f32.mrf.mxu0 }
0x1d4e   :  { %v24014_v27 = vadd.f32 %v24013_v36, %v23940_v46 }
0x1d4f   :  { %v24087_v17 = vpop.f32.mrf.mxu0 }
0x1d50   :  { %v24088_v41 = vadd.f32 %v24087_v17, %v24014_v27  ;;  %24192 = vrot.lane.b32.xlu0 %v29538_v7, %s34252_s16 }
0x1d51   :  { %v33224_v26 = vpop.f32.mrf.mxu0 }
0x1d52   :  { %v24160_v40 = vadd.f32 %v24159_v49, %v24088_v41 }
0x1d54   :  { %22317 = vrot.lane.b32.xlu0 %v37667_v20, %s34251_s14  ;;  %24167 = vrot.lane.b32.xlu1 %v24160_v40, %s34253_s19  ;;  %v29542_v20 = vld [vmem:[%s39387_s2 + $0x60] sm:$0xff] }
0x1d58   :  { %24702 = vrot.lane.b32.xlu0 %v29545_v56, %s34252_s16  ;;  %24700 = vrot.lane.b32.xlu1 %v29544_v54, %s34252_s16 }
0x1d5c   :  { %24698 = vrot.lane.b32.xlu0 %v29543_v13, %s34252_s16  ;;  %24696 = vrot.lane.b32.xlu1 %v29542_v20, %s34252_s16 }
0x1dba   :  { %v24166_v19 = vpop.permute.xlu0 %24165 }
0x1dbb   :  { %24171 = vst.msk [vmem:[#allocation4] sm:$0xff] %vm12371_vm8, %v24166_v19  ;;  %v29547_v19 = vld [vmem:[%s39390_s5 + $0x9] ss:$0 sm:$0xff] }
0x1dbe   :  { %v24197_v24 = vpop.permute.xlu0 %24196 }
0x1dbf   :  { %v37800_v52 = vand.u32 4294901760, %v24197_v24 }
0x1dc1   :  { %v37804_v9 = vsub.f32 %v24197_v24, %v37800_v52  ;;  %33233 = vmatpush3.msra.mxu0 %v37800_v52 }
0x1dc2   :  { %v24193_v16 = vpop.permute.xlu0 %24192  ;;  %33234 = vmatprep.subr.mxu0 %v34236_v3  ;;  %v24182_v44 = vld [vmem:[#allocation4] sm:$0xff] }
0x1dc3   :  { %v24320_v21 = vand.u32 4294901760, %v37804_v9  ;;  %v37809_v50 = vand.u32 4294901760, %v24193_v16  ;;  %33235 = vmatpush3.msra.mxu0 %v37793_v0  ;;  %v24205_v4 = vsel %vm4002_vm3, %v24182_v44, 0 }
0x1dc4   :  { %33236 = vmatprep.subr.mxu0 %v34236_v3  ;;  %v37814_v33 = vand.u32 4294901760, %v24205_v4 }
0x1dc5   :  { %v24321_v61 = vsub.f32 %v37804_v9, %v24320_v21  ;;  %v37823_v28 = vsub.f32 %v24193_v16, %v37809_v50  ;;  %33237 = vmatpush3.msra.mxu0 %v37809_v50 }
0x1dc6   :  { %v22318_v6 = vpop.permute.xlu0 %22317  ;;  %v24168_v63 = vpop.permute.xlu1 %24167  ;;  %33252 = vmatprep.subr.mxu0 %v34236_v3  ;;  %v24277_v37 = vsub.f32 %v24205_v4, %v37814_v33 }
0x1dc7   :  { %v24322_v31 = vand.u32 4294901760, %v24321_v61  ;;  %v24334_v30 = vand.u32 4294901760, %v37823_v28  ;;  %22322 = vst.msk [vmem:[#allocation4 + $0x8] sm:$0xff] %vm10520_vm7, %v22318_v6 }
0x1dc8   :  { %24172 = vst.msk [vmem:[#allocation4 + $0x8] sm:$0xff] %vm12371_vm8, %v24168_v63  ;;  %v24278_v32 = vand.u32 4294901760, %v24277_v37 }
0x1dc9   :  { %v24335_v5 = vsub.f32 %v37823_v28, %v24334_v30  ;;  %33244 = vmatpush3.msra.mxu1 %v24322_v31 }
0x1dca   :  { %33245 = vmatprep.subr.mxu1 %v34236_v3  ;;  %v24279_v10 = vsub.f32 %v24277_v37, %v24278_v32  ;;  %v24703_v51 = vpop.permute.xlu0 %24702  ;;  %v24701_v43 = vpop.permute.xlu1 %24700 }
0x1dcb   :  { %v24336_v39 = vand.u32 4294901760, %v24335_v5  ;;  %33246 = vmatpush3.msra.mxu1 %v24329_v35  ;;  %v37841_v48 = vand.u32 4294901760, %v24703_v51  ;;  %v37847_v25 = vand.u32 4294901760, %v24701_v43 }
0x1dcc   :  { %33247 = vmatprep.subr.mxu1 %v34236_v3  ;;  %v24280_v23 = vand.u32 4294901760, %v24279_v10 }
0x1dcd   :  { %33248 = vmatpush3.msra.mxu1 %v24336_v39  ;;  %v37854_v11 = vsub.f32 %v24703_v51, %v37841_v48  ;;  %v37864_v45 = vsub.f32 %v24701_v43, %v37847_v25 }
0x1dce   :  { %33239 = vmatmul.mubr.f32.vlgmr.msra.gmra.mxu0 %v24280_v23  ;;  %33250 = vmatmul.mubr.f32.vlgmr.msra.gmra.mxu1 %v37814_v33  ;;  %v24699_v12 = vpop.permute.xlu0 %24698  ;;  %v24697_v38 = vpop.permute.xlu1 %24696 }
0x1dcf   :  { %33253 = vmatpush3.msra.mxu0 %v37717_v34  ;;  %33263 = vmatprep.subr.mxu1 %v34236_v3  ;;  %v24183_v29 = vld [vmem:[#allocation4 + $0x8] sm:$0xff]  ;;  %v37856_v36 = vand.u32 4294901760, %v24699_v12  ;;  %v37869_v62 = vand.u32 4294901760, %v24697_v38  ;;  %v24817_v22 = vand.u32 4294901760, %v37854_v11  ;;  %v24824_v58 = vand.u32 4294901760, %v37864_v45 }
0x1dd0   :  { %33254 = vmatprep.subr.mxu0 %v34236_v3  ;;  %33264 = vmatpush3.msra.mxu1 %v37711_v53  ;;  %v24709_v15 = vsel %vm4002_vm3, %v24183_v29, 0 }
0x1dd1   :  { %33255 = vmatpush3.msra.mxu0 %v37804_v9  ;;  %33265 = vmatprep.subr.mxu1 %v34236_v3  ;;  %v37874_v49 = vsub.f32 %v24699_v12, %v37856_v36  ;;  %v37876_v57 = vand.u32 4294901760, %v24709_v15  ;;  %v37888_v59 = vsub.f32 %v24697_v38, %v37869_v62  ;;  %v24818_v34 = vsub.f32 %v37854_v11, %v24817_v22 }
0x1dd2   :  { %33256 = vmatprep.subr.mxu0 %v34236_v3  ;;  %33266 = vmatpush3.msra.mxu1 %v37800_v52  ;;  %v24825_v2 = vsub.f32 %v37864_v45, %v24824_v58 }
0x1dd3   :  { %33257 = vmatpush3.msra.mxu0 %v37798_v18  ;;  %33267 = vmatprep.subr.mxu1 %v34236_v3  ;;  %v24838_v14 = vand.u32 4294901760, %v37888_v59  ;;  %v24819_v46 = vand.u32 4294901760, %v24818_v34 }
0x1dd4   :  { %33258 = vmatprep.subr.mxu0 %v34236_v3  ;;  %33268 = vmatpush3.msra.mxu1 %v37793_v0  ;;  %v24826_v27 = vand.u32 4294901760, %v24825_v2  ;;  %v29554_v2 = vld [vmem:[%s39388_s3 + $0x50] sm:$0xff] }
0x1dd5   :  { %33259 = vmatpush3.msra.mxu0 %v37823_v28  ;;  %33260 = vmatprep.mubr.msk.f32.mxu0 %vm34237_vm1, %v34236_v3  ;;  %v24839_v17 = vsub.f32 %v37888_v59, %v24838_v14 }
0x1dd6   :  { %33269 = vmatprep.subr.mxu1 %v34236_v3  ;;  %33261 = vmatmul.mubr.f32.vlgmr.msra.gmra.mxu0 %v24277_v37 }
0x1dd7   :  { %33270 = vmatpush3.msra.mxu1 %v37809_v50  ;;  %33271 = vmatprep.mubr.msk.f32.mxu1 %vm34237_vm1, %v34236_v3  ;;  %v24840_v40 = vand.u32 4294901760, %v24839_v17 }
0x1dd8   :  { %33274 = vmatprep.subr.mxu0 %v34236_v3  ;;  %33272 = vmatmul.mubr.f32.vlgmr.msra.gmra.mxu1 %v24278_v32 }
0x1dd9   :  { %33275 = vmatpush3.msra.mxu0 %v24313_v1  ;;  %33285 = vmatprep.subr.mxu1 %v34236_v3  ;;  %v24831_v1 = vand.u32 4294901760, %v37874_v49 }
0x1dda   :  { %33276 = vmatprep.subr.mxu0 %v34236_v3  ;;  %33286 = vmatpush3.msra.mxu1 %v37711_v53  ;;  %v37897_v53 = vsub.f32 %v24709_v15, %v37876_v57 }
0x1ddb   :  { %33277 = vmatpush3.msra.mxu0 %v24320_v21  ;;  %33287 = vmatprep.subr.mxu1 %v34236_v3  ;;  %v24832_v55 = vsub.f32 %v37874_v49, %v24831_v1 }
0x1ddc   :  { %33278 = vmatprep.subr.mxu0 %v34236_v3  ;;  %33288 = vmatpush3.msra.mxu1 %v37800_v52  ;;  %v24782_v7 = vand.u32 4294901760, %v37897_v53 }
0x1ddd   :  { %33279 = vmatpush3.msra.mxu0 %v24327_v60  ;;  %33289 = vmatprep.subr.mxu1 %v34236_v3  ;;  %v24833_v41 = vand.u32 4294901760, %v24832_v55  ;;  %v29553_v55 = vld [vmem:[%s39388_s3 + $0x48] sm:$0xff] }
0x1dde   :  { %33280 = vmatprep.subr.mxu0 %v34236_v3  ;;  %33290 = vmatpush3.msra.mxu1 %v37793_v0  ;;  %v24783_v26 = vsub.f32 %v37897_v53, %v24782_v7 }
0x1ddf   :  { %33281 = vmatpush3.msra.mxu0 %v24334_v30  ;;  %33282 = vmatprep.mubr.msk.f32.mxu0 %vm34237_vm1, %v34236_v3 }
0x1de0   :  { %33291 = vmatprep.subr.mxu1 %v34236_v3  ;;  %33283 = vmatmul.mubr.f32.vlgmr.msra.gmra.mxu0 %v37814_v33  ;;  %v24784_v56 = vand.u32 4294901760, %v24783_v26 }
0x1de1   :  { %33292 = vmatpush3.msra.mxu1 %v37809_v50  ;;  %33293 = vmatprep.mubr.msk.f32.mxu1 %vm34237_vm1, %v34236_v3 }
0x1de2   :  { %33296 = vmatprep.subr.mxu0 %v34236_v3  ;;  %33294 = vmatmul.mubr.f32.vlgmr.msra.gmra.mxu1 %v37814_v33 }
0x1de3   :  { %33297 = vmatpush3.msra.mxu0 %v37841_v48  ;;  %33307 = vmatprep.subr.mxu1 %v34236_v3 }
0x1de4   :  { %33298 = vmatprep.subr.mxu0 %v34236_v3  ;;  %33308 = vmatpush3.msra.mxu1 %v24819_v46  ;;  %v38019_v46 = vand.u32 4294901760, %v29554_v2 }
0x1de5   :  { %33299 = vmatpush3.msra.mxu0 %v37847_v25  ;;  %33309 = vmatprep.subr.mxu1 %v34236_v3 }
0x1de6   :  { %33300 = vmatprep.subr.mxu0 %v34236_v3  ;;  %33310 = vmatpush3.msra.mxu1 %v24826_v27  ;;  %v38026_v27 = vand.u32 4294901760, %v29553_v55 }
0x1de7   :  { %33301 = vmatpush3.msra.mxu0 %v37856_v36  ;;  %33311 = vmatprep.subr.mxu1 %v34236_v3 }
0x1de8   :  { %33302 = vmatprep.subr.mxu0 %v34236_v3  ;;  %33312 = vmatpush3.msra.mxu1 %v24833_v41  ;;  %v38031_v41 = vsub.f32 %v29554_v2, %v38019_v46  ;;  %v38035_v26 = vsub.f32 %v29553_v55, %v38026_v27 }
0x1de9   :  { %33303 = vmatpush3.msra.mxu0 %v37869_v62  ;;  %33304 = vmatprep.mubr.msk.f32.mxu0 %vm34237_vm1, %v34236_v3 }
0x1dea   :  { %33313 = vmatprep.subr.mxu1 %v34236_v3  ;;  %33305 = vmatmul.mubr.f32.vlgmr.msra.gmra.mxu0 %v24784_v56 }
0x1deb   :  { %33314 = vmatpush3.msra.mxu1 %v24840_v40  ;;  %33315 = vmatprep.mubr.msk.f32.mxu1 %vm34237_vm1, %v34236_v3  ;;  %v29552_v40 = vld [vmem:[%s39388_s3 + $0x40] sm:$0xff] }
0x1dec   :  { %33318 = vmatprep.subr.mxu0 %v34236_v3  ;;  %33316 = vmatmul.mubr.f32.vlgmr.msra.gmra.mxu1 %v37876_v57 }
0x1ded   :  { %33319 = vmatpush3.msra.mxu0 %v37854_v11  ;;  %33329 = vmatprep.subr.mxu1 %v34236_v3 }
0x1dee   :  { %33320 = vmatprep.subr.mxu0 %v34236_v3  ;;  %33330 = vmatpush3.msra.mxu1 %v37841_v48 }
0x1def   :  { %33321 = vmatpush3.msra.mxu0 %v37864_v45  ;;  %33331 = vmatprep.subr.mxu1 %v34236_v3 }
0x1df0   :  { %33322 = vmatprep.subr.mxu0 %v34236_v3  ;;  %33332 = vmatpush3.msra.mxu1 %v37847_v25 }
0x1df1   :  { %33323 = vmatpush3.msra.mxu0 %v37874_v49  ;;  %33333 = vmatprep.subr.mxu1 %v34236_v3 }
0x1df2   :  { %33324 = vmatprep.subr.mxu0 %v34236_v3  ;;  %33334 = vmatpush3.msra.mxu1 %v37856_v36 }
0x1df3   :  { %33325 = vmatpush3.msra.mxu0 %v37888_v59  ;;  %33326 = vmatprep.mubr.msk.f32.mxu0 %vm34237_vm1, %v34236_v3 }
0x1df4   :  { %33335 = vmatprep.subr.mxu1 %v34236_v3  ;;  %33327 = vmatmul.mubr.f32.vlgmr.msra.gmra.mxu0 %v37897_v53 }
0x1df5   :  { %33336 = vmatpush3.msra.mxu1 %v37869_v62  ;;  %33337 = vmatprep.mubr.msk.f32.mxu1 %vm34237_vm1, %v34236_v3 }
0x1df6   :  { %33340 = vmatprep.subr.mxu0 %v34236_v3  ;;  %33338 = vmatmul.mubr.f32.vlgmr.msra.gmra.mxu1 %v24782_v7 }
0x1df7   :  { %33341 = vmatpush3.msra.mxu0 %v24817_v22  ;;  %33351 = vmatprep.subr.mxu1 %v34236_v3 }
0x1df8   :  { %33342 = vmatprep.subr.mxu0 %v34236_v3  ;;  %33352 = vmatpush3.msra.mxu1 %v37841_v48 }
0x1df9   :  { %33343 = vmatpush3.msra.mxu0 %v24824_v58  ;;  %33353 = vmatprep.subr.mxu1 %v34236_v3 }
0x1dfa   :  { %33344 = vmatprep.subr.mxu0 %v34236_v3  ;;  %33354 = vmatpush3.msra.mxu1 %v37847_v25 }
0x1dfb   :  { %33345 = vmatpush3.msra.mxu0 %v24831_v1  ;;  %33355 = vmatprep.subr.mxu1 %v34236_v3  ;;  %v29555_v1 = vld [vmem:[%s39388_s3 + $0x58] sm:$0xff] }
0x1dfc   :  { %33346 = vmatprep.subr.mxu0 %v34236_v3  ;;  %33356 = vmatpush3.msra.mxu1 %v37856_v36  ;;  %v38009_v53 = vand.u32 4294901760, %v29555_v1 }
0x1dfd   :  { %33347 = vmatpush3.msra.mxu0 %v24838_v14  ;;  %33348 = vmatprep.mubr.msk.f32.mxu0 %vm34237_vm1, %v34236_v3 }
0x1dfe   :  { %33357 = vmatprep.subr.mxu1 %v34236_v3  ;;  %33349 = vmatmul.mubr.f32.vlgmr.msra.gmra.mxu0 %v37876_v57  ;;  %v38017_v14 = vsub.f32 %v29555_v1, %v38009_v53 }
0x1dff   :  { %33358 = vmatpush3.msra.mxu1 %v37869_v62  ;;  %33359 = vmatprep.mubr.msk.f32.mxu1 %vm34237_vm1, %v34236_v3 }
0x1e00   :  { %33360 = vmatmul.mubr.f32.vlgmr.msra.gmra.mxu1 %v37876_v57  ;;  %33373 = vmatprep.subr.mxu1 %v34236_v3  ;;  %v25361_v17 = vand.u32 4294901760, %v38017_v14 }
0x1e01   :  { %33362 = vmatprep.subr.mxu0 %v34236_v3  ;;  %33381 = vmatprep.mubr.msk.f32.mxu1 %vm34237_vm1, %v34236_v3 }
0x1e02   :  { %33370 = vmatprep.mubr.msk.f32.mxu0 %vm34237_vm1, %v34236_v3  ;;  %33363 = vmatpush3.msra.mxu0 %v38009_v53  ;;  %v25362_v56 = vsub.f32 %v38017_v14, %v25361_v17 }
0x1e03   :  { %33364 = vmatprep.subr.mxu0 %v34236_v3 }
0x1e04   :  { %33365 = vmatpush3.msra.mxu0 %v38019_v46 }
0x1e05   :  { %33366 = vmatprep.subr.mxu0 %v34236_v3 }
0x1e06   :  { %33367 = vmatpush3.msra.mxu0 %v38026_v27 }
0x1e07   :  { %33368 = vmatprep.subr.mxu0 %v34236_v3 }
0x1e8e   :  { %v24282_v54 = vpop.f32.mrf.mxu0  ;;  %v24373_v13 = vpop.f32.mrf.mxu1 }
0x1e8f   :  { %v24283_v18 = vadd.f32 %v29547_v19, %v24282_v54  ;;  %v25368_v54 = vand.u32 4294901760, %v38031_v41 }
0x1e90   :  { %v33240_v20 = vpop.f32.mrf.mxu0  ;;  %v33251_v0 = vpop.f32.mrf.mxu1 }
0x1e91   :  { %v24374_v9 = vadd.f32 %v24373_v13, %v24283_v18  ;;  %v38045_v13 = vand.u32 4294901760, %v29552_v40  ;;  %v25375_v20 = vand.u32 4294901760, %v38035_v26  ;;  %v25363_v0 = vand.u32 4294901760, %v25362_v56 }
0x1e93   :  { %v38054_v18 = vsub.f32 %v29552_v40, %v38045_v13  ;;  %33369 = vmatpush3.msra.mxu0 %v38045_v13  ;;  %33374 = vmatpush3.msra.mxu1 %v25363_v0  ;;  %v29576_v0 = vld [vmem:[%s39389_s4 + $0x170] sm:$0xff] }
0x1e94   :  { %33384 = vmatprep.subr.mxu0 %v34236_v3  ;;  %33375 = vmatprep.subr.mxu1 %v34236_v3 }
0x1e96   :  { %v24453_v24 = vpop.f32.mrf.mxu0 }
0x1e97   :  { %v24454_v44 = vadd.f32 %v24453_v24, %v24374_v9  ;;  %v25376_v24 = vsub.f32 %v38035_v26, %v25375_v20 }
0x1e98   :  { %v24530_v52 = vpop.f32.mrf.mxu1  ;;  %v33262_v60 = vpop.f32.mrf.mxu0 }
0x1e99   :  { %v24531_v21 = vadd.f32 %v24530_v52, %v24454_v44  ;;  %v25382_v60 = vand.u32 4294901760, %v38054_v18  ;;  %v25377_v9 = vand.u32 4294901760, %v25376_v24  ;;  %v29575_v24 = vld [vmem:[%s39389_s4 + $0x168] sm:$0xff] }
0x1e9a   :  { %v33273_v16 = vpop.f32.mrf.mxu1 }
0x1e9b   :  { %v25383_v16 = vsub.f32 %v38054_v18, %v25382_v60 }
0x1e9d   :  { %v25384_v44 = vand.u32 4294901760, %v25383_v16  ;;  %v38279_v16 = vand.u32 4294901760, %v29575_v24 }
0x1ea0   :  { %v24613_v50 = vpop.f32.mrf.mxu0 }
0x1ea1   :  { %v24614_v4 = vadd.f32 %v24613_v50, %v24531_v21 }
0x1ea2   :  { %v24688_v33 = vpop.f32.mrf.mxu1  ;;  %v33284_v42 = vpop.f32.mrf.mxu0 }
0x1ea3   :  { %v24689_v61 = vadd.f32 %v24688_v33, %v24614_v4  ;;  %v38072_v42 = vld [vmem:[%s39390_s5 + $0xc] ss:$0 sm:$0xff] }
0x1ea4   :  { %v33295_v28 = vpop.f32.mrf.mxu1 }
0x1ea5   :  { %v25198_v6 = vadd.f32 %v24689_v61, %v37029_v47  ;;  %v38077_v28 = vld [vmem:[%s39390_s5 + $0xd] ss:$0 sm:$0xff] }
0x1ea7   :  { %v25200_v63 = vsel %vm4002_vm3, %v25198_v6, 0.0 }
0x1ea8   :  { %25201 = vadd.xlane.f32.xlu0 %v25200_v63 }
0x1eaa   :  { %v24786_v37 = vpop.f32.mrf.mxu0 }
0x1eab   :  { %v24787_v35 = vadd.f32 %v29547_v19, %v24786_v37  ;;  %v25369_v19 = vsub.f32 %v38031_v41, %v25368_v54 }
0x1eac   :  { %v24877_v31 = vpop.f32.mrf.mxu1  ;;  %v33306_v30 = vpop.f32.mrf.mxu0 }
0x1ead   :  { %v24878_v51 = vadd.f32 %v24877_v31, %v24787_v35  ;;  %v25370_v52 = vand.u32 4294901760, %v25369_v19  ;;  %v29559_v31 = vld [vmem:[%s39388_s3 + $0x78] sm:$0xff] }
0x1eae   :  { %v33317_v32 = vpop.f32.mrf.mxu1 }
0x1eaf   :  { %33376 = vmatpush3.msra.mxu1 %v25370_v52  ;;  %v29558_v32 = vld [vmem:[%s39388_s3 + $0x70] sm:$0xff]  ;;  %v29574_v52 = vld [vmem:[%s39389_s4 + $0x160] sm:$0xff] }
0x1eb0   :  { %33377 = vmatprep.subr.mxu1 %v34236_v3 }
0x1eb1   :  { %33378 = vmatpush3.msra.mxu1 %v25377_v9 }
0x1eb2   :  { %33379 = vmatprep.subr.mxu1 %v34236_v3 }
0x1eb3   :  { %33380 = vmatpush3.msra.mxu1 %v25384_v44  ;;  %v38281_v44 = vand.u32 4294901760, %v29574_v52 }
0x1eb4   :  { %v24957_v5 = vpop.f32.mrf.mxu0  ;;  %33395 = vmatprep.subr.mxu1 %v34236_v3 }
0x1eb5   :  { %v24958_v43 = vadd.f32 %v24957_v5, %v24878_v51  ;;  %v38095_v5 = vand.u32 4294901760, %v29559_v31 }
0x1eb6   :  { %v25034_v10 = vpop.f32.mrf.mxu1  ;;  %v33328_v39 = vpop.f32.mrf.mxu0 }
0x1eb7   :  { %v25035_v48 = vadd.f32 %v25034_v10, %v24958_v43  ;;  %v29557_v10 = vld [vmem:[%s39388_s3 + $0x68] sm:$0xff] }
0x1eb8   :  { %v33339_v23 = vpop.f32.mrf.mxu1 }
0x1eb9   :  { %v38104_v23 = vand.u32 4294901760, %v29558_v32 }
0x1ebe   :  { %v25117_v12 = vpop.f32.mrf.mxu0 }
0x1ebf   :  { %v25118_v25 = vadd.f32 %v25117_v12, %v25035_v48  ;;  %v29556_v48 = vld [vmem:[%s39388_s3 + $0x60] sm:$0xff] }
0x1ec0   :  { %v25192_v29 = vpop.f32.mrf.mxu1  ;;  %v33350_v11 = vpop.f32.mrf.mxu0 }
0x1ec1   :  { %v25193_v47 = vadd.f32 %v25192_v29, %v25118_v25  ;;  %v38112_v25 = vsub.f32 %v29559_v31, %v38095_v5  ;;  %v38114_v29 = vand.u32 4294901760, %v29557_v10 }
0x1ec2   :  { %v33361_v36 = vpop.f32.mrf.mxu1 }
0x1ec3   :  { %v25199_v38 = vadd.f32 %v25193_v47, %v37150_v8  ;;  %v38119_v36 = vsub.f32 %v29558_v32, %v38104_v23 }
0x1ec5   :  { %v25203_v15 = vsel %vm4002_vm3, %v25199_v38, 0.0 }
0x1ec6   :  { %25204 = vadd.xlane.f32.xlu0 %v25203_v15  ;;  %v25849_v15 = vand.u32 4294901760, %v38112_v25 }
0x1f31   :  { %v25202_v45 = vpop.xlane.xlu0 %25201 }
0x1f32   :  { %v25206_v62 = vmul.f32 0.03125, %v25202_v45  ;;  %v38127_v45 = vsub.f32 %v29557_v10, %v38114_v29 }
0x1f34   :  { %v25208_v22 = vsub.f32 %v25198_v6, %v25206_v62  ;;  %v25856_v62 = vand.u32 4294901760, %v38119_v36 }
0x1f36   :  { %v25210_v49 = vmul.f32 %v25208_v22, %v25208_v22 }
0x1f38   :  { %v25212_v57 = vsel %vm4002_vm3, %v25210_v49, 0.0  ;;  %v25850_v49 = vsub.f32 %v38112_v25, %v25849_v15 }
0x1f39   :  { %25213 = vadd.xlane.f32.xlu1 %v25212_v57  ;;  %v25863_v57 = vand.u32 4294901760, %v38127_v45 }
0x1f3a   :  { %v25851_v1 = vand.u32 4294901760, %v25850_v49 }
0x1f4f   :  { %v25205_v58 = vpop.xlane.xlu0 %25204 }
0x1f50   :  { %v25207_v59 = vmul.f32 0.03125, %v25205_v58  ;;  %v25857_v58 = vsub.f32 %v38119_v36, %v25856_v62 }
0x1f52   :  { %v38004_v34 = vsub.f32 %v25199_v38, %v25207_v59  ;;  %v38121_v38 = vand.u32 4294901760, %v29556_v48 }
0x1f54   :  { %v25211_v8 = vmul.f32 %v38004_v34, %v38004_v34 }
0x1f56   :  { %v25215_v7 = vsel %vm4002_vm3, %v25211_v8, 0.0  ;;  %v25858_v8 = vand.u32 4294901760, %v25857_v58 }
0x1f57   :  { %25216 = vadd.xlane.f32.xlu0 %v25215_v7 }
0x1fc2   :  { %v25214_v21 = vpop.xlane.xlu1 %25213 }
0x1fc3   :  { %v25218_v50 = vmul.f32 0.03125, %v25214_v21 }
0x1fc5   :  { %v25220_v4 = vadd.f32 1e-05, %v25218_v50 }
0x1fc7   :  { %34200 = vrsqrt.f32 %v25220_v4  ;;  %v38290_v4 = vsub.f32 %v29575_v24, %v38279_v16 }
0x1fd4   :  { %v34201_v33 = vpop.eup %34200 }
0x1fd5   :  { %v25224_v61 = vmul.f32 %v34201_v33, %v25208_v22  ;;  %v38134_v22 = vsub.f32 %v29556_v48, %v38121_v38  ;;  %v38293_v33 = vsub.f32 %v29574_v52, %v38281_v44 }
0x1fd7   :  { %v25230_v6 = vmul.f32 %v38072_v42, %v25224_v61  ;;  %v25870_v59 = vand.u32 4294901760, %v38134_v22 }
0x1fd9   :  { %v38081_v63 = vadd.f32 %v38077_v28, %v25230_v6  ;;  %v25871_v2 = vsub.f32 %v38134_v22, %v25870_v59  ;;  %v26376_v6 = vand.u32 4294901760, %v38290_v4 }
0x1fdb   :  { %v25253_v37 = vsel %vm4002_vm3, %v38081_v63, 0 }
0x1fdc   :  { %v38088_v30 = vand.u32 4294901760, %v25253_v37 }
0x1fde   :  { %v25325_v35 = vsub.f32 %v25253_v37, %v38088_v30  ;;  %33382 = vmatmul.mubr.f32.vlgmr.msra.gmra.mxu1 %v38088_v30  ;;  %v26383_v37 = vand.u32 4294901760, %v38293_v33 }
0x1fdf   :  { %33396 = vmatpush3.msra.mxu1 %v38009_v53  ;;  %33403 = vmatprep.mubr.msk.f32.mxu1 %vm34237_vm1, %v34236_v3 }
0x1fe0   :  { %v25217_v39 = vpop.xlane.xlu0 %25216  ;;  %33397 = vmatprep.subr.mxu1 %v34236_v3  ;;  %v25326_v51 = vand.u32 4294901760, %v25325_v35 }
0x1fe1   :  { %v25219_v43 = vmul.f32 0.03125, %v25217_v39  ;;  %33398 = vmatpush3.msra.mxu1 %v38019_v46 }
0x1fe2   :  { %33399 = vmatprep.subr.mxu1 %v34236_v3  ;;  %v25327_v12 = vsub.f32 %v25325_v35, %v25326_v51 }
0x1fe3   :  { %v25221_v11 = vadd.f32 1e-05, %v25219_v43  ;;  %33400 = vmatpush3.msra.mxu1 %v38026_v27 }
0x1fe4   :  { %33401 = vmatprep.subr.mxu1 %v34236_v3  ;;  %v25328_v47 = vand.u32 4294901760, %v25327_v12 }
0x1fe5   :  { %34202 = vrsqrt.f32 %v25221_v11  ;;  %33402 = vmatpush3.msra.mxu1 %v38045_v13 }
0x1fe6   :  { %33404 = vmatmul.mubr.f32.vlgmr.msra.gmra.mxu1 %v25326_v51  ;;  %33417 = vmatprep.subr.mxu1 %v34236_v3  ;;  %v29571_v51 = vld [vmem:[%s39389_s4 + $0x148] sm:$0xff] }
0x1fe7   :  { %33371 = vmatmul.mubr.f32.vlgmr.msra.gmra.mxu0 %v25328_v47  ;;  %33418 = vmatpush3.msra.mxu1 %v38009_v53  ;;  %v25864_v53 = vsub.f32 %v38127_v45, %v25863_v57  ;;  %v38331_v12 = vand.u32 4294901760, %v29571_v51 }
0x1fe8   :  { %33385 = vmatpush3.msra.mxu0 %v38017_v14  ;;  %33419 = vmatprep.subr.mxu1 %v34236_v3 }
0x1fe9   :  { %33386 = vmatprep.subr.mxu0 %v34236_v3  ;;  %33420 = vmatpush3.msra.mxu1 %v38019_v46  ;;  %v25865_v55 = vand.u32 4294901760, %v25864_v53 }
0x1fea   :  { %33387 = vmatpush3.msra.mxu0 %v38031_v41  ;;  %33421 = vmatprep.subr.mxu1 %v34236_v3 }
0x1feb   :  { %33388 = vmatprep.subr.mxu0 %v34236_v3  ;;  %33422 = vmatpush3.msra.mxu1 %v38026_v27  ;;  %v25872_v27 = vand.u32 4294901760, %v25871_v2 }
0x1fec   :  { %33389 = vmatpush3.msra.mxu0 %v38035_v26  ;;  %33423 = vmatprep.subr.mxu1 %v34236_v3 }
0x1fed   :  { %33390 = vmatprep.subr.mxu0 %v34236_v3  ;;  %33392 = vmatprep.mubr.msk.f32.mxu0 %vm34237_vm1, %v34236_v3 }
0x1fee   :  { %33391 = vmatpush3.msra.mxu0 %v38054_v18  ;;  %33424 = vmatpush3.msra.mxu1 %v38045_v13  ;;  %v29577_v13 = vld [vmem:[%s39389_s4 + $0x178] sm:$0xff]  ;;  %v38265_v18 = vand.u32 4294901760, %v29576_v0 }
0x1fef   :  { %33425 = vmatprep.mubr.msk.f32.mxu1 %vm34237_vm1, %v34236_v3  ;;  %33393 = vmatmul.mubr.f32.vlgmr.msra.gmra.mxu0 %v25325_v35  ;;  %v26377_v35 = vsub.f32 %v38290_v4, %v26376_v6 }
0x1ff0   :  { %33406 = vmatprep.subr.mxu0 %v34236_v3  ;;  %33426 = vmatmul.mubr.f32.vlgmr.msra.gmra.mxu1 %v38088_v30  ;;  %v38277_v9 = vsub.f32 %v29576_v0, %v38265_v18  ;;  %v29565_v0 = vld [vmem:[%s39389_s4 + $0x118] sm:$0xff] }
0x1ff1   :  { %33439 = vmatprep.subr.mxu1 %v34236_v3  ;;  %33407 = vmatpush3.msra.mxu0 %v25361_v17 }
0x1ff2   :  { %v34203_v46 = vpop.eup %34202  ;;  %33440 = vmatpush3.msra.mxu1 %v25851_v1  ;;  %33408 = vmatprep.subr.mxu0 %v34236_v3  ;;  %v26369_v50 = vand.u32 4294901760, %v38277_v9 }
0x1ff3   :  { %v25225_v7 = vmul.f32 %v34203_v46, %v38004_v34  ;;  %33441 = vmatprep.subr.mxu1 %v34236_v3  ;;  %33409 = vmatpush3.msra.mxu0 %v25368_v54 }
0x1ff4   :  { %33442 = vmatpush3.msra.mxu1 %v25858_v8  ;;  %33410 = vmatprep.subr.mxu0 %v34236_v3 }
0x1ff5   :  { %33443 = vmatprep.subr.mxu1 %v34236_v3  ;;  %33411 = vmatpush3.msra.mxu0 %v25375_v20  ;;  %v25231_v14 = vmul.f32 %v38072_v42, %v25225_v7  ;;  %v38257_v20 = vand.u32 4294901760, %v29577_v13  ;;  %v29573_v42 = vld [vmem:[%s39389_s4 + $0x158] sm:$0xff] }
0x1ff6   :  { %33444 = vmatpush3.msra.mxu1 %v25865_v55  ;;  %33412 = vmatprep.subr.mxu0 %v34236_v3  ;;  %v38306_v31 = vand.u32 4294901760, %v29573_v42  ;;  %v29567_v55 = vld [vmem:[%s39389_s4 + $0x128] sm:$0xff] }
0x1ff7   :  { %33445 = vmatprep.subr.mxu1 %v34236_v3  ;;  %33413 = vmatpush3.msra.mxu0 %v25382_v60  ;;  %v38185_v34 = vadd.f32 %v38077_v28, %v25231_v14  ;;  %v38263_v19 = vsub.f32 %v29577_v13, %v38257_v20  ;;  %v26370_v28 = vsub.f32 %v38277_v9, %v26369_v50 }
0x1ff8   :  { %33414 = vmatprep.mubr.msk.f32.mxu0 %vm34237_vm1, %v34236_v3  ;;  %33446 = vmatpush3.msra.mxu1 %v25872_v27  ;;  %v38322_v39 = vsub.f32 %v29573_v42, %v38306_v31 }
0x1ff9   :  { %33415 = vmatmul.mubr.f32.vlgmr.msra.gmra.mxu0 %v38088_v30  ;;  %33428 = vmatprep.subr.mxu0 %v34236_v3  ;;  %v25741_v17 = vsel %vm4002_vm3, %v38185_v34, 0  ;;  %v26362_v60 = vand.u32 4294901760, %v38263_v19  ;;  %v29572_v30 = vld [vmem:[%s39389_s4 + $0x150] sm:$0xff]  ;;  %v26371_v32 = vand.u32 4294901760, %v26370_v28 }
0x1ffa   :  { %33447 = vmatprep.mubr.msk.f32.mxu1 %vm34237_vm1, %v34236_v3  ;;  %33461 = vmatprep.subr.mxu1 %v34236_v3  ;;  %v25812_v41 = vand.u32 4294901760, %v25741_v17  ;;  %v38318_v10 = vand.u32 4294901760, %v29572_v30  ;;  %v29564_v28 = vld [vmem:[%s39389_s4 + $0x110] sm:$0xff] }
0x1ffb   :  { %33429 = vmatpush3.msra.mxu0 %v38095_v5  ;;  %33436 = vmatprep.mubr.msk.f32.mxu0 %vm34237_vm1, %v34236_v3  ;;  %v26363_v21 = vsub.f32 %v38263_v19, %v26362_v60 }
0x1ffc   :  { %v25813_v26 = vsub.f32 %v25741_v17, %v25812_v41  ;;  %33448 = vmatmul.mubr.f32.vlgmr.msra.gmra.mxu1 %v25812_v41  ;;  %33430 = vmatprep.subr.mxu0 %v34236_v3  ;;  %v38329_v48 = vsub.f32 %v29572_v30, %v38318_v10  ;;  %v38392_v17 = vand.u32 4294901760, %v29567_v55 }
0x1ffd   :  { %33462 = vmatpush3.msra.mxu1 %v38095_v5  ;;  %33431 = vmatpush3.msra.mxu0 %v38104_v23  ;;  %v26364_v61 = vand.u32 4294901760, %v26363_v21 }
0x1ffe   :  { %33463 = vmatprep.subr.mxu1 %v34236_v3  ;;  %33432 = vmatprep.subr.mxu0 %v34236_v3  ;;  %v25814_v40 = vand.u32 4294901760, %v25813_v26  ;;  %v26397_v47 = vand.u32 4294901760, %v38329_v48 }
0x1fff   :  { %33464 = vmatpush3.msra.mxu1 %v38104_v23  ;;  %33433 = vmatpush3.msra.mxu0 %v38114_v29 }
0x2000   :  { %33465 = vmatprep.subr.mxu1 %v34236_v3  ;;  %33434 = vmatprep.subr.mxu0 %v34236_v3  ;;  %v25815_v56 = vsub.f32 %v25813_v26, %v25814_v40 }
0x2001   :  { %33466 = vmatpush3.msra.mxu1 %v38114_v29  ;;  %33435 = vmatpush3.msra.mxu0 %v38121_v38 }
0x2002   :  { %33467 = vmatprep.subr.mxu1 %v34236_v3  ;;  %33469 = vmatprep.mubr.msk.f32.mxu1 %vm34237_vm1, %v34236_v3  ;;  %v25816_v54 = vand.u32 4294901760, %v25815_v56 }
0x2003   :  { %33468 = vmatpush3.msra.mxu1 %v38121_v38  ;;  %33450 = vmatprep.subr.mxu0 %v34236_v3 }
0x2004   :  { %33470 = vmatmul.mubr.f32.vlgmr.msra.gmra.mxu1 %v25814_v40  ;;  %33483 = vmatprep.subr.mxu1 %v34236_v3 }
0x2005   :  { %33437 = vmatmul.mubr.f32.vlgmr.msra.gmra.mxu0 %v25816_v54  ;;  %33484 = vmatpush3.msra.mxu1 %v38095_v5  ;;  %v26384_v5 = vsub.f32 %v38293_v33, %v26383_v37  ;;  %v38405_v54 = vsub.f32 %v29567_v55, %v38392_v17 }
0x2006   :  { %33451 = vmatpush3.msra.mxu0 %v38112_v25  ;;  %33485 = vmatprep.subr.mxu1 %v34236_v3  ;;  %v29570_v25 = vld [vmem:[%s39389_s4 + $0x140] sm:$0xff] }
0x2007   :  { %33452 = vmatprep.subr.mxu0 %v34236_v3  ;;  %33486 = vmatpush3.msra.mxu1 %v38104_v23  ;;  %v26378_v23 = vand.u32 4294901760, %v26377_v35  ;;  %v26385_v43 = vand.u32 4294901760, %v26384_v5  ;;  %v38339_v11 = vand.u32 4294901760, %v29570_v25  ;;  %v39407_v21 = vand.u32 4294901760, %v38405_v54 }
0x2008   :  { %33453 = vmatpush3.msra.mxu0 %v38119_v36  ;;  %33487 = vmatprep.subr.mxu1 %v34236_v3  ;;  %v38344_v36 = vsub.f32 %v29571_v51, %v38331_v12  ;;  %v38434_v5 = vand.u32 4294901760, %v29564_v28 }
0x2009   :  { %33454 = vmatprep.subr.mxu0 %v34236_v3  ;;  %33488 = vmatpush3.msra.mxu1 %v38114_v29  ;;  %v26390_v29 = vand.u32 4294901760, %v38322_v39 }
0x200a   :  { %33455 = vmatpush3.msra.mxu0 %v38127_v45  ;;  %33489 = vmatprep.subr.mxu1 %v34236_v3  ;;  %v29569_v45 = vld [vmem:[%s39389_s4 + $0x138] sm:$0xff] }
0x200b   :  { %33456 = vmatprep.subr.mxu0 %v34236_v3  ;;  %33458 = vmatprep.mubr.msk.f32.mxu0 %vm34237_vm1, %v34236_v3  ;;  %v38362_v49 = vand.u32 4294901760, %v29569_v45 }
0x200c   :  { %33457 = vmatpush3.msra.mxu0 %v38134_v22  ;;  %33490 = vmatpush3.msra.mxu1 %v38121_v38  ;;  %v26391_v38 = vsub.f32 %v38322_v39, %v26390_v29  ;;  %v26404_v22 = vand.u32 4294901760, %v38344_v36 }
0x200d   :  { %33491 = vmatprep.mubr.msk.f32.mxu1 %vm34237_vm1, %v34236_v3  ;;  %33459 = vmatmul.mubr.f32.vlgmr.msra.gmra.mxu0 %v25813_v26  ;;  %v38375_v8 = vsub.f32 %v29569_v45, %v38362_v49  ;;  %v29566_v26 = vld [vmem:[%s39389_s4 + $0x120] sm:$0xff] }
0x200e   :  { %33472 = vmatprep.subr.mxu0 %v34236_v3  ;;  %33492 = vmatmul.mubr.f32.vlgmr.msra.gmra.mxu1 %v25812_v41  ;;  %v26405_v53 = vsub.f32 %v38344_v36, %v26404_v22  ;;  %v38407_v13 = vand.u32 4294901760, %v29566_v26 }
0x200f   :  { %33473 = vmatpush3.msra.mxu0 %v25849_v15  ;;  %33480 = vmatprep.mubr.msk.f32.mxu0 %vm34237_vm1, %v34236_v3  ;;  %v38352_v15 = vsub.f32 %v29570_v25, %v38339_v11  ;;  %v39409_v27 = vand.u32 4294901760, %v38375_v8 }
0x2010   :  { %33474 = vmatprep.subr.mxu0 %v34236_v3  ;;  %33529 = vmatprep.subr.mxu1 %v34236_v3  ;;  %v26406_v7 = vand.u32 4294901760, %v26405_v53  ;;  %v38420_v42 = vsub.f32 %v29566_v26, %v38407_v13 }
0x2011   :  { %33475 = vmatpush3.msra.mxu0 %v25856_v62  ;;  %33561 = vmatprep.mubr.msk.f32.mxu1 %vm34237_vm1, %v34236_v3  ;;  %v26398_v62 = vsub.f32 %v38329_v48, %v26397_v47  ;;  %v26411_v58 = vand.u32 4294901760, %v38352_v15  ;;  %v26419_v40 = vsub.f32 %v38375_v8, %v39409_v27 }
0x2012   :  { %33476 = vmatprep.subr.mxu0 %v34236_v3  ;;  %33530 = vmatpush3.msra.mxu1 %v26364_v61  ;;  %v38423_v61 = vand.u32 4294901760, %v29565_v0  ;;  %v39406_v35 = vand.u32 4294901760, %v38420_v42 }
0x2013   :  { %33477 = vmatpush3.msra.mxu0 %v25863_v57  ;;  %33531 = vmatprep.subr.mxu1 %v34236_v3  ;;  %v26392_v57 = vand.u32 4294901760, %v26391_v38  ;;  %v26399_v1 = vand.u32 4294901760, %v26398_v62  ;;  %v26412_v46 = vsub.f32 %v38352_v15, %v26411_v58  ;;  %v26420_v24 = vand.u32 4294901760, %v26419_v40 }
0x2014   :  { %33478 = vmatprep.subr.mxu0 %v34236_v3  ;;  %33532 = vmatpush3.msra.mxu1 %v26371_v32  ;;  %v26433_v32 = vsub.f32 %v38405_v54, %v39407_v21  ;;  %v38438_v51 = vsub.f32 %v29565_v0, %v38423_v61  ;;  %v26440_v25 = vsub.f32 %v38420_v42, %v39406_v35 }
0x2015   :  { %33479 = vmatpush3.msra.mxu0 %v25870_v59  ;;  %33533 = vmatprep.subr.mxu1 %v34236_v3  ;;  %v29568_v59 = vld [vmem:[%s39389_s4 + $0x130] sm:$0xff]  ;;  %v38449_v38 = vsub.f32 %v29564_v28, %v38434_v5 }
0x2016   :  { %33481 = vmatmul.mubr.f32.vlgmr.msra.gmra.mxu0 %v25812_v41  ;;  %33494 = vmatprep.subr.mxu0 %v34236_v3  ;;  %v38377_v2 = vand.u32 4294901760, %v29568_v59  ;;  %v26413_v41 = vand.u32 4294901760, %v26412_v46  ;;  %v39405_v62 = vand.u32 4294901760, %v38438_v51 }
0x2017   :  { %33526 = vmatprep.mubr.msk.f32.mxu0 %vm34237_vm1, %v34236_v3  ;;  %33495 = vmatpush3.msra.mxu0 %v38257_v20 }
0x2018   :  { %33496 = vmatprep.subr.mxu0 %v34236_v3  ;;  %33534 = vmatpush3.msra.mxu1 %v26378_v23  ;;  %v38390_v14 = vsub.f32 %v29568_v59, %v38377_v2  ;;  %v29563_v23 = vld [vmem:[%s39389_s4 + $0x108] sm:$0xff]  ;;  %v26441_v59 = vand.u32 4294901760, %v26440_v25  ;;  %v26447_v55 = vsub.f32 %v38438_v51, %v39405_v62 }
0x2019   :  { %33497 = vmatpush3.msra.mxu0 %v38265_v18  ;;  %33535 = vmatprep.subr.mxu1 %v34236_v3  ;;  %v38451_v45 = vand.u32 4294901760, %v29563_v23 }
0x201a   :  { %33498 = vmatprep.subr.mxu0 %v34236_v3  ;;  %33536 = vmatpush3.msra.mxu1 %v26385_v43  ;;  %v39408_v56 = vand.u32 4294901760, %v38390_v14  ;;  %v26434_v43 = vand.u32 4294901760, %v26433_v32  ;;  %v26448_v40 = vand.u32 4294901760, %v26447_v55 }
0x201b   :  { %33499 = vmatpush3.msra.mxu0 %v38279_v16  ;;  %33537 = vmatprep.subr.mxu1 %v34236_v3  ;;  %v38462_v53 = vsub.f32 %v29563_v23, %v38451_v45 }
0x201c   :  { %33500 = vmatprep.subr.mxu0 %v34236_v3  ;;  %33538 = vmatpush3.msra.mxu1 %v26392_v57  ;;  %v26426_v52 = vsub.f32 %v38390_v14, %v39408_v56  ;;  %v29562_v57 = vld [vmem:[%s39389_s4 + $0x100] sm:$0xff] }
0x201d   :  { %33501 = vmatpush3.msra.mxu0 %v38281_v44  ;;  %33539 = vmatprep.subr.mxu1 %v34236_v3  ;;  %v38464_v46 = vand.u32 4294901760, %v29562_v57 }
0x201e   :  { %33502 = vmatprep.subr.mxu0 %v34236_v3  ;;  %33540 = vmatpush3.msra.mxu1 %v26399_v1  ;;  %v26427_v30 = vand.u32 4294901760, %v26426_v52  ;;  %v39404_v1 = vand.u32 4294901760, %v38449_v38 }
0x201f   :  { %33503 = vmatpush3.msra.mxu0 %v38306_v31  ;;  %33541 = vmatprep.subr.mxu1 %v34236_v3  ;;  %v38477_v26 = vsub.f32 %v29562_v57, %v38464_v46 }
0x2020   :  { %33504 = vmatprep.subr.mxu0 %v34236_v3  ;;  %33542 = vmatpush3.msra.mxu1 %v26406_v7  ;;  %v26454_v7 = vsub.f32 %v38449_v38, %v39404_v1 }
0x2021   :  { %33505 = vmatpush3.msra.mxu0 %v38318_v10  ;;  %33543 = vmatprep.subr.mxu1 %v34236_v3  ;;  %v39402_v52 = vand.u32 4294901760, %v38477_v26 }
0x2022   :  { %33506 = vmatprep.subr.mxu0 %v34236_v3  ;;  %33544 = vmatpush3.msra.mxu1 %v26413_v41  ;;  %v39403_v41 = vand.u32 4294901760, %v38462_v53  ;;  %v26455_v0 = vand.u32 4294901760, %v26454_v7  ;;  %v29561_v7 = vld [vmem:[%s39390_s5 + $0xa] ss:$0 sm:$0xff] }
0x2023   :  { %33507 = vmatpush3.msra.mxu0 %v38331_v12  ;;  %33545 = vmatprep.subr.mxu1 %v34236_v3 }
0x2024   :  { %33508 = vmatprep.subr.mxu0 %v34236_v3  ;;  %33546 = vmatpush3.msra.mxu1 %v26420_v24  ;;  %v26461_v24 = vsub.f32 %v38462_v53, %v39403_v41 }
0x2025   :  { %33509 = vmatpush3.msra.mxu0 %v38339_v11  ;;  %33547 = vmatprep.subr.mxu1 %v34236_v3 }
0x2026   :  { %33510 = vmatprep.subr.mxu0 %v34236_v3  ;;  %33548 = vmatpush3.msra.mxu1 %v26427_v30  ;;  %v26462_v28 = vand.u32 4294901760, %v26461_v24  ;;  %v26468_v30 = vsub.f32 %v38477_v26, %v39402_v52 }
0x2027   :  { %33511 = vmatpush3.msra.mxu0 %v38362_v49  ;;  %33549 = vmatprep.subr.mxu1 %v34236_v3 }
0x2028   :  { %33512 = vmatprep.subr.mxu0 %v34236_v3  ;;  %33550 = vmatpush3.msra.mxu1 %v26434_v43  ;;  %v26469_v32 = vand.u32 4294901760, %v26468_v30 }
0x2029   :  { %33513 = vmatpush3.msra.mxu0 %v38377_v2  ;;  %33551 = vmatprep.subr.mxu1 %v34236_v3 }
0x202a   :  { %33514 = vmatprep.subr.mxu0 %v34236_v3  ;;  %33552 = vmatpush3.msra.mxu1 %v26441_v59 }
0x202b   :  { %33515 = vmatpush3.msra.mxu0 %v38392_v17  ;;  %33553 = vmatprep.subr.mxu1 %v34236_v3 }
0x202c   :  { %33516 = vmatprep.subr.mxu0 %v34236_v3  ;;  %33554 = vmatpush3.msra.mxu1 %v26448_v40 }
0x202d   :  { %33517 = vmatpush3.msra.mxu0 %v38407_v13  ;;  %33555 = vmatprep.subr.mxu1 %v34236_v3 }
0x202e   :  { %33518 = vmatprep.subr.mxu0 %v34236_v3  ;;  %33556 = vmatpush3.msra.mxu1 %v26455_v0 }
0x202f   :  { %33519 = vmatpush3.msra.mxu0 %v38423_v61  ;;  %33557 = vmatprep.subr.mxu1 %v34236_v3 }
0x2030   :  { %33520 = vmatprep.subr.mxu0 %v34236_v3  ;;  %33558 = vmatpush3.msra.mxu1 %v26462_v28 }
0x2031   :  { %33521 = vmatpush3.msra.mxu0 %v38434_v5  ;;  %33559 = vmatprep.subr.mxu1 %v34236_v3 }
0x2032   :  { %33522 = vmatprep.subr.mxu0 %v34236_v3  ;;  %33560 = vmatpush3.msra.mxu1 %v26469_v32 }
0x2033   :  { %33523 = vmatpush3.msra.mxu0 %v38451_v45  ;;  %33599 = vmatprep.subr.mxu1 %v34236_v3 }
0x2034   :  { %33524 = vmatprep.subr.mxu0 %v34236_v3 }
0x2035   :  { %33525 = vmatpush3.msra.mxu0 %v38464_v46 }
0x2036   :  { %33564 = vmatprep.subr.mxu0 %v34236_v3 }
0x209e   :  { %v25421_v23 = vpop.f32.mrf.mxu1 }
0x20a0   :  { %v33383_v43 = vpop.f32.mrf.mxu1 }
0x20a6   :  { %v25578_v25 = vpop.f32.mrf.mxu1 }
0x20a7   :  { %v25330_v57 = vpop.f32.mrf.mxu0 }
0x20a8   :  { %v33405_v59 = vpop.f32.mrf.mxu1  ;;  %v25331_v40 = vadd.f32 %v29561_v7, %v25330_v57 }
0x20a9   :  { %v33372_v55 = vpop.f32.mrf.mxu0 }
0x20aa   :  { %v25422_v28 = vadd.f32 %v25421_v23, %v25331_v40 }
0x20af   :  { %v25501_v0 = vpop.f32.mrf.mxu0 }
0x20b0   :  { %v25736_v24 = vpop.f32.mrf.mxu1  ;;  %v25502_v41 = vadd.f32 %v25501_v0, %v25422_v28 }
0x20b1   :  { %v33394_v30 = vpop.f32.mrf.mxu0 }
0x20b2   :  { %v33427_v52 = vpop.f32.mrf.mxu1  ;;  %v25579_v32 = vadd.f32 %v25578_v25, %v25502_v41 }
0x20b9   :  { %v25661_v1 = vpop.f32.mrf.mxu0 }
0x20ba   :  { %v25662_v62 = vadd.f32 %v25661_v1, %v25579_v32 }
0x20bb   :  { %v33416_v35 = vpop.f32.mrf.mxu0 }
0x20bc   :  { %v25737_v43 = vadd.f32 %v25736_v24, %v25662_v62  ;;  %v25909_v21 = vpop.f32.mrf.mxu1 }
0x20be   :  { %v26228_v56 = vmax.f32 %v25737_v43, 0.0  ;;  %v33449_v59 = vpop.f32.mrf.mxu1 }
0x20c0   :  { %v38497_v55 = vand.u32 4294901760, %v26228_v56 }
0x20c2   :  { %v38500_v27 = vsub.f32 %v26228_v56, %v38497_v55  ;;  %33562 = vmatmul.mubr.f32.vlgmr.msra.gmra.mxu1 %v38497_v55 }
0x20c3   :  { %33600 = vmatpush3.msra.mxu1 %v38257_v20  ;;  %33631 = vmatprep.mubr.msk.f32.mxu1 %vm34237_vm1, %v34236_v3 }
0x20c4   :  { %v26351_v41 = vand.u32 4294901760, %v38500_v27  ;;  %v26066_v1 = vpop.f32.mrf.mxu1  ;;  %33601 = vmatprep.subr.mxu1 %v34236_v3 }
0x20c5   :  { %v25818_v35 = vpop.f32.mrf.mxu0  ;;  %33602 = vmatpush3.msra.mxu1 %v38265_v18 }
0x20c6   :  { %v26352_v56 = vsub.f32 %v38500_v27, %v26351_v41  ;;  %v25819_v62 = vadd.f32 %v29561_v7, %v25818_v35  ;;  %v33471_v52 = vpop.f32.mrf.mxu1  ;;  %33603 = vmatprep.subr.mxu1 %v34236_v3 }
0x20c7   :  { %v33438_v23 = vpop.f32.mrf.mxu0  ;;  %33604 = vmatpush3.msra.mxu1 %v38279_v16 }
0x20c8   :  { %v26353_v25 = vand.u32 4294901760, %v26352_v56  ;;  %33605 = vmatprep.subr.mxu1 %v34236_v3  ;;  %v25910_v57 = vadd.f32 %v25909_v21, %v25819_v62  ;;  %v39422_v23 = vand.u32 4294901760, %v38438_v51 }
0x20c9   :  { %33606 = vmatpush3.msra.mxu1 %v38281_v44 }
0x20ca   :  { %33607 = vmatprep.subr.mxu1 %v34236_v3  ;;  %33527 = vmatmul.mubr.f32.vlgmr.msra.gmra.mxu0 %v26353_v25 }
0x20cb   :  { %33565 = vmatpush3.msra.mxu0 %v38263_v19  ;;  %33608 = vmatpush3.msra.mxu1 %v38306_v31  ;;  %v29592_v19 = vld [vmem:[%s39389_s4 + $0x1f0] sm:$0xff] }
0x20cc   :  { %33566 = vmatprep.subr.mxu0 %v34236_v3  ;;  %33609 = vmatprep.subr.mxu1 %v34236_v3 }
0x20cd   :  { %v25989_v7 = vpop.f32.mrf.mxu0  ;;  %33567 = vmatpush3.msra.mxu0 %v38277_v9  ;;  %33610 = vmatpush3.msra.mxu1 %v38318_v10  ;;  %v38621_v9 = vand.u32 4294901760, %v29592_v19 }
0x20ce   :  { %v25990_v40 = vadd.f32 %v25989_v7, %v25910_v57  ;;  %v26224_v21 = vpop.f32.mrf.mxu1  ;;  %33568 = vmatprep.subr.mxu0 %v34236_v3  ;;  %33611 = vmatprep.subr.mxu1 %v34236_v3 }
0x20cf   :  { %v33460_v0 = vpop.f32.mrf.mxu0  ;;  %33569 = vmatpush3.msra.mxu0 %v38290_v4  ;;  %33612 = vmatpush3.msra.mxu1 %v38331_v12  ;;  %v38642_v4 = vsub.f32 %v29592_v19, %v38621_v9 }
0x20d0   :  { %v33493_v24 = vpop.f32.mrf.mxu1  ;;  %33570 = vmatprep.subr.mxu0 %v34236_v3  ;;  %33613 = vmatprep.subr.mxu1 %v34236_v3  ;;  %v26067_v30 = vadd.f32 %v26066_v1, %v25990_v40  ;;  %v39423_v0 = vand.u32 4294901760, %v38449_v38 }
0x20d1   :  { %33571 = vmatpush3.msra.mxu0 %v38293_v33  ;;  %33614 = vmatpush3.msra.mxu1 %v38339_v11 }
0x20d2   :  { %33572 = vmatprep.subr.mxu0 %v34236_v3  ;;  %33615 = vmatprep.subr.mxu1 %v34236_v3 }
0x20d3   :  { %33573 = vmatpush3.msra.mxu0 %v38322_v39  ;;  %33616 = vmatpush3.msra.mxu1 %v38362_v49 }
0x20d4   :  { %33574 = vmatprep.subr.mxu0 %v34236_v3  ;;  %33617 = vmatprep.subr.mxu1 %v34236_v3 }
0x20d5   :  { %33575 = vmatpush3.msra.mxu0 %v38329_v48  ;;  %33618 = vmatpush3.msra.mxu1 %v38377_v2  ;;  %v29587_v48 = vld [vmem:[%s39389_s4 + $0x1c8] sm:$0xff] }
0x20d6   :  { %v26149_v28 = vpop.f32.mrf.mxu0  ;;  %33576 = vmatprep.subr.mxu0 %v34236_v3  ;;  %33619 = vmatprep.subr.mxu1 %v34236_v3 }
0x20d7   :  { %v26150_v32 = vadd.f32 %v26149_v28, %v26067_v30  ;;  %33577 = vmatpush3.msra.mxu0 %v38344_v36  ;;  %33620 = vmatpush3.msra.mxu1 %v38392_v17  ;;  %v29586_v36 = vld [vmem:[%s39389_s4 + $0x1c0] sm:$0xff] }
0x20d8   :  { %v33482_v43 = vpop.f32.mrf.mxu0  ;;  %33578 = vmatprep.subr.mxu0 %v34236_v3  ;;  %33621 = vmatprep.subr.mxu1 %v34236_v3 }
0x20d9   :  { %v38545_v59 = vadd.f32 %v26224_v21, %v26150_v32  ;;  %33579 = vmatpush3.msra.mxu0 %v38352_v15  ;;  %33622 = vmatpush3.msra.mxu1 %v38407_v13  ;;  %v39419_v15 = vand.u32 4294901760, %v38390_v14  ;;  %v29582_v21 = vld [vmem:[%s39389_s4 + $0x1a0] sm:$0xff]  ;;  %v39424_v43 = vand.u32 4294901760, %v38462_v53 }
0x20da   :  { %33580 = vmatprep.subr.mxu0 %v34236_v3  ;;  %33623 = vmatprep.subr.mxu1 %v34236_v3 }
0x20db   :  { %33581 = vmatpush3.msra.mxu0 %v38375_v8  ;;  %33624 = vmatpush3.msra.mxu1 %v38423_v61 }
0x20dc   :  { %33582 = vmatprep.subr.mxu0 %v34236_v3  ;;  %33625 = vmatprep.subr.mxu1 %v34236_v3 }
0x20dd   :  { %33583 = vmatpush3.msra.mxu0 %v38390_v14  ;;  %33626 = vmatpush3.msra.mxu1 %v38434_v5 }
0x20de   :  { %33584 = vmatprep.subr.mxu0 %v34236_v3  ;;  %33627 = vmatprep.subr.mxu1 %v34236_v3 }
0x20df   :  { %33585 = vmatpush3.msra.mxu0 %v38405_v54  ;;  %33628 = vmatpush3.msra.mxu1 %v38451_v45 }
0x20e0   :  { %33586 = vmatprep.subr.mxu0 %v34236_v3  ;;  %33629 = vmatprep.subr.mxu1 %v34236_v3 }
0x20e1   :  { %33587 = vmatpush3.msra.mxu0 %v38420_v42  ;;  %33630 = vmatpush3.msra.mxu1 %v38464_v46 }
0x20e2   :  { %33588 = vmatprep.subr.mxu0 %v34236_v3  ;;  %33632 = vmatmul.mubr.f32.vlgmr.msra.gmra.mxu1 %v26351_v41 }
0x20e3   :  { %33669 = vmatprep.subr.mxu1 %v34236_v3  ;;  %33589 = vmatpush3.msra.mxu0 %v38438_v51 }
0x20e4   :  { %33670 = vmatpush3.msra.mxu1 %v38257_v20  ;;  %33590 = vmatprep.subr.mxu0 %v34236_v3  ;;  %v29593_v20 = vld [vmem:[%s39389_s4 + $0x1f8] sm:$0xff] }
0x20e5   :  { %33671 = vmatprep.subr.mxu1 %v34236_v3  ;;  %33591 = vmatpush3.msra.mxu0 %v38449_v38  ;;  %v29581_v38 = vld [vmem:[%s39389_s4 + $0x198] sm:$0xff] }
0x20e6   :  { %33672 = vmatpush3.msra.mxu1 %v38265_v18  ;;  %33592 = vmatprep.subr.mxu0 %v34236_v3  ;;  %v38611_v18 = vand.u32 4294901760, %v29593_v20 }
0x20e7   :  { %33673 = vmatprep.subr.mxu1 %v34236_v3  ;;  %33593 = vmatpush3.msra.mxu0 %v38462_v53  ;;  %v29580_v53 = vld [vmem:[%s39389_s4 + $0x190] sm:$0xff] }
0x20e8   :  { %33674 = vmatpush3.msra.mxu1 %v38279_v16  ;;  %33594 = vmatprep.subr.mxu0 %v34236_v3  ;;  %v29590_v16 = vld [vmem:[%s39389_s4 + $0x1e0] sm:$0xff] }
0x20e9   :  { %33675 = vmatprep.subr.mxu1 %v34236_v3  ;;  %33595 = vmatpush3.msra.mxu0 %v38477_v26  ;;  %v38644_v33 = vand.u32 4294901760, %v29590_v16 }
0x20ea   :  { %33596 = vmatprep.mubr.msk.f32.mxu0 %vm34237_vm1, %v34236_v3  ;;  %33676 = vmatpush3.msra.mxu1 %v38281_v44  ;;  %v38632_v44 = vsub.f32 %v29593_v20, %v38611_v18 }
0x20eb   :  { %33597 = vmatmul.mubr.f32.vlgmr.msra.gmra.mxu0 %v38500_v27  ;;  %33634 = vmatprep.subr.mxu0 %v34236_v3 }
0x20ec   :  { %33677 = vmatprep.subr.mxu1 %v34236_v3  ;;  %33635 = vmatpush3.msra.mxu0 %v26362_v60  ;;  %v29591_v60 = vld [vmem:[%s39389_s4 + $0x1e8] sm:$0xff] }
0x20ed   :  { %33678 = vmatpush3.msra.mxu1 %v38306_v31  ;;  %33636 = vmatprep.subr.mxu0 %v34236_v3 }
0x20ee   :  { %33679 = vmatprep.subr.mxu1 %v34236_v3  ;;  %33637 = vmatpush3.msra.mxu0 %v26369_v50  ;;  %v38634_v50 = vand.u32 4294901760, %v29591_v60 }
0x20ef   :  { %33680 = vmatpush3.msra.mxu1 %v38318_v10  ;;  %33638 = vmatprep.subr.mxu0 %v34236_v3  ;;  %v29588_v10 = vld [vmem:[%s39389_s4 + $0x1d0] sm:$0xff] }
0x20f0   :  { %33681 = vmatprep.subr.mxu1 %v34236_v3  ;;  %33639 = vmatpush3.msra.mxu0 %v26376_v6  ;;  %v29589_v6 = vld [vmem:[%s39389_s4 + $0x1d8] sm:$0xff]  ;;  %v38656_v31 = vsub.f32 %v29591_v60, %v38634_v50  ;;  %v38778_v60 = vand.u32 4294901760, %v29582_v21 }
0x20f1   :  { %33682 = vmatpush3.msra.mxu1 %v38331_v12  ;;  %33640 = vmatprep.subr.mxu0 %v34236_v3  ;;  %v38663_v39 = vand.u32 4294901760, %v29589_v6  ;;  %v39418_v12 = vand.u32 4294901760, %v38375_v8 }
0x20f2   :  { %33683 = vmatprep.subr.mxu1 %v34236_v3  ;;  %33641 = vmatpush3.msra.mxu0 %v26383_v37  ;;  %v27003_v37 = vand.u32 4294901760, %v38632_v44 }
0x20f3   :  { %33684 = vmatpush3.msra.mxu1 %v38339_v11  ;;  %33642 = vmatprep.subr.mxu0 %v34236_v3  ;;  %v38673_v11 = vsub.f32 %v29590_v16, %v38644_v33  ;;  %v38694_v8 = vsub.f32 %v29589_v6, %v38663_v39  ;;  %v39425_v6 = vand.u32 4294901760, %v38477_v26  ;;  %v29579_v26 = vld [vmem:[%s39389_s4 + $0x188] sm:$0xff] }
0x20f4   :  { %33685 = vmatprep.subr.mxu1 %v34236_v3  ;;  %33643 = vmatpush3.msra.mxu0 %v26390_v29  ;;  %v27010_v29 = vand.u32 4294901760, %v38642_v4 }
0x20f5   :  { %33686 = vmatpush3.msra.mxu1 %v38362_v49  ;;  %33644 = vmatprep.subr.mxu0 %v34236_v3  ;;  %v27017_v49 = vand.u32 4294901760, %v38656_v31  ;;  %v27024_v14 = vand.u32 4294901760, %v38673_v11 }
0x20f6   :  { %33687 = vmatprep.subr.mxu1 %v34236_v3  ;;  %33645 = vmatpush3.msra.mxu0 %v26397_v47  ;;  %v38677_v47 = vand.u32 4294901760, %v29588_v10  ;;  %v27011_v27 = vsub.f32 %v38642_v4, %v27010_v29 }
0x20f7   :  { %33688 = vmatpush3.msra.mxu1 %v38377_v2  ;;  %33646 = vmatprep.subr.mxu0 %v34236_v3  ;;  %v39420_v2 = vand.u32 4294901760, %v38405_v54  ;;  %v39421_v54 = vand.u32 4294901760, %v38420_v42  ;;  %v27018_v41 = vsub.f32 %v38656_v31, %v27017_v49  ;;  %v27031_v42 = vand.u32 4294901760, %v38694_v8 }
0x20f8   :  { %33689 = vmatprep.subr.mxu1 %v34236_v3  ;;  %33647 = vmatpush3.msra.mxu0 %v26404_v22  ;;  %v27004_v22 = vsub.f32 %v38632_v44, %v27003_v37  ;;  %v27012_v56 = vand.u32 4294901760, %v27011_v27  ;;  %v27025_v62 = vsub.f32 %v38673_v11, %v27024_v14  ;;  %v38808_v27 = vsub.f32 %v29582_v21, %v38778_v60 }
0x20f9   :  { %33690 = vmatpush3.msra.mxu1 %v38392_v17  ;;  %33648 = vmatprep.subr.mxu0 %v34236_v3  ;;  %v38703_v17 = vand.u32 4294901760, %v29586_v36  ;;  %v27019_v7 = vand.u32 4294901760, %v27018_v41  ;;  %v27032_v51 = vsub.f32 %v38694_v8, %v27031_v42 }
0x20fa   :  { %33691 = vmatprep.subr.mxu1 %v34236_v3  ;;  %33649 = vmatpush3.msra.mxu0 %v26411_v58  ;;  %v38689_v58 = vand.u32 4294901760, %v29587_v48  ;;  %v27026_v28 = vand.u32 4294901760, %v27025_v62 }
0x20fb   :  { %33692 = vmatpush3.msra.mxu1 %v38407_v13  ;;  %33650 = vmatprep.subr.mxu0 %v34236_v3  ;;  %v29585_v13 = vld [vmem:[%s39389_s4 + $0x1b8] sm:$0xff]  ;;  %v38737_v52 = vsub.f32 %v29586_v36, %v38703_v17  ;;  %v38794_v36 = vand.u32 4294901760, %v29581_v38 }
0x20fc   :  { %33693 = vmatprep.subr.mxu1 %v34236_v3  ;;  %33651 = vmatpush3.msra.mxu0 %v39418_v12  ;;  %v38720_v1 = vsub.f32 %v29587_v48, %v38689_v58  ;;  %v38729_v35 = vand.u32 4294901760, %v29585_v13 }
0x20fd   :  { %33694 = vmatpush3.msra.mxu1 %v38423_v61  ;;  %33652 = vmatprep.subr.mxu0 %v34236_v3  ;;  %v38711_v61 = vsub.f32 %v29588_v10, %v38677_v47  ;;  %v27052_v32 = vand.u32 4294901760, %v38737_v52  ;;  %v27033_v10 = vand.u32 4294901760, %v27032_v51 }
0x20fe   :  { %33695 = vmatprep.subr.mxu1 %v34236_v3  ;;  %33653 = vmatpush3.msra.mxu0 %v39419_v15  ;;  %v27045_v40 = vand.u32 4294901760, %v38720_v1  ;;  %v38760_v24 = vsub.f32 %v29585_v13, %v38729_v35  ;;  %v38810_v13 = vand.u32 4294901760, %v29580_v53 }
0x20ff   :  { %33696 = vmatpush3.msra.mxu1 %v38434_v5  ;;  %33654 = vmatprep.subr.mxu0 %v34236_v3  ;;  %v27005_v5 = vand.u32 4294901760, %v27004_v22  ;;  %v27038_v25 = vand.u32 4294901760, %v38711_v61  ;;  %v27053_v15 = vsub.f32 %v38737_v52, %v27052_v32 }
0x2100   :  { %33697 = vmatprep.subr.mxu1 %v34236_v3  ;;  %33655 = vmatpush3.msra.mxu0 %v39420_v2  ;;  %v27046_v16 = vsub.f32 %v38720_v1, %v27045_v40  ;;  %v27059_v48 = vand.u32 4294901760, %v38760_v24 }
0x2101   :  { %33698 = vmatpush3.msra.mxu1 %v38451_v45  ;;  %33656 = vmatprep.subr.mxu0 %v34236_v3  ;;  %v29584_v45 = vld [vmem:[%s39389_s4 + $0x1b0] sm:$0xff]  ;;  %v27039_v20 = vsub.f32 %v38711_v61, %v27038_v25  ;;  %v27054_v62 = vand.u32 4294901760, %v27053_v15 }
0x2102   :  { %33699 = vmatprep.subr.mxu1 %v34236_v3  ;;  %33657 = vmatpush3.msra.mxu0 %v39421_v54  ;;  %v38746_v57 = vand.u32 4294901760, %v29584_v45  ;;  %v27047_v54 = vand.u32 4294901760, %v27046_v16 }
0x2103   :  { %33700 = vmatpush3.msra.mxu1 %v38464_v46  ;;  %33701 = vmatprep.mubr.msk.f32.mxu1 %vm34237_vm1, %v34236_v3  ;;  %v29583_v46 = vld [vmem:[%s39389_s4 + $0x1a8] sm:$0xff]  ;;  %v27040_v22 = vand.u32 4294901760, %v27039_v20 }
0x2104   :  { %33658 = vmatprep.subr.mxu0 %v34236_v3  ;;  %33702 = vmatmul.mubr.f32.vlgmr.msra.gmra.mxu1 %v38497_v55  ;;  %v38762_v30 = vand.u32 4294901760, %v29583_v46  ;;  %v38776_v19 = vsub.f32 %v29584_v45, %v38746_v57  ;;  %v38823_v45 = vsub.f32 %v29581_v38, %v38794_v36 }
0x2105   :  { %33739 = vmatprep.subr.mxu1 %v34236_v3  ;;  %33659 = vmatpush3.msra.mxu0 %v39422_v23  ;;  %v27080_v23 = vand.u32 4294901760, %v38808_v27 }
0x2106   :  { %33740 = vmatpush3.msra.mxu1 %v27005_v5  ;;  %33660 = vmatprep.subr.mxu0 %v34236_v3  ;;  %v38792_v12 = vsub.f32 %v29583_v46, %v38762_v30  ;;  %v27066_v2 = vand.u32 4294901760, %v38776_v19  ;;  %v29578_v5 = vld [vmem:[%s39389_s4 + $0x180] sm:$0xff] }
0x2107   :  { %33741 = vmatprep.subr.mxu1 %v34236_v3  ;;  %33661 = vmatpush3.msra.mxu0 %v39423_v0  ;;  %v38837_v21 = vand.u32 4294901760, %v29578_v5  ;;  %v27081_v20 = vsub.f32 %v38808_v27, %v27080_v23 }
0x2108   :  { %33742 = vmatpush3.msra.mxu1 %v27012_v56  ;;  %33662 = vmatprep.subr.mxu0 %v34236_v3  ;;  %v27073_v41 = vand.u32 4294901760, %v38792_v12  ;;  %v38825_v56 = vand.u32 4294901760, %v29579_v26  ;;  %v27067_v46 = vsub.f32 %v38776_v19, %v27066_v2 }
0x2109   :  { %33743 = vmatprep.subr.mxu1 %v34236_v3  ;;  %33663 = vmatpush3.msra.mxu0 %v39424_v43 }
0x210a   :  { %33744 = vmatpush3.msra.mxu1 %v27019_v7  ;;  %33664 = vmatprep.subr.mxu0 %v34236_v3  ;;  %v38835_v7 = vsub.f32 %v29580_v53, %v38810_v13  ;;  %v27074_v51 = vsub.f32 %v38792_v12, %v27073_v41  ;;  %v38847_v38 = vsub.f32 %v29579_v26, %v38825_v56  ;;  %v27068_v43 = vand.u32 4294901760, %v27067_v46 }
0x210b   :  { %33745 = vmatprep.subr.mxu1 %v34236_v3  ;;  %33665 = vmatpush3.msra.mxu0 %v39425_v6  ;;  %v38857_v53 = vsub.f32 %v29578_v5, %v38837_v21  ;;  %v26229_v26 = vmax.f32 %v38545_v59, 0.0 }
0x210c   :  { %33666 = vmatprep.mubr.msk.f32.mxu0 %vm34237_vm1, %v34236_v3  ;;  %33746 = vmatpush3.msra.mxu1 %v27026_v28  ;;  %v27087_v28 = vand.u32 4294901760, %v38823_v45  ;;  %v27094_v16 = vand.u32 4294901760, %v38835_v7  ;;  %v27075_v6 = vand.u32 4294901760, %v27074_v51  ;;  %v27101_v15 = vand.u32 4294901760, %v38847_v38 }
0x210d   :  { %33667 = vmatmul.mubr.f32.vlgmr.msra.gmra.mxu0 %v38497_v55  ;;  %33704 = vmatprep.subr.mxu0 %v34236_v3  ;;  %v27060_v55 = vsub.f32 %v38760_v24, %v27059_v48  ;;  %v27108_v5 = vand.u32 4294901760, %v38857_v53 }
0x210e   :  { %33747 = vmatprep.subr.mxu1 %v34236_v3  ;;  %33705 = vmatpush3.msra.mxu0 %v38611_v18  ;;  %v27102_v59 = vsub.f32 %v38847_v38, %v27101_v15 }
0x210f   :  { %33748 = vmatpush3.msra.mxu1 %v27033_v10  ;;  %33706 = vmatprep.subr.mxu0 %v34236_v3  ;;  %v27061_v0 = vand.u32 4294901760, %v27060_v55  ;;  %v27088_v10 = vsub.f32 %v38823_v45, %v27087_v28 }
0x2110   :  { %33749 = vmatprep.subr.mxu1 %v34236_v3  ;;  %33707 = vmatpush3.msra.mxu0 %v38621_v9  ;;  %v27103_v51 = vand.u32 4294901760, %v27102_v59 }
0x2111   :  { %33750 = vmatpush3.msra.mxu1 %v27040_v22  ;;  %33708 = vmatprep.subr.mxu0 %v34236_v3  ;;  %v27082_v22 = vand.u32 4294901760, %v27081_v20  ;;  %v27089_v55 = vand.u32 4294901760, %v27088_v10 }
0x2112   :  { %33751 = vmatprep.subr.mxu1 %v34236_v3  ;;  %33709 = vmatpush3.msra.mxu0 %v38634_v50 }
0x2113   :  { %33752 = vmatpush3.msra.mxu1 %v27047_v54  ;;  %33710 = vmatprep.subr.mxu0 %v34236_v3  ;;  %v27095_v54 = vsub.f32 %v38835_v7, %v27094_v16 }
0x2114   :  { %33753 = vmatprep.subr.mxu1 %v34236_v3  ;;  %33711 = vmatpush3.msra.mxu0 %v38644_v33 }
0x2115   :  { %33754 = vmatpush3.msra.mxu1 %v27054_v62  ;;  %33712 = vmatprep.subr.mxu0 %v34236_v3  ;;  %v38882_v62 = vand.u32 4294901760, %v26229_v26  ;;  %v27096_v46 = vand.u32 4294901760, %v27095_v54 }
0x2116   :  { %33755 = vmatprep.subr.mxu1 %v34236_v3  ;;  %33713 = vmatpush3.msra.mxu0 %v38663_v39 }
0x2117   :  { %33756 = vmatpush3.msra.mxu1 %v27061_v0  ;;  %33714 = vmatprep.subr.mxu0 %v34236_v3  ;;  %v27109_v0 = vsub.f32 %v38857_v53, %v27108_v5 }
0x2118   :  { %33757 = vmatprep.subr.mxu1 %v34236_v3  ;;  %33715 = vmatpush3.msra.mxu0 %v38677_v47 }
0x2119   :  { %33758 = vmatpush3.msra.mxu1 %v27068_v43  ;;  %33716 = vmatprep.subr.mxu0 %v34236_v3  ;;  %v38894_v43 = vsub.f32 %v26229_v26, %v38882_v62  ;;  %v27110_v20 = vand.u32 4294901760, %v27109_v0 }
0x211a   :  { %33759 = vmatprep.subr.mxu1 %v34236_v3  ;;  %33717 = vmatpush3.msra.mxu0 %v38689_v58 }
0x211b   :  { %33760 = vmatpush3.msra.mxu1 %v27075_v6  ;;  %33718 = vmatprep.subr.mxu0 %v34236_v3  ;;  %v26992_v6 = vand.u32 4294901760, %v38894_v43 }
0x211c   :  { %33761 = vmatprep.subr.mxu1 %v34236_v3  ;;  %33719 = vmatpush3.msra.mxu0 %v38703_v17 }
0x211d   :  { %33762 = vmatpush3.msra.mxu1 %v27082_v22  ;;  %33720 = vmatprep.subr.mxu0 %v34236_v3  ;;  %v26993_v10 = vsub.f32 %v38894_v43, %v26992_v6 }
0x211e   :  { %33763 = vmatprep.subr.mxu1 %v34236_v3  ;;  %33721 = vmatpush3.msra.mxu0 %v38729_v35 }
0x211f   :  { %33764 = vmatpush3.msra.mxu1 %v27089_v55  ;;  %33722 = vmatprep.subr.mxu0 %v34236_v3  ;;  %v26994_v26 = vand.u32 4294901760, %v26993_v10  ;;  %v29599_v10 = vld [vmem:[%s39390_s5 + $0xf] ss:$0 sm:$0xff] }
0x2120   :  { %33765 = vmatprep.subr.mxu1 %v34236_v3  ;;  %33723 = vmatpush3.msra.mxu0 %v38746_v57 }
0x2121   :  { %33766 = vmatpush3.msra.mxu1 %v27096_v46  ;;  %33724 = vmatprep.subr.mxu0 %v34236_v3 }
0x2122   :  { %33767 = vmatprep.subr.mxu1 %v34236_v3  ;;  %33725 = vmatpush3.msra.mxu0 %v38762_v30 }
0x2123   :  { %33768 = vmatpush3.msra.mxu1 %v27103_v51  ;;  %33726 = vmatprep.subr.mxu0 %v34236_v3 }
0x2124   :  { %33769 = vmatprep.subr.mxu1 %v34236_v3  ;;  %33727 = vmatpush3.msra.mxu0 %v38778_v60 }
0x2125   :  { %33770 = vmatpush3.msra.mxu1 %v27110_v20  ;;  %33771 = vmatprep.mubr.msk.f32.mxu1 %vm34237_vm1, %v34236_v3  ;;  %v29598_v20 = vld [vmem:[%s39390_s5 + $0xe] ss:$0 sm:$0xff] }
0x2126   :  { %33728 = vmatprep.subr.mxu0 %v34236_v3  ;;  %33772 = vmatmul.mubr.f32.vlgmr.msra.gmra.mxu1 %v38882_v62 }
0x2127   :  { %33809 = vmatprep.subr.mxu1 %v34236_v3  ;;  %33729 = vmatpush3.msra.mxu0 %v38794_v36 }
0x2128   :  { %33810 = vmatpush3.msra.mxu1 %v38611_v18  ;;  %33730 = vmatprep.subr.mxu0 %v34236_v3 }
0x2129   :  { %33811 = vmatprep.subr.mxu1 %v34236_v3  ;;  %33731 = vmatpush3.msra.mxu0 %v38810_v13 }
0x212a   :  { %33812 = vmatpush3.msra.mxu1 %v38621_v9  ;;  %33732 = vmatprep.subr.mxu0 %v34236_v3 }
0x212b   :  { %33813 = vmatprep.subr.mxu1 %v34236_v3  ;;  %33733 = vmatpush3.msra.mxu0 %v38825_v56 }
0x212c   :  { %33814 = vmatpush3.msra.mxu1 %v38634_v50  ;;  %33734 = vmatprep.subr.mxu0 %v34236_v3 }
0x212d   :  { %33815 = vmatprep.subr.mxu1 %v34236_v3  ;;  %33735 = vmatpush3.msra.mxu0 %v38837_v21 }
0x212e   :  { %33736 = vmatprep.mubr.msk.f32.mxu0 %vm34237_vm1, %v34236_v3  ;;  %33816 = vmatpush3.msra.mxu1 %v38644_v33 }
0x212f   :  { %33737 = vmatmul.mubr.f32.vlgmr.msra.gmra.mxu0 %v26994_v26  ;;  %33774 = vmatprep.subr.mxu0 %v34236_v3 }
0x2130   :  { %33817 = vmatprep.subr.mxu1 %v34236_v3  ;;  %33775 = vmatpush3.msra.mxu0 %v38632_v44 }
0x2131   :  { %33818 = vmatpush3.msra.mxu1 %v38663_v39  ;;  %33776 = vmatprep.subr.mxu0 %v34236_v3 }
0x2132   :  { %33819 = vmatprep.subr.mxu1 %v34236_v3  ;;  %33777 = vmatpush3.msra.mxu0 %v38642_v4 }
0x2133   :  { %33820 = vmatpush3.msra.mxu1 %v38677_v47  ;;  %33778 = vmatprep.subr.mxu0 %v34236_v3 }
0x2134   :  { %33821 = vmatprep.subr.mxu1 %v34236_v3  ;;  %33779 = vmatpush3.msra.mxu0 %v38656_v31 }
0x2135   :  { %33822 = vmatpush3.msra.mxu1 %v38689_v58  ;;  %33780 = vmatprep.subr.mxu0 %v34236_v3 }
0x2136   :  { %33823 = vmatprep.subr.mxu1 %v34236_v3  ;;  %33781 = vmatpush3.msra.mxu0 %v38673_v11 }
0x2137   :  { %33824 = vmatpush3.msra.mxu1 %v38703_v17  ;;  %33782 = vmatprep.subr.mxu0 %v34236_v3 }
0x2138   :  { %33825 = vmatprep.subr.mxu1 %v34236_v3  ;;  %33783 = vmatpush3.msra.mxu0 %v38694_v8 }
0x2139   :  { %33826 = vmatpush3.msra.mxu1 %v38729_v35  ;;  %33784 = vmatprep.subr.mxu0 %v34236_v3 }
0x213a   :  { %33827 = vmatprep.subr.mxu1 %v34236_v3  ;;  %33785 = vmatpush3.msra.mxu0 %v38711_v61 }
0x213b   :  { %33828 = vmatpush3.msra.mxu1 %v38746_v57  ;;  %33786 = vmatprep.subr.mxu0 %v34236_v3 }
0x213c   :  { %33829 = vmatprep.subr.mxu1 %v34236_v3  ;;  %33787 = vmatpush3.msra.mxu0 %v38720_v1 }
0x213d   :  { %33830 = vmatpush3.msra.mxu1 %v38762_v30  ;;  %33788 = vmatprep.subr.mxu0 %v34236_v3 }
0x213e   :  { %33831 = vmatprep.subr.mxu1 %v34236_v3  ;;  %33789 = vmatpush3.msra.mxu0 %v38737_v52 }
0x213f   :  { %33832 = vmatpush3.msra.mxu1 %v38778_v60  ;;  %33790 = vmatprep.subr.mxu0 %v34236_v3 }
0x2140   :  { %33833 = vmatprep.subr.mxu1 %v34236_v3  ;;  %33791 = vmatpush3.msra.mxu0 %v38760_v24 }
0x2141   :  { %33834 = vmatpush3.msra.mxu1 %v38794_v36  ;;  %33792 = vmatprep.subr.mxu0 %v34236_v3 }
0x2142   :  { %33835 = vmatprep.subr.mxu1 %v34236_v3  ;;  %33793 = vmatpush3.msra.mxu0 %v38776_v19 }
0x2143   :  { %33836 = vmatpush3.msra.mxu1 %v38810_v13  ;;  %33794 = vmatprep.subr.mxu0 %v34236_v3 }
0x2144   :  { %33837 = vmatprep.subr.mxu1 %v34236_v3  ;;  %33795 = vmatpush3.msra.mxu0 %v38792_v12 }
0x2145   :  { %33838 = vmatpush3.msra.mxu1 %v38825_v56  ;;  %33796 = vmatprep.subr.mxu0 %v34236_v3 }
0x2146   :  { %33839 = vmatprep.subr.mxu1 %v34236_v3  ;;  %33797 = vmatpush3.msra.mxu0 %v38808_v27 }
0x2147   :  { %33840 = vmatpush3.msra.mxu1 %v38837_v21  ;;  %33841 = vmatprep.mubr.msk.f32.mxu1 %vm34237_vm1, %v34236_v3 }
0x2148   :  { %33798 = vmatprep.subr.mxu0 %v34236_v3  ;;  %33842 = vmatmul.mubr.f32.vlgmr.msra.gmra.mxu1 %v26992_v6 }
0x2149   :  { %33879 = vmatprep.subr.mxu1 %v34236_v3  ;;  %33799 = vmatpush3.msra.mxu0 %v38823_v45 }
0x214a   :  { %33880 = vmatpush3.msra.mxu1 %v38611_v18  ;;  %33800 = vmatprep.subr.mxu0 %v34236_v3 }
0x214b   :  { %33881 = vmatprep.subr.mxu1 %v34236_v3  ;;  %33801 = vmatpush3.msra.mxu0 %v38835_v7 }
0x214c   :  { %33882 = vmatpush3.msra.mxu1 %v38621_v9  ;;  %33802 = vmatprep.subr.mxu0 %v34236_v3 }
0x214d   :  { %33883 = vmatprep.subr.mxu1 %v34236_v3  ;;  %33803 = vmatpush3.msra.mxu0 %v38847_v38 }
0x214e   :  { %33884 = vmatpush3.msra.mxu1 %v38634_v50  ;;  %33804 = vmatprep.subr.mxu0 %v34236_v3 }
0x214f   :  { %33885 = vmatprep.subr.mxu1 %v34236_v3  ;;  %33805 = vmatpush3.msra.mxu0 %v38857_v53 }
0x2150   :  { %33806 = vmatprep.mubr.msk.f32.mxu0 %vm34237_vm1, %v34236_v3  ;;  %33886 = vmatpush3.msra.mxu1 %v38644_v33 }
0x2151   :  { %33807 = vmatmul.mubr.f32.vlgmr.msra.gmra.mxu0 %v38894_v43  ;;  %33844 = vmatprep.subr.mxu0 %v34236_v3 }
0x2152   :  { %33887 = vmatprep.subr.mxu1 %v34236_v3  ;;  %33845 = vmatpush3.msra.mxu0 %v27003_v37 }
0x2153   :  { %33888 = vmatpush3.msra.mxu1 %v38663_v39  ;;  %33846 = vmatprep.subr.mxu0 %v34236_v3  ;;  %v29595_v39 = vld [vmem:[%s39390_s5 + $0xb] ss:$0 sm:$0xff] }
0x2154   :  { %33889 = vmatprep.subr.mxu1 %v34236_v3  ;;  %33847 = vmatpush3.msra.mxu0 %v27010_v29 }
0x2155   :  { %33890 = vmatpush3.msra.mxu1 %v38677_v47  ;;  %33848 = vmatprep.subr.mxu0 %v34236_v3 }
0x2156   :  { %33891 = vmatprep.subr.mxu1 %v34236_v3  ;;  %33849 = vmatpush3.msra.mxu0 %v27017_v49 }
0x2157   :  { %33892 = vmatpush3.msra.mxu1 %v38689_v58  ;;  %33850 = vmatprep.subr.mxu0 %v34236_v3 }
0x2158   :  { %33893 = vmatprep.subr.mxu1 %v34236_v3  ;;  %33851 = vmatpush3.msra.mxu0 %v27024_v14 }
0x2159   :  { %33894 = vmatpush3.msra.mxu1 %v38703_v17  ;;  %33852 = vmatprep.subr.mxu0 %v34236_v3 }
0x215a   :  { %33895 = vmatprep.subr.mxu1 %v34236_v3  ;;  %33853 = vmatpush3.msra.mxu0 %v27031_v42 }
0x215b   :  { %33896 = vmatpush3.msra.mxu1 %v38729_v35  ;;  %33854 = vmatprep.subr.mxu0 %v34236_v3 }
0x215c   :  { %33897 = vmatprep.subr.mxu1 %v34236_v3  ;;  %33855 = vmatpush3.msra.mxu0 %v27038_v25 }
0x215d   :  { %33898 = vmatpush3.msra.mxu1 %v38746_v57  ;;  %33856 = vmatprep.subr.mxu0 %v34236_v3 }
0x215e   :  { %33899 = vmatprep.subr.mxu1 %v34236_v3  ;;  %33857 = vmatpush3.msra.mxu0 %v27045_v40 }
0x215f   :  { %33900 = vmatpush3.msra.mxu1 %v38762_v30  ;;  %33858 = vmatprep.subr.mxu0 %v34236_v3 }
0x2160   :  { %33901 = vmatprep.subr.mxu1 %v34236_v3  ;;  %33859 = vmatpush3.msra.mxu0 %v27052_v32 }
0x2161   :  { %33902 = vmatpush3.msra.mxu1 %v38778_v60  ;;  %33860 = vmatprep.subr.mxu0 %v34236_v3 }
0x2162   :  { %33903 = vmatprep.subr.mxu1 %v34236_v3  ;;  %33861 = vmatpush3.msra.mxu0 %v27059_v48 }
0x2163   :  { %33904 = vmatpush3.msra.mxu1 %v38794_v36  ;;  %33862 = vmatprep.subr.mxu0 %v34236_v3 }
0x2164   :  { %33905 = vmatprep.subr.mxu1 %v34236_v3  ;;  %33863 = vmatpush3.msra.mxu0 %v27066_v2 }
0x2165   :  { %33906 = vmatpush3.msra.mxu1 %v38810_v13  ;;  %33864 = vmatprep.subr.mxu0 %v34236_v3 }
0x2166   :  { %33907 = vmatprep.subr.mxu1 %v34236_v3  ;;  %33865 = vmatpush3.msra.mxu0 %v27073_v41 }
0x2167   :  { %33908 = vmatpush3.msra.mxu1 %v38825_v56  ;;  %33866 = vmatprep.subr.mxu0 %v34236_v3 }
0x2168   :  { %33909 = vmatprep.subr.mxu1 %v34236_v3  ;;  %33867 = vmatpush3.msra.mxu0 %v27080_v23 }
0x2169   :  { %33910 = vmatpush3.msra.mxu1 %v38837_v21  ;;  %33911 = vmatprep.mubr.msk.f32.mxu1 %vm34237_vm1, %v34236_v3 }
0x216a   :  { %33868 = vmatprep.subr.mxu0 %v34236_v3  ;;  %33912 = vmatmul.mubr.f32.vlgmr.msra.gmra.mxu1 %v38882_v62 }
0x216b   :  { %33869 = vmatpush3.msra.mxu0 %v27087_v28  ;;  %33876 = vmatprep.mubr.msk.f32.mxu0 %vm34237_vm1, %v34236_v3 }
0x216c   :  { %33870 = vmatprep.subr.mxu0 %v34236_v3  ;;  %33919 = vmatprep.subr.mxu1 %v34236_v3 }
0x216d   :  { %33871 = vmatpush3.msra.mxu0 %v27094_v16  ;;  %33921 = vmatprep.mubr.msk.f32.mxu1 %vm34237_vm1, %v34236_v3 }
0x216e   :  { %33872 = vmatprep.subr.mxu0 %v34236_v3 }
0x216f   :  { %33873 = vmatpush3.msra.mxu0 %v27101_v15 }
0x2170   :  { %33874 = vmatprep.subr.mxu0 %v34236_v3 }
0x2171   :  { %33875 = vmatpush3.msra.mxu0 %v27108_v5 }
0x2172   :  { %33877 = vmatmul.mubr.f32.vlgmr.msra.gmra.mxu0 %v38882_v62  ;;  %33914 = vmatprep.subr.mxu0 %v34236_v3  ;;  %v34254_v62 = vmov 0  }
0x2173   :  { %33916 = vmatprep.mubr.msk.f32.mxu0 %vm34237_vm1, %v34236_v3  ;;  %v27593_v46 = vsel %vm4987_vm5, 0.125, %v34254_v62 }
0x2174   :  { %v39092_v0 = vsub.f32 %v27593_v46, %v27593_v46 }
0x2176   :  { %v39095_v51 = vand.u32 4294901760, %v39092_v0 }
0x2178   :  { %v27664_v26 = vsub.f32 %v39092_v0, %v39095_v51 }
0x2182   :  { %v26506_v18 = vpop.f32.mrf.mxu1 }
0x2184   :  { %v33563_v9 = vpop.f32.mrf.mxu1 }
0x218a   :  { %v26355_v44 = vpop.f32.mrf.mxu0 }
0x218b   :  { %v26356_v29 = vadd.f32 %v29595_v39, %v26355_v44  ;;  %v27665_v44 = vand.u32 4294901760, %v27664_v26 }
0x218c   :  { %v33528_v50 = vpop.f32.mrf.mxu0 }
0x218d   :  { %v26507_v47 = vadd.f32 %v26506_v18, %v26356_v29 }
0x21a2   :  { %v26699_v4 = vpop.f32.mrf.mxu1 }
0x21a4   :  { %v33633_v33 = vpop.f32.mrf.mxu1 }
0x21ab   :  { %v26610_v37 = vpop.f32.mrf.mxu0 }
0x21ac   :  { %v26611_v58 = vadd.f32 %v26610_v37, %v26507_v47 }
0x21ad   :  { %v33598_v31 = vpop.f32.mrf.mxu0 }
0x21ae   :  { %v26700_v8 = vadd.f32 %v26699_v4, %v26611_v58 }
0x21c4   :  { %v26905_v11 = vpop.f32.mrf.mxu1 }
0x21c6   :  { %v33703_v49 = vpop.f32.mrf.mxu1 }
0x21cd   :  { %v26818_v14 = vpop.f32.mrf.mxu0 }
0x21ce   :  { %v26819_v17 = vadd.f32 %v26818_v14, %v26700_v8  ;;  %v28490_v14 = vld [vmem:[%s39391_s6 + $0x18] sm:$0xff] }
0x21cf   :  { %v33668_v61 = vpop.f32.mrf.mxu0 }
0x21d0   :  { %v26906_v1 = vadd.f32 %v26905_v11, %v26819_v17  ;;  %v28489_v61 = vld [vmem:[%s39391_s6 + $0x10] sm:$0xff] }
0x21d2   :  { %v27552_v42 = vadd.f32 %v26906_v1, %v38081_v63 }
0x21d4   :  { %v27554_v35 = vsel %vm4002_vm3, %v27552_v42, 0.0 }
0x21d5   :  { %27555 = vadd.xlane.f32.xlu1 %v27554_v35  ;;  %v28488_v35 = vld [vmem:[%s39391_s6 + $0x8] sm:$0xff] }
0x21e6   :  { %v27147_v52 = vpop.f32.mrf.mxu1 }
0x21e8   :  { %v33773_v25 = vpop.f32.mrf.mxu1 }
0x21e9   :  { %v39142_v25 = vand.u32 4294901760, %v28489_v61 }
0x21ef   :  { %v26996_v57 = vpop.f32.mrf.mxu0 }
0x21f0   :  { %v26997_v60 = vadd.f32 %v29595_v39, %v26996_v57  ;;  %v34255_v39 = vmov 0.125   ;;  %v28487_v57 = vld [vmem:[%s39391_s6] sm:$0xff] }
0x21f1   :  { %v33738_v40 = vpop.f32.mrf.mxu0 }
0x21f2   :  { %v27148_v12 = vadd.f32 %v27147_v52, %v26997_v60  ;;  %v39159_v60 = vand.u32 4294901760, %v28487_v57 }
0x2208   :  { %v27340_v24 = vpop.f32.mrf.mxu1 }
0x220a   :  { %v33843_v30 = vpop.f32.mrf.mxu1 }
0x220b   :  { %v39153_v30 = vand.u32 4294901760, %v28488_v35 }
0x2211   :  { %v27251_v32 = vpop.f32.mrf.mxu0 }
0x2212   :  { %v27252_v2 = vadd.f32 %v27251_v32, %v27148_v12 }
0x2213   :  { %v33808_v19 = vpop.f32.mrf.mxu0 }
0x2214   :  { %v27341_v27 = vadd.f32 %v27340_v24, %v27252_v2  ;;  %v39157_v19 = vsub.f32 %v28489_v61, %v39142_v25 }
0x2216   :  { %v28612_v2 = vand.u32 4294901760, %v39157_v19 }
0x222a   :  { %v27546_v48 = vpop.f32.mrf.mxu1 }
0x222c   :  { %v33913_v36 = vpop.f32.mrf.mxu1 }
0x222d   :  { %v39166_v36 = vsub.f32 %v28488_v35, %v39153_v30 }
0x2232   :  { %v27459_v13 = vpop.f32.mrf.mxu0 }
0x2233   :  { %v27460_v41 = vadd.f32 %v27459_v13, %v27341_v27  ;;  %v39171_v27 = vsub.f32 %v28487_v57, %v39159_v60 }
0x2234   :  { %v33878_v63 = vpop.f32.mrf.mxu0 }
0x2235   :  { %v27547_v45 = vadd.f32 %v27546_v48, %v27460_v41  ;;  %v28619_v41 = vand.u32 4294901760, %v39166_v36  ;;  %v28613_v63 = vsub.f32 %v39157_v19, %v28612_v2 }
0x2237   :  { %v27553_v56 = vadd.f32 %v27547_v45, %v38185_v34  ;;  %v28626_v45 = vand.u32 4294901760, %v39171_v27 }
0x2239   :  { %v27557_v23 = vsel %vm4002_vm3, %v27553_v56, 0.0 }
0x223a   :  { %27558 = vadd.xlane.f32.xlu0 %v27557_v23  ;;  %v28620_v23 = vsub.f32 %v39166_v36, %v28619_v41 }
0x225e   :  { %v27556_v7 = vpop.xlane.xlu1 %27555 }
0x225f   :  { %v27560_v21 = vmul.f32 0.03125, %v27556_v7  ;;  %v28614_v7 = vand.u32 4294901760, %v28613_v63 }
0x2261   :  { %v27562_v28 = vsub.f32 %v27552_v42, %v27560_v21  ;;  %v39137_v42 = vand.u32 4294901760, %v28490_v14  ;;  %v28627_v21 = vsub.f32 %v39171_v27, %v28626_v45 }
0x2263   :  { %v27564_v38 = vmul.f32 %v27562_v28, %v27562_v28  ;;  %v39151_v24 = vsub.f32 %v28490_v14, %v39137_v42 }
0x2265   :  { %v27566_v16 = vsel %vm4002_vm3, %v27564_v38, 0.0  ;;  %v28605_v12 = vand.u32 4294901760, %v39151_v24  ;;  %v28628_v38 = vand.u32 4294901760, %v28627_v21 }
0x2266   :  { %27567 = vadd.xlane.f32.xlu1 %v27566_v16 }
0x2267   :  { %v28606_v13 = vsub.f32 %v39151_v24, %v28605_v12 }
0x22c3   :  { %v27559_v53 = vpop.xlane.xlu0 %27558 }
0x22c4   :  { %v27561_v15 = vmul.f32 0.03125, %v27559_v53 }
0x22c6   :  { %v27563_v22 = vsub.f32 %v27553_v56, %v27561_v15  ;;  %v28607_v56 = vand.u32 4294901760, %v28606_v13 }
0x22c8   :  { %v27565_v54 = vmul.f32 %v27563_v22, %v27563_v22 }
0x22ca   :  { %v27569_v5 = vsel %vm4002_vm3, %v27565_v54, 0.0 }
0x22cb   :  { %27570 = vadd.xlane.f32.xlu0 %v27569_v5 }
0x22ef   :  { %v27568_v55 = vpop.xlane.xlu1 %27567 }
0x22f0   :  { %v27572_v59 = vmul.f32 0.03125, %v27568_v55 }
0x22f2   :  { %v27574_v34 = vadd.f32 1e-05, %v27572_v59 }
0x22f4   :  { %34204 = vrsqrt.f32 %v27574_v34 }
0x2301   :  { %v34205_v43 = vpop.eup %34204 }
0x2302   :  { %v27578_v6 = vmul.f32 %v34205_v43, %v27562_v28  ;;  %v28621_v28 = vand.u32 4294901760, %v28620_v23 }
0x2304   :  { %v27584_v18 = vmul.f32 %v29598_v20, %v27578_v6 }
0x2306   :  { %v27590_v9 = vadd.f32 %v29599_v10, %v27584_v18 }
0x2308   :  { %v27626_v50 = vand.u32 4294901760, %v27590_v9 }
0x230a   :  { %33915 = vmatpush3.msra.mxu0 %v27626_v50  ;;  %v27703_v4 = vsub.f32 %v27590_v9, %v27626_v50 }
0x230b   :  { %33917 = vmatmul.mubr.f32.vlgmr.msra.gmra.mxu0 %v27665_v44  ;;  %33924 = vmatprep.subr.mxu0 %v34236_v3 }
0x230c   :  { %33925 = vmatpush3.msra.mxu0 %v27703_v4  ;;  %33926 = vmatprep.mubr.msk.f32.mxu0 %vm34237_vm1, %v34236_v3  ;;  %v27704_v33 = vand.u32 4294901760, %v27703_v4 }
0x230d   :  { %33934 = vmatprep.subr.mxu0 %v34236_v3 }
0x230e   :  { %v27705_v37 = vsub.f32 %v27703_v4, %v27704_v33  ;;  %v28493_v4 = vld [vmem:[%s39391_s6 + $0x30] sm:$0xff] }
0x230f   :  { %33927 = vmatmul.mubr.f32.vlgmr.msra.gmra.mxu0 %v39092_v0 }
0x2310   :  { %33935 = vmatpush3.msra.mxu0 %v27704_v33  ;;  %v27706_v31 = vand.u32 4294901760, %v27705_v37  ;;  %33936 = vmatprep.mubr.msk.f32.mxu0 %vm34237_vm1, %v34236_v3 }
0x2311   :  { %33944 = vmatprep.subr.mxu0 %v34236_v3 }
0x2312   :  { %33920 = vmatpush3.msra.mxu1 %v27706_v31  ;;  %v28492_v31 = vld [vmem:[%s39391_s6 + $0x28] sm:$0xff] }
0x2313   :  { %33922 = vmatmul.mubr.msk.f32.vlgmr.msra.gmra.mxu1 %vm4987_vm5, %v34255_v39  ;;  %33929 = vmatprep.subr.mxu1 %v34236_v3 }
0x2314   :  { %33930 = vmatpush3.msra.mxu1 %v27626_v50  ;;  %33931 = vmatprep.mubr.msk.f32.mxu1 %vm34237_vm1, %v34236_v3 }
0x2315   :  { %33939 = vmatprep.subr.mxu1 %v34236_v3  ;;  %33937 = vmatmul.mubr.msk.f32.vlgmr.msra.gmra.mxu0 %vm4987_vm5, %v34255_v39 }
0x2316   :  { %33946 = vmatprep.mubr.msk.f32.mxu0 %vm34237_vm1, %v34236_v3 }
0x2317   :  { %33932 = vmatmul.mubr.f32.vlgmr.msra.gmra.mxu1 %v39095_v51 }
0x2318   :  { %33940 = vmatpush3.msra.mxu1 %v27626_v50  ;;  %33941 = vmatprep.mubr.msk.f32.mxu1 %vm34237_vm1, %v34236_v3 }
0x2319   :  { %33949 = vmatprep.subr.mxu1 %v34236_v3 }
0x231b   :  { %33942 = vmatmul.mubr.msk.f32.vlgmr.msra.gmra.mxu1 %vm4987_vm5, %v34255_v39 }
0x231c   :  { %33951 = vmatprep.mubr.msk.f32.mxu1 %vm34237_vm1, %v34236_v3 }
0x2354   :  { %v27571_v29 = vpop.xlane.xlu0 %27570 }
0x2355   :  { %v27573_v11 = vmul.f32 0.03125, %v27571_v29 }
0x2357   :  { %v27575_v47 = vadd.f32 1e-05, %v27573_v11  ;;  %v28491_v11 = vld [vmem:[%s39391_s6 + $0x20] sm:$0xff] }
0x2359   :  { %34206 = vrsqrt.f32 %v27575_v47 }
0x2366   :  { %v34207_v49 = vpop.eup %34206 }
0x2367   :  { %v27579_v58 = vmul.f32 %v34207_v49, %v27563_v22  ;;  %v39250_v49 = vand.u32 4294901760, %v28492_v31 }
0x2369   :  { %v27585_v8 = vmul.f32 %v29598_v20, %v27579_v58 }
0x236b   :  { %v27591_v17 = vadd.f32 %v29599_v10, %v27585_v8  ;;  %v39259_v8 = vand.u32 4294901760, %v28491_v11 }
0x236d   :  { %v28072_v1 = vand.u32 4294901760, %v27591_v17 }
0x236f   :  { %33945 = vmatpush3.msra.mxu0 %v28072_v1  ;;  %v28149_v52 = vsub.f32 %v27591_v17, %v28072_v1  ;;  %v39266_v17 = vsub.f32 %v28492_v31, %v39250_v49 }
0x2370   :  { %33947 = vmatmul.mubr.f32.vlgmr.msra.gmra.mxu0 %v27665_v44  ;;  %33954 = vmatprep.subr.mxu0 %v34236_v3  ;;  %v28494_v44 = vld [vmem:[%s39391_s6 + $0x38] sm:$0xff] }
0x2371   :  { %33955 = vmatpush3.msra.mxu0 %v28149_v52  ;;  %33956 = vmatprep.mubr.msk.f32.mxu0 %vm34237_vm1, %v34236_v3  ;;  %v28150_v40 = vand.u32 4294901760, %v28149_v52  ;;  %v39233_v33 = vand.u32 4294901760, %v28494_v44  ;;  %v29107_v35 = vand.u32 4294901760, %v39266_v17 }
0x2372   :  { %33964 = vmatprep.subr.mxu0 %v34236_v3 }
0x2373   :  { %v28151_v32 = vsub.f32 %v28149_v52, %v28150_v40  ;;  %v39248_v47 = vsub.f32 %v28494_v44, %v39233_v33 }
0x2374   :  { %33957 = vmatmul.mubr.f32.vlgmr.msra.gmra.mxu0 %v39092_v0 }
0x2375   :  { %33965 = vmatpush3.msra.mxu0 %v28150_v40  ;;  %v28152_v48 = vand.u32 4294901760, %v28151_v32  ;;  %33966 = vmatprep.mubr.msk.f32.mxu0 %vm34237_vm1, %v34236_v3  ;;  %v29093_v14 = vand.u32 4294901760, %v39248_v47  ;;  %v29108_v40 = vsub.f32 %v39266_v17, %v29107_v35 }
0x2376   :  { %33974 = vmatprep.subr.mxu0 %v34236_v3 }
0x2377   :  { %33950 = vmatpush3.msra.mxu1 %v28152_v48  ;;  %v29109_v32 = vand.u32 4294901760, %v29108_v40 }
0x2378   :  { %33952 = vmatmul.mubr.msk.f32.vlgmr.msra.gmra.mxu1 %vm4987_vm5, %v34255_v39  ;;  %33959 = vmatprep.subr.mxu1 %v34236_v3 }
0x2379   :  { %33960 = vmatpush3.msra.mxu1 %v28072_v1  ;;  %33961 = vmatprep.mubr.msk.f32.mxu1 %vm34237_vm1, %v34236_v3 }
0x237a   :  { %33969 = vmatprep.subr.mxu1 %v34236_v3  ;;  %33967 = vmatmul.mubr.msk.f32.vlgmr.msra.gmra.mxu0 %vm4987_vm5, %v34255_v39 }
0x237b   :  { %33975 = vmatpush3.msra.mxu0 %v39137_v42  ;;  %33982 = vmatprep.mubr.msk.f32.mxu0 %vm34237_vm1, %v34236_v3 }
0x237c   :  { %33962 = vmatmul.mubr.f32.vlgmr.msra.gmra.mxu1 %v39095_v51  ;;  %33976 = vmatprep.subr.mxu0 %v34236_v3 }
0x237d   :  { %33970 = vmatpush3.msra.mxu1 %v28072_v1  ;;  %33971 = vmatprep.mubr.msk.f32.mxu1 %vm34237_vm1, %v34236_v3  ;;  %v39274_v1 = vsub.f32 %v28491_v11, %v39259_v8 }
0x237e   :  { %33985 = vmatprep.subr.mxu1 %v34236_v3  ;;  %33977 = vmatpush3.msra.mxu0 %v39142_v25 }
0x237f   :  { %33978 = vmatprep.subr.mxu0 %v34236_v3 }
0x2380   :  { %33972 = vmatmul.mubr.msk.f32.vlgmr.msra.gmra.mxu1 %vm4987_vm5, %v34255_v39  ;;  %33979 = vmatpush3.msra.mxu0 %v39153_v30  ;;  %v39240_v39 = vand.u32 4294901760, %v28493_v4 }
0x2381   :  { %33986 = vmatpush3.msra.mxu1 %v28607_v56  ;;  %33980 = vmatprep.subr.mxu0 %v34236_v3 }
0x2382   :  { %33987 = vmatprep.subr.mxu1 %v34236_v3  ;;  %33981 = vmatpush3.msra.mxu0 %v39159_v60  ;;  %v39257_v58 = vsub.f32 %v28493_v4, %v39240_v39 }
0x2383   :  { %33988 = vmatpush3.msra.mxu1 %v28614_v7  ;;  %33993 = vmatprep.mubr.msk.f32.mxu1 %vm34237_vm1, %v34236_v3 }
0x2384   :  { %33989 = vmatprep.subr.mxu1 %v34236_v3  ;;  %33996 = vmatprep.subr.mxu0 %v34236_v3  ;;  %v29100_v61 = vand.u32 4294901760, %v39257_v58 }
0x2385   :  { %33990 = vmatpush3.msra.mxu1 %v28621_v28 }
0x2386   :  { %33991 = vmatprep.subr.mxu1 %v34236_v3  ;;  %v29101_v52 = vsub.f32 %v39257_v58, %v29100_v61 }
0x2387   :  { %33992 = vmatpush3.msra.mxu1 %v28628_v38 }
0x2388   :  { %34007 = vmatprep.subr.mxu1 %v34236_v3 }
0x23cb   :  { %v27667_v16 = vpop.f32.mrf.mxu0 }
0x23cd   :  { %v33918_v53 = vpop.f32.mrf.mxu0 }
0x23cf   :  { %v27817_v15 = vpop.f32.mrf.mxu0 }
0x23d1   :  { %v33928_v22 = vpop.f32.mrf.mxu0 }
0x23d3   :  { %v27743_v54 = vpop.f32.mrf.mxu1 }
0x23d4   :  { %v27744_v5 = vadd.f32 %v27743_v54, %v27667_v16 }
0x23d5   :  { %v33923_v55 = vpop.f32.mrf.mxu1  ;;  %v27965_v59 = vpop.f32.mrf.mxu0 }
0x23d6   :  { %v27818_v34 = vadd.f32 %v27817_v15, %v27744_v5 }
0x23d7   :  { %v27891_v62 = vpop.f32.mrf.mxu1  ;;  %v33938_v46 = vpop.f32.mrf.mxu0 }
0x23d8   :  { %v27892_v0 = vadd.f32 %v27891_v62, %v27818_v34  ;;  %v28495_v62 = vld [vmem:[%s39392_s7] sm:$0x1]  ;;  %s34256_s7 = smov [#allocation5]  }
0x23d9   :  { %v33933_v51 = vpop.f32.mrf.mxu1  ;;  %s29480_s26 = sshll.u32 %s34256_s7, 4  ;;  %s29481_s26 = int_to_ptr.vmem [resolvable:$true] %s29480_s26 }
0x23da   :  { %v27966_v43 = vadd.f32 %v27965_v59, %v27892_v0  ;;  %s34214_s27 = scalar_lea.vmem %s29481_s26, 32  ;;  %p34219_p1 = scmp.lt.s32.totalorder %s29481_s26, %s29481_s26 }
0x23db   :  { %v28037_v20 = vpop.f32.mrf.mxu1  ;;  %p34215_p0 = scmp.ne.s32.totalorder %s29481_s26, %s34214_s27  ;;  %p34220_p2 = scmp.lt.s32.totalorder %s34214_s27, %s34214_s27 }
0x23dc   :  { %v28038_v6 = vadd.f32 %v28037_v20, %v27966_v43 }
0x23dd   :  { %v33943_v10 = vpop.f32.mrf.mxu1  ;;  %p34221_p3 = por %p34220_p2, %p34219_p1 }
0x23de   :  { %v28497_v26 = vsel %vm4002_vm3, %v28038_v6, 0 }
0x23df   :  { %v39218_v18 = vand.u32 4294901760, %v28497_v26  ;;  %p34222_p4 = pnand %p34221_p3, %p34215_p0 }
0x23e1   :  { %v28569_v9 = vsub.f32 %v28497_v26, %v39218_v18  ;;  %33994 = vmatmul.mubr.f32.vlgmr.msra.gmra.mxu1 %v39218_v18 }
0x23e2   :  { %34008 = vmatpush3.msra.mxu1 %v39137_v42  ;;  %34015 = vmatprep.mubr.msk.f32.mxu1 %vm34237_vm1, %v34236_v3 }
0x23e3   :  { %v28570_v50 = vand.u32 4294901760, %v28569_v9  ;;  %34009 = vmatprep.subr.mxu1 %v34236_v3 }
0x23e4   :  { %34010 = vmatpush3.msra.mxu1 %v39142_v25 }
0x23e5   :  { %v28571_v37 = vsub.f32 %v28569_v9, %v28570_v50  ;;  %34011 = vmatprep.subr.mxu1 %v34236_v3 }
0x23e6   :  { %34012 = vmatpush3.msra.mxu1 %v39153_v30 }
0x23e7   :  { %v28572_v29 = vand.u32 4294901760, %v28571_v37  ;;  %34013 = vmatprep.subr.mxu1 %v34236_v3 }
0x23e8   :  { %34014 = vmatpush3.msra.mxu1 %v39159_v60 }
0x23e9   :  { %33983 = vmatmul.mubr.f32.vlgmr.msra.gmra.mxu0 %v28572_v29  ;;  %34029 = vmatprep.subr.mxu1 %v34236_v3 }
0x23ea   :  { %33997 = vmatpush3.msra.mxu0 %v39151_v24  ;;  %34004 = vmatprep.mubr.msk.f32.mxu0 %vm34237_vm1, %v34236_v3  ;;  %v29102_v24 = vand.u32 4294901760, %v29101_v52 }
0x23eb   :  { %33998 = vmatprep.subr.mxu0 %v34236_v3  ;;  %34016 = vmatmul.mubr.f32.vlgmr.msra.gmra.mxu1 %v28570_v50 }
0x23ec   :  { %33999 = vmatpush3.msra.mxu0 %v39157_v19  ;;  %34030 = vmatpush3.msra.mxu1 %v39137_v42  ;;  %v29094_v42 = vsub.f32 %v39248_v47, %v29093_v14 }
0x23ed   :  { %34000 = vmatprep.subr.mxu0 %v34236_v3  ;;  %34031 = vmatprep.subr.mxu1 %v34236_v3 }
0x23ee   :  { %34001 = vmatpush3.msra.mxu0 %v39166_v36  ;;  %34032 = vmatpush3.msra.mxu1 %v39142_v25  ;;  %v29114_v25 = vand.u32 4294901760, %v39274_v1  ;;  %v29095_v57 = vand.u32 4294901760, %v29094_v42 }
0x23ef   :  { %34002 = vmatprep.subr.mxu0 %v34236_v3  ;;  %34033 = vmatprep.subr.mxu1 %v34236_v3 }
0x23f0   :  { %34003 = vmatpush3.msra.mxu0 %v39171_v27  ;;  %34034 = vmatpush3.msra.mxu1 %v39153_v30  ;;  %v29115_v30 = vsub.f32 %v39274_v1, %v29114_v25 }
0x23f1   :  { %34018 = vmatprep.subr.mxu0 %v34236_v3  ;;  %34005 = vmatmul.mubr.f32.vlgmr.msra.gmra.mxu0 %v28569_v9 }
0x23f2   :  { %34019 = vmatpush3.msra.mxu0 %v28605_v12  ;;  %34035 = vmatprep.subr.mxu1 %v34236_v3  ;;  %v29116_v19 = vand.u32 4294901760, %v29115_v30 }
0x23f3   :  { %34020 = vmatprep.subr.mxu0 %v34236_v3  ;;  %34026 = vmatprep.mubr.msk.f32.mxu0 %vm34237_vm1, %v34236_v3 }
0x23f4   :  { %34021 = vmatpush3.msra.mxu0 %v28612_v2  ;;  %34036 = vmatpush3.msra.mxu1 %v39159_v60 }
0x23f5   :  { %34022 = vmatprep.subr.mxu0 %v34236_v3  ;;  %34037 = vmatprep.mubr.msk.f32.mxu1 %vm34237_vm1, %v34236_v3 }
0x23f6   :  { %34023 = vmatpush3.msra.mxu0 %v28619_v41  ;;  %34038 = vmatmul.mubr.f32.vlgmr.msra.gmra.mxu1 %v39218_v18 }
0x23f7   :  { %34024 = vmatprep.subr.mxu0 %v34236_v3  ;;  %34051 = vmatprep.subr.mxu1 %v34236_v3 }
0x23f8   :  { %34025 = vmatpush3.msra.mxu0 %v28626_v45  ;;  %34052 = vmatpush3.msra.mxu1 %v29095_v57 }
0x23f9   :  { %34027 = vmatmul.mubr.f32.vlgmr.msra.gmra.mxu0 %v39218_v18  ;;  %34053 = vmatprep.subr.mxu1 %v34236_v3 }
0x23fa   :  { %34054 = vmatpush3.msra.mxu1 %v29102_v24  ;;  %34040 = vmatprep.subr.mxu0 %v34236_v3 }
0x23fb   :  { %34055 = vmatprep.subr.mxu1 %v34236_v3  ;;  %34059 = vmatprep.mubr.msk.f32.mxu1 %vm34237_vm1, %v34236_v3 }
0x23fc   :  { %34056 = vmatpush3.msra.mxu1 %v29109_v32  ;;  %34041 = vmatpush3.msra.mxu0 %v39233_v33 }
0x23fd   :  { %34057 = vmatprep.subr.mxu1 %v34236_v3  ;;  %34042 = vmatprep.subr.mxu0 %v34236_v3 }
0x23fe   :  { %34058 = vmatpush3.msra.mxu1 %v29116_v19  ;;  %34043 = vmatpush3.msra.mxu0 %v39240_v39 }
0x23ff   :  { %34073 = vmatprep.subr.mxu1 %v34236_v3  ;;  %34044 = vmatprep.subr.mxu0 %v34236_v3 }
0x2400   :  { %34045 = vmatpush3.msra.mxu0 %v39250_v49  ;;  %34048 = vmatprep.mubr.msk.f32.mxu0 %vm34237_vm1, %v34236_v3 }
0x2401   :  { %34046 = vmatprep.subr.mxu0 %v34236_v3 }
0x2402   :  { %34047 = vmatpush3.msra.mxu0 %v39259_v8 }
0x2403   :  { %34062 = vmatprep.subr.mxu0 %v34236_v3 }
0x2430   :  { %v28113_v60 = vpop.f32.mrf.mxu0 }
0x2432   :  { %v33948_v48 = vpop.f32.mrf.mxu0 }
0x2434   :  { %v28263_v12 = vpop.f32.mrf.mxu0 }
0x2436   :  { %v33958_v36 = vpop.f32.mrf.mxu0 }
0x2438   :  { %v28189_v2 = vpop.f32.mrf.mxu1 }
0x2439   :  { %v28190_v27 = vadd.f32 %v28189_v2, %v28113_v60 }
0x243a   :  { %v33953_v13 = vpop.f32.mrf.mxu1  ;;  %v28411_v41 = vpop.f32.mrf.mxu0 }
0x243b   :  { %v28264_v63 = vadd.f32 %v28263_v12, %v28190_v27 }
0x243c   :  { %v28337_v45 = vpop.f32.mrf.mxu1  ;;  %v33968_v56 = vpop.f32.mrf.mxu0 }
0x243d   :  { %v28338_v23 = vadd.f32 %v28337_v45, %v28264_v63 }
0x243e   :  { %v33963_v7 = vpop.f32.mrf.mxu1 }
0x243f   :  { %v28412_v21 = vadd.f32 %v28411_v41, %v28338_v23 }
0x2440   :  { %v28483_v28 = vpop.f32.mrf.mxu1 }
0x2441   :  { %v28484_v38 = vadd.f32 %v28483_v28, %v28412_v21 }
0x2442   :  { %v33973_v16 = vpop.f32.mrf.mxu1 }
0x2443   :  { %v28985_v53 = vsel %vm4002_vm3, %v28484_v38, 0 }
0x2444   :  { %v29056_v15 = vand.u32 4294901760, %v28985_v53 }
0x2446   :  { %v29057_v22 = vsub.f32 %v28985_v53, %v29056_v15  ;;  %34060 = vmatmul.mubr.f32.vlgmr.msra.gmra.mxu1 %v29056_v15 }
0x2447   :  { %34074 = vmatpush3.msra.mxu1 %v39233_v33  ;;  %34081 = vmatprep.mubr.msk.f32.mxu1 %vm34237_vm1, %v34236_v3 }
0x2448   :  { %v29058_v54 = vand.u32 4294901760, %v29057_v22  ;;  %34075 = vmatprep.subr.mxu1 %v34236_v3 }
0x2449   :  { %34076 = vmatpush3.msra.mxu1 %v39240_v39 }
0x244a   :  { %v29059_v5 = vsub.f32 %v29057_v22, %v29058_v54  ;;  %34077 = vmatprep.subr.mxu1 %v34236_v3 }
0x244b   :  { %34078 = vmatpush3.msra.mxu1 %v39250_v49 }
0x244c   :  { %v29060_v55 = vand.u32 4294901760, %v29059_v5  ;;  %34079 = vmatprep.subr.mxu1 %v34236_v3 }
0x244d   :  { %34080 = vmatpush3.msra.mxu1 %v39259_v8 }
0x244e   :  { %34082 = vmatmul.mubr.f32.vlgmr.msra.gmra.mxu1 %v29058_v54  ;;  %34095 = vmatprep.subr.mxu1 %v34236_v3 }
0x244f   :  { %34049 = vmatmul.mubr.f32.vlgmr.msra.gmra.mxu0 %v29060_v55  ;;  %34096 = vmatpush3.msra.mxu1 %v39233_v33 }
0x2450   :  { %34063 = vmatpush3.msra.mxu0 %v39248_v47  ;;  %34097 = vmatprep.subr.mxu1 %v34236_v3 }
0x2451   :  { %34064 = vmatprep.subr.mxu0 %v34236_v3  ;;  %34098 = vmatpush3.msra.mxu1 %v39240_v39 }
0x2452   :  { %34065 = vmatpush3.msra.mxu0 %v39257_v58  ;;  %34099 = vmatprep.subr.mxu1 %v34236_v3 }
0x2453   :  { %34066 = vmatprep.subr.mxu0 %v34236_v3  ;;  %34100 = vmatpush3.msra.mxu1 %v39250_v49 }
0x2454   :  { %34067 = vmatpush3.msra.mxu0 %v39266_v17  ;;  %34101 = vmatprep.subr.mxu1 %v34236_v3 }
0x2455   :  { %34068 = vmatprep.subr.mxu0 %v34236_v3  ;;  %34070 = vmatprep.mubr.msk.f32.mxu0 %vm34237_vm1, %v34236_v3 }
0x2456   :  { %34069 = vmatpush3.msra.mxu0 %v39274_v1  ;;  %34102 = vmatpush3.msra.mxu1 %v39259_v8 }
0x2457   :  { %34103 = vmatprep.mubr.msk.f32.mxu1 %vm34237_vm1, %v34236_v3  ;;  %34071 = vmatmul.mubr.f32.vlgmr.msra.gmra.mxu0 %v29057_v22 }
0x2458   :  { %34084 = vmatprep.subr.mxu0 %v34236_v3  ;;  %34104 = vmatmul.mubr.f32.vlgmr.msra.gmra.mxu1 %v29056_v15 }
0x2459   :  { %34085 = vmatpush3.msra.mxu0 %v29093_v14  ;;  %34092 = vmatprep.mubr.msk.f32.mxu0 %vm34237_vm1, %v34236_v3 }
0x245a   :  { %34086 = vmatprep.subr.mxu0 %v34236_v3 }
0x245b   :  { %34087 = vmatpush3.msra.mxu0 %v29100_v61 }
0x245c   :  { %34088 = vmatprep.subr.mxu0 %v34236_v3 }
0x245d   :  { %34089 = vmatpush3.msra.mxu0 %v29107_v35 }
0x245e   :  { %34090 = vmatprep.subr.mxu0 %v34236_v3 }
0x245f   :  { %34091 = vmatpush3.msra.mxu0 %v29114_v25 }
0x2460   :  { %34093 = vmatmul.mubr.f32.vlgmr.msra.gmra.mxu0 %v29056_v15 }
0x24a1   :  { %v28665_v59 = vpop.f32.mrf.mxu1 }
0x24a3   :  { %v33995_v34 = vpop.f32.mrf.mxu1 }
0x24a9   :  { %v28574_v46 = vpop.f32.mrf.mxu0 }
0x24aa   :  { %v28575_v0 = vadd.f32 %v28574_v46, %v28495_v62 }
0x24ab   :  { %v33984_v51 = vpop.f32.mrf.mxu0  ;;  %v28822_v43 = vpop.f32.mrf.mxu1 }
0x24ac   :  { %v28666_v6 = vadd.f32 %v28665_v59, %v28575_v0 }
0x24ad   :  { %v34017_v20 = vpop.f32.mrf.mxu1 }
0x24b1   :  { %v28745_v10 = vpop.f32.mrf.mxu0 }
0x24b2   :  { %v28746_v26 = vadd.f32 %v28745_v10, %v28666_v6 }
0x24b3   :  { %v34006_v18 = vpop.f32.mrf.mxu0 }
0x24b4   :  { %v28823_v3 = vadd.f32 %v28822_v43, %v28746_v26 }
0x24b6   :  { %v28980_v9 = vpop.f32.mrf.mxu1 }
0x24b8   :  { %v34039_v44 = vpop.f32.mrf.mxu1 }
0x24b9   :  { %v28905_v50 = vpop.f32.mrf.mxu0 }
0x24ba   :  { %v28906_v4 = vadd.f32 %v28905_v50, %v28823_v3 }
0x24bb   :  { %v34028_v33 = vpop.f32.mrf.mxu0 }
0x24bc   :  { %v28981_v37 = vadd.f32 %v28980_v9, %v28906_v4 }
0x24be   :  { %29473 = vst.msk [vmem:[#allocation5] sm:$0x1] %vm29472_vm9, %v28981_v37 }
0x2506   :  { %v29153_v31 = vpop.f32.mrf.mxu1 }
0x2508   :  { %v34061_v39 = vpop.f32.mrf.mxu1 }
0x250e   :  { %v29310_v29 = vpop.f32.mrf.mxu1 }
0x250f   :  { %v29062_v11 = vpop.f32.mrf.mxu0 }
0x2510   :  { %v34083_v47 = vpop.f32.mrf.mxu1  ;;  %v29063_v58 = vadd.f32 %v29062_v11, %v28495_v62 }
0x2511   :  { %v34050_v49 = vpop.f32.mrf.mxu0 }
0x2512   :  { %v29154_v17 = vadd.f32 %v29153_v31, %v29063_v58 }
0x2517   :  { %v29233_v8 = vpop.f32.mrf.mxu0 }
0x2518   :  { %v29468_v14 = vpop.f32.mrf.mxu1  ;;  %v29234_v42 = vadd.f32 %v29233_v8, %v29154_v17 }
0x2519   :  { %v34072_v61 = vpop.f32.mrf.mxu0 }
0x251a   :  { %v34105_v1 = vpop.f32.mrf.mxu1  ;;  %v29311_v35 = vadd.f32 %v29310_v29, %v29234_v42 }
0x2520   :  { %v29393_v52 = vpop.f32.mrf.mxu0 }
0x2521   :  { %v29394_v25 = vadd.f32 %v29393_v52, %v29311_v35 }
0x2522   :  { %v34094_v57 = vpop.f32.mrf.mxu0 }
0x2523   :  { %v29469_v40 = vadd.f32 %v29468_v14, %v29394_v25 }
0x2525   :  { %29474 = vst.msk [vmem:[#allocation5 + $0x1] sm:$0x1] %vm29472_vm9, %v29469_v40 }
0x2526   :  { %34225 = shalt.err (!%p34222_p4)
}
0x2527   :  { %s34257_s28 = smov 1  }
0x2528   :  { %29486 = dma.vmem_to_hbm [thread:$0]  %s29481_s26, 32, %s39393_s8, [#allocation6], %s34251_s14, %s34251_s14, %s34257_s28  }
0x2529   :  { %34234 = dma.done.wait [#allocation6], 32  }
0x252a   :  { %34235 = vsyncadd [#allocation6], 4294967264 }
0x252b   :  { %29490 = vsyncpa [#allocation6], 1 }

</bundles_post_ra>
